<compile_context>
chip_gen: v5e
topology: v5e:2x2
jax: 0.10.0
libtpu: 0.0.40
codegen_flags: <defaults>
</compile_context>

<pallas_src>
import jax
import jax.numpy as jnp
from jax import lax
from jax.experimental import pallas as pl
from jax.experimental.pallas import tpu as pltpu


def _rgcn_kernel(adj_ref, x_ref, w1_ref, b1_ref, w2_ref, b2_ref, w3_ref, b3_ref,
                 o_ref):
    """Fused 3-layer GraphConv forward for G graphs of the batch."""
    G, N, _ = adj_ref.shape
    F = x_ref.shape[-1]

    # ---- In-kernel GraphConv norm='both': D_in^{-1/2} A D_out^{-1/2}.
    # Rows = dst, cols = src.  Zero-degree nodes contribute zero (DGL semantics).
    a = adj_ref[...].astype(jnp.float32)                    # (G, N, N), 0/1 exact
    deg_in = jnp.sum(a, axis=-1, keepdims=True)             # (G, N, 1) dst in-degree
    deg_out = jnp.sum(a, axis=-2, keepdims=True)            # (G, 1, N) src out-degree
    inv_in = jnp.where(deg_in > 0, lax.rsqrt(deg_in), 0.0)
    inv_out = jnp.where(deg_out > 0, lax.rsqrt(deg_out), 0.0)
    a_n = (inv_in * a * inv_out).astype(jnp.bfloat16)       # bf16 MXU operand

    h = x_ref[...].astype(jnp.bfloat16)                     # (G, N, F)

    def layer(h_bf16, w_ref, b_ref, relu):
        # Aggregation: batched per-graph MXU matmul, bf16 operands, f32 accumulate.
        agg = jnp.einsum("gij,gjf->gif", a_n, h_bf16,
                         preferred_element_type=jnp.float32)
        # Dense layer: one (G*N, F) x (F, F) slab matmul (fills the 256-wide MXU).
        slab = agg.reshape(G * N, F).astype(jnp.bfloat16)
        out = jnp.dot(slab, w_ref[...],
                      preferred_element_type=jnp.float32) + b_ref[...]
        if relu:
            out = jnp.maximum(out, 0.0)
        return out.reshape(G, N, F)

    h = layer(h, w1_ref, b1_ref, True).astype(jnp.bfloat16)
    h = layer(h, w2_ref, b2_ref, True).astype(jnp.bfloat16)
    h = layer(h, w3_ref, b3_ref, False)                     # final layer: f32 acc
    o_ref[...] = h.astype(o_ref.dtype)


def _pick_graphs_per_step(B, N, F):
    """Amortize per-step overhead while keeping >= 2 grid steps (v7x: 2 TCs)."""
    # Double-buffered per-graph block footprint: adj bf16 + x f32 + out bf16.
    per_graph = 2 * (N * N * 2 + N * F * 4 + N * F * 2)
    cap = max(1, (24 * 1024 * 1024) // per_graph)           # stay well under scoped VMEM
    g = min(max(1, B // 2), cap)
    while g > 1 and B % g:
        g -= 1
    return g


def _build_pallas_call(B, N, F, G, out_dtype, single_buffer_weights):
    # Weights / biases: constant index map -> DMA'd once, VMEM-resident across the
    # grid.  pl.Buffered(1) drops the pointless second buffer for them.
    resident = {"pipeline_mode": pl.Buffered(1)} if single_buffer_weights else {}
    w_spec = pl.BlockSpec((F, F), lambda g: (0, 0), **resident)
    b_spec = pl.BlockSpec((1, F), lambda g: (0, 0), **resident)
    adj_spec = pl.BlockSpec((G, N, N), lambda g: (g, 0, 0))
    x_spec = pl.BlockSpec((G, N, F), lambda g: (g, 0, 0))
    out_spec = pl.BlockSpec((G, N, F), lambda g: (g, 0, 0))

    # 3 aggregations (N x N x F) + 3 slab matmuls (N x F x F) per graph.
    flops = B * 3 * (2 * N * N * F + 2 * N * F * F)
    bytes_accessed = (B * N * N * 2                          # raw adjacency (bf16)
                      + B * N * F * 4                        # X (f32)
                      + B * N * F * jnp.dtype(out_dtype).itemsize
                      + 3 * (F * F * 2 + F * 4))             # weights (bf16) + biases

    return pl.pallas_call(
        _rgcn_kernel,
        out_shape=jax.ShapeDtypeStruct((B, N, F), out_dtype),
        grid_spec=pltpu.PrefetchScalarGridSpec(
            num_scalar_prefetch=0,
            grid=(B // G,),
            in_specs=[adj_spec, x_spec,
                      w_spec, b_spec,
                      w_spec, b_spec,
                      w_spec, b_spec],
            out_specs=out_spec,
        ),
        compiler_params=pltpu.CompilerParams(
            dimension_semantics=("parallel",),               # shard steps over v7x TCs
            vmem_limit_bytes=32 * 1024 * 1024,               # safe on v5e/v6e/v7x
        ),
        cost_estimate=pl.CostEstimate(flops=flops, transcendentals=2 * B * N,
                                      bytes_accessed=bytes_accessed),
    )


def rgcn_forward(adj, x, params, *, graphs_per_step=None, out_dtype=jnp.bfloat16):
    """adj: [B, N, N] raw 0/1 adjacency (row = dst); x: [B, N, F] features."""
    (w1, b1), (w2, b2), (w3, b3) = params
    B, N, _ = adj.shape
    F = x.shape[-1]
    assert x.shape == (B, N, F)
    assert all(w.shape == (F, F) for w in (w1, w2, w3)), (
        "original module wiring requires in_feats == hid_feats")
    # Lane-dense outputs / aligned blocks (no masked partial stores).
    assert N % 8 == 0 and F % 128 == 0, "need N % 8 == 0 and F % 128 == 0"

    G = graphs_per_step or _pick_graphs_per_step(B, N, F)
    assert B % G == 0, "graphs_per_step must divide the batch"

    args = (adj, x,
            w1.astype(jnp.bfloat16), b1.astype(jnp.float32),
            w2.astype(jnp.bfloat16), b2.astype(jnp.float32),
            w3.astype(jnp.bfloat16), b3.astype(jnp.float32))
    try:
        return _build_pallas_call(B, N, F, G, out_dtype, True)(*args)
    except Exception:
        # pl.Buffered(1) not supported on this jax/libtpu combo: default buffering.
        return _build_pallas_call(B, N, F, G, out_dtype, False)(*args)


def glorot(key, shape):
    limit = jnp.sqrt(6.0 / (shape[0] + shape[1]))
    return jax.random.uniform(key, shape, jnp.float32, -limit, limit)


def _normalize(adj):
    a = adj.astype(jnp.float32)
    deg_in = a.sum(axis=-1, keepdims=True)
    deg_out = a.sum(axis=-2, keepdims=True)
    inv_in = jnp.where(deg_in > 0, lax.rsqrt(deg_in), 0.0)
    inv_out = jnp.where(deg_out > 0, lax.rsqrt(deg_out), 0.0)
    return inv_in * a * inv_out


def rgcn_reference(adj, x, params):
    """Pure-JAX reference with the same bf16-operand / f32-accumulate recipe."""
    a_n = _normalize(adj).astype(jnp.bfloat16)
    h = x.astype(jnp.bfloat16)
    for i, (w, b) in enumerate(params):
        agg = jnp.einsum("gij,gjf->gif", a_n, h, preferred_element_type=jnp.float32)
        h = jnp.einsum("gnf,fo->gno", agg.astype(jnp.bfloat16),
                       w.astype(jnp.bfloat16),
                       preferred_element_type=jnp.float32) + b
        if i < 2:
            h = jnp.maximum(h, 0.0).astype(jnp.bfloat16)
    return h.astype(jnp.bfloat16).astype(jnp.float32)


def rgcn_reference_f32(adj, x, params):
    a_n = _normalize(adj)
    h = x
    for i, (w, b) in enumerate(params):
        h = jnp.einsum("gij,gjf->gif", a_n, h) @ w + b
        if i < 2:
            h = jnp.maximum(h, 0.0)
    return h


if __name__ == "__main__":
    key = jax.random.PRNGKey(0)
    B = 8                  # graphs per batch -> grid of 2 steps x 4 graphs
    N = 128                # nodes per graph (MXU-aligned)
    F = 128                # in_feats == hid_feats, lane-dense (multiple of 128)

    k_adj, k_x, k1, k2, k3, kb1, kb2, kb3 = jax.random.split(key, 8)

    # Random symmetric graphs with self-loops; raw 0/1 adjacency stored as bf16 (exact).
    raw = jax.random.uniform(k_adj, (B, N, N)) < 0.1
    eye = jnp.eye(N, dtype=bool)[None, :, :]
    adj = (raw | jnp.swapaxes(raw, -1, -2) | eye).astype(jnp.bfloat16)

    x = jax.random.normal(k_x, (B, N, F), jnp.float32)

    params = (
        (glorot(k1, (F, F)), 0.01 * jax.random.normal(kb1, (1, F), jnp.float32)),
        (glorot(k2, (F, F)), 0.01 * jax.random.normal(kb2, (1, F), jnp.float32)),
        (glorot(k3, (F, F)), 0.01 * jax.random.normal(kb3, (1, F), jnp.float32)),
    )

    out = jax.block_until_ready(rgcn_forward(adj, x, params))
    assert out.shape == (B, N, F)
    out_f32 = out.astype(jnp.float32)

    # Check against a bf16-matched reference (same quantization recipe).
    ref = rgcn_reference(adj, x, params)
    assert jnp.allclose(out_f32, ref, atol=2e-2, rtol=2e-2), "mismatch vs bf16 reference"

    # Loose sanity check against the full-f32 math.
    ref32 = rgcn_reference_f32(adj, x, params)
    assert jnp.allclose(out_f32, ref32, atol=1.5e-1, rtol=1.5e-1), "mismatch vs f32 reference"

    print("KERNEL_OK")
</pallas_src>

<mosaic_0001>
module attributes {stable_mosaic.version = 11 : i64} {
  func.func @_rgcn_kernel(%arg0: i32, %arg1: memref<4x128x128xbf16, #tpu.memory_space<vmem>>, %arg2: memref<4x128x128xf32, #tpu.memory_space<vmem>>, %arg3: memref<128x128xbf16, #tpu.memory_space<vmem>>, %arg4: memref<1x128xf32, #tpu.memory_space<vmem>>, %arg5: memref<128x128xbf16, #tpu.memory_space<vmem>>, %arg6: memref<1x128xf32, #tpu.memory_space<vmem>>, %arg7: memref<128x128xbf16, #tpu.memory_space<vmem>>, %arg8: memref<1x128xf32, #tpu.memory_space<vmem>>, %arg9: memref<4x128x128xbf16, #tpu.memory_space<vmem>>) attributes {dimension_semantics = [#tpu.dimension_semantics<parallel>], iteration_bounds = array<i64: 2>, scalar_prefetch = 0 : i64, scratch_operands = 0 : i64, tpu.core_type = #tpu.core_type<tc>, window_params = [{transform_indices = @transform_0, window_bounds = array<i64: 4, 128, 128>}, {transform_indices = @transform_1, window_bounds = array<i64: 4, 128, 128>}, {pipeline_mode = #tpu.pipeline_mode<synchronous>, transform_indices = @transform_2, window_bounds = array<i64: 128, 128>}, {pipeline_mode = #tpu.pipeline_mode<synchronous>, transform_indices = @transform_3, window_bounds = array<i64: 1, 128>}, {pipeline_mode = #tpu.pipeline_mode<synchronous>, transform_indices = @transform_4, window_bounds = array<i64: 128, 128>}, {pipeline_mode = #tpu.pipeline_mode<synchronous>, transform_indices = @transform_5, window_bounds = array<i64: 1, 128>}, {pipeline_mode = #tpu.pipeline_mode<synchronous>, transform_indices = @transform_6, window_bounds = array<i64: 128, 128>}, {pipeline_mode = #tpu.pipeline_mode<synchronous>, transform_indices = @transform_7, window_bounds = array<i64: 1, 128>}, {transform_indices = @transform_8, window_bounds = array<i64: 4, 128, 128>}]} {
    %c0 = arith.constant 0 : index
    %c0_0 = arith.constant 0 : index
    %c0_1 = arith.constant 0 : index
    %0 = vector.load %arg1[%c0, %c0_0, %c0_1] : memref<4x128x128xbf16, #tpu.memory_space<vmem>>, vector<4x128x128xbf16>
    %1 = arith.extf %0 : vector<4x128x128xbf16> to vector<4x128x128xf32>
    %cst = arith.constant dense<0.000000e+00> : vector<4x128xf32>
    %2 = vector.multi_reduction <add>, %1, %cst [2] : vector<4x128x128xf32> to vector<4x128xf32>
    %3 = vector.shape_cast %2 : vector<4x128xf32> to vector<4x128x1xf32>
    %cst_2 = arith.constant dense<0.000000e+00> : vector<4x128xf32>
    %4 = vector.multi_reduction <add>, %1, %cst_2 [1] : vector<4x128x128xf32> to vector<4x128xf32>
    %5 = vector.shape_cast %4 : vector<4x128xf32> to vector<4x1x128xf32>
    %cst_3 = arith.constant 0.000000e+00 : f32
    %6 = vector.broadcast %cst_3 : f32 to vector<4x128x1xf32>
    %7 = arith.cmpf ogt, %3, %6 : vector<4x128x1xf32>
    %8 = math.rsqrt %3 : vector<4x128x1xf32>
    %cst_4 = arith.constant 0.000000e+00 : f32
    %9 = vector.broadcast %cst_4 : f32 to vector<4x128x1xf32>
    %10 = arith.select %7, %8, %9 : vector<4x128x1xi1>, vector<4x128x1xf32>
    %cst_5 = arith.constant 0.000000e+00 : f32
    %11 = vector.broadcast %cst_5 : f32 to vector<4x1x128xf32>
    %12 = arith.cmpf ogt, %5, %11 : vector<4x1x128xf32>
    %13 = math.rsqrt %5 : vector<4x1x128xf32>
    %cst_6 = arith.constant 0.000000e+00 : f32
    %14 = vector.broadcast %cst_6 : f32 to vector<4x1x128xf32>
    %15 = arith.select %12, %13, %14 : vector<4x1x128xi1>, vector<4x1x128xf32>
    %16 = vector.broadcast %10 : vector<4x128x1xf32> to vector<4x128x128xf32>
    %17 = arith.mulf %16, %1 : vector<4x128x128xf32>
    %18 = vector.broadcast %15 : vector<4x1x128xf32> to vector<4x128x128xf32>
    %19 = arith.mulf %17, %18 : vector<4x128x128xf32>
    %20 = arith.truncf %19 : vector<4x128x128xf32> to vector<4x128x128xbf16>
    %c0_7 = arith.constant 0 : index
    %c0_8 = arith.constant 0 : index
    %c0_9 = arith.constant 0 : index
    %21 = vector.load %arg2[%c0_7, %c0_8, %c0_9] : memref<4x128x128xf32, #tpu.memory_space<vmem>>, vector<4x128x128xf32>
    %22 = arith.truncf %21 : vector<4x128x128xf32> to vector<4x128x128xbf16>
    "tpu.trace_start"() <{level = 10 : i32, message = "gij,gjf->gif"}> : () -> ()
    %cst_10 = arith.constant dense<0.000000e+00> : vector<4x128x128xf32>
    %23 = tpu.matmul %20, %22, %cst_10 {dimension_numbers = #tpu.dot_dimension_numbers<[2], [1], [1], [2], [0, 0, 0, 1, 1, 2], [0], [0]>} : vector<4x128x128xbf16>, vector<4x128x128xbf16>, vector<4x128x128xf32> -> vector<4x128x128xf32>
    "tpu.trace_stop"() : () -> ()
    %24 = vector.shape_cast %23 : vector<4x128x128xf32> to vector<512x128xf32>
    %25 = arith.truncf %24 : vector<512x128xf32> to vector<512x128xbf16>
    %c0_11 = arith.constant 0 : index
    %c0_12 = arith.constant 0 : index
    %26 = vector.load %arg3[%c0_11, %c0_12] : memref<128x128xbf16, #tpu.memory_space<vmem>>, vector<128x128xbf16>
    %cst_13 = arith.constant dense<0.000000e+00> : vector<512x128xf32>
    %27 = tpu.matmul %25, %26, %cst_13 {dimension_numbers = #tpu.dot_dimension_numbers<[1], [0], [0], [1], [0, 0, 1, 1], [], []>} : vector<512x128xbf16>, vector<128x128xbf16>, vector<512x128xf32> -> vector<512x128xf32>
    %c0_14 = arith.constant 0 : index
    %c0_15 = arith.constant 0 : index
    %28 = vector.load %arg4[%c0_14, %c0_15] : memref<1x128xf32, #tpu.memory_space<vmem>>, vector<1x128xf32>
    %29 = vector.broadcast %28 : vector<1x128xf32> to vector<512x128xf32>
    %30 = arith.addf %27, %29 : vector<512x128xf32>
    %cst_16 = arith.constant 0.000000e+00 : f32
    %31 = vector.broadcast %cst_16 : f32 to vector<512x128xf32>
    %32 = arith.maximumf %30, %31 : vector<512x128xf32>
    %33 = vector.shape_cast %32 : vector<512x128xf32> to vector<4x128x128xf32>
    %34 = arith.truncf %33 : vector<4x128x128xf32> to vector<4x128x128xbf16>
    "tpu.trace_start"() <{level = 10 : i32, message = "gij,gjf->gif"}> : () -> ()
    %cst_17 = arith.constant dense<0.000000e+00> : vector<4x128x128xf32>
    %35 = tpu.matmul %20, %34, %cst_17 {dimension_numbers = #tpu.dot_dimension_numbers<[2], [1], [1], [2], [0, 0, 0, 1, 1, 2], [0], [0]>} : vector<4x128x128xbf16>, vector<4x128x128xbf16>, vector<4x128x128xf32> -> vector<4x128x128xf32>
    "tpu.trace_stop"() : () -> ()
    %36 = vector.shape_cast %35 : vector<4x128x128xf32> to vector<512x128xf32>
    %37 = arith.truncf %36 : vector<512x128xf32> to vector<512x128xbf16>
    %c0_18 = arith.constant 0 : index
    %c0_19 = arith.constant 0 : index
    %38 = vector.load %arg5[%c0_18, %c0_19] : memref<128x128xbf16, #tpu.memory_space<vmem>>, vector<128x128xbf16>
    %cst_20 = arith.constant dense<0.000000e+00> : vector<512x128xf32>
    %39 = tpu.matmul %37, %38, %cst_20 {dimension_numbers = #tpu.dot_dimension_numbers<[1], [0], [0], [1], [0, 0, 1, 1], [], []>} : vector<512x128xbf16>, vector<128x128xbf16>, vector<512x128xf32> -> vector<512x128xf32>
    %c0_21 = arith.constant 0 : index
    %c0_22 = arith.constant 0 : index
    %40 = vector.load %arg6[%c0_21, %c0_22] : memref<1x128xf32, #tpu.memory_space<vmem>>, vector<1x128xf32>
    %41 = vector.broadcast %40 : vector<1x128xf32> to vector<512x128xf32>
    %42 = arith.addf %39, %41 : vector<512x128xf32>
    %cst_23 = arith.constant 0.000000e+00 : f32
    %43 = vector.broadcast %cst_23 : f32 to vector<512x128xf32>
    %44 = arith.maximumf %42, %43 : vector<512x128xf32>
    %45 = vector.shape_cast %44 : vector<512x128xf32> to vector<4x128x128xf32>
    %46 = arith.truncf %45 : vector<4x128x128xf32> to vector<4x128x128xbf16>
    "tpu.trace_start"() <{level = 10 : i32, message = "gij,gjf->gif"}> : () -> ()
    %cst_24 = arith.constant dense<0.000000e+00> : vector<4x128x128xf32>
    %47 = tpu.matmul %20, %46, %cst_24 {dimension_numbers = #tpu.dot_dimension_numbers<[2], [1], [1], [2], [0, 0, 0, 1, 1, 2], [0], [0]>} : vector<4x128x128xbf16>, vector<4x128x128xbf16>, vector<4x128x128xf32> -> vector<4x128x128xf32>
    "tpu.trace_stop"() : () -> ()
    %48 = vector.shape_cast %47 : vector<4x128x128xf32> to vector<512x128xf32>
    %49 = arith.truncf %48 : vector<512x128xf32> to vector<512x128xbf16>
    %c0_25 = arith.constant 0 : index
    %c0_26 = arith.constant 0 : index
    %50 = vector.load %arg7[%c0_25, %c0_26] : memref<128x128xbf16, #tpu.memory_space<vmem>>, vector<128x128xbf16>
    %cst_27 = arith.constant dense<0.000000e+00> : vector<512x128xf32>
    %51 = tpu.matmul %49, %50, %cst_27 {dimension_numbers = #tpu.dot_dimension_numbers<[1], [0], [0], [1], [0, 0, 1, 1], [], []>} : vector<512x128xbf16>, vector<128x128xbf16>, vector<512x128xf32> -> vector<512x128xf32>
    %c0_28 = arith.constant 0 : index
    %c0_29 = arith.constant 0 : index
    %52 = vector.load %arg8[%c0_28, %c0_29] : memref<1x128xf32, #tpu.memory_space<vmem>>, vector<1x128xf32>
    %53 = vector.broadcast %52 : vector<1x128xf32> to vector<512x128xf32>
    %54 = arith.addf %51, %53 : vector<512x128xf32>
    %55 = vector.shape_cast %54 : vector<512x128xf32> to vector<4x128x128xf32>
    %56 = arith.truncf %55 : vector<4x128x128xf32> to vector<4x128x128xbf16>
    %c0_30 = arith.constant 0 : index
    %c0_31 = arith.constant 0 : index
    %c0_32 = arith.constant 0 : index
    %57 = vector.load %arg9[%c0_30, %c0_31, %c0_32] : memref<4x128x128xbf16, #tpu.memory_space<vmem>>, vector<4x128x128xbf16>
    tpu.vector_store %arg9[%c0_30, %c0_31, %c0_32], %56 {strides = array<i32>} : memref<4x128x128xbf16, #tpu.memory_space<vmem>>, vector<4x128x128xbf16>,
    return
  }
  func.func @transform_0(%arg0: i32) -> (i32, i32, i32) {
    %c0_i32 = arith.constant 0 : i32
    %c0_i32_0 = arith.constant 0 : i32
    %c0_i32_1 = arith.constant 0 : i32
    return %arg0, %c0_i32, %c0_i32_0 : i32, i32, i32
  }
  func.func @transform_1(%arg0: i32) -> (i32, i32, i32) {
    %c0_i32 = arith.constant 0 : i32
    %c0_i32_0 = arith.constant 0 : i32
    %c0_i32_1 = arith.constant 0 : i32
    return %arg0, %c0_i32, %c0_i32_0 : i32, i32, i32
  }
  func.func @transform_2(%arg0: i32) -> (i32, i32) {
    %c0_i32 = arith.constant 0 : i32
    %c0_i32_0 = arith.constant 0 : i32
    %c0_i32_1 = arith.constant 0 : i32
    return %c0_i32, %c0_i32_0 : i32, i32
  }
  func.func @transform_3(%arg0: i32) -> (i32, i32) {
    %c0_i32 = arith.constant 0 : i32
    %c0_i32_0 = arith.constant 0 : i32
    %c0_i32_1 = arith.constant 0 : i32
    return %c0_i32, %c0_i32_0 : i32, i32
  }
  func.func @transform_4(%arg0: i32) -> (i32, i32) {
    %c0_i32 = arith.constant 0 : i32
    %c0_i32_0 = arith.constant 0 : i32
    %c0_i32_1 = arith.constant 0 : i32
    return %c0_i32, %c0_i32_0 : i32, i32
  }
  func.func @transform_5(%arg0: i32) -> (i32, i32) {
    %c0_i32 = arith.constant 0 : i32
    %c0_i32_0 = arith.constant 0 : i32
    %c0_i32_1 = arith.constant 0 : i32
    return %c0_i32, %c0_i32_0 : i32, i32
  }
  func.func @transform_6(%arg0: i32) -> (i32, i32) {
    %c0_i32 = arith.constant 0 : i32
    %c0_i32_0 = arith.constant 0 : i32
    %c0_i32_1 = arith.constant 0 : i32
    return %c0_i32, %c0_i32_0 : i32, i32
  }
  func.func @transform_7(%arg0: i32) -> (i32, i32) {
    %c0_i32 = arith.constant 0 : i32
    %c0_i32_0 = arith.constant 0 : i32
    %c0_i32_1 = arith.constant 0 : i32
    return %c0_i32, %c0_i32_0 : i32, i32
  }
  func.func @transform_8(%arg0: i32) -> (i32, i32, i32) {
    %c0_i32 = arith.constant 0 : i32
    %c0_i32_0 = arith.constant 0 : i32
    %c0_i32_1 = arith.constant 0 : i32
    return %arg0, %c0_i32, %c0_i32_0 : i32, i32, i32
  }
}

module attributes {stable_mosaic.version = 11 : i64} {
  func.func @_rgcn_kernel(%arg0: i32, %arg1: memref<4x128x128xbf16, #tpu.memory_space<vmem>>, %arg2: memref<4x128x128xf32, #tpu.memory_space<vmem>>, %arg3: memref<128x128xbf16, #tpu.memory_space<vmem>>, %arg4: memref<1x128xf32, #tpu.memory_space<vmem>>, %arg5: memref<128x128xbf16, #tpu.memory_space<vmem>>, %arg6: memref<1x128xf32, #tpu.memory_space<vmem>>, %arg7: memref<128x128xbf16, #tpu.memory_space<vmem>>, %arg8: memref<1x128xf32, #tpu.memory_space<vmem>>, %arg9: memref<4x128x128xbf16, #tpu.memory_space<vmem>>) attributes {dimension_semantics = [#tpu.dimension_semantics<parallel>], iteration_bounds = array<i64: 2>, scalar_prefetch = 0 : i64, scratch_operands = 0 : i64, tpu.core_type = #tpu.core_type<tc>, window_params = [{transform_indices = @transform_0, window_bounds = array<i64: 4, 128, 128>}, {transform_indices = @transform_1, window_bounds = array<i64: 4, 128, 128>}, {pipeline_mode = #tpu.pipeline_mode<synchronous>, transform_indices = @transform_2, window_bounds = array<i64: 128, 128>}, {pipeline_mode = #tpu.pipeline_mode<synchronous>, transform_indices = @transform_3, window_bounds = array<i64: 1, 128>}, {pipeline_mode = #tpu.pipeline_mode<synchronous>, transform_indices = @transform_4, window_bounds = array<i64: 128, 128>}, {pipeline_mode = #tpu.pipeline_mode<synchronous>, transform_indices = @transform_5, window_bounds = array<i64: 1, 128>}, {pipeline_mode = #tpu.pipeline_mode<synchronous>, transform_indices = @transform_6, window_bounds = array<i64: 128, 128>}, {pipeline_mode = #tpu.pipeline_mode<synchronous>, transform_indices = @transform_7, window_bounds = array<i64: 1, 128>}, {transform_indices = @transform_8, window_bounds = array<i64: 4, 128, 128>}]} {
    %c0 = arith.constant 0 : index
    %c0_0 = arith.constant 0 : index
    %c0_1 = arith.constant 0 : index
    %0 = vector.load %arg1[%c0, %c0_0, %c0_1] : memref<4x128x128xbf16, #tpu.memory_space<vmem>>, vector<4x128x128xbf16>
    %1 = arith.extf %0 : vector<4x128x128xbf16> to vector<4x128x128xf32>
    %cst = arith.constant dense<0.000000e+00> : vector<4x128xf32>
    %2 = vector.multi_reduction <add>, %1, %cst [2] : vector<4x128x128xf32> to vector<4x128xf32>
    %3 = vector.shape_cast %2 : vector<4x128xf32> to vector<4x128x1xf32>
    %cst_2 = arith.constant dense<0.000000e+00> : vector<4x128xf32>
    %4 = vector.multi_reduction <add>, %1, %cst_2 [1] : vector<4x128x128xf32> to vector<4x128xf32>
    %5 = vector.shape_cast %4 : vector<4x128xf32> to vector<4x1x128xf32>
    %cst_3 = arith.constant 0.000000e+00 : f32
    %6 = vector.broadcast %cst_3 : f32 to vector<4x128x1xf32>
    %7 = arith.cmpf ogt, %3, %6 : vector<4x128x1xf32>
    %8 = math.rsqrt %3 : vector<4x128x1xf32>
    %cst_4 = arith.constant 0.000000e+00 : f32
    %9 = vector.broadcast %cst_4 : f32 to vector<4x128x1xf32>
    %10 = arith.select %7, %8, %9 : vector<4x128x1xi1>, vector<4x128x1xf32>
    %cst_5 = arith.constant 0.000000e+00 : f32
    %11 = vector.broadcast %cst_5 : f32 to vector<4x1x128xf32>
    %12 = arith.cmpf ogt, %5, %11 : vector<4x1x128xf32>
    %13 = math.rsqrt %5 : vector<4x1x128xf32>
    %cst_6 = arith.constant 0.000000e+00 : f32
    %14 = vector.broadcast %cst_6 : f32 to vector<4x1x128xf32>
    %15 = arith.select %12, %13, %14 : vector<4x1x128xi1>, vector<4x1x128xf32>
    %16 = vector.broadcast %10 : vector<4x128x1xf32> to vector<4x128x128xf32>
    %17 = arith.mulf %16, %1 : vector<4x128x128xf32>
    %18 = vector.broadcast %15 : vector<4x1x128xf32> to vector<4x128x128xf32>
    %19 = arith.mulf %17, %18 : vector<4x128x128xf32>
    %20 = arith.truncf %19 : vector<4x128x128xf32> to vector<4x128x128xbf16>
    %c0_7 = arith.constant 0 : index
    %c0_8 = arith.constant 0 : index
    %c0_9 = arith.constant 0 : index
    %21 = vector.load %arg2[%c0_7, %c0_8, %c0_9] : memref<4x128x128xf32, #tpu.memory_space<vmem>>, vector<4x128x128xf32>
    %22 = arith.truncf %21 : vector<4x128x128xf32> to vector<4x128x128xbf16>
    "tpu.trace_start"() <{level = 10 : i32, message = "gij,gjf->gif"}> : () -> ()
    %cst_10 = arith.constant dense<0.000000e+00> : vector<4x128x128xf32>
    %23 = tpu.matmul %20, %22, %cst_10 {dimension_numbers = #tpu.dot_dimension_numbers<[2], [1], [1], [2], [0, 0, 0, 1, 1, 2], [0], [0]>} : vector<4x128x128xbf16>, vector<4x128x128xbf16>, vector<4x128x128xf32> -> vector<4x128x128xf32>
    "tpu.trace_stop"() : () -> ()
    %24 = vector.shape_cast %23 : vector<4x128x128xf32> to vector<512x128xf32>
    %25 = arith.truncf %24 : vector<512x128xf32> to vector<512x128xbf16>
    %c0_11 = arith.constant 0 : index
    %c0_12 = arith.constant 0 : index
    %26 = vector.load %arg3[%c0_11, %c0_12] : memref<128x128xbf16, #tpu.memory_space<vmem>>, vector<128x128xbf16>
    %cst_13 = arith.constant dense<0.000000e+00> : vector<512x128xf32>
    %27 = tpu.matmul %25, %26, %cst_13 {dimension_numbers = #tpu.dot_dimension_numbers<[1], [0], [0], [1], [0, 0, 1, 1], [], []>} : vector<512x128xbf16>, vector<128x128xbf16>, vector<512x128xf32> -> vector<512x128xf32>
    %c0_14 = arith.constant 0 : index
    %c0_15 = arith.constant 0 : index
    %28 = vector.load %arg4[%c0_14, %c0_15] : memref<1x128xf32, #tpu.memory_space<vmem>>, vector<1x128xf32>
    %29 = vector.broadcast %28 : vector<1x128xf32> to vector<512x128xf32>
    %30 = arith.addf %27, %29 : vector<512x128xf32>
    %cst_16 = arith.constant 0.000000e+00 : f32
    %31 = vector.broadcast %cst_16 : f32 to vector<512x128xf32>
    %32 = arith.maximumf %30, %31 : vector<512x128xf32>
    %33 = vector.shape_cast %32 : vector<512x128xf32> to vector<4x128x128xf32>
    %34 = arith.truncf %33 : vector<4x128x128xf32> to vector<4x128x128xbf16>
    "tpu.trace_start"() <{level = 10 : i32, message = "gij,gjf->gif"}> : () -> ()
    %cst_17 = arith.constant dense<0.000000e+00> : vector<4x128x128xf32>
    %35 = tpu.matmul %20, %34, %cst_17 {dimension_numbers = #tpu.dot_dimension_numbers<[2], [1], [1], [2], [0, 0, 0, 1, 1, 2], [0], [0]>} : vector<4x128x128xbf16>, vector<4x128x128xbf16>, vector<4x128x128xf32> -> vector<4x128x128xf32>
    "tpu.trace_stop"() : () -> ()
    %36 = vector.shape_cast %35 : vector<4x128x128xf32> to vector<512x128xf32>
    %37 = arith.truncf %36 : vector<512x128xf32> to vector<512x128xbf16>
    %c0_18 = arith.constant 0 : index
    %c0_19 = arith.constant 0 : index
    %38 = vector.load %arg5[%c0_18, %c0_19] : memref<128x128xbf16, #tpu.memory_space<vmem>>, vector<128x128xbf16>
    %cst_20 = arith.constant dense<0.000000e+00> : vector<512x128xf32>
    %39 = tpu.matmul %37, %38, %cst_20 {dimension_numbers = #tpu.dot_dimension_numbers<[1], [0], [0], [1], [0, 0, 1, 1], [], []>} : vector<512x128xbf16>, vector<128x128xbf16>, vector<512x128xf32> -> vector<512x128xf32>
    %c0_21 = arith.constant 0 : index
    %c0_22 = arith.constant 0 : index
    %40 = vector.load %arg6[%c0_21, %c0_22] : memref<1x128xf32, #tpu.memory_space<vmem>>, vector<1x128xf32>
    %41 = vector.broadcast %40 : vector<1x128xf32> to vector<512x128xf32>
    %42 = arith.addf %39, %41 : vector<512x128xf32>
    %cst_23 = arith.constant 0.000000e+00 : f32
    %43 = vector.broadcast %cst_23 : f32 to vector<512x128xf32>
    %44 = arith.maximumf %42, %43 : vector<512x128xf32>
    %45 = vector.shape_cast %44 : vector<512x128xf32> to vector<4x128x128xf32>
    %46 = arith.truncf %45 : vector<4x128x128xf32> to vector<4x128x128xbf16>
    "tpu.trace_start"() <{level = 10 : i32, message = "gij,gjf->gif"}> : () -> ()
    %cst_24 = arith.constant dense<0.000000e+00> : vector<4x128x128xf32>
    %47 = tpu.matmul %20, %46, %cst_24 {dimension_numbers = #tpu.dot_dimension_numbers<[2], [1], [1], [2], [0, 0, 0, 1, 1, 2], [0], [0]>} : vector<4x128x128xbf16>, vector<4x128x128xbf16>, vector<4x128x128xf32> -> vector<4x128x128xf32>
    "tpu.trace_stop"() : () -> ()
    %48 = vector.shape_cast %47 : vector<4x128x128xf32> to vector<512x128xf32>
    %49 = arith.truncf %48 : vector<512x128xf32> to vector<512x128xbf16>
    %c0_25 = arith.constant 0 : index
    %c0_26 = arith.constant 0 : index
    %50 = vector.load %arg7[%c0_25, %c0_26] : memref<128x128xbf16, #tpu.memory_space<vmem>>, vector<128x128xbf16>
    %cst_27 = arith.constant dense<0.000000e+00> : vector<512x128xf32>
    %51 = tpu.matmul %49, %50, %cst_27 {dimension_numbers = #tpu.dot_dimension_numbers<[1], [0], [0], [1], [0, 0, 1, 1], [], []>} : vector<512x128xbf16>, vector<128x128xbf16>, vector<512x128xf32> -> vector<512x128xf32>
    %c0_28 = arith.constant 0 : index
    %c0_29 = arith.constant 0 : index
    %52 = vector.load %arg8[%c0_28, %c0_29] : memref<1x128xf32, #tpu.memory_space<vmem>>, vector<1x128xf32>
    %53 = vector.broadcast %52 : vector<1x128xf32> to vector<512x128xf32>
    %54 = arith.addf %51, %53 : vector<512x128xf32>
    %55 = vector.shape_cast %54 : vector<512x128xf32> to vector<4x128x128xf32>
    %56 = arith.truncf %55 : vector<4x128x128xf32> to vector<4x128x128xbf16>
    %c0_30 = arith.constant 0 : index
    %c0_31 = arith.constant 0 : index
    %c0_32 = arith.constant 0 : index
    %57 = vector.load %arg9[%c0_30, %c0_31, %c0_32] : memref<4x128x128xbf16, #tpu.memory_space<vmem>>, vector<4x128x128xbf16>
    tpu.vector_store %arg9[%c0_30, %c0_31, %c0_32], %56 {strides = array<i32>} : memref<4x128x128xbf16, #tpu.memory_space<vmem>>, vector<4x128x128xbf16>,
    return
  }
  func.func @transform_0(%arg0: i32) -> (i32, i32, i32) {
    %c0_i32 = arith.constant 0 : i32
    %c0_i32_0 = arith.constant 0 : i32
    %c0_i32_1 = arith.constant 0 : i32
    return %arg0, %c0_i32, %c0_i32_0 : i32, i32, i32
  }
  func.func @transform_1(%arg0: i32) -> (i32, i32, i32) {
    %c0_i32 = arith.constant 0 : i32
    %c0_i32_0 = arith.constant 0 : i32
    %c0_i32_1 = arith.constant 0 : i32
    return %arg0, %c0_i32, %c0_i32_0 : i32, i32, i32
  }
  func.func @transform_2(%arg0: i32) -> (i32, i32) {
    %c0_i32 = arith.constant 0 : i32
    %c0_i32_0 = arith.constant 0 : i32
    %c0_i32_1 = arith.constant 0 : i32
    return %c0_i32, %c0_i32_0 : i32, i32
  }
  func.func @transform_3(%arg0: i32) -> (i32, i32) {
    %c0_i32 = arith.constant 0 : i32
    %c0_i32_0 = arith.constant 0 : i32
    %c0_i32_1 = arith.constant 0 : i32
    return %c0_i32, %c0_i32_0 : i32, i32
  }
  func.func @transform_4(%arg0: i32) -> (i32, i32) {
    %c0_i32 = arith.constant 0 : i32
    %c0_i32_0 = arith.constant 0 : i32
    %c0_i32_1 = arith.constant 0 : i32
    return %c0_i32, %c0_i32_0 : i32, i32
  }
  func.func @transform_5(%arg0: i32) -> (i32, i32) {
    %c0_i32 = arith.constant 0 : i32
    %c0_i32_0 = arith.constant 0 : i32
    %c0_i32_1 = arith.constant 0 : i32
    return %c0_i32, %c0_i32_0 : i32, i32
  }
  func.func @transform_6(%arg0: i32) -> (i32, i32) {
    %c0_i32 = arith.constant 0 : i32
    %c0_i32_0 = arith.constant 0 : i32
    %c0_i32_1 = arith.constant 0 : i32
    return %c0_i32, %c0_i32_0 : i32, i32
  }
  func.func @transform_7(%arg0: i32) -> (i32, i32) {
    %c0_i32 = arith.constant 0 : i32
    %c0_i32_0 = arith.constant 0 : i32
    %c0_i32_1 = arith.constant 0 : i32
    return %c0_i32, %c0_i32_0 : i32, i32
  }
  func.func @transform_8(%arg0: i32) -> (i32, i32, i32) {
    %c0_i32 = arith.constant 0 : i32
    %c0_i32_0 = arith.constant 0 : i32
    %c0_i32_1 = arith.constant 0 : i32
    return %arg0, %c0_i32, %c0_i32_0 : i32, i32, i32
  }
}

</mosaic_0001>

<bundles_post_ra>
// kernel: tpu_custom_call.1
= control target key start
LH: loop header
LB: loop body
LE: loop exit
PB: predicated region body
PF: predicated region fallthrough
CT: control target
= control target key end

     0   :  { %s8299_s0 = inlined_call_operand.hbm [shape: bf16[8,128,128], index: 0, kind: input, shape index: {}]   ;;  %s8300_s1 = inlined_call_operand.hbm [shape: f32[8,128,128], index: 1, kind: input, shape index: {}]   ;;  %s8301_s2 = inlined_call_operand.hbm [shape: bf16[128,128], index: 2, kind: input, shape index: {}]   ;;  %s8302_s3 = inlined_call_operand.vmem [shape: f32[1,128], index: 3, kind: input, shape index: {}]   ;;  %s8303_s4 = inlined_call_operand.hbm [shape: bf16[128,128], index: 4, kind: input, shape index: {}]   ;;  %s8304_s5 = inlined_call_operand.vmem [shape: f32[1,128], index: 5, kind: input, shape index: {}]   ;;  %s8305_s6 = inlined_call_operand.hbm [shape: bf16[128,128], index: 6, kind: input, shape index: {}]   ;;  %s8306_s7 = inlined_call_operand.vmem [shape: f32[1,128], index: 7, kind: input, shape index: {}]   ;;  %s8307_s8 = inlined_call_operand.hbm [shape: bf16[8,128,128], index: 8, kind: output, shape index: {}]  }
   0x1   :  { %8356 = sst [smem:[#allocation41_spill]] %s8301_s2 }
   0x2   :  { %8357 = sst [smem:[#allocation42_spill]] %s8303_s4 }
   0x3   :  { %8358 = sst [smem:[#allocation43_spill]] %s8305_s6 }
   0x4   :  { %13 = vsyncpa [#allocation3], 0 }
   0x5   :  { %15 = vsyncpa [#allocation3 + $0x1], 0 }
   0x6   :  { %16 = vsyncpa [#allocation6], 0 }
   0x7   :  { %18 = vsyncpa [#allocation6 + $0x1], 0 }
   0x8   :  { %19 = vsyncpa [#allocation9], 0 }
   0x9   :  { %20 = vsyncpa [#allocation4], 0 }
   0xa   :  { %22 = vsyncpa [#allocation4 + $0x1], 0  ;;  %s5601_s27 = smov 0   ;;  %s5603_s28 = smov 0  }
   0xb   :  { %s5605_s29 = smov 0   ;;  %s5607_s30 = smov 0  }
   0xc LB: > { %8359 = sst [smem:[#allocation17_spill]] %s5541_s29  ;;  %s5622_s9 = sadd.s32 4294967295, %s5545_s30   ;;  %s5545_s30 = sphi %s5607_s30, %s8559_s30   ;;  %s5541_s29 = sphi %s5605_s29, %s8561_s29   ;;  %s5537_s28 = sphi %s5603_s28, %s8563_s28   ;;  %s5533_s27 = sphi %s5601_s27, %s8562_s27  }
   0xd   : > { %s4586_s10 = sadd.s32 4294967294, %s5545_s30   ;;  %p48_p0 = scmp.ne.s32.totalorder %s5537_s28, %s5533_s27 }
   0xe   : > { %p49_p1 = scmp.eq.s32.totalorder %s5622_s9, 0  ;;  %p224_p2 = scmp.eq.s32.totalorder %s5622_s9, 1 }
   0xf   : > { %p230_p3 = scmp.eq.s32.totalorder %s4586_s10, 1  ;;  %p4587_p5 = scmp.ge.s32.totalorder %s5545_s30, 1 }
  0x10   : > { %p5631_p4 = por %p49_p1, %p48_p0  ;;  %p237_p7 = scmp.lt.s32.totalorder %s5545_s30, 3 }
  0x11   : > { %p5636_p6 = por %p230_p3, %p48_p0  ;;  %s8363_s2 = sld [smem:[#allocation41_spill]] }
  0x12   : > { %p5644_p8 = pnand %p4587_p5, %p237_p7  ;;  %s5547_s17 = smov [#allocation7]  }
  0x13   : > { %s8361_s12 = scalar_select %p5636_p6, 1, 0 }
  0x14   : > { %p5107_p9 = pneg %p5644_p8  ;;  %s250_s18 = sshll.u32 %s5547_s17, 4  ;;  %s251_s18 = int_to_ptr.vmem [resolvable:$true] %s250_s18 }
  0x15   : > { %8362 = sst [smem:[#allocation18_spill]] %s8361_s12  ;;  %s8308_s23 = smov 64  }
  0x16   : > { %p5652_p10 = pnand %p5107_p9, %p49_p1  ;;  %s8366_s4 = sld [smem:[#allocation42_spill]] }
  0x17   : > { %s248_s15 = sshll.u32 %s8363_s2, 4  ;;  %s8309_s24 = smov 4   ;;  %s249_s15 = int_to_ptr.hbm [resolvable:$true] %s248_s15 }
  0x18   : > { %5110 = dma.hbm_to_vmem [thread:$0]  (!%p5652_p10), %s249_s15, 1024, %s251_s18, [#allocation6], %s8308_s23, %s8308_s23, %s8309_s24  }
  0x19   : > { %s5550_s25 = smov [#allocation8]   ;;  %s8367_s6 = sld [smem:[#allocation43_spill]] }
  0x1a   : > { %s267_s26 = sshll.u32 %s5550_s25, 4  ;;  %s5551_s15 = smov [#allocation10]   ;;  %s268_s26 = int_to_ptr.vmem [resolvable:$true] %s267_s26 }
  0x1b   : > { %s284_s17 = sshll.u32 %s5551_s15, 4  ;;  %s5674_s18 = sadd.s32 1, %s5545_s30   ;;  %s285_s17 = int_to_ptr.vmem [resolvable:$true] %s284_s17 }
  0x1c   : > { %s265_s22 = sshll.u32 %s8366_s4, 4  ;;  %8368 = sst [smem:[#allocation19_spill]] %s5674_s18  ;;  %s266_s22 = int_to_ptr.hbm [resolvable:$true] %s265_s22 }
  0x1d   : > { %5113 = dma.hbm_to_vmem [thread:$0]  (!%p5652_p10), %s266_s22, 1024, %s268_s26, [#allocation9], %s8308_s23, %s8308_s23, %s8309_s24  }
  0x1e   : > { %s32_s20 = ssub.s32 %s5545_s30, %s5674_s18  ;;  %s35_s21 = sadd.s32 1, %s5541_s29 }
  0x1f   : > { %s282_s14 = sshll.u32 %s8367_s6, 4  ;;  %p33_p12 = scmp.eq.s32.totalorder %s32_s20, 0  ;;  %s283_s14 = int_to_ptr.hbm [resolvable:$true] %s282_s14 }
  0x20   : > { %5116 = dma.hbm_to_vmem [thread:$0]  (!%p5652_p10), %s283_s14, 1024, %s285_s17, [#allocation9], %s8308_s23, %s8308_s23, %s8309_s24  }
  0x21   : > { %p42_p13 = scmp.ne.s32.totalorder %s5541_s29, %s5537_s28  ;;  %p43_p0 = scmp.eq.s32.totalorder %s5545_s30, 0 }
  0x22   : > { %p5131_p3 = scmp.lt.s32.totalorder %s5545_s30, 2  ;;  %s5698_s19 = sand.u32 1, %s5541_s29  }
  0x23   : > { %s5689_s22 = scalar_select %p33_p12, %s5541_s29, %s35_s21  }
  0x24   : > { %p44_p5 = por %p43_p0, %p42_p13  ;;  %p5693_p7 = por %p224_p2, %p42_p13 }
  0x25   : > { %8369 = sst [smem:[#allocation20_spill]] %s5689_s22  ;;  %s4710_s26 = sshll.u32 %s5545_s30, 8 }
  0x26   : > { %s4592_s10 = sshll.u32 %s5698_s19, 8  ;;  %s311_s15 = scalar_lea.hbm %s8299_s0, %s4710_s26 }
  0x27   : > { %s312_s17 = sshll.u32 %s311_s15, 4  ;;  %s305_s20 = scalar_lea.vmem [#allocation2], %s4592_s10  ;;  %s313_s17 = int_to_ptr.hbm [resolvable:$true] %s312_s17 }
  0x28   : > { %s314_s21 = sshll.u32 %s305_s20, 4  ;;  %p5707_p2 = pnand %p5131_p3, %p44_p5  ;;  %s315_s21 = int_to_ptr.vmem [resolvable:$true] %s314_s21 }
  0x29   : > { %s324_s24 = sand.u32 1, %s5545_s30   ;;  %s4596_s2 = sshll.u32 %s5698_s19, 9 }
  0x2a   : > { %s302_s4 = scalar_lea.sflag [#allocation3], %s5698_s19  ;;  %s5407_s6 = sshra.s32 %s313_s17, 4  ;;  %s5408_s6 = int_to_ptr.hbm [resolvable:$true] %s5407_s6 }
  0x2b   : > { %s5409_s22 = scalar_lea.hbm %s5408_s6, 256  ;;  %p5411_p10 = pneg %p5707_p2 }
  0x2c   : > { %p5410_p9 = scmp.ne.s32.totalorder %s5408_s6, %s5409_s22  ;;  %s5414_s13 = scalar_lea.hbm %s8299_s0, 512 }
  0x2d   : > { %p5415_p0 = scmp.lt.s32.totalorder %s5408_s6, %s8299_s0  ;;  %p5416_p3 = scmp.lt.s32.totalorder %s5414_s13, %s5409_s22 }
  0x2e   : > { %p5412_p12 = pnand %p5411_p10, %p5410_p9 }
  0x2f   : > { %p5417_p5 = por %p5416_p3, %p5415_p0 }
  0x30   : > { %p5413_p13 = pneg %p5412_p12 }
  0x32   : > { %p5418_p11 = pnand %p5417_p5, %p5413_p13 }
  0x34   : > { %5421 = shalt.err (!%p5418_p11)
}
  0x35   : > { %s8372_s19 = smov 4   ;;  %s8373_s20 = smov 64  }
  0x36   : > { %5120 = dma.hbm_to_vmem [thread:$0]  (!%p5707_p2), %s313_s17, 4096, %s315_s21, %s302_s4, %s8373_s20, %s8373_s20, %s8372_s19  }
  0x37   : > { %s4712_s29 = sshll.u32 %s5545_s30, 9  ;;  %s328_s18 = scalar_lea.vmem [#allocation5], %s4596_s2 }
  0x38   : > { %s337_s26 = sshll.u32 %s328_s18, 4  ;;  %s334_s14 = scalar_lea.hbm %s8300_s1, %s4712_s29  ;;  %s338_s26 = int_to_ptr.vmem [resolvable:$true] %s337_s26 }
  0x39   : > { %s335_s6 = sshll.u32 %s334_s14, 4  ;;  %s325_s22 = scalar_lea.sflag [#allocation6], %s324_s24  ;;  %s336_s6 = int_to_ptr.hbm [resolvable:$true] %s335_s6 }
  0x3a   : > { %s5437_s13 = sshra.s32 %s336_s6, 4  ;;  %s5444_s2 = scalar_lea.hbm %s8300_s1, 1024  ;;  %s5438_s13 = int_to_ptr.hbm [resolvable:$true] %s5437_s13 }
  0x3b   : > { %s5439_s15 = scalar_lea.hbm %s5438_s13, 512  ;;  %p5445_p13 = scmp.lt.s32.totalorder %s5438_s13, %s8300_s1 }
  0x3c   : > { %p5440_p11 = scmp.ne.s32.totalorder %s5438_s13, %s5439_s15  ;;  %p5446_p0 = scmp.lt.s32.totalorder %s5444_s2, %s5439_s15 }
  0x3e   : > { %p5442_p9 = pnand %p5440_p11, %p5411_p10  ;;  %p5447_p3 = por %p5446_p0, %p5445_p13 }
  0x40   : > { %p5443_p12 = pneg %p5442_p9 }
  0x42   : > { %p5448_p5 = pnand %p5447_p3, %p5443_p12 }
  0x44   : > { %5451 = shalt.err (!%p5448_p5)
}
  0x45   : > { %s5552_s29 = smov 128   ;;  %s5553_s12 = smov 8  }
  0x46   : > { %5123 = dma.hbm_to_vmem [thread:$0]  (!%p5707_p2), %s336_s6, 8192, %s338_s26, %s325_s22, %s5552_s29, %s5552_s29, %s5553_s12  }
  0x47   : > { %349 = sbr.rel (%p5644_p8) target bundleno = 2364 (0x93c), region = 52 }
  0x4c   : > { %s5748_s24 = sand.u32 1, %s5537_s28  }
  0x4d   : > { %s4601_s19 = sshll.u32 %s5748_s24, 8  ;;  %s352_s20 = scalar_lea.sflag [#allocation3], %s5748_s24 }
  0x4e   : > { %s5754_s10 = scalar_lea.vmem [#allocation2], %s4601_s19 }
  0x4f   : > { %5512 = dma.done.wait (%p5631_p4), %s352_s20, 4096  }
  0x50   : > { %5514 = vsyncadd (%p5631_p4), %s352_s20, 4294963200  ;;  %s361_s16 = sand.u32 1, %s5622_s9   ;;  %s4602_s23 = sshll.u32 %s5748_s24, 9 }
  0x51   : > { %s362_s26 = scalar_lea.sflag [#allocation6], %s361_s16  ;;  %s5762_s14 = scalar_lea.vmem [#allocation5], %s4602_s23 }
  0x52   : > { %5516 = dma.done.wait (%p5631_p4), %s362_s26, 8192  }
  0x53   : > { %5518 = vsyncadd (%p5631_p4), %s362_s26, 4294959104 }
  0x54   : > { %5520 = dma.done.wait (%p49_p1), [#allocation6], 1024  }
  0x55   : > { %5522 = vsyncadd (%p49_p1), [#allocation6], 4294966272 }
  0x56   : > { %5524 = dma.done.wait (%p49_p1), [#allocation9], 2048  }
  0x57   : > { %5526 = vsyncadd (%p49_p1), [#allocation9], 4294965248  ;;  %v5027_v0 = vld [vmem:[%s5754_s10 + $0x8] sm:$0xff]   ;;  %v4740_v1 = vld [vmem:[%s5754_s10] sm:$0xff]   ;;  %s8145_s18 = scalar_lea.vmem [#allocation11], %s4601_s19  ;;  %s4738_s21 = sshll.u32 %s5622_s9, 8 }
  0x58   : > { %v5028_v2 = vld [vmem:[%s5754_s10 + $0x10] sm:$0xff]   ;;  %v5779_v3 = vunpack.c.l.bf16 %v5027_v0  ;;  %v5781_v4 = vunpack.c.l.bf16 %v4740_v1  ;;  %v5788_v6 = vunpack.c.h.bf16 %v5027_v0  ;;  %v5790_v7 = vunpack.c.h.bf16 %v4740_v1  ;;  %v5029_v9 = vld [vmem:[%s5754_s10 + $0x18] sm:$0xff]   ;;  %v5030_v10 = vld [vmem:[%s5754_s10 + $0x20] sm:$0xff]   ;;  %s4458_s19 = scalar_lea.hbm %s8307_s8, %s4738_s21  ;;  %s4459_s20 = sshll.u32 %s8145_s18, 4  ;;  %s4460_s20 = int_to_ptr.vmem [resolvable:$true] %s4459_s20 }
  0x59   : > { %v5783_v5 = vunpack.c.l.bf16 %v5028_v2  ;;  %v5792_v8 = vunpack.c.h.bf16 %v5028_v2  ;;  %v5799_v11 = vunpack.c.h.bf16 %v5029_v9  ;;  %v5801_v12 = vunpack.c.l.bf16 %v5029_v9  ;;  %v5031_v14 = vld [vmem:[%s5754_s10 + $0x28] sm:$0xff]   ;;  %v5032_v19 = vld [vmem:[%s5754_s10 + $0x30] sm:$0xff]   ;;  %v5033_v20 = vld [vmem:[%s5754_s10 + $0x38] sm:$0xff]   ;;  %s4446_s16 = scalar_lea.sflag [#allocation4], %s5748_s24  ;;  %s5487_s11 = scalar_lea.hbm %s8307_s8, 512 }
  0x5a   : > { %554 = vadd.xlane.f32.xlu1 %v5779_v3  ;;  %550 = vadd.xlane.f32.xlu0 %v5781_v4  ;;  %v5803_v13 = vunpack.c.l.bf16 %v5030_v10  ;;  %v5809_v15 = vunpack.c.h.bf16 %v5030_v10  ;;  %v5811_v16 = vunpack.c.l.bf16 %v5031_v14  ;;  %v5813_v17 = vunpack.c.h.bf16 %v5031_v14  ;;  %v1784_v39 = vld [vmem:[%s5762_s14 + $0x70] sm:$0xff]  ;;  %v1785_v40 = vld [vmem:[%s5762_s14 + $0x78] sm:$0xff]  ;;  %v5050_v42 = vld [vmem:[%s5754_s10 + $0xc0] sm:$0xff]  }
  0x5b   : > { %558 = vadd.xlane.f32.xlu2 %v5783_v5  ;;  %v678_v18 = vadd.f32 %v5790_v7, %v5781_v4  ;;  %v5822_v21 = vunpack.c.h.bf16 %v5032_v19  ;;  %v5824_v22 = vunpack.c.l.bf16 %v5032_v19  ;;  %v5827_v24 = vunpack.c.l.bf16 %v5033_v20  ;;  %v1782_v51 = vld [vmem:[%s5762_s14 + $0x60] sm:$0xff]  ;;  %v1783_v52 = vld [vmem:[%s5762_s14 + $0x68] sm:$0xff]  ;;  %v1780_v58 = vld [vmem:[%s5762_s14 + $0x50] sm:$0xff] }
  0x5c   : > { %v5833_v26 = vunpack.c.h.bf16 %v5033_v20  ;;  %v1848_v43 = vpack.c.bf16 %v1784_v39, %v1784_v39  ;;  %v1849_v44 = vpack.c.bf16 %v1785_v40, %v1785_v40  ;;  %v5851_v45 = vunpack.c.h.bf16 %v5050_v42  ;;  %v1781_v59 = vld [vmem:[%s5762_s14 + $0x58] sm:$0xff]  ;;  %v1778_v2 = vld [vmem:[%s5762_s14 + $0x40] sm:$0xff]  ;;  %v1779_v9 = vld [vmem:[%s5762_s14 + $0x48] sm:$0xff] }
  0x5d   : > { %v679_v23 = vadd.f32 %v5779_v3, %v678_v18  ;;  %v5853_v46 = vunpack.c.l.bf16 %v5050_v42  ;;  %v1846_v53 = vpack.c.bf16 %v1782_v51, %v1782_v51  ;;  %v1847_v54 = vpack.c.bf16 %v1783_v52, %v1783_v52 }
  0x5e   : > { %v1976_v47 = vunpack.c.l.b16 %v1848_v43  ;;  %v1977_v48 = vunpack.c.l.b16 %v1849_v44  ;;  %v1844_v61 = vpack.c.bf16 %v1780_v58, %v1780_v58  ;;  %v1845_v62 = vpack.c.bf16 %v1781_v59, %v1781_v59  ;;  %v1772_v44 = vld [vmem:[%s5762_s14 + $0x10] sm:$0xff] }
  0x5f   : > { %v680_v25 = vadd.f32 %v5788_v6, %v679_v23  ;;  %v1974_v56 = vunpack.c.l.b16 %v1846_v53  ;;  %v1975_v57 = vunpack.c.l.b16 %v1847_v54  ;;  %v1842_v14 = vpack.c.bf16 %v1778_v2, %v1778_v2  ;;  %v1770_v53 = vld [vmem:[%s5762_s14] sm:$0xff]  ;;  %v1771_v54 = vld [vmem:[%s5762_s14 + $0x8] sm:$0xff] }
  0x60   : > { %v1985_v50 = vpack.c.b16 %v1977_v48, %v1976_v47  ;;  %v1972_v0 = vunpack.c.l.b16 %v1844_v61  ;;  %v1973_v1 = vunpack.c.l.b16 %v1845_v62  ;;  %v1843_v18 = vpack.c.bf16 %v1779_v9, %v1779_v9  ;;  %v1773_v47 = vld [vmem:[%s5762_s14 + $0x18] sm:$0xff] }
  0x61   : > { %v681_v27 = vadd.f32 %v5783_v5, %v680_v25  ;;  %v1984_v60 = vpack.c.b16 %v1975_v57, %v1974_v56  ;;  %v1970_v20 = vunpack.c.l.b16 %v1842_v14  ;;  %v1776_v25 = vld [vmem:[%s5762_s14 + $0x30] sm:$0xff]  ;;  %v1835_v61 = vpack.c.bf16 %v1771_v54, %v1771_v54 }
  0x62   : > { %556 = vadd.xlane.f32.xlu1 %v5788_v6  ;;  %552 = vadd.xlane.f32.xlu0 %v5790_v7  ;;  %v1983_v10 = vpack.c.b16 %v1973_v1, %v1972_v0  ;;  %v1971_v23 = vunpack.c.l.b16 %v1843_v18 }
  0x63   : > { %560 = vadd.xlane.f32.xlu2 %v5792_v8  ;;  %v682_v28 = vadd.f32 %v5792_v8, %v681_v27  ;;  %1994 = vmatpush.bf16.msra.mxu0 %v1985_v50  ;;  %v1777_v27 = vld [vmem:[%s5762_s14 + $0x38] sm:$0xff]  ;;  %v1837_v50 = vpack.c.bf16 %v1773_v47, %v1773_v47  ;;  %v1963_v1 = vunpack.c.l.b16 %v1835_v61 }
  0x65   : > { %v683_v29 = vadd.f32 %v5801_v12, %v682_v28  ;;  %v1982_v28 = vpack.c.b16 %v1971_v23, %v1970_v20  ;;  %v1965_v52 = vunpack.c.l.b16 %v1837_v50 }
  0x67   : > { %v684_v30 = vadd.f32 %v5799_v11, %v683_v29  ;;  %1995 = vmatpush.bf16.msra.mxu0 %v1984_v60  ;;  %v5051_v29 = vld [vmem:[%s5754_s10 + $0xc8] sm:$0xff]   ;;  %v1834_v60 = vpack.c.bf16 %v1770_v53, %v1770_v53 }
  0x69   : > { %v685_v31 = vadd.f32 %v5803_v13, %v684_v30  ;;  %v1840_v30 = vpack.c.bf16 %v1776_v25, %v1776_v25  ;;  %v1962_v0 = vunpack.c.l.b16 %v1834_v60  ;;  %v5053_v25 = vld [vmem:[%s5754_s10 + $0xd8] sm:$0xff]  }
  0x6a   : > { %564 = vadd.xlane.f32.xlu1 %v5799_v11  ;;  %562 = vadd.xlane.f32.xlu0 %v5801_v12 }
  0x6b   : > { %566 = vadd.xlane.f32.xlu2 %v5803_v13  ;;  %v686_v32 = vadd.f32 %v5809_v15, %v685_v31  ;;  %1996 = vmatpush.bf16.msra.mxu0 %v1983_v10  ;;  %v1841_v31 = vpack.c.bf16 %v1777_v27, %v1777_v27  ;;  %v1978_v9 = vpack.c.b16 %v1963_v1, %v1962_v0 }
  0x6d   : > { %v687_v33 = vadd.f32 %v5811_v16, %v686_v32  ;;  %v5866_v32 = vunpack.c.h.bf16 %v5051_v29 }
  0x6f   : > { %v688_v34 = vadd.f32 %v5813_v17, %v687_v33  ;;  %v5868_v33 = vunpack.c.l.bf16 %v5051_v29  ;;  %1997 = vmatpush.bf16.msra.mxu0 %v1982_v28 }
  0x71   : > { %v689_v35 = vadd.f32 %v5824_v22, %v688_v34 }
  0x72   : > { %568 = vadd.xlane.f32.xlu0 %v5809_v15  ;;  %570 = vadd.xlane.f32.xlu1 %v5811_v16 }
  0x73   : > { %572 = vadd.xlane.f32.xlu2 %v5813_v17  ;;  %v690_v36 = vadd.f32 %v5822_v21, %v689_v35  ;;  %v1968_v35 = vunpack.c.l.b16 %v1840_v30 }
  0x75   : > { %v691_v37 = vadd.f32 %v5827_v24, %v690_v36  ;;  %v1969_v36 = vunpack.c.l.b16 %v1841_v31  ;;  %v5907_v31 = vunpack.c.h.bf16 %v5053_v25 }
  0x77   : > { %v692_v38 = vadd.f32 %v5833_v26, %v691_v37  ;;  %v1774_v37 = vld [vmem:[%s5762_s14 + $0x20] sm:$0xff]  ;;  %v1981_v39 = vpack.c.b16 %v1969_v36, %v1968_v35  ;;  %v5909_v35 = vunpack.c.l.bf16 %v5053_v25 }
  0x78   : > { %v1838_v40 = vpack.c.bf16 %v1774_v37, %v1774_v37 }
  0x79   : > { %v693_v41 = vrot.slane %v692_v38, 4  ;;  %1998 = vmatpush.bf16.msra.mxu0 %v1981_v39 }
  0x7a   : > { %576 = vadd.xlane.f32.xlu1 %v5822_v21  ;;  %574 = vadd.xlane.f32.xlu0 %v5824_v22  ;;  %v1966_v42 = vunpack.c.l.b16 %v1838_v40 }
  0x7b   : > { %578 = vadd.xlane.f32.xlu2 %v5827_v24  ;;  %v694_v49 = vadd.f32 %v693_v41, %v692_v38  ;;  %v1775_v38 = vld [vmem:[%s5762_s14 + $0x28] sm:$0xff] }
  0x7c   : > { %v1839_v41 = vpack.c.bf16 %v1775_v38, %v1775_v38 }
  0x7d   : > { %v695_v55 = vrot.slane %v694_v49, 2 }
  0x7e   : > { %v1967_v43 = vunpack.c.l.b16 %v1839_v41 }
  0x7f   : > { %v696_v63 = vadd.f32 %v695_v55, %v694_v49  ;;  %v1836_v49 = vpack.c.bf16 %v1772_v44, %v1772_v44  ;;  %v5052_v55 = vld [vmem:[%s5754_s10 + $0xd0] sm:$0xff]  }
  0x80   : > { %v1980_v48 = vpack.c.b16 %v1967_v43, %v1966_v42  ;;  %v5886_v62 = vunpack.c.l.bf16 %v5052_v55  ;;  %v5891_v2 = vunpack.c.h.bf16 %v5052_v55 }
  0x81   : > { %v697_v19 = vrot.slane %v696_v63, 1  ;;  %v1964_v51 = vunpack.c.l.b16 %v1836_v49 }
  0x82   : > { %580 = vadd.xlane.f32.xlu0 %v5833_v26  ;;  %646 = vadd.xlane.f32.xlu1 %v5853_v46 }
  0x83   : > { %648 = vadd.xlane.f32.xlu2 %v5851_v45  ;;  %v5870_v34 = vadd.f32 %v697_v19, %v696_v63  ;;  %1999 = vmatpush.bf16.msra.mxu0 %v1980_v48  ;;  %v1979_v59 = vpack.c.b16 %v1965_v52, %v1964_v51 }
  0x85   : > { %5180 = vrsqrt.f32 %v5870_v34  ;;  %vm1540_vm1 = vweird.f32 %v5870_v34  ;;  %vm1530_vm7 = vcmp.gt.f32.partialorder %v5870_v34, 0.0 }
  0x87   : > { %2000 = vmatpush.bf16.msra.mxu0 %v1979_v59 }
  0x8a   : > { %652 = vadd.xlane.f32.xlu1 %v5866_v32  ;;  %650 = vadd.xlane.f32.xlu0 %v5868_v33 }
  0x8b   : > { %v5882_v56 = vpop.eup %5180  ;;  %654 = vadd.xlane.f32.xlu2 %v5886_v62  ;;  %2001 = vmatpush.bf16.msra.mxu0 %v1978_v9 }
  0x8c   : > { %v1535_v63 = vmul.f32 %v5882_v56, %v5870_v34  ;;  %vm1541_vm2 = vweird.f32 %v5882_v56 }
  0x8d   : > { %vm5928_vm5 = vmor %vm1540_vm1, %vm1541_vm2 }
  0x8e   : > { %v1536_v10 = vmul.f32 %v5882_v56, %v1535_v63 }
  0x90   : > { %v1537_v27 = vmul.f32 0.5, %v1536_v10 }
  0x92   : > { %656 = vadd.xlane.f32.xlu0 %v5891_v2  ;;  %v1538_v37 = vsub.f32 1.5, %v1537_v27  ;;  %658 = vadd.xlane.f32.xlu1 %v5909_v35 }
  0x93   : > { %660 = vadd.xlane.f32.xlu2 %v5907_v31 }
  0x94   : > { %v1539_v48 = vmul.f32 %v5882_v56, %v1538_v37 }
  0x96   : > { %v1543_v55 = vsel %vm5928_vm5, %v5882_v56, %v1539_v48  ;;  %v741_v48 = vadd.f32 %v5851_v45, %v5853_v46 }
  0xcd   : > { %v5884_v57 = vpop.xlane.xlu1 %554  ;;  %v551_v58 = vpop.xlane.xlu0 %550 }
  0xce   : > { %5182 = vrsqrt.f32 %v551_v58  ;;  %v5896_v14 = vpop.xlane.xlu2 %558  ;;  %vm832_vm3 = vweird.f32 %v551_v58  ;;  %vm762_vm6 = vcmp.gt.f32.partialorder %v551_v58, 0.0  ;;  %vm852_vm12 = vweird.f32 %v5884_v57 }
  0xcf   : > { %5184 = vrsqrt.f32 %v5884_v57 }
  0xd4   : > { %v5183_v18 = vpop.eup %5182 }
  0xd5   : > { %v5898_v19 = vpop.xlane.xlu1 %556  ;;  %v5900_v20 = vpop.xlane.xlu0 %552  ;;  %v827_v23 = vmul.f32 %v5183_v18, %v551_v58  ;;  %vm833_vm0 = vweird.f32 %v5183_v18  ;;  %v5942_v58 = vsel %vm1530_vm7, %v1543_v55, 0.0 }
  0xd6   : > { %5186 = vrsqrt.f32 %v5898_v19  ;;  %v5905_v29 = vpop.eup %5184  ;;  %v5921_v43 = vpop.xlane.xlu2 %560  ;;  %vm834_vm4 = vmor %vm832_vm3, %vm833_vm0  ;;  %vm862_vm9 = vweird.f32 %v5898_v19  ;;  %vm842_vm11 = vweird.f32 %v5900_v20  ;;  %vm763_vm14 = vcmp.gt.f32.partialorder %v5900_v20, 0.0 }
  0xd7   : > { %v828_v28 = vmul.f32 %v5183_v18, %v827_v23  ;;  %5188 = vrsqrt.f32 %v5900_v20  ;;  %v847_v38 = vmul.f32 %v5905_v29, %v5884_v57  ;;  %vm853_vm13 = vweird.f32 %v5905_v29 }
  0xd8   : > { %5190 = vrsqrt.f32 %v5896_v14  ;;  %vm5963_vm1 = vmor %vm852_vm12, %vm853_vm13  ;;  %vm765_vm2 = vcmp.gt.f32.partialorder %v5898_v19, 0.0  ;;  %vm764_vm3 = vcmp.gt.f32.partialorder %v5884_v57, 0.0 }
  0xd9   : > { %v829_v30 = vmul.f32 0.5, %v828_v28  ;;  %v848_v49 = vmul.f32 %v5905_v29, %v847_v38  ;;  %5192 = vrsqrt.f32 %v5921_v43  ;;  %v5054_v38 = vld [vmem:[%s5754_s10 + $0xe0] sm:$0xff]  }
  0xdb   : > { %v830_v39 = vsub.f32 1.5, %v829_v30  ;;  %v849_v59 = vmul.f32 0.5, %v848_v49  ;;  %v5980_v49 = vunpack.c.h.bf16 %v5054_v38 }
  0xdc   : > { %v5911_v36 = vpop.eup %5186 }
  0xdd   : > { %v857_v40 = vmul.f32 %v5911_v36, %v5898_v19  ;;  %v5189_v41 = vpop.eup %5188  ;;  %v831_v42 = vmul.f32 %v5183_v18, %v830_v39  ;;  %v850_v34 = vsub.f32 1.5, %v849_v59  ;;  %vm863_vm10 = vweird.f32 %v5911_v36  ;;  %664 = vadd.xlane.f32.xlu1 %v5980_v49 }
  0xde   : > { %v837_v47 = vmul.f32 %v5189_v41, %v5900_v20  ;;  %v5937_v61 = vpop.eup %5190  ;;  %vm843_vm8 = vweird.f32 %v5189_v41  ;;  %vm5956_vm0 = vmor %vm862_vm9, %vm863_vm10  ;;  %v742_v59 = vadd.f32 %v5868_v33, %v741_v48  ;;  %v6027_v20 = vpop.xlane.xlu2 %566  ;;  %vm766_vm10 = vcmp.gt.f32.partialorder %v5896_v14, 0.0 }
  0xdf   : > { %v858_v44 = vmul.f32 %v5911_v36, %v857_v40  ;;  %v835_v50 = vsel %vm834_vm4, %v5183_v18, %v831_v42  ;;  %v5940_v9 = vpop.eup %5192  ;;  %vm844_vm15 = vmor %vm842_vm11, %vm843_vm8  ;;  %v851_v30 = vmul.f32 %v5905_v29, %v850_v34  ;;  %v5969_v40 = vpop.xlane.xlu1 %564  ;;  %vm872_vm4 = vweird.f32 %v5896_v14 }
  0xe0   : > { %v838_v53 = vmul.f32 %v5189_v41, %v837_v47  ;;  %v1466_v54 = vsel %vm762_vm6, %v835_v50, 0.0  ;;  %v877_v23 = vmul.f32 %v5940_v9, %v5921_v43  ;;  %v5976_v47 = vpop.xlane.xlu0 %562  ;;  %v5982_v50 = vunpack.c.l.bf16 %v5054_v38 }
  0xe1   : > { %v859_v52 = vmul.f32 0.5, %v858_v44  ;;  %v1578_v63 = vmul.f32 %v5781_v4, %v1466_v54  ;;  %v867_v4 = vmul.f32 %v5937_v61, %v5896_v14  ;;  %v855_v19 = vsel %vm5963_vm1, %v5905_v29, %v851_v30 }
  0xe2   : > { %v839_v60 = vmul.f32 0.5, %v838_v53  ;;  %v878_v42 = vmul.f32 %v5940_v9, %v877_v23  ;;  %5194 = vrsqrt.f32 %v5969_v40  ;;  %662 = vadd.xlane.f32.xlu0 %v5982_v50  ;;  %v1468_v57 = vsel %vm764_vm3, %v855_v19, 0.0 }
  0xe3   : > { %v860_v0 = vsub.f32 1.5, %v859_v52  ;;  %v1642_v25 = vmul.f32 %v1578_v63, %v5942_v58  ;;  %v868_v39 = vmul.f32 %v5937_v61, %v867_v4  ;;  %5196 = vrsqrt.f32 %v5976_v47 }
  0xe4   : > { %v840_v1 = vsub.f32 1.5, %v839_v60  ;;  %v879_v53 = vmul.f32 0.5, %v878_v42  ;;  %vm873_vm5 = vweird.f32 %v5937_v61  ;;  %v743_v4 = vadd.f32 %v5866_v32, %v742_v59 }
  0xe5   : > { %v861_v10 = vmul.f32 %v5911_v36, %v860_v0  ;;  %v869_v51 = vmul.f32 0.5, %v868_v39  ;;  %vm882_vm6 = vweird.f32 %v5921_v43  ;;  %vm883_vm7 = vweird.f32 %v5940_v9  ;;  %vm6012_vm8 = vmor %vm872_vm4, %vm873_vm5 }
  0xe6   : > { %v841_v56 = vmul.f32 %v5189_v41, %v840_v1  ;;  %v1580_v1 = vmul.f32 %v5779_v3, %v1468_v57  ;;  %v880_v34 = vsub.f32 1.5, %v879_v53  ;;  %vm6022_vm9 = vmor %vm882_vm6, %vm883_vm7  ;;  %v744_v38 = vadd.f32 %v5886_v62, %v743_v4  ;;  %v5056_v4 = vld [vmem:[%s5754_s10 + $0xf0] sm:$0xff]  }
  0xe7   : > { %v870_v63 = vsub.f32 1.5, %v869_v51  ;;  %vm767_vm11 = vcmp.gt.f32.partialorder %v5921_v43, 0.0  ;;  %5198 = vrsqrt.f32 %v6027_v20  ;;  %vm902_vm12 = vweird.f32 %v5969_v40 }
  0xe8   : > { %v845_v18 = vsel %vm844_vm15, %v5189_v41, %v841_v56  ;;  %v865_v41 = vsel %vm5956_vm0, %v5911_v36, %v861_v10  ;;  %v5996_v0 = vpop.eup %5194  ;;  %v5055_v10 = vld [vmem:[%s5754_s10 + $0xe8] sm:$0xff]   ;;  %v6031_v42 = vpop.xlane.xlu0 %568  ;;  %v745_v14 = vadd.f32 %v5891_v2, %v744_v38  ;;  %v6072_v23 = vunpack.c.l.bf16 %v5056_v4 }
  0xe9   : > { %v1467_v28 = vsel %vm763_vm14, %v845_v18, 0.0  ;;  %v1469_v52 = vsel %vm765_vm2, %v865_v41, 0.0  ;;  %v6000_v56 = vpop.eup %5196  ;;  %v871_v3 = vmul.f32 %v5937_v61, %v870_v63  ;;  %v897_v18 = vmul.f32 %v5996_v0, %v5969_v40 }
  0xea   : > { %v1579_v37 = vmul.f32 %v5790_v7, %v1467_v28  ;;  %v1706_v7 = vpack.c.bf16 %v1642_v25, %v1642_v25  ;;  %v1581_v29 = vmul.f32 %v5788_v6, %v1469_v52  ;;  %v881_v25 = vmul.f32 %v5940_v9, %v880_v34  ;;  %670 = vadd.xlane.f32.xlu1 %v6072_v23 }
  0xeb   : > { %v887_v27 = vmul.f32 %v6000_v56, %v5976_v47  ;;  %v1644_v28 = vmul.f32 %v1580_v1, %v5942_v58  ;;  %v6020_v30 = vunpack.c.l.bf16 %v5055_v10  ;;  %v6029_v39 = vunpack.c.h.bf16 %v5055_v10 }
  0xec   : > { %v1643_v44 = vmul.f32 %v1579_v37, %v5942_v58  ;;  %v1914_v54 = vunpack.c.l.b16 %v1706_v7  ;;  %v1645_v6 = vmul.f32 %v1581_v29, %v5942_v58  ;;  %v898_v7 = vmul.f32 %v5996_v0, %v897_v18 }
  0xed   : > { %666 = vadd.xlane.f32.xlu2 %v6020_v30  ;;  %668 = vadd.xlane.f32.xlu0 %v6029_v39  ;;  %v885_v48 = vsel %vm6022_vm9, %v5940_v9, %v881_v25  ;;  %v888_v19 = vmul.f32 %v6000_v56, %v887_v27  ;;  %5200 = vrsqrt.f32 %v6031_v42  ;;  %v6049_v57 = vpop.eup %5198  ;;  %vm903_vm13 = vweird.f32 %v5996_v0 }
  0xee   : > { %v1707_v36 = vpack.c.bf16 %v1643_v44, %v1643_v44  ;;  %v1709_v41 = vpack.c.bf16 %v1645_v6, %v1645_v6  ;;  %v875_v44 = vsel %vm6012_vm8, %v5937_v61, %v871_v3  ;;  %v1471_v51 = vsel %vm767_vm11, %v885_v48, 0.0  ;;  %vm6077_vm0 = vmor %vm902_vm12, %vm903_vm13 }
  0xef   : > { %v1470_v43 = vsel %vm766_vm10, %v875_v44, 0.0  ;;  %v899_v52 = vmul.f32 0.5, %v898_v7  ;;  %v889_v53 = vmul.f32 0.5, %v888_v19  ;;  %v1583_v59 = vmul.f32 %v5792_v8, %v1471_v51  ;;  %v6088_v44 = vpop.xlane.xlu1 %570 }
  0xf0   : > { %v1915_v55 = vunpack.c.l.b16 %v1707_v36  ;;  %v1708_v36 = vpack.c.bf16 %v1644_v28, %v1644_v28  ;;  %v1917_v61 = vunpack.c.l.b16 %v1709_v41  ;;  %v1582_v9 = vmul.f32 %v5783_v5, %v1470_v43 }
  0xf1   : > { %v900_v1 = vsub.f32 1.5, %v899_v52  ;;  %v890_v34 = vsub.f32 1.5, %v889_v53  ;;  %vm892_vm14 = vweird.f32 %v5976_v47  ;;  %v907_v5 = vmul.f32 %v6049_v57, %v6027_v20 }
  0xf2   : > { %v5994_v60 = vpack.c.b16 %v1915_v55, %v1914_v54  ;;  %v1916_v54 = vunpack.c.l.b16 %v1708_v36  ;;  %v746_v55 = vadd.f32 %v5909_v35, %v745_v14  ;;  %vm893_vm15 = vweird.f32 %v6000_v56  ;;  %v6093_v36 = vpop.xlane.xlu2 %572 }
  0xf3   : > { %v6055_v63 = vpop.eup %5200  ;;  %v1646_v6 = vmul.f32 %v1582_v9, %v5942_v58  ;;  %v1647_v3 = vmul.f32 %v1583_v59, %v5942_v58  ;;  %v6070_v18 = vunpack.c.h.bf16 %v5056_v4  ;;  %v901_v25 = vmul.f32 %v5996_v0, %v900_v1  ;;  %vm6082_vm1 = vmor %vm892_vm14, %vm893_vm15 }
  0xf4   : > { %8380 = vst [vmem:[#allocation21_spill] sm:$0xff] %v5994_v60  ;;  %2002 = vmatmul.bf16.vlgmr.msra.gmra.mxu0 %v5994_v60  ;;  %v6053_v29 = vpack.c.b16 %v1917_v61, %v1916_v54  ;;  %v747_v8 = vadd.f32 %v5907_v31, %v746_v55  ;;  %v917_v10 = vmul.f32 %v6055_v63, %v6031_v42  ;;  %vm769_vm2 = vcmp.gt.f32.partialorder %v5969_v40, 0.0 }
  0xf5   : > { %v891_v28 = vmul.f32 %v6000_v56, %v890_v34  ;;  %v908_v38 = vmul.f32 %v6049_v57, %v907_v5  ;;  %672 = vadd.xlane.f32.xlu2 %v6070_v18  ;;  %v1710_v48 = vpack.c.bf16 %v1646_v6, %v1646_v6  ;;  %v1711_v19 = vpack.c.bf16 %v1647_v3, %v1647_v3  ;;  %v5057_v5 = vld [vmem:[%s5754_s10 + $0xf8] sm:$0xff]   ;;  %v6126_v6 = vpop.xlane.xlu0 %574 }
  0xf6   : > { %8385 = vst [vmem:[#allocation22_spill] sm:$0xff] %v6053_v29  ;;  %v748_v41 = vadd.f32 %v5982_v50, %v747_v8  ;;  %v918_v7 = vmul.f32 %v6055_v63, %v917_v10  ;;  %v905_v14 = vsel %vm6077_vm0, %v5996_v0, %v901_v25  ;;  %vm768_vm3 = vcmp.gt.f32.partialorder %v5976_v47, 0.0  ;;  %v5034_v8 = vld [vmem:[%s5754_s10 + $0x40] sm:$0xff]  }
  0xf7   : > { %v895_v61 = vsel %vm6082_vm1, %v6000_v56, %v891_v28  ;;  %5202 = vrsqrt.f32 %v6088_v44  ;;  %v909_v43 = vmul.f32 0.5, %v908_v38  ;;  %v1918_v53 = vunpack.c.l.b16 %v1710_v48  ;;  %v6146_v48 = vpop.xlane.xlu1 %576  ;;  %v5035_v38 = vld [vmem:[%s5754_s10 + $0x48] sm:$0xff]  }
  0xf8   : > { %5204 = vrsqrt.f32 %v6093_v36  ;;  %v749_v51 = vadd.f32 %v5980_v49, %v748_v41  ;;  %v919_v52 = vmul.f32 0.5, %v918_v7  ;;  %v1919_v40 = vunpack.c.l.b16 %v1711_v19 }
  0xf9   : > { %v1473_v54 = vsel %vm769_vm2, %v905_v14, 0.0  ;;  %v1472_v0 = vsel %vm768_vm3, %v895_v61, 0.0  ;;  %v910_v55 = vsub.f32 1.5, %v909_v43  ;;  %vm912_vm4 = vweird.f32 %v6027_v20 }
  0xfa   : > { %v750_v47 = vadd.f32 %v6020_v30, %v749_v51  ;;  %v1585_v56 = vmul.f32 %v5799_v11, %v1473_v54  ;;  %v1584_v59 = vmul.f32 %v5801_v12, %v1472_v0  ;;  %v920_v1 = vsub.f32 1.5, %v919_v52 }
  0xfb   : > { %v6111_v34 = vpack.c.b16 %v1919_v40, %v1918_v53  ;;  %vm913_vm5 = vweird.f32 %v6049_v57  ;;  %vm922_vm6 = vweird.f32 %v6031_v42  ;;  %vm923_vm7 = vweird.f32 %v6055_v63 }
  0xfc   : > { %v911_v11 = vmul.f32 %v6049_v57, %v910_v55  ;;  %v751_v10 = vadd.f32 %v6029_v39, %v750_v47  ;;  %vm6128_vm8 = vmor %vm912_vm4, %vm913_vm5  ;;  %v921_v25 = vmul.f32 %v6055_v63, %v920_v1  ;;  %v1648_v28 = vmul.f32 %v1584_v59, %v5942_v58 }
  0xfd   : > { %v6107_v9 = vpop.eup %5202  ;;  %8390 = vst [vmem:[#allocation23_spill] sm:$0xff] %v6111_v34  ;;  %v1649_v37 = vmul.f32 %v1585_v56, %v5942_v58  ;;  %vm6137_vm9 = vmor %vm922_vm6, %vm923_vm7  ;;  %v6141_v41 = vunpack.c.l.bf16 %v5057_v5  ;;  %v6143_v7 = vunpack.c.l.bf16 %v5034_v8  ;;  %vm770_vm10 = vcmp.gt.f32.partialorder %v6027_v20, 0.0 }
  0xfe   : > { %v6113_v4 = vpop.eup %5204  ;;  %v927_v12 = vmul.f32 %v6107_v9, %v6088_v44  ;;  %5206 = vrsqrt.f32 %v6126_v6  ;;  %v6149_v19 = vunpack.c.h.bf16 %v5057_v5  ;;  %v915_v14 = vsel %vm6128_vm8, %v6049_v57, %v911_v11 }
  0xff   : > { %v937_v27 = vmul.f32 %v6113_v4, %v6093_v36  ;;  %vm771_vm11 = vcmp.gt.f32.partialorder %v6031_v42, 0.0  ;;  %v752_v43 = vadd.f32 %v6072_v23, %v751_v10  ;;  %674 = vadd.xlane.f32.xlu0 %v6141_v41  ;;  %582 = vadd.xlane.f32.xlu2 %v6143_v7  ;;  %v925_v51 = vsel %vm6137_vm9, %v6055_v63, %v921_v25 }
 0x100   : > { %v928_v61 = vmul.f32 %v6107_v9, %v927_v12  ;;  %v1712_v53 = vpack.c.bf16 %v1648_v28, %v1648_v28  ;;  %v1713_v40 = vpack.c.bf16 %v1649_v37, %v1649_v37  ;;  %676 = vadd.xlane.f32.xlu1 %v6149_v19  ;;  %5208 = vrsqrt.f32 %v6146_v48 }
 0x101   : > { %v938_v52 = vmul.f32 %v6113_v4, %v937_v27  ;;  %v1474_v42 = vsel %vm770_vm10, %v915_v14, 0.0  ;;  %v1475_v57 = vsel %vm771_vm11, %v925_v51, 0.0  ;;  %v753_v0 = vadd.f32 %v6070_v18, %v752_v43  ;;  %v6200_v43 = vpop.xlane.xlu2 %578 }
 0x102   : > { %v929_v54 = vmul.f32 0.5, %v928_v61  ;;  %v6168_v55 = vunpack.c.h.bf16 %v5034_v8  ;;  %v1920_v56 = vunpack.c.l.b16 %v1712_v53  ;;  %v1921_v59 = vunpack.c.l.b16 %v1713_v40 }
 0x103   : > { %v939_v63 = vmul.f32 0.5, %v938_v52  ;;  %v1586_v1 = vmul.f32 %v5803_v13, %v1474_v42  ;;  %v1587_v5 = vmul.f32 %v5809_v15, %v1475_v57  ;;  %v754_v10 = vadd.f32 %v6141_v41, %v753_v0 }
 0x104   : > { %2007 = vmatmul.bf16.gmra.mxu0 %v6053_v29  ;;  %v6170_v47 = vpop.eup %5206  ;;  %v930_v12 = vsub.f32 1.5, %v929_v54  ;;  %v6180_v3 = vpack.c.b16 %v1921_v59, %v1920_v56  ;;  %vm932_vm12 = vweird.f32 %v6088_v44  ;;  %vm933_vm13 = vweird.f32 %v6107_v9 }
 0x105   : > { %v947_v20 = vmul.f32 %v6170_v47, %v6126_v6  ;;  %v940_v8 = vsub.f32 1.5, %v939_v63  ;;  %v1650_v13 = vmul.f32 %v1586_v1, %v5942_v58  ;;  %vm942_vm14 = vweird.f32 %v6093_v36  ;;  %vm6196_vm0 = vmor %vm932_vm12, %vm933_vm13  ;;  %v6216_v63 = vpop.xlane.xlu0 %580 }
 0x106   : > { %v6174_v11 = vpop.eup %5208  ;;  %8395 = vst [vmem:[#allocation24_spill] sm:$0xff] %v6180_v3  ;;  %vm943_vm15 = vweird.f32 %v6113_v4  ;;  %v1651_v25 = vmul.f32 %v1587_v5, %v5942_v58  ;;  %v931_v27 = vmul.f32 %v6107_v9, %v930_v12  ;;  %v755_v37 = vadd.f32 %v6149_v19, %v754_v10 }
 0x107   : > { %584 = vadd.xlane.f32.xlu0 %v6168_v55  ;;  %v957_v15 = vmul.f32 %v6174_v11, %v6146_v48  ;;  %v948_v28 = vmul.f32 %v6170_v47, %v947_v20  ;;  %v941_v14 = vmul.f32 %v6113_v4, %v940_v8  ;;  %vm6202_vm1 = vmor %vm942_vm14, %vm943_vm15  ;;  %vm772_vm2 = vcmp.gt.f32.partialorder %v6088_v44, 0.0 }
 0x108   : > { %v1714_v52 = vpack.c.bf16 %v1650_v13, %v1650_v13  ;;  %v1715_v40 = vpack.c.bf16 %v1651_v25, %v1651_v25  ;;  %v6208_v42 = vunpack.c.h.bf16 %v5035_v38  ;;  %v6210_v57 = vunpack.c.l.bf16 %v5035_v38 }
 0x109   : > { %v958_v53 = vmul.f32 %v6174_v11, %v957_v15  ;;  %v935_v54 = vsel %vm6196_vm0, %v6107_v9, %v931_v27  ;;  %v949_v0 = vmul.f32 0.5, %v948_v28  ;;  %5210 = vrsqrt.f32 %v6200_v43  ;;  %v1832_v28 = vld [vmem:[%s5762_s14 + $0x1f0] sm:$0xff]  ;;  %v6273_v38 = vpop.xlane.xlu2 %648 }
 0x10a   : > { %v756_v56 = vrot.slane %v755_v37, 4  ;;  %vm773_vm3 = vcmp.gt.f32.partialorder %v6093_v36, 0.0  ;;  %v945_v44 = vsel %vm6202_vm1, %v6113_v4, %v941_v14  ;;  %588 = vadd.xlane.f32.xlu2 %v6208_v42  ;;  %586 = vadd.xlane.f32.xlu1 %v6210_v57  ;;  %v1476_v59 = vsel %vm772_vm2, %v935_v54, 0.0 }
 0x10b   : > { %v959_v1 = vmul.f32 0.5, %v958_v53  ;;  %v1922_v5 = vunpack.c.l.b16 %v1714_v52  ;;  %5212 = vrsqrt.f32 %v6216_v63  ;;  %v1477_v9 = vsel %vm773_vm3, %v945_v44, 0.0  ;;  %v1828_v44 = vld [vmem:[%s5762_s14 + $0x1d0] sm:$0xff] }
 0x10c   : > { %v950_v12 = vsub.f32 1.5, %v949_v0  ;;  %v1923_v20 = vunpack.c.l.b16 %v1715_v40  ;;  %v757_v10 = vadd.f32 %v756_v56, %v755_v37  ;;  %v1588_v8 = vmul.f32 %v5811_v16, %v1476_v59  ;;  %v1833_v37 = vld [vmem:[%s5762_s14 + $0x1f8] sm:$0xff]  ;;  %v1830_v0 = vld [vmem:[%s5762_s14 + $0x1e0] sm:$0xff]  ;;  %v1831_v56 = vld [vmem:[%s5762_s14 + $0x1e8] sm:$0xff] }
 0x10d   : > { %vm952_vm4 = vweird.f32 %v6126_v6  ;;  %vm953_vm5 = vweird.f32 %v6170_v47  ;;  %v1589_v4 = vmul.f32 %v5813_v17, %v1477_v9  ;;  %v960_v13 = vsub.f32 1.5, %v959_v1 }
 0x10e   : > { %vm962_vm6 = vweird.f32 %v6146_v48  ;;  %v951_v15 = vmul.f32 %v6170_v47, %v950_v12  ;;  %v6233_v25 = vpack.c.b16 %v1923_v20, %v1922_v5  ;;  %v758_v27 = vrot.slane %v757_v10, 2  ;;  %vm6240_vm8 = vmor %vm952_vm4, %vm953_vm5 }
 0x10f   : > { %v6225_v36 = vpop.eup %5210  ;;  %vm963_vm7 = vweird.f32 %v6174_v11  ;;  %v1896_v14 = vpack.c.bf16 %v1832_v28, %v1832_v28  ;;  %v1897_v61 = vpack.c.bf16 %v1833_v37, %v1833_v37  ;;  %vm774_vm9 = vcmp.gt.f32.partialorder %v6126_v6, 0.0  ;;  %v1829_v28 = vld [vmem:[%s5762_s14 + $0x1d8] sm:$0xff] }
 0x110   : > { %8400 = vst [vmem:[#allocation25_spill] sm:$0xff] %v6233_v25  ;;  %v967_v17 = vmul.f32 %v6225_v36, %v6200_v43  ;;  %v1652_v51 = vmul.f32 %v1588_v8, %v5942_v58  ;;  %v961_v52 = vmul.f32 %v6174_v11, %v960_v13  ;;  %v1653_v53 = vmul.f32 %v1589_v4, %v5942_v58  ;;  %vm6258_vm10 = vmor %vm962_vm6, %vm963_vm7 }
 0x111   : > { %v6237_v16 = vpop.eup %5212  ;;  %v2411_v40 = vunpack.c.l.b16 %v1896_v14  ;;  %v2412_v54 = vunpack.c.l.b16 %v1897_v61  ;;  %v955_v1 = vsel %vm6240_vm8, %v6170_v47, %v951_v15  ;;  %v759_v9 = vadd.f32 %v758_v27, %v757_v10  ;;  %v1826_v14 = vld [vmem:[%s5762_s14 + $0x1c0] sm:$0xff]  ;;  %v1827_v10 = vld [vmem:[%s5762_s14 + $0x1c8] sm:$0xff]  ;;  %v5036_v27 = vld [vmem:[%s5754_s10 + $0x50] sm:$0xff]  }
 0x112   : > { %v977_v5 = vmul.f32 %v6237_v16, %v6216_v63  ;;  %v1894_v12 = vpack.c.bf16 %v1830_v0, %v1830_v0  ;;  %v968_v20 = vmul.f32 %v6225_v36, %v967_v17  ;;  %v1895_v4 = vpack.c.bf16 %v1831_v56, %v1831_v56 }
 0x113   : > { %v2420_v8 = vpack.c.b16 %v2412_v54, %v2411_v40  ;;  %v1892_v13 = vpack.c.bf16 %v1828_v44, %v1828_v44  ;;  %vm775_vm11 = vcmp.gt.f32.partialorder %v6146_v48, 0.0  ;;  %v965_v37 = vsel %vm6258_vm10, %v6174_v11, %v961_v52  ;;  %v6281_v54 = vpop.xlane.xlu1 %646 }
 0x114   : > { %2012 = vmatmul.bf16.gmra.mxu0 %v6111_v34  ;;  %v1716_v47 = vpack.c.bf16 %v1652_v51, %v1652_v51  ;;  %v1717_v15 = vpack.c.bf16 %v1653_v53, %v1653_v53  ;;  %v1478_v17 = vsel %vm774_vm9, %v955_v1, 0.0  ;;  %v978_v61 = vmul.f32 %v6237_v16, %v977_v5 }
 0x115   : > { %2429 = vmatpush.bf16.msrb.mxu0 %v2420_v8  ;;  %v760_v40 = vrot.slane %v759_v9, 1  ;;  %v2409_v0 = vunpack.c.l.b16 %v1894_v12  ;;  %v969_v56 = vmul.f32 0.5, %v968_v20  ;;  %v2410_v44 = vunpack.c.l.b16 %v1895_v4 }
 0x116   : > { %v1893_v11 = vpack.c.bf16 %v1829_v28, %v1829_v28  ;;  %v2407_v51 = vunpack.c.l.b16 %v1892_v13  ;;  %5214 = vrsqrt.f32 %v6273_v38  ;;  %v1890_v52 = vpack.c.bf16 %v1826_v14, %v1826_v14 }
 0x117   : > { %v1891_v53 = vpack.c.bf16 %v1827_v10, %v1827_v10  ;;  %v6284_v59 = vunpack.c.h.bf16 %v5036_v27  ;;  %5216 = vrsqrt.f32 %v6281_v54  ;;  %v2419_v6 = vpack.c.b16 %v2410_v44, %v2409_v0 }
 0x118   : > { %v2408_v1 = vunpack.c.l.b16 %v1893_v11  ;;  %v6287_v8 = vunpack.c.l.bf16 %v5036_v27  ;;  %v1479_v5 = vsel %vm775_vm11, %v965_v37, 0.0  ;;  %v6291_v12 = vadd.f32 %v760_v40, %v759_v9 }
 0x119   : > { %v1924_v20 = vunpack.c.l.b16 %v1716_v47  ;;  %v1925_v4 = vunpack.c.l.b16 %v1717_v15  ;;  %592 = vadd.xlane.f32.xlu1 %v6284_v59  ;;  %v979_v13 = vmul.f32 0.5, %v978_v61  ;;  %2430 = vmatpush.bf16.msrb.mxu0 %v2419_v6  ;;  %v2405_v14 = vunpack.c.l.b16 %v1890_v52  ;;  %v1824_v15 = vld [vmem:[%s5762_s14 + $0x1b0] sm:$0xff]  ;;  %v1825_v61 = vld [vmem:[%s5762_s14 + $0x1b8] sm:$0xff]  ;;  %v1823_v6 = vld [vmem:[%s5762_s14 + $0x1a8] sm:$0xff] }
 0x11a   : > { %v2418_v28 = vpack.c.b16 %v2408_v1, %v2407_v51  ;;  %v2406_v10 = vunpack.c.l.b16 %v1891_v53  ;;  %590 = vadd.xlane.f32.xlu0 %v6287_v8  ;;  %v1590_v27 = vmul.f32 %v5824_v22, %v1478_v17  ;;  %v1591_v48 = vmul.f32 %v5822_v21, %v1479_v5  ;;  %v1822_v53 = vld [vmem:[%s5762_s14 + $0x1a0] sm:$0xff]  ;;  %v1820_v1 = vld [vmem:[%s5762_s14 + $0x190] sm:$0xff] }
 0x11b   : > { %v970_v37 = vsub.f32 1.5, %v969_v56  ;;  %vm972_vm12 = vweird.f32 %v6200_v43  ;;  %vm973_vm13 = vweird.f32 %v6225_v36  ;;  %5218 = vrsqrt.f32 %v6291_v12 }
 0x11c   : > { %v6297_v9 = vpop.eup %5214  ;;  %v6302_v47 = vpack.c.b16 %v1925_v4, %v1924_v20  ;;  %v980_v22 = vsub.f32 1.5, %v979_v13  ;;  %v2417_v21 = vpack.c.b16 %v2406_v10, %v2405_v14  ;;  %v1888_v17 = vpack.c.bf16 %v1824_v15, %v1824_v15  ;;  %vm6321_vm0 = vmor %vm972_vm12, %vm973_vm13  ;;  %v1821_v13 = vld [vmem:[%s5762_s14 + $0x198] sm:$0xff] }
 0x11d   : > { %v6306_v40 = vpop.eup %5216  ;;  %2431 = vmatpush.bf16.msrb.mxu0 %v2418_v28  ;;  %v1889_v0 = vpack.c.bf16 %v1825_v61, %v1825_v61  ;;  %vm982_vm14 = vweird.f32 %v6216_v63  ;;  %vm983_vm15 = vweird.f32 %v6237_v16  ;;  %v1654_v56 = vmul.f32 %v1590_v27, %v5942_v58 }
 0x11e   : > { %8405 = vst [vmem:[#allocation26_spill] sm:$0xff] %v6302_v47  ;;  %v971_v44 = vmul.f32 %v6225_v36, %v970_v37  ;;  %v1655_v11 = vmul.f32 %v1591_v48, %v5942_v58  ;;  %v2403_v51 = vunpack.c.l.b16 %v1888_v17  ;;  %v1317_v20 = vmul.f32 %v6297_v9, %v6273_v38  ;;  %vm6339_vm3 = vmor %vm982_vm14, %vm983_vm15  ;;  %v6346_v17 = vpop.xlane.xlu1 %652 }
 0x11f   : > { %v2404_v52 = vunpack.c.l.b16 %v1889_v0  ;;  %v1307_v4 = vmul.f32 %v6306_v40, %v6281_v54  ;;  %vm776_vm1 = vcmp.gt.f32.partialorder %v6200_v43, 0.0  ;;  %v981_v28 = vmul.f32 %v6237_v16, %v980_v22 }
 0x120   : > { %vm777_vm2 = vcmp.gt.f32.partialorder %v6216_v63, 0.0  ;;  %v1886_v48 = vpack.c.bf16 %v1822_v53, %v1822_v53  ;;  %v1887_v37 = vpack.c.bf16 %v1823_v6, %v1823_v6  ;;  %v1884_v15 = vpack.c.bf16 %v1820_v1, %v1820_v1 }
 0x121   : > { %2432 = vmatpush.bf16.msrb.mxu0 %v2417_v21  ;;  %v2416_v14 = vpack.c.b16 %v2404_v52, %v2403_v51  ;;  %v6332_v10 = vpop.eup %5218  ;;  %v975_v61 = vsel %vm6321_vm0, %v6225_v36, %v971_v44  ;;  %v1718_v22 = vpack.c.bf16 %v1654_v56, %v1654_v56  ;;  %v1719_v21 = vpack.c.bf16 %v1655_v11, %v1655_v11 }
 0x122   : > { %v1885_v0 = vpack.c.bf16 %v1821_v13, %v1821_v13  ;;  %v1318_v51 = vmul.f32 %v6297_v9, %v1317_v20  ;;  %v1308_v52 = vmul.f32 %v6306_v40, %v1307_v4  ;;  %v2402_v53 = vunpack.c.l.b16 %v1887_v37 }
 0x123   : > { %v985_v6 = vsel %vm6339_vm3, %v6237_v16, %v981_v28  ;;  %v1565_v36 = vmul.f32 %v6332_v10, %v6291_v12  ;;  %v2399_v56 = vunpack.c.l.b16 %v1884_v15  ;;  %5220 = vrsqrt.f32 %v6346_v17  ;;  %v1818_v28 = vld [vmem:[%s5762_s14 + $0x180] sm:$0xff] }
 0x124   : > { %2017 = vmatmul.bf16.gmra.mxu0 %v6180_v3  ;;  %v2400_v44 = vunpack.c.l.b16 %v1885_v0  ;;  %v1926_v1 = vunpack.c.l.b16 %v1718_v22  ;;  %v1927_v5 = vunpack.c.l.b16 %v1719_v21  ;;  %v1480_v20 = vsel %vm776_vm1, %v975_v61, 0.0 }
 0x125   : > { %2433 = vmatpush.bf16.msrb.mxu0 %v2416_v14  ;;  %v1481_v4 = vsel %vm777_vm2, %v985_v6, 0.0  ;;  %v1319_v16 = vmul.f32 0.5, %v1318_v51  ;;  %v1309_v13 = vmul.f32 0.5, %v1308_v52  ;;  %v1819_v14 = vld [vmem:[%s5762_s14 + $0x188] sm:$0xff]  ;;  %v1566_v27 = vmul.f32 %v6332_v10, %v1565_v36  ;;  %v5037_v52 = vld [vmem:[%s5754_s10 + $0x58] sm:$0xff]  }
 0x126   : > { %v1883_v37 = vpack.c.bf16 %v1819_v14, %v1819_v14  ;;  %v6366_v15 = vpack.c.b16 %v1927_v5, %v1926_v1  ;;  %v1592_v63 = vmul.f32 %v5827_v24, %v1480_v20  ;;  %v1593_v61 = vmul.f32 %v5833_v26, %v1481_v4  ;;  %v5038_v20 = vld [vmem:[%s5754_s10 + $0x60] sm:$0xff]  }
 0x127   : > { %v1320_v0 = vsub.f32 1.5, %v1319_v16  ;;  %v1310_v51 = vsub.f32 1.5, %v1309_v13  ;;  %v1567_v6 = vmul.f32 0.5, %v1566_v27  ;;  %vm1322_vm4 = vweird.f32 %v6273_v38 }
 0x128   : > { %8410 = vst [vmem:[#allocation27_spill] sm:$0xff] %v6366_v15  ;;  %v2398_v21 = vunpack.c.l.b16 %v1883_v37  ;;  %vm1323_vm5 = vweird.f32 %v6297_v9  ;;  %vm1312_vm6 = vweird.f32 %v6281_v54  ;;  %vm1313_vm7 = vweird.f32 %v6306_v40 }
 0x129   : > { %v6368_v43 = vpop.eup %5220  ;;  %v1568_v1 = vsub.f32 1.5, %v1567_v6  ;;  %v1321_v5 = vmul.f32 %v6297_v9, %v1320_v0  ;;  %vm6392_vm8 = vmor %vm1322_vm4, %vm1323_vm5  ;;  %v1311_v4 = vmul.f32 %v6306_v40, %v1310_v51  ;;  %v1657_v16 = vmul.f32 %v1593_v61, %v5942_v58 }
 0x12a   : > { %v1337_v24 = vmul.f32 %v6368_v43, %v6346_v17  ;;  %vm6398_vm9 = vmor %vm1312_vm6, %vm1313_vm7  ;;  %vm1570_vm10 = vweird.f32 %v6291_v12  ;;  %vm1571_vm11 = vweird.f32 %v6332_v10  ;;  %vm811_vm12 = vcmp.gt.f32.partialorder %v6273_v38, 0.0 }
 0x12b   : > { %vm810_vm13 = vcmp.gt.f32.partialorder %v6281_v54, 0.0  ;;  %v1325_v37 = vsel %vm6392_vm8, %v6297_v9, %v1321_v5  ;;  %vm6421_vm14 = vmor %vm1570_vm10, %vm1571_vm11  ;;  %vm1533_vm15 = vcmp.gt.f32.partialorder %v6291_v12, 0.0  ;;  %vm1342_vm0 = vweird.f32 %v6346_v17 }
 0x12c   : > { %v1338_v14 = vmul.f32 %v6368_v43, %v1337_v24  ;;  %v1515_v0 = vsel %vm811_vm12, %v1325_v37, 0.0  ;;  %vm1343_vm1 = vweird.f32 %v6368_v43  ;;  %vm813_vm6 = vcmp.gt.f32.partialorder %v6346_v17, 0.0 }
 0x12d   : > { %v1627_v24 = vmul.f32 %v5851_v45, %v1515_v0  ;;  %v6448_v45 = vunpack.c.l.bf16 %v5038_v20  ;;  %vm6461_vm4 = vmor %vm1342_vm0, %vm1343_vm1 }
 0x12e   : > { %v1339_v61 = vmul.f32 0.5, %v1338_v14 }
 0x12f   : > { %598 = vadd.xlane.f32.xlu1 %v6448_v45 }
 0x134   : > { %2022 = vmatmul.bf16.gmra.mxu0 %v6233_v25  ;;  %v2401_v25 = vunpack.c.l.b16 %v1886_v48  ;;  %v2414_v48 = vpack.c.b16 %v2400_v44, %v2399_v56  ;;  %v6375_v56 = vunpack.c.l.bf16 %v5037_v52  ;;  %v6377_v44 = vunpack.c.h.bf16 %v5037_v52 }
 0x136   : > { %v2415_v11 = vpack.c.b16 %v2402_v53, %v2401_v25  ;;  %v1882_v25 = vpack.c.bf16 %v1818_v28, %v1818_v28  ;;  %594 = vadd.xlane.f32.xlu2 %v6375_v56  ;;  %596 = vadd.xlane.f32.xlu0 %v6377_v44  ;;  %v699_v28 = vadd.f32 %v6168_v55, %v6143_v7 }
 0x138   : > { %2434 = vmatpush.bf16.msrb.mxu0 %v2415_v11  ;;  %v2397_v22 = vunpack.c.l.b16 %v1882_v25  ;;  %v1656_v11 = vmul.f32 %v1592_v63, %v5942_v58  ;;  %v1569_v25 = vmul.f32 %v6332_v10, %v1568_v1  ;;  %v700_v54 = vadd.f32 %v6210_v57, %v699_v28 }
 0x13a   : > { %v2413_v36 = vpack.c.b16 %v2398_v21, %v2397_v22  ;;  %v1720_v27 = vpack.c.bf16 %v1656_v11, %v1656_v11  ;;  %v1315_v22 = vsel %vm6398_vm9, %v6306_v40, %v1311_v4  ;;  %v1721_v21 = vpack.c.bf16 %v1657_v16, %v1657_v16 }
 0x13b   : > { %v1514_v51 = vsel %vm810_vm13, %v1315_v22, 0.0  ;;  %v1573_v40 = vsel %vm6421_vm14, %v6332_v10, %v1569_v25  ;;  %v1340_v11 = vsub.f32 1.5, %v1339_v61  ;;  %v701_v12 = vadd.f32 %v6208_v42, %v700_v54 }
 0x13c   : > { %2435 = vmatpush.bf16.msrb.mxu0 %v2414_v48  ;;  %v6410_v48 = vpop.xlane.xlu2 %654  ;;  %v1928_v52 = vunpack.c.l.b16 %v1720_v27  ;;  %v1929_v6 = vunpack.c.l.b16 %v1721_v21  ;;  %v6436_v1 = vsel %vm1533_vm15, %v1573_v40, 0.0  ;;  %v6446_v16 = vunpack.c.h.bf16 %v5038_v20 }
 0x13d   : > { %v1341_v13 = vmul.f32 %v6368_v43, %v1340_v11  ;;  %v1691_v14 = vmul.f32 %v1627_v24, %v6436_v1  ;;  %v702_v25 = vadd.f32 %v6287_v8, %v701_v12  ;;  %vm1352_vm8 = vweird.f32 %v6410_v48 }
 0x13e   : > { %v6444_v10 = vpack.c.b16 %v1929_v6, %v1928_v52  ;;  %600 = vadd.xlane.f32.xlu2 %v6446_v16  ;;  %vm814_vm14 = vcmp.gt.f32.partialorder %v6410_v48, 0.0 }
 0x13f   : > { %v1345_v0 = vsel %vm6461_vm4, %v6368_v43, %v1341_v13 }
 0x140   : > { %2436 = vmatpush.bf16.msrb.mxu0 %v2413_v36  ;;  %v6432_v36 = vpop.xlane.xlu1 %658  ;;  %8417 = vst [vmem:[#allocation28_spill] sm:$0xff] %v6444_v10  ;;  %v1517_v6 = vsel %vm813_vm6, %v1345_v0, 0.0 }
 0x141   : > { %vm1372_vm1 = vweird.f32 %v6432_v36 }
 0x144   : > { %2027 = vmatmul.bf16.gmra.mxu0 %v6302_v47  ;;  %v6350_v47 = vpop.xlane.xlu0 %650  ;;  %v6469_v22 = vpop.xlane.xlu2 %660 }
 0x145   : > { %5222 = vrsqrt.f32 %v6350_v47  ;;  %vm1332_vm2 = vweird.f32 %v6350_v47  ;;  %vm812_vm7 = vcmp.gt.f32.partialorder %v6350_v47, 0.0  ;;  %vm1382_vm0 = vweird.f32 %v6469_v22 }
 0x146   : > { %5224 = vrsqrt.f32 %v6410_v48 }
 0x14b   : > { %v6373_v53 = vpop.eup %5222 }
 0x14c   : > { %v1327_v26 = vmul.f32 %v6373_v53, %v6350_v47  ;;  %v6419_v63 = vpop.xlane.xlu0 %656  ;;  %v6441_v4 = vpop.eup %5224  ;;  %vm1333_vm3 = vweird.f32 %v6373_v53  ;;  %v703_v47 = vadd.f32 %v6284_v59, %v702_v25 }
 0x14d   : > { %5226 = vrsqrt.f32 %v6419_v63  ;;  %v1347_v37 = vmul.f32 %v6441_v4, %v6410_v48  ;;  %vm6472_vm5 = vmor %vm1332_vm2, %vm1333_vm3  ;;  %vm1353_vm9 = vweird.f32 %v6441_v4  ;;  %vm1362_vm10 = vweird.f32 %v6419_v63 }
 0x14e   : > { %v1328_v58 = vmul.f32 %v6373_v53, %v1327_v26  ;;  %v1626_v26 = vmul.f32 %v5853_v46, %v1514_v51  ;;  %5228 = vrsqrt.f32 %v6432_v36  ;;  %v704_v11 = vadd.f32 %v6375_v56, %v703_v47  ;;  %vm6541_vm12 = vmor %vm1352_vm8, %vm1353_vm9 }
 0x14f   : > { %5230 = vrsqrt.f32 %v6469_v22  ;;  %v1348_v17 = vmul.f32 %v6441_v4, %v1347_v37  ;;  %vm815_vm15 = vcmp.gt.f32.partialorder %v6419_v63, 0.0 }
 0x150   : > { %v1329_v9 = vmul.f32 0.5, %v1328_v58  ;;  %v1690_v28 = vmul.f32 %v1626_v26, %v6436_v1  ;;  %v6483_v61 = vpop.xlane.xlu1 %664  ;;  %v705_v21 = vadd.f32 %v6377_v44, %v704_v11 }
 0x151   : > { %v1349_v26 = vmul.f32 0.5, %v1348_v17 }
 0x152   : > { %v1330_v5 = vsub.f32 1.5, %v1329_v9  ;;  %v1754_v51 = vpack.c.bf16 %v1690_v28, %v1690_v28  ;;  %v1755_v9 = vpack.c.bf16 %v1691_v14, %v1691_v14  ;;  %v1629_v28 = vmul.f32 %v5866_v32, %v1517_v6  ;;  %v5039_v32 = vld [vmem:[%s5754_s10 + $0x68] sm:$0xff]  }
 0x153   : > { %v6450_v46 = vpop.eup %5226  ;;  %v1350_v25 = vsub.f32 1.5, %v1349_v26  ;;  %v706_v11 = vadd.f32 %v6448_v45, %v705_v21 }
 0x154   : > { %2032 = vmatmul.bf16.gmra.mxu0 %v6366_v15  ;;  %v1331_v27 = vmul.f32 %v6373_v53, %v1330_v5  ;;  %v1357_v38 = vmul.f32 %v6450_v46, %v6419_v63  ;;  %v6497_v24 = vpop.eup %5228  ;;  %v2349_v5 = vunpack.c.l.b16 %v1754_v51  ;;  %v1693_v47 = vmul.f32 %v1629_v28, %v6436_v1 }
 0x155   : > { %v6478_v54 = vpop.xlane.xlu0 %662  ;;  %v6500_v12 = vpop.eup %5230  ;;  %vm1363_vm11 = vweird.f32 %v6450_v46  ;;  %vm1373_vm2 = vweird.f32 %v6497_v24 }
 0x156   : > { %v1335_v40 = vsel %vm6472_vm5, %v6373_v53, %v1331_v27  ;;  %5232 = vrsqrt.f32 %v6478_v54  ;;  %v1358_v52 = vmul.f32 %v6450_v46, %v1357_v38  ;;  %v2350_v53 = vunpack.c.l.b16 %v1755_v9  ;;  %vm6549_vm13 = vmor %vm1362_vm10, %vm1363_vm11 }
 0x157   : > { %5234 = vrsqrt.f32 %v6483_v61  ;;  %v1516_v43 = vsel %vm812_vm7, %v1335_v40, 0.0  ;;  %v1367_v27 = vmul.f32 %v6497_v24, %v6432_v36  ;;  %v1377_v0 = vmul.f32 %v6500_v12, %v6469_v22  ;;  %vm6590_vm6 = vmor %vm1372_vm1, %vm1373_vm2 }
 0x158   : > { %v1359_v20 = vmul.f32 0.5, %v1358_v52  ;;  %v1628_v14 = vmul.f32 %v5868_v33, %v1516_v43  ;;  %v6514_v38 = vpack.c.b16 %v2350_v53, %v2349_v5  ;;  %v6521_v9 = vunpack.c.h.bf16 %v5039_v32 }
 0x159   : > { %v6523_v40 = vunpack.c.l.bf16 %v5039_v32  ;;  %v1368_v6 = vmul.f32 %v6497_v24, %v1367_v27  ;;  %v1351_v43 = vmul.f32 %v6441_v4, %v1350_v25  ;;  %v1378_v26 = vmul.f32 %v6500_v12, %v1377_v0 }
 0x15a   : > { %8422 = vst [vmem:[#allocation29_spill] sm:$0xff] %v6514_v38  ;;  %v1360_v51 = vsub.f32 1.5, %v1359_v20  ;;  %v1692_v17 = vmul.f32 %v1628_v14, %v6436_v1  ;;  %604 = vadd.xlane.f32.xlu1 %v6521_v9  ;;  %v1757_v25 = vpack.c.bf16 %v1693_v47, %v1693_v47  ;;  %vm1383_vm3 = vweird.f32 %v6500_v12 }
 0x15b   : > { %602 = vadd.xlane.f32.xlu0 %v6523_v40  ;;  %v1369_v32 = vmul.f32 0.5, %v1368_v6  ;;  %vm1392_vm4 = vweird.f32 %v6478_v54  ;;  %vm1402_vm7 = vweird.f32 %v6483_v61  ;;  %vm6604_vm9 = vmor %vm1382_vm0, %vm1383_vm3  ;;  %vm816_vm11 = vcmp.gt.f32.partialorder %v6432_v36, 0.0 }
 0x15c   : > { %v6502_v13 = vpop.eup %5232  ;;  %v1361_v53 = vmul.f32 %v6450_v46, %v1360_v51  ;;  %v1756_v27 = vpack.c.bf16 %v1692_v17, %v1692_v17  ;;  %v1355_v51 = vsel %vm6541_vm12, %v6441_v4, %v1351_v43  ;;  %v2352_v6 = vunpack.c.l.b16 %v1757_v25 }
 0x15d   : > { %v6506_v58 = vpop.eup %5234  ;;  %v1387_v33 = vmul.f32 %v6502_v13, %v6478_v54  ;;  %v1518_v43 = vsel %vm814_vm14, %v1355_v51, 0.0  ;;  %vm1393_vm5 = vweird.f32 %v6502_v13  ;;  %v5040_v51 = vld [vmem:[%s5754_s10 + $0x70] sm:$0xff]   ;;  %vm819_vm14 = vcmp.gt.f32.partialorder %v6483_v61, 0.0 }
 0x15e   : > { %v1397_v52 = vmul.f32 %v6506_v58, %v6483_v61  ;;  %v1365_v17 = vsel %vm6549_vm13, %v6450_v46, %v1361_v53  ;;  %vm1403_vm8 = vweird.f32 %v6506_v58  ;;  %vm6618_vm10 = vmor %vm1392_vm4, %vm1393_vm5  ;;  %vm817_vm13 = vcmp.gt.f32.partialorder %v6469_v22, 0.0 }
 0x15f   : > { %v1388_v20 = vmul.f32 %v6502_v13, %v1387_v33  ;;  %v1379_v33 = vmul.f32 0.5, %v1378_v26  ;;  %v1370_v26 = vsub.f32 1.5, %v1369_v32  ;;  %vm6631_vm12 = vmor %vm1402_vm7, %vm1403_vm8  ;;  %v5041_v32 = vld [vmem:[%s5754_s10 + $0x78] sm:$0xff]  }
 0x160   : > { %v6547_v28 = vpop.xlane.xlu2 %666  ;;  %v1398_v21 = vmul.f32 %v6506_v58, %v1397_v52  ;;  %v6554_v0 = vpop.xlane.xlu0 %668  ;;  %v2351_v52 = vunpack.c.l.b16 %v1756_v27 }
 0x161   : > { %5236 = vrsqrt.f32 %v6547_v28  ;;  %v1389_v47 = vmul.f32 0.5, %v1388_v20  ;;  %v1380_v5 = vsub.f32 1.5, %v1379_v33  ;;  %v1630_v20 = vmul.f32 %v5886_v62, %v1518_v43 }
 0x162   : > { %5238 = vrsqrt.f32 %v6554_v0  ;;  %v1399_v4 = vmul.f32 0.5, %v1398_v21  ;;  %v6581_v14 = vpack.c.b16 %v2352_v6, %v2351_v52  ;;  %v1371_v25 = vmul.f32 %v6497_v24, %v1370_v26 }
 0x163   : > { %v1390_v46 = vsub.f32 1.5, %v1389_v47  ;;  %v1381_v21 = vmul.f32 %v6500_v12, %v1380_v5  ;;  %v6611_v52 = vunpack.c.l.bf16 %v5040_v51  ;;  %v6613_v6 = vunpack.c.h.bf16 %v5040_v51 }
 0x164   : > { %2037 = vmatmul.bf16.gmra.mxu0 %v6444_v10  ;;  %v707_v10 = vadd.f32 %v6446_v16, %v706_v11  ;;  %v1519_v11 = vsel %vm815_vm15, %v1365_v17, 0.0  ;;  %8427 = vst [vmem:[#allocation30_spill] sm:$0xff] %v6581_v14  ;;  %v1400_v63 = vsub.f32 1.5, %v1399_v4  ;;  %v1375_v26 = vsel %vm6590_vm6, %v6497_v24, %v1371_v25 }
 0x165   : > { %v1391_v17 = vmul.f32 %v6502_v13, %v1390_v46  ;;  %606 = vadd.xlane.f32.xlu2 %v6611_v52  ;;  %v1385_v36 = vsel %vm6604_vm9, %v6500_v12, %v1381_v21  ;;  %v1694_v24 = vmul.f32 %v1630_v20, %v6436_v1  ;;  %608 = vadd.xlane.f32.xlu0 %v6613_v6  ;;  %vm818_vm15 = vcmp.gt.f32.partialorder %v6478_v54, 0.0 }
 0x166   : > { %v708_v15 = vadd.f32 %v6523_v40, %v707_v10  ;;  %v1631_v10 = vmul.f32 %v5891_v2, %v1519_v11  ;;  %v1401_v4 = vmul.f32 %v6506_v58, %v1400_v63  ;;  %v1520_v25 = vsel %vm816_vm11, %v1375_v26, 0.0 }
 0x167   : > { %v6577_v53 = vpop.eup %5236  ;;  %v1395_v63 = vsel %vm6618_vm10, %v6502_v13, %v1391_v17  ;;  %v1521_v21 = vsel %vm817_vm13, %v1385_v36, 0.0  ;;  %v1758_v54 = vpack.c.bf16 %v1694_v24, %v1694_v24  ;;  %v1632_v13 = vmul.f32 %v5909_v35, %v1520_v25 }
 0x168   : > { %v6583_v27 = vpop.eup %5238  ;;  %v709_v2 = vadd.f32 %v6521_v9, %v708_v15  ;;  %v1407_v47 = vmul.f32 %v6577_v53, %v6547_v28  ;;  %v1695_v46 = vmul.f32 %v1631_v10, %v6436_v1  ;;  %v1405_v12 = vsel %vm6631_vm12, %v6506_v58, %v1401_v4  ;;  %v6671_v36 = vpop.xlane.xlu2 %672  ;;  %v1796_v58 = vld [vmem:[%s5762_s14 + $0xd0] sm:$0xff] }
 0x169   : > { %v1417_v43 = vmul.f32 %v6583_v27, %v6554_v0  ;;  %v1522_v51 = vsel %vm818_vm15, %v1395_v63, 0.0  ;;  %v6658_v15 = vunpack.c.l.bf16 %v5041_v32  ;;  %v1523_v17 = vsel %vm819_vm14, %v1405_v12, 0.0  ;;  %v1800_v12 = vld [vmem:[%s5762_s14 + $0xf0] sm:$0xff] }
 0x16a   : > { %v710_v5 = vadd.f32 %v6611_v52, %v709_v2  ;;  %v1408_v22 = vmul.f32 %v6577_v53, %v1407_v47  ;;  %v1759_v33 = vpack.c.bf16 %v1695_v46, %v1695_v46  ;;  %v1633_v4 = vmul.f32 %v5907_v31, %v1521_v21 }
 0x16b   : > { %v1418_v20 = vmul.f32 %v6583_v27, %v1417_v43  ;;  %8436 = vst [vmem:[#allocation31_spill] sm:$0xff] %v6658_v15  ;;  %v6666_v26 = vunpack.c.h.bf16 %v5041_v32  ;;  %610 = vadd.xlane.f32.xlu1 %v6658_v15  ;;  %v1635_v61 = vmul.f32 %v5980_v49, %v1523_v17  ;;  %v2353_v24 = vunpack.c.l.b16 %v1758_v54  ;;  %v6690_v32 = vpop.xlane.xlu1 %670 }
 0x16c   : > { %v711_v10 = vadd.f32 %v6613_v6, %v710_v5  ;;  %v1409_v47 = vmul.f32 0.5, %v1408_v22  ;;  %v1634_v5 = vmul.f32 %v5982_v50, %v1522_v51  ;;  %v2354_v31 = vunpack.c.l.b16 %v1759_v33 }
 0x16d   : > { %v1419_v43 = vmul.f32 0.5, %v1418_v20  ;;  %8437 = vst [vmem:[#allocation32_spill] sm:$0xff] %v6666_v26  ;;  %612 = vadd.xlane.f32.xlu2 %v6666_v26  ;;  %v1696_v63 = vmul.f32 %v1632_v13, %v6436_v1  ;;  %vm1412_vm0 = vweird.f32 %v6547_v28  ;;  %vm1422_vm1 = vweird.f32 %v6554_v0  ;;  %v1801_v20 = vld [vmem:[%s5762_s14 + $0xf8] sm:$0xff] }
 0x16e   : > { %v712_v11 = vadd.f32 %v6658_v15, %v711_v10  ;;  %v1410_v46 = vsub.f32 1.5, %v1409_v47  ;;  %v1697_v25 = vmul.f32 %v1633_v4, %v6436_v1  ;;  %vm1413_vm2 = vweird.f32 %v6577_v53  ;;  %v1797_v4 = vld [vmem:[%s5762_s14 + $0xd8] sm:$0xff] }
 0x16f   : > { %v1420_v50 = vsub.f32 1.5, %v1419_v43  ;;  %vm1423_vm3 = vweird.f32 %v6583_v27  ;;  %v1698_v10 = vmul.f32 %v1634_v5, %v6436_v1  ;;  %5240 = vrsqrt.f32 %v6671_v36  ;;  %vm6700_vm4 = vmor %vm1412_vm0, %vm1413_vm2 }
 0x170   : > { %v713_v22 = vadd.f32 %v6666_v26, %v712_v11  ;;  %v1864_v51 = vpack.c.bf16 %v1800_v12, %v1800_v12  ;;  %v1865_v54 = vpack.c.bf16 %v1801_v20, %v1801_v20  ;;  %v1699_v33 = vmul.f32 %v1635_v61, %v6436_v1  ;;  %vm6710_vm5 = vmor %vm1422_vm1, %vm1423_vm3 }
 0x171   : > { %v6511_v37 = vpop.f32.mrf.mxu0  ;;  %v6693_v13 = vpack.c.b16 %v2354_v31, %v2353_v24  ;;  %v1411_v17 = vmul.f32 %v6577_v53, %v1410_v46  ;;  %v1421_v43 = vmul.f32 %v6583_v27, %v1420_v50  ;;  %v1760_v24 = vpack.c.bf16 %v1696_v63, %v1696_v63 }
 0x172   : > { %v6673_v35 = vpop.xlane.xlu0 %674  ;;  %v714_v49 = vrot.slane %v713_v22, 4  ;;  %v2121_v11 = vunpack.c.l.b16 %v1864_v51  ;;  %v2122_v5 = vunpack.c.l.b16 %v1865_v54  ;;  %v1761_v31 = vpack.c.bf16 %v1697_v25, %v1697_v25  ;;  %v1798_v54 = vld [vmem:[%s5762_s14 + $0xe0] sm:$0xff] }
 0x173   : > { %8438 = vst [vmem:[#allocation33_spill] sm:$0xff] %v6693_v13  ;;  %5242 = vrsqrt.f32 %v6690_v32  ;;  %v1763_v12 = vpack.c.bf16 %v1699_v33, %v1699_v33  ;;  %vm820_vm6 = vcmp.gt.f32.partialorder %v6547_v28, 0.0  ;;  %v1415_v63 = vsel %vm6700_vm4, %v6577_v53, %v1411_v17 }
 0x174   : > { %2437 = vmatmul.bf16.vlgmr.msrb.gmra.mxu0 %v6514_v38  ;;  %v715_v47 = vadd.f32 %v714_v49, %v713_v22  ;;  %v6715_v22 = vpop.xlane.xlu2 %582  ;;  %v2130_v50 = vpack.c.b16 %v2122_v5, %v2121_v11  ;;  %v1762_v49 = vpack.c.bf16 %v1698_v10, %v1698_v10  ;;  %vm821_vm7 = vcmp.gt.f32.partialorder %v6554_v0, 0.0  ;;  %v1799_v5 = vld [vmem:[%s5762_s14 + $0xe8] sm:$0xff] }
 0x175   : > { %5244 = vrsqrt.f32 %v6715_v22  ;;  %v6724_v51 = vpop.eup %5240  ;;  %v1425_v10 = vsel %vm6710_vm5, %v6583_v27, %v1421_v43  ;;  %v2355_v33 = vunpack.c.l.b16 %v1760_v24  ;;  %v2356_v11 = vunpack.c.l.b16 %v1761_v31 }
 0x176   : > { %v716_v46 = vrot.slane %v715_v47, 2  ;;  %2139 = vmatpush.bf16.msra.mxu1 %v2130_v50  ;;  %v1524_v53 = vsel %vm820_vm6, %v1415_v63, 0.0  ;;  %v1525_v27 = vsel %vm821_vm7, %v1425_v10, 0.0  ;;  %v1437_v61 = vmul.f32 %v6724_v51, %v6671_v36 }
 0x177   : > { %v1862_v50 = vpack.c.bf16 %v1798_v54, %v1798_v54  ;;  %v1861_v63 = vpack.c.bf16 %v1797_v4, %v1797_v4  ;;  %v6750_v0 = vpack.c.b16 %v2356_v11, %v2355_v33  ;;  %v1637_v54 = vmul.f32 %v6029_v39, %v1525_v27  ;;  %v1794_v33 = vld [vmem:[%s5762_s14 + $0xc0] sm:$0xff]  ;;  %v1795_v11 = vld [vmem:[%s5762_s14 + $0xc8] sm:$0xff]  ;;  %v1792_v27 = vld [vmem:[%s5762_s14 + $0xb0] sm:$0xff] }
 0x178   : > { %v717_v25 = vadd.f32 %v716_v46, %v715_v47  ;;  %v2357_v47 = vunpack.c.l.b16 %v1762_v49  ;;  %v2358_v46 = vunpack.c.l.b16 %v1763_v12  ;;  %v1863_v49 = vpack.c.bf16 %v1799_v5, %v1799_v5 }
 0x179   : > { %v6561_v38 = vpop.f32.mrf.mxu0  ;;  %v6737_v48 = vpop.eup %5242  ;;  %v1860_v12 = vpack.c.bf16 %v1796_v58, %v1796_v58  ;;  %8443 = vst [vmem:[#allocation34_spill] sm:$0xff] %v6750_v0  ;;  %v1438_v4 = vmul.f32 %v6724_v51, %v1437_v61  ;;  %vm992_vm8 = vweird.f32 %v6715_v22  ;;  %v1858_v3 = vpack.c.bf16 %v1794_v33, %v1794_v33 }
 0x17a   : > { %v6722_v20 = vpop.xlane.xlu0 %584  ;;  %v718_v28 = vrot.slane %v717_v25, 1  ;;  %v6753_v10 = vpack.c.b16 %v2358_v46, %v2357_v47  ;;  %v2120_v43 = vunpack.c.l.b16 %v1863_v49  ;;  %v1427_v58 = vmul.f32 %v6737_v48, %v6690_v32  ;;  %v6767_v47 = vpop.xlane.xlu1 %676  ;;  %v1793_v49 = vld [vmem:[%s5762_s14 + $0xb8] sm:$0xff] }
 0x17b   : > { %5246 = vrsqrt.f32 %v6722_v20  ;;  %v6747_v31 = vpop.eup %5244  ;;  %v1856_v29 = vpack.c.bf16 %v1792_v27, %v1792_v27  ;;  %v1857_v60 = vpack.c.bf16 %v1793_v49, %v1793_v49  ;;  %vm778_vm10 = vcmp.gt.f32.partialorder %v6715_v22, 0.0 }
 0x17c   : > { %v6745_v24 = vadd.f32 %v718_v28, %v717_v25  ;;  %8444 = vst [vmem:[#allocation35_spill] sm:$0xff] %v6753_v10  ;;  %v987_v25 = vmul.f32 %v6747_v31, %v6715_v22  ;;  %v2119_v28 = vunpack.c.l.b16 %v1862_v50  ;;  %v2118_v50 = vunpack.c.l.b16 %v1861_v63 }
 0x17d   : > { %vm993_vm9 = vweird.f32 %v6747_v31  ;;  %v2115_v26 = vunpack.c.l.b16 %v1858_v3  ;;  %vm1002_vm12 = vweird.f32 %v6722_v20  ;;  %vm779_vm1 = vcmp.gt.f32.partialorder %v6722_v20, 0.0 }
 0x17e   : > { %5248 = vrsqrt.f32 %v6745_v24  ;;  %v2129_v46 = vpack.c.b16 %v2120_v43, %v2119_v28  ;;  %v1859_v43 = vpack.c.bf16 %v1795_v11, %v1795_v11  ;;  %v1428_v28 = vmul.f32 %v6737_v48, %v1427_v58  ;;  %vm6794_vm11 = vmor %vm992_vm8, %vm993_vm9  ;;  %v6800_v11 = vpop.xlane.xlu2 %588 }
 0x17f   : > { %5250 = vrsqrt.f32 %v6673_v35  ;;  %vm1550_vm14 = vweird.f32 %v6745_v24  ;;  %vm1442_vm2 = vweird.f32 %v6671_v36  ;;  %vm1443_vm3 = vweird.f32 %v6724_v51 }
 0x180   : > { %2140 = vmatpush.bf16.msra.mxu1 %v2129_v46  ;;  %v2116_v33 = vunpack.c.l.b16 %v1859_v43  ;;  %5252 = vrsqrt.f32 %v6800_v11  ;;  %v1429_v43 = vmul.f32 0.5, %v1428_v28  ;;  %vm1531_vm4 = vcmp.gt.f32.partialorder %v6745_v24, 0.0 }
 0x181   : > { %v6594_v62 = vpop.f32.mrf.mxu0  ;;  %v6763_v5 = vpop.eup %5246  ;;  %5254 = vrsqrt.f32 %v6767_v47  ;;  %vm1432_vm6 = vweird.f32 %v6690_v32  ;;  %vm1433_vm7 = vweird.f32 %v6737_v48  ;;  %vm1022_vm8 = vweird.f32 %v6800_v11 }
 0x182   : > { %v997_v39 = vmul.f32 %v6763_v5, %v6722_v20  ;;  %vm1003_vm13 = vweird.f32 %v6763_v5  ;;  %v2127_v49 = vpack.c.b16 %v2116_v33, %v2115_v26  ;;  %v6823_v26 = vmul.f32 0.5, %v1438_v4  ;;  %v1791_v4 = vld [vmem:[%s5762_s14 + $0xa8] sm:$0xff]  ;;  %v1789_v33 = vld [vmem:[%s5762_s14 + $0x98] sm:$0xff] }
 0x183   : > { %vm6816_vm0 = vmor %vm1002_vm12, %vm1003_vm13 }
 0x184   : > { %2442 = vmatmul.bf16.gmra.mxu0 %v6581_v14  ;;  %v6780_v63 = vpop.eup %5248  ;;  %v998_v34 = vmul.f32 %v6763_v5, %v997_v39  ;;  %v2114_v39 = vunpack.c.l.b16 %v1857_v60  ;;  %v1855_v60 = vpack.c.bf16 %v1791_v4, %v1791_v4  ;;  %vm6898_vm12 = vmor %vm1442_vm2, %vm1443_vm3 }
 0x185   : > { %v1545_v15 = vmul.f32 %v6780_v63, %v6745_v24  ;;  %vm1551_vm15 = vweird.f32 %v6780_v63 }
 0x186   : > { %vm6845_vm5 = vmor %vm1550_vm14, %vm1551_vm15  ;;  %v2112_v4 = vunpack.c.l.b16 %v1855_v60 }
 0x187   : > { %v1546_v3 = vmul.f32 %v6780_v63, %v1545_v15 }
 0x189   : > { %v6656_v2 = vpop.f32.mrf.mxu0 }
 0x191   : > { %v6687_v21 = vpop.f32.mrf.mxu0 }
 0x194   : > { %2447 = vmatmul.bf16.gmra.mxu0 %v6693_v13  ;;  %v1636_v13 = vmul.f32 %v6020_v30, %v1524_v53  ;;  %v2117_v30 = vunpack.c.l.b16 %v1860_v12  ;;  %v988_v53 = vmul.f32 %v6747_v31, %v987_v25 }
 0x196   : > { %v6776_v12 = vmul.f32 %v1636_v13, %v6436_v1  ;;  %v989_v61 = vmul.f32 0.5, %v988_v53  ;;  %v2128_v25 = vpack.c.b16 %v2118_v50, %v2117_v30  ;;  %v6787_v53 = vpop.eup %5250  ;;  %v999_v30 = vmul.f32 0.5, %v998_v34 }
 0x197   : > { %v2113_v50 = vunpack.c.l.b16 %v1856_v29  ;;  %v6806_v34 = vmul.f32 %v1637_v54, %v6436_v1  ;;  %v6821_v29 = vpop.xlane.xlu1 %586 }
 0x198   : > { %v990_v13 = vsub.f32 1.5, %v989_v61  ;;  %2141 = vmatpush.bf16.msra.mxu1 %v2128_v25  ;;  %v1000_v27 = vsub.f32 1.5, %v999_v30  ;;  %v1547_v61 = vmul.f32 0.5, %v1546_v3  ;;  %v1790_v25 = vld [vmem:[%s5762_s14 + $0xa0] sm:$0xff]  ;;  %v1788_v30 = vld [vmem:[%s5762_s14 + $0x90] sm:$0xff]  ;;  %5256 = vrsqrt.f32 %v6821_v29 }
 0x199   : > { %v6734_v17 = vpop.f32.mrf.mxu0  ;;  %v2126_v22 = vpack.c.b16 %v2114_v39, %v2113_v50  ;;  %v1786_v50 = vld [vmem:[%s5762_s14 + $0x80] sm:$0xff]  ;;  %v1787_v39 = vld [vmem:[%s5762_s14 + $0x88] sm:$0xff]  ;;  %vm1012_vm13 = vweird.f32 %v6821_v29  ;;  %vm780_vm3 = vcmp.gt.f32.partialorder %v6821_v29, 0.0 }
 0x19a   : > { %v991_v46 = vmul.f32 %v6747_v31, %v990_v13  ;;  %v1001_v54 = vmul.f32 %v6763_v5, %v1000_v27  ;;  %v1548_v58 = vsub.f32 1.5, %v1547_v61  ;;  %v1850_v20 = vpack.c.bf16 %v1786_v50, %v1786_v50 }
 0x19c   : > { %v995_v15 = vsel %vm6794_vm11, %v6747_v31, %v991_v46  ;;  %2142 = vmatpush.bf16.msra.mxu1 %v2127_v49  ;;  %v1005_v46 = vsel %vm6816_vm0, %v6763_v5, %v1001_v54  ;;  %v1549_v27 = vmul.f32 %v6780_v63, %v1548_v58  ;;  %v1852_v5 = vpack.c.bf16 %v1788_v30, %v1788_v30 }
 0x19d   : > { %v1482_v31 = vsel %vm778_vm10, %v995_v15, 0.0  ;;  %v1483_v61 = vsel %vm779_vm1, %v1005_v46, 0.0  ;;  %v1854_v15 = vpack.c.bf16 %v1790_v25, %v1790_v25  ;;  %v1853_v54 = vpack.c.bf16 %v1789_v33, %v1789_v33  ;;  %vm6929_vm1 = vmor %vm1432_vm6, %vm1433_vm7 }
 0x19e   : > { %v1594_v49 = vmul.f32 %v6143_v7, %v1482_v31  ;;  %v1595_v3 = vmul.f32 %v6168_v55, %v1483_v61  ;;  %v1553_v58 = vsel %vm6845_vm5, %v6780_v63, %v1549_v27  ;;  %v1851_v31 = vpack.c.bf16 %v1787_v39, %v1787_v39 }
 0x19f   : > { %v2111_v7 = vunpack.c.l.b16 %v1854_v15  ;;  %v1440_v25 = vsub.f32 1.5, %v6823_v26  ;;  %v6870_v46 = vsel %vm1531_vm4, %v1553_v58, 0.0  ;;  %v1430_v33 = vsub.f32 1.5, %v1429_v43 }
 0x1a0   : > { %2143 = vmatpush.bf16.msra.mxu1 %v2126_v22  ;;  %v2109_v63 = vunpack.c.l.b16 %v1852_v5  ;;  %v2110_v22 = vunpack.c.l.b16 %v1853_v54  ;;  %v1658_v24 = vmul.f32 %v1594_v49, %v6870_v46  ;;  %v1659_v39 = vmul.f32 %v1595_v3, %v6870_v46 }
 0x1a1   : > { %v6778_v14 = vpop.f32.mrf.mxu0  ;;  %v2125_v26 = vpack.c.b16 %v2112_v4, %v2111_v7  ;;  %v2107_v61 = vunpack.c.l.b16 %v1850_v20  ;;  %v2108_v15 = vunpack.c.l.b16 %v1851_v31  ;;  %vm823_vm10 = vcmp.gt.f32.partialorder %v6671_v36, 0.0  ;;  %v5042_v4 = vld [vmem:[%s5754_s10 + $0x80] sm:$0xff]  }
 0x1a2   : > { %vm822_vm11 = vcmp.gt.f32.partialorder %v6690_v32, 0.0  ;;  %v2124_v5 = vpack.c.b16 %v2110_v22, %v2109_v63  ;;  %v1722_v49 = vpack.c.bf16 %v1658_v24, %v1658_v24  ;;  %v1723_v54 = vpack.c.bf16 %v1659_v39, %v1659_v39  ;;  %v4720_v63 = vld [vmem:[#allocation7 + $0x38] sm:$0xff]  ;;  %v4719_v22 = vld [vmem:[#allocation7 + $0x30] sm:$0xff] }
 0x1a3   : > { %v1441_v3 = vmul.f32 %v6724_v51, %v1440_v25  ;;  %v1431_v58 = vmul.f32 %v6737_v48, %v1430_v33  ;;  %v1447_v7 = vmul.f32 %v6787_v53, %v6673_v35  ;;  %v6908_v33 = vpop.xlane.xlu1 %592  ;;  %v6918_v39 = vunpack.c.h.bf16 %v5042_v4  ;;  %2578 = vmatpush.bf16.msra.mxu0 %v4720_v63 }
 0x1a4   : > { %2452 = vmatmul.bf16.gmra.mxu0 %v6750_v0  ;;  %v6862_v0 = vpop.eup %5252  ;;  %2144 = vmatpush.bf16.msra.mxu1 %v2125_v26  ;;  %v2059_v26 = vunpack.c.l.b16 %v1722_v49  ;;  %v2060_v24 = vunpack.c.l.b16 %v1723_v54  ;;  %vm781_vm0 = vcmp.gt.f32.partialorder %v6800_v11, 0.0  ;;  %5258 = vrsqrt.f32 %v6908_v33 }
 0x1a5   : > { %v1017_v55 = vmul.f32 %v6862_v0, %v6800_v11  ;;  %v6874_v30 = vpop.eup %5254  ;;  %vm1023_vm9 = vweird.f32 %v6862_v0  ;;  %v1764_v54 = vpack.c.bf16 %v6776_v12, %v6776_v12  ;;  %616 = vadd.xlane.f32.xlu1 %v6918_v39  ;;  %vm1452_vm4 = vweird.f32 %v6673_v35 }
 0x1a6   : > { %v6877_v28 = vpop.eup %5256  ;;  %v1457_v25 = vmul.f32 %v6874_v30, %v6767_v47  ;;  %vm6914_vm15 = vmor %vm1022_vm8, %vm1023_vm9  ;;  %vm1042_vm5 = vweird.f32 %v6908_v33  ;;  %vm1453_vm7 = vweird.f32 %v6787_v53 }
 0x1a7   : > { %v1018_v50 = vmul.f32 %v6862_v0, %v1017_v55  ;;  %v1007_v43 = vmul.f32 %v6877_v28, %v6821_v29  ;;  %vm1013_vm14 = vweird.f32 %v6877_v28  ;;  %2579 = vmatpush.bf16.msra.mxu0 %v4719_v22 }
 0x1a8   : > { %2145 = vmatpush.bf16.msra.mxu1 %v2124_v5  ;;  %v1448_v5 = vmul.f32 %v6787_v53, %v1447_v7  ;;  %vm6951_vm2 = vmor %vm1012_vm13, %vm1013_vm14  ;;  %v1435_v7 = vsel %vm6929_vm1, %v6737_v48, %v1431_v58  ;;  %v1458_v31 = vmul.f32 %v6874_v30, %v1457_v25  ;;  %vm1463_vm13 = vweird.f32 %v6874_v30 }
 0x1a9   : > { %v6832_v13 = vpop.f32.mrf.mxu0  ;;  %v1019_v60 = vmul.f32 0.5, %v1018_v50  ;;  %v1008_v20 = vmul.f32 %v6877_v28, %v1007_v43  ;;  %v6920_v43 = vpop.xlane.xlu0 %590  ;;  %v1526_v58 = vsel %vm822_vm11, %v1435_v7, 0.0 }
 0x1aa   : > { %5260 = vrsqrt.f32 %v6920_v43  ;;  %v1449_v25 = vmul.f32 0.5, %v1448_v5  ;;  %v1459_v49 = vmul.f32 0.5, %v1458_v31  ;;  %vm1032_vm8 = vweird.f32 %v6920_v43 }
 0x1ab   : > { %v1020_v55 = vsub.f32 1.5, %v1019_v60  ;;  %v1009_v50 = vmul.f32 0.5, %v1008_v20  ;;  %v1765_v20 = vpack.c.bf16 %v6806_v34, %v6806_v34 }
 0x1ac   : > { %v1450_v31 = vsub.f32 1.5, %v1449_v25 }
 0x1ad   : > { %v1021_v60 = vmul.f32 %v6862_v0, %v1020_v55  ;;  %v1010_v55 = vsub.f32 1.5, %v1009_v50  ;;  %v6975_v50 = vpop.eup %5258 }
 0x1ae   : > { %vm1043_vm6 = vweird.f32 %v6975_v50 }
 0x1af   : > { %v1025_v63 = vsel %vm6914_vm15, %v6862_v0, %v1021_v60  ;;  %v6962_v0 = vpack.c.b16 %v2060_v24, %v2059_v26  ;;  %v2359_v26 = vunpack.c.l.b16 %v1764_v54  ;;  %v4718_v60 = vld [vmem:[#allocation7 + $0x28] sm:$0xff]  ;;  %v2360_v54 = vunpack.c.l.b16 %v1765_v20  ;;  %vm7013_vm11 = vmor %vm1042_vm5, %vm1043_vm6 }
 0x1b0   : > { %2580 = vmatpush.bf16.msra.mxu0 %v4718_v60  ;;  %vm782_vm15 = vcmp.gt.f32.partialorder %v6920_v43, 0.0 }
 0x1b1   : > { %v6882_v27 = vpop.f32.mrf.mxu0 }
 0x1b4   : > { %2457 = vmatmul.bf16.gmra.mxu0 %v6753_v10  ;;  %v2123_v10 = vpack.c.b16 %v2108_v15, %v2107_v61  ;;  %v6938_v61 = vunpack.c.l.bf16 %v5042_v4  ;;  %v1445_v15 = vsel %vm6898_vm12, %v6724_v51, %v1441_v3  ;;  %v1485_v51 = vsel %vm781_vm0, %v1025_v63, 0.0  ;;  %vm7046_vm0 = vmor %vm1452_vm4, %vm1453_vm7 }
 0x1b5   : > { %v1011_v3 = vmul.f32 %v6877_v28, %v1010_v55  ;;  %v1597_v11 = vmul.f32 %v6208_v42, %v1485_v51  ;;  %v1527_v48 = vsel %vm823_vm10, %v1445_v15, 0.0  ;;  %v1638_v63 = vmul.f32 %v6072_v23, %v1526_v58 }
 0x1b6   : > { %614 = vadd.xlane.f32.xlu0 %v6938_v61  ;;  %2146 = vmatpush.bf16.msra.mxu1 %v2123_v10  ;;  %v1037_v10 = vmul.f32 %v6975_v50, %v6908_v33  ;;  %v1639_v15 = vmul.f32 %v6070_v18, %v1527_v48  ;;  %v1460_v18 = vsub.f32 1.5, %v1459_v49  ;;  %vm783_vm10 = vcmp.gt.f32.partialorder %v6908_v33, 0.0  ;;  %v5043_v48 = vld [vmem:[%s5754_s10 + $0x88] sm:$0xff]   ;;  %v4716_v49 = vld [vmem:[#allocation7 + $0x18] sm:$0xff] }
 0x1b7   : > { %v1015_v29 = vsel %vm6951_vm2, %v6877_v28, %v1011_v3  ;;  %v6985_v28 = vpop.eup %5260  ;;  %v1661_v55 = vmul.f32 %v1597_v11, %v6870_v46  ;;  %v4717_v3 = vld [vmem:[#allocation7 + $0x20] sm:$0xff]  ;;  %v7001_v11 = vpack.c.b16 %v2360_v54, %v2359_v26  ;;  %v7019_v25 = vunpack.c.l.bf16 %v5043_v48 }
 0x1b8   : > { %v1484_v24 = vsel %vm780_vm3, %v1015_v29, 0.0  ;;  %v1038_v36 = vmul.f32 %v6975_v50, %v1037_v10  ;;  %v1027_v32 = vmul.f32 %v6985_v28, %v6920_v43  ;;  %vm1033_vm9 = vweird.f32 %v6985_v28  ;;  %2581 = vmatpush.bf16.msra.mxu0 %v4717_v3  ;;  %v4714_v43 = vld [vmem:[#allocation7 + $0x8] sm:$0xff] }
 0x1b9   : > { %v6956_v34 = vpop.f32.mrf.mxu0  ;;  %v1596_v42 = vmul.f32 %v6210_v57, %v1484_v24  ;;  %2147 = vmatmul.bf16.vlgmr.msra.gmra.mxu1 %v6962_v0  ;;  %v1725_v5 = vpack.c.bf16 %v1661_v55, %v1661_v55  ;;  %8459 = vst [vmem:[#allocation36_spill] sm:$0xff] %v7001_v11  ;;  %v1702_v29 = vmul.f32 %v1638_v63, %v6436_v1  ;;  %vm1462_vm12 = vweird.f32 %v6767_v47  ;;  %vm7027_vm14 = vmor %vm1032_vm8, %vm1033_vm9 }
 0x1ba   : > { %v1039_v12 = vmul.f32 0.5, %v1038_v36  ;;  %v1028_v51 = vmul.f32 %v6985_v28, %v1027_v32  ;;  %v1703_v24 = vmul.f32 %v1639_v15, %v6436_v1  ;;  %v7031_v55 = vunpack.c.h.bf16 %v5043_v48  ;;  %618 = vadd.xlane.f32.xlu2 %v7019_v25  ;;  %vm7061_vm1 = vmor %vm1462_vm12, %vm1463_vm13  ;;  %v4715_v48 = vld [vmem:[#allocation7 + $0x10] sm:$0xff] }
 0x1bb   : > { %v1660_v57 = vmul.f32 %v1596_v42, %v6870_v46  ;;  %v2062_v60 = vunpack.c.l.b16 %v1725_v5  ;;  %v1451_v15 = vmul.f32 %v6787_v53, %v1450_v31  ;;  %vm824_vm2 = vcmp.gt.f32.partialorder %v6673_v35, 0.0 }
 0x1bc   : > { %v1040_v23 = vsub.f32 1.5, %v1039_v12  ;;  %v1029_v22 = vmul.f32 0.5, %v1028_v51  ;;  %v7055_v12 = vpop.xlane.xlu0 %596  ;;  %v1767_v31 = vpack.c.bf16 %v1703_v24, %v1703_v24  ;;  %2582 = vmatpush.bf16.msra.mxu0 %v4716_v49  ;;  %vm825_vm3 = vcmp.gt.f32.partialorder %v6767_v47, 0.0 }
 0x1bd   : > { %v1724_v7 = vpack.c.bf16 %v1660_v57, %v1660_v57  ;;  %v7039_v57 = vpop.xlane.xlu2 %594  ;;  %vm1062_vm6 = vweird.f32 %v7055_v12 }
 0x1be   : > { %v1041_v58 = vmul.f32 %v6975_v50, %v1040_v23  ;;  %v1030_v42 = vsub.f32 1.5, %v1029_v22  ;;  %5262 = vrsqrt.f32 %v7039_v57  ;;  %620 = vadd.xlane.f32.xlu0 %v7031_v55  ;;  %vm1052_vm4 = vweird.f32 %v7039_v57 }
 0x1bf   : > { %v2061_v10 = vunpack.c.l.b16 %v1724_v7  ;;  %v1766_v7 = vpack.c.bf16 %v1702_v29, %v1702_v29  ;;  %5264 = vrsqrt.f32 %v7055_v12  ;;  %vm784_vm9 = vcmp.gt.f32.partialorder %v7039_v57, 0.0 }
 0x1c0   : > { %v1045_v36 = vsel %vm7013_vm11, %v6975_v50, %v1041_v58  ;;  %v1031_v32 = vmul.f32 %v6985_v28, %v1030_v42  ;;  %v1461_v50 = vmul.f32 %v6874_v30, %v1460_v18  ;;  %2583 = vmatpush.bf16.msra.mxu0 %v4715_v48  ;;  %v2362_v58 = vunpack.c.l.b16 %v1767_v31 }
 0x1c1   : > { %v6996_v20 = vpop.f32.mrf.mxu0  ;;  %v1487_v5 = vsel %vm783_vm10, %v1045_v36, 0.0  ;;  %v7070_v18 = vpack.c.b16 %v2062_v60, %v2061_v10  ;;  %v2361_v60 = vunpack.c.l.b16 %v1766_v7  ;;  %vm785_vm10 = vcmp.gt.f32.partialorder %v7055_v12, 0.0 }
 0x1c2   : > { %v1035_v33 = vsel %vm7027_vm14, %v6985_v28, %v1031_v32  ;;  %v1599_v22 = vmul.f32 %v6284_v59, %v1487_v5  ;;  %v1455_v28 = vsel %vm7046_vm0, %v6787_v53, %v1451_v15  ;;  %v1465_v59 = vsel %vm7061_vm1, %v6874_v30, %v1461_v50  ;;  %v4713_v15 = vld [vmem:[#allocation7] sm:$0xff] }
 0x1c3   : > { %v1486_v26 = vsel %vm782_vm15, %v1035_v33, 0.0  ;;  %v1528_v42 = vsel %vm824_vm2, %v1455_v28, 0.0  ;;  %v1529_v10 = vsel %vm825_vm3, %v1465_v59, 0.0  ;;  %v7096_v5 = vpack.c.b16 %v2362_v58, %v2361_v60 }
 0x1c4   : > { %2462 = vmatmul.bf16.gmra.mxu0 %v7001_v11  ;;  %v1598_v29 = vmul.f32 %v6287_v8, %v1486_v26  ;;  %v5263_v24 = vpop.eup %5262  ;;  %v1663_v35 = vmul.f32 %v1599_v22, %v6870_v46  ;;  %v1640_v63 = vmul.f32 %v6141_v41, %v1528_v42  ;;  %v1641_v50 = vmul.f32 %v6149_v19, %v1529_v10  ;;  %v5044_v22 = vld [vmem:[%s5754_s10 + $0x90] sm:$0xff]  }
 0x1c5   : > { %v1047_v53 = vmul.f32 %v5263_v24, %v7039_v57  ;;  %v5265_v47 = vpop.eup %5264  ;;  %2584 = vmatpush.bf16.msra.mxu0 %v4714_v43  ;;  %8468 = vst [vmem:[#allocation37_spill] sm:$0xff] %v7096_v5  ;;  %vm1053_vm5 = vweird.f32 %v5263_v24  ;;  %v7102_v41 = vunpack.c.h.bf16 %v5044_v22  ;;  %v7104_v19 = vunpack.c.l.bf16 %v5044_v22  ;;  %v7117_v58 = vpop.xlane.xlu2 %600 }
 0x1c6   : > { %v1662_v8 = vmul.f32 %v1598_v29, %v6870_v46  ;;  %v1727_v54 = vpack.c.bf16 %v1663_v35, %v1663_v35  ;;  %v1057_v32 = vmul.f32 %v5265_v47, %v7055_v12  ;;  %vm1063_vm7 = vweird.f32 %v5265_v47  ;;  %vm7111_vm8 = vmor %vm1052_vm4, %vm1053_vm5 }
 0x1c7   : > { %v1048_v30 = vmul.f32 %v5263_v24, %v1047_v53  ;;  %v1704_v29 = vmul.f32 %v1640_v63, %v6436_v1  ;;  %v1705_v28 = vmul.f32 %v1641_v50, %v6436_v1  ;;  %624 = vadd.xlane.f32.xlu2 %v7102_v41  ;;  %622 = vadd.xlane.f32.xlu1 %v7104_v19  ;;  %vm1064_vm11 = vmor %vm1062_vm6, %vm1063_vm7  ;;  %5266 = vrsqrt.f32 %v7117_v58  ;;  %v7125_v1 = vpop.xlane.xlu1 %598 }
 0x1c8   : > { %v1726_v49 = vpack.c.bf16 %v1662_v8, %v1662_v8  ;;  %v1058_v7 = vmul.f32 %v5265_v47, %v1057_v32  ;;  %v2064_v33 = vunpack.c.l.b16 %v1727_v54  ;;  %5268 = vrsqrt.f32 %v7125_v1 }
 0x1c9   : > { %v7065_v3 = vpop.f32.mrf.mxu0  ;;  %2152 = vmatmul.bf16.gmra.mxu1 %v7070_v18  ;;  %v1049_v51 = vmul.f32 0.5, %v1048_v30  ;;  %2585 = vmatpush.bf16.msra.mxu0 %v4713_v15  ;;  %v1769_v12 = vpack.c.bf16 %v1705_v28, %v1705_v28  ;;  %vm1082_vm12 = vweird.f32 %v7117_v58  ;;  %vm1072_vm14 = vweird.f32 %v7125_v1 }
 0x1ca   : > { %v2063_v31 = vunpack.c.l.b16 %v1726_v49  ;;  %v1059_v48 = vmul.f32 0.5, %v1058_v7  ;;  %v1768_v49 = vpack.c.bf16 %v1704_v29, %v1704_v29  ;;  %vm787_vm1 = vcmp.gt.f32.partialorder %v7117_v58, 0.0 }
 0x1cb   : > { %v1050_v26 = vsub.f32 1.5, %v1049_v51  ;;  %v2364_v51 = vunpack.c.l.b16 %v1769_v12  ;;  %vm786_vm3 = vcmp.gt.f32.partialorder %v7125_v1, 0.0 }
 0x1cc   : > { %v1060_v60 = vsub.f32 1.5, %v1059_v48  ;;  %v7131_v10 = vpack.c.b16 %v2064_v33, %v2063_v31  ;;  %v2363_v50 = vunpack.c.l.b16 %v1768_v49 }
 0x1cd   : > { %v1051_v43 = vmul.f32 %v5263_v24, %v1050_v26 }
 0x1ce   : > { %v1061_v42 = vmul.f32 %v5265_v47, %v1060_v60  ;;  %v7147_v48 = vpack.c.b16 %v2364_v51, %v2363_v50  ;;  %v5045_v60 = vld [vmem:[%s5754_s10 + $0x98] sm:$0xff]   ;;  %v603_v51 = vpop.xlane.xlu0 %602 }
 0x1cf   : > { %v1055_v35 = vsel %vm7111_vm8, %v5263_v24, %v1051_v43  ;;  %v5267_v24 = vpop.eup %5266  ;;  %v7153_v49 = vunpack.c.h.bf16 %v5045_v60  ;;  %v7155_v12 = vunpack.c.l.bf16 %v5045_v60  ;;  %vm1092_vm6 = vweird.f32 %v603_v51 }
 0x1d0   : > { %v1488_v54 = vsel %vm784_vm9, %v1055_v35, 0.0  ;;  %v1065_v32 = vsel %vm1064_vm11, %v5265_v47, %v1061_v42  ;;  %v5269_v31 = vpop.eup %5268  ;;  %v1077_v33 = vmul.f32 %v5267_v24, %v7117_v58  ;;  %8471 = vst [vmem:[#allocation38_spill] sm:$0xff] %v7147_v48  ;;  %vm1083_vm13 = vweird.f32 %v5267_v24 }
 0x1d1   : > { %v7091_v36 = vpop.f32.mrf.mxu0  ;;  %v1600_v30 = vmul.f32 %v6375_v56, %v1488_v54  ;;  %v1489_v15 = vsel %vm785_vm10, %v1065_v32, 0.0  ;;  %v1067_v57 = vmul.f32 %v5269_v31, %v7125_v1  ;;  %vm1073_vm15 = vweird.f32 %v5269_v31  ;;  %vm7157_vm0 = vmor %vm1082_vm12, %vm1083_vm13  ;;  %628 = vadd.xlane.f32.xlu1 %v7153_v49  ;;  %626 = vadd.xlane.f32.xlu0 %v7155_v12 }
 0x1d2   : > { %v1601_v63 = vmul.f32 %v6377_v44, %v1489_v15  ;;  %v1078_v26 = vmul.f32 %v5267_v24, %v1077_v33  ;;  %vm7162_vm2 = vmor %vm1072_vm14, %vm1073_vm15  ;;  %v720_v1 = vadd.f32 %v6918_v39, %v6938_v61  ;;  %vm788_vm11 = vcmp.gt.f32.partialorder %v603_v51, 0.0 }
 0x1d3   : > { %v1664_v7 = vmul.f32 %v1600_v30, %v6870_v46  ;;  %v1068_v29 = vmul.f32 %v5269_v31, %v1067_v57 }
 0x1d4   : > { %2467 = vmatmul.bf16.gmra.mxu0 %v7096_v5  ;;  %v1665_v22 = vmul.f32 %v1601_v63, %v6870_v46  ;;  %v1079_v28 = vmul.f32 0.5, %v1078_v26  ;;  %v7167_v63 = vpop.xlane.xlu1 %604  ;;  %v721_v60 = vadd.f32 %v7019_v25, %v720_v1 }
 0x1d5   : > { %v1728_v56 = vpack.c.bf16 %v1664_v7, %v1664_v7  ;;  %v1069_v59 = vmul.f32 0.5, %v1068_v29  ;;  %5270 = vrsqrt.f32 %v7167_v63  ;;  %vm1102_vm4 = vweird.f32 %v7167_v63 }
 0x1d6   : > { %v1729_v44 = vpack.c.bf16 %v1665_v22, %v1665_v22  ;;  %v1080_v35 = vsub.f32 1.5, %v1079_v28  ;;  %5272 = vrsqrt.f32 %v603_v51  ;;  %vm789_vm9 = vcmp.gt.f32.partialorder %v7167_v63, 0.0  ;;  %v1814_v22 = vld [vmem:[%s5762_s14 + $0x160] sm:$0xff] }
 0x1d7   : > { %v2065_v43 = vunpack.c.l.b16 %v1728_v56  ;;  %v1070_v30 = vsub.f32 1.5, %v1069_v59  ;;  %v1878_v23 = vpack.c.bf16 %v1814_v22, %v1814_v22 }
 0x1d8   : > { %v2066_v42 = vunpack.c.l.b16 %v1729_v44  ;;  %v1081_v32 = vmul.f32 %v5267_v24, %v1080_v35 }
 0x1d9   : > { %v7127_v8 = vpop.f32.mrf.mxu0  ;;  %2157 = vmatmul.bf16.gmra.mxu1 %v7131_v10  ;;  %v1071_v50 = vmul.f32 %v5269_v31, %v1070_v30 }
 0x1da   : > { %v1085_v58 = vsel %vm7157_vm0, %v5267_v24, %v1081_v32  ;;  %v7176_v33 = vpack.c.b16 %v2066_v42, %v2065_v43  ;;  %v722_v32 = vadd.f32 %v7031_v55, %v721_v60 }
 0x1db   : > { %v1491_v57 = vsel %vm787_vm1, %v1085_v58, 0.0  ;;  %v1075_v56 = vsel %vm7162_vm2, %v5269_v31, %v1071_v50  ;;  %v5271_v24 = vpop.eup %5270  ;;  %v8476_v50 = vpack.c.bf16 %v6561_v38, %v6511_v37 }
 0x1dc   : > { %v1603_v26 = vmul.f32 %v6446_v16, %v1491_v57  ;;  %v1490_v44 = vsel %vm786_vm3, %v1075_v56, 0.0  ;;  %v5273_v43 = vpop.eup %5272  ;;  %v1097_v31 = vmul.f32 %v5271_v24, %v7167_v63  ;;  %vm1103_vm5 = vweird.f32 %v5271_v24  ;;  %v5046_v56 = vld [vmem:[%s5754_s10 + $0xa0] sm:$0xff]  }
 0x1dd   : > { %v1602_v29 = vmul.f32 %v6448_v45, %v1490_v44  ;;  %v1087_v35 = vmul.f32 %v5273_v43, %v603_v51  ;;  %vm1093_vm7 = vweird.f32 %v5273_v43  ;;  %v7199_v44 = vunpack.c.l.bf16 %v5046_v56  ;;  %vm7203_vm8 = vmor %vm1102_vm4, %vm1103_vm5 }
 0x1de   : > { %v1667_v59 = vmul.f32 %v1603_v26, %v6870_v46  ;;  %v1098_v16 = vmul.f32 %v5271_v24, %v1097_v31  ;;  %v723_v60 = vadd.f32 %v7104_v19, %v722_v32  ;;  %vm7209_vm10 = vmor %vm1092_vm6, %vm1093_vm7  ;;  %v7214_v31 = vpop.xlane.xlu2 %606 }
 0x1df   : > { %v1666_v28 = vmul.f32 %v1602_v29, %v6870_v46  ;;  %v1088_v45 = vmul.f32 %v5273_v43, %v1087_v35  ;;  %v7201_v29 = vunpack.c.h.bf16 %v5046_v56  ;;  %630 = vadd.xlane.f32.xlu2 %v7199_v44  ;;  %5274 = vrsqrt.f32 %v7214_v31 }
 0x1e0   : > { %v1731_v30 = vpack.c.bf16 %v1667_v59, %v1667_v59  ;;  %v1099_v15 = vmul.f32 0.5, %v1098_v16  ;;  %vm1112_vm12 = vweird.f32 %v7214_v31  ;;  %vm790_vm1 = vcmp.gt.f32.partialorder %v7214_v31, 0.0 }
 0x1e1   : > { %v7145_v47 = vpop.f32.mrf.mxu0  ;;  %v1730_v42 = vpack.c.bf16 %v1666_v28, %v1666_v28  ;;  %v1089_v58 = vmul.f32 0.5, %v1088_v45  ;;  %632 = vadd.xlane.f32.xlu0 %v7201_v29 }
 0x1e2   : > { %v1100_v1 = vsub.f32 1.5, %v1099_v15  ;;  %v2068_v26 = vunpack.c.l.b16 %v1731_v30 }
 0x1e3   : > { %v2067_v57 = vunpack.c.l.b16 %v1730_v42  ;;  %v1090_v59 = vsub.f32 1.5, %v1089_v58  ;;  %v609_v42 = vpop.xlane.xlu0 %608 }
 0x1e4   : > { %2472 = vmatmul.bf16.gmra.mxu0 %v7147_v48  ;;  %v1101_v37 = vmul.f32 %v5271_v24, %v1100_v1  ;;  %5276 = vrsqrt.f32 %v609_v42  ;;  %vm1122_vm14 = vweird.f32 %v609_v42  ;;  %vm791_vm3 = vcmp.gt.f32.partialorder %v609_v42, 0.0 }
 0x1e5   : > { %v1091_v35 = vmul.f32 %v5273_v43, %v1090_v59  ;;  %v7222_v30 = vpack.c.b16 %v2068_v26, %v2067_v57 }
 0x1e6   : > { %v1105_v63 = vsel %vm7203_vm8, %v5271_v24, %v1101_v37  ;;  %v5275_v24 = vpop.eup %5274 }
 0x1e7   : > { %v1493_v32 = vsel %vm789_vm9, %v1105_v63, 0.0  ;;  %v1095_v15 = vsel %vm7209_vm10, %v5273_v43, %v1091_v35  ;;  %v1107_v59 = vmul.f32 %v5275_v24, %v7214_v31  ;;  %vm1113_vm13 = vweird.f32 %v5275_v24 }
 0x1e8   : > { %v1605_v51 = vmul.f32 %v6521_v9, %v1493_v32  ;;  %v1492_v58 = vsel %vm788_vm11, %v1095_v15, 0.0  ;;  %v8481_v32 = vpack.c.bf16 %v6656_v2, %v6594_v62  ;;  %vm7251_vm0 = vmor %vm1112_vm12, %vm1113_vm13 }
 0x1e9   : > { %v7172_v7 = vpop.f32.mrf.mxu0  ;;  %2162 = vmatmul.bf16.gmra.mxu1 %v7176_v33  ;;  %v1604_v56 = vmul.f32 %v6523_v40, %v1492_v58  ;;  %v7244_v58 = vpop.xlane.xlu2 %612 }
 0x1ea   : > { %v1669_v1 = vmul.f32 %v1605_v51, %v6870_v46  ;;  %v5277_v26 = vpop.eup %5276  ;;  %5278 = vrsqrt.f32 %v7244_v58  ;;  %vm1142_vm4 = vweird.f32 %v7244_v58  ;;  %vm793_vm9 = vcmp.gt.f32.partialorder %v7244_v58, 0.0 }
 0x1eb   : > { %v1668_v57 = vmul.f32 %v1604_v56, %v6870_v46  ;;  %v1117_v43 = vmul.f32 %v5277_v26, %v609_v42  ;;  %vm1123_vm15 = vweird.f32 %v5277_v26  ;;  %v7246_v56 = vpop.xlane.xlu1 %610 }
 0x1ec   : > { %v1733_v38 = vpack.c.bf16 %v1669_v1, %v1669_v1  ;;  %vm7259_vm2 = vmor %vm1122_vm14, %vm1123_vm15  ;;  %5280 = vrsqrt.f32 %v7246_v56  ;;  %vm1132_vm6 = vweird.f32 %v7246_v56  ;;  %vm792_vm11 = vcmp.gt.f32.partialorder %v7246_v56, 0.0 }
 0x1ed   : > { %v1732_v9 = vpack.c.bf16 %v1668_v57, %v1668_v57  ;;  %v1118_v40 = vmul.f32 %v5277_v26, %v1117_v43 }
 0x1ee   : > { %v2070_v1 = vunpack.c.l.b16 %v1733_v38 }
 0x1ef   : > { %v1119_v15 = vmul.f32 0.5, %v1118_v40  ;;  %v2069_v51 = vunpack.c.l.b16 %v1732_v9 }
 0x1f1   : > { %v7191_v54 = vpop.f32.mrf.mxu0  ;;  %v1120_v62 = vsub.f32 1.5, %v1119_v15 }
 0x1f3   : > { %v1121_v38 = vmul.f32 %v5277_v26, %v1120_v62 }
 0x1f4   : > { %2586 = vmatmul.bf16.vlgmr.msra.gmra.mxu0 %v8476_v50  ;;  %v724_v50 = vadd.f32 %v7102_v41, %v723_v60  ;;  %v1108_v60 = vmul.f32 %v5275_v24, %v1107_v59 }
 0x1f6   : > { %v725_v28 = vadd.f32 %v7155_v12, %v724_v50  ;;  %v1109_v63 = vmul.f32 0.5, %v1108_v60  ;;  %v5047_v50 = vld [vmem:[%s5754_s10 + $0xa8] sm:$0xff]  }
 0x1f7   : > { %v7255_v2 = vunpack.c.l.bf16 %v5047_v50 }
 0x1f8   : > { %v726_v35 = vadd.f32 %v7153_v49, %v725_v28  ;;  %v1110_v57 = vsub.f32 1.5, %v1109_v63  ;;  %v7248_v28 = vunpack.c.h.bf16 %v5047_v50  ;;  %v7271_v63 = vpack.c.b16 %v2070_v1, %v2069_v51 }
 0x1f9   : > { %v7218_v16 = vpop.f32.mrf.mxu0  ;;  %2167 = vmatmul.bf16.gmra.mxu1 %v7222_v30  ;;  %634 = vadd.xlane.f32.xlu1 %v7255_v2  ;;  %v1125_v50 = vsel %vm7259_vm2, %v5277_v26, %v1121_v38 }
 0x1fa   : > { %v1111_v43 = vmul.f32 %v5275_v24, %v1110_v57  ;;  %636 = vadd.xlane.f32.xlu2 %v7248_v28  ;;  %v727_v60 = vadd.f32 %v7199_v44, %v726_v35  ;;  %8486 = vst [vmem:[#allocation39_spill] sm:$0xff] %v7271_v63  ;;  %v5279_v57 = vpop.eup %5278  ;;  %v1495_v35 = vsel %vm791_vm3, %v1125_v50, 0.0 }
 0x1fb   : > { %v1607_v45 = vmul.f32 %v6613_v6, %v1495_v35  ;;  %v1137_v59 = vmul.f32 %v5279_v57, %v7244_v58  ;;  %vm1143_vm5 = vweird.f32 %v5279_v57 }
 0x1fc   : > { %v1115_v31 = vsel %vm7251_vm0, %v5275_v24, %v1111_v43  ;;  %v728_v62 = vadd.f32 %v7201_v29, %v727_v60  ;;  %v5281_v24 = vpop.eup %5280  ;;  %vm7290_vm8 = vmor %vm1142_vm4, %vm1143_vm5 }
 0x1fd   : > { %v1494_v15 = vsel %vm790_vm1, %v1115_v31, 0.0  ;;  %v1138_v51 = vmul.f32 %v5279_v57, %v1137_v59  ;;  %v1127_v1 = vmul.f32 %v5281_v24, %v7246_v56  ;;  %v1671_v26 = vmul.f32 %v1607_v45, %v6870_v46  ;;  %v5048_v59 = vld [vmem:[%s5754_s10 + $0xb0] sm:$0xff]  }
 0x1fe   : > { %v1606_v42 = vmul.f32 %v6611_v52, %v1494_v15  ;;  %v729_v9 = vadd.f32 %v7255_v2, %v728_v62  ;;  %vm1133_vm7 = vweird.f32 %v5281_v24  ;;  %v8489_v45 = vpack.c.bf16 %v6734_v17, %v6687_v21  ;;  %v8492_v56 = vld [vmem:[#allocation31_spill] sm:$0xff] }
 0x1ff   : > { %v1139_v52 = vmul.f32 0.5, %v1138_v51  ;;  %v1128_v6 = vmul.f32 %v5281_v24, %v1127_v1  ;;  %v1735_v31 = vpack.c.bf16 %v1671_v26, %v1671_v26  ;;  %vm1134_vm10 = vmor %vm1132_vm6, %vm1133_vm7  ;;  %v7300_v26 = vunpack.c.h.bf16 %v5048_v59 }
 0x200   : > { %v1670_v43 = vmul.f32 %v1606_v42, %v6870_v46  ;;  %v730_v51 = vadd.f32 %v7248_v28, %v729_v9 }
 0x201   : > { %v7236_v37 = vpop.f32.mrf.mxu0  ;;  %v1140_v15 = vsub.f32 1.5, %v1139_v52  ;;  %v1129_v50 = vmul.f32 0.5, %v1128_v6  ;;  %v7302_v52 = vunpack.c.l.bf16 %v5048_v59  ;;  %640 = vadd.xlane.f32.xlu1 %v7300_v26 }
 0x202   : > { %v1734_v38 = vpack.c.bf16 %v1670_v43, %v1670_v43  ;;  %v2072_v43 = vunpack.c.l.b16 %v1735_v31 }
 0x203   : > { %v1141_v35 = vmul.f32 %v5279_v57, %v1140_v15  ;;  %v1130_v62 = vsub.f32 1.5, %v1129_v50  ;;  %638 = vadd.xlane.f32.xlu0 %v7302_v52  ;;  %v731_v9 = vadd.f32 %v7302_v52, %v730_v51 }
 0x204   : > { %2591 = vmatmul.bf16.gmra.mxu0 %v8481_v32  ;;  %v2071_v1 = vunpack.c.l.b16 %v1734_v38 }
 0x205   : > { %v1145_v6 = vsel %vm7290_vm8, %v5279_v57, %v1141_v35  ;;  %v1131_v21 = vmul.f32 %v5281_v24, %v1130_v62  ;;  %v8491_v57 = vld [vmem:[#allocation32_spill] sm:$0xff] }
 0x206   : > { %v1497_v17 = vsel %vm793_vm9, %v1145_v6, 0.0  ;;  %v7312_v15 = vpack.c.b16 %v2072_v43, %v2071_v1  ;;  %v5049_v35 = vld [vmem:[%s5754_s10 + $0xb8] sm:$0xff]   ;;  %s4461_s10 = sshll.u32 %s4458_s19, 4  ;;  %s4462_s10 = int_to_ptr.hbm [resolvable:$true] %s4461_s10 }
 0x207   : > { %v1135_v58 = vsel %vm1134_vm10, %v5281_v24, %v1131_v21  ;;  %v1609_v42 = vmul.f32 %v8491_v57, %v1497_v17  ;;  %v7319_v62 = vunpack.c.l.bf16 %v5049_v35  ;;  %v732_v24 = vadd.f32 %v7300_v26, %v731_v9  ;;  %v1817_v57 = vld [vmem:[%s5762_s14 + $0x178] sm:$0xff]  ;;  %s5481_s23 = sshra.s32 %s4462_s10, 4  ;;  %s5482_s23 = int_to_ptr.hbm [resolvable:$true] %s5481_s23 }
 0x208   : > { %v1496_v31 = vsel %vm792_vm11, %v1135_v58, 0.0  ;;  %8490 = vst [vmem:[#allocation40_spill] sm:$0xff] %v7312_v15  ;;  %v7327_v43 = vunpack.c.h.bf16 %v5049_v35  ;;  %s5483_s9 = scalar_lea.hbm %s5482_s23, 256  ;;  %p5488_p2 = scmp.lt.s32.totalorder %s5482_s23, %s8307_s8 }
 0x209   : > { %v7267_v40 = vpop.f32.mrf.mxu0  ;;  %2172 = vmatmul.bf16.gmra.mxu1 %v7271_v63  ;;  %v1673_v51 = vmul.f32 %v1609_v42, %v6870_v46  ;;  %v733_v1 = vadd.f32 %v7319_v62, %v732_v24  ;;  %642 = vadd.xlane.f32.xlu2 %v7319_v62  ;;  %v1803_v63 = vld [vmem:[%s5762_s14 + $0x108] sm:$0xff]  ;;  %p5484_p1 = scmp.ne.s32.totalorder %s5482_s23, %s5483_s9  ;;  %p5489_p10 = scmp.lt.s32.totalorder %s5487_s11, %s5483_s9 }
 0x20b   : > { %v734_v6 = vadd.f32 %v7327_v43, %v733_v1  ;;  %644 = vadd.xlane.f32.xlu0 %v7327_v43  ;;  %v1737_v58 = vpack.c.bf16 %v1673_v51, %v1673_v51  ;;  %p5485_p4 = pnand %p5484_p1, %p5693_p7  ;;  %p5490_p11 = por %p5489_p10, %p5488_p2 }
 0x20d   : > { %v735_v9 = vrot.slane %v734_v6, 4  ;;  %v2074_v24 = vunpack.c.l.b16 %v1737_v58  ;;  %v2264_v58 = vunpack.c.l.b16 %v1878_v23  ;;  %v1810_v23 = vld [vmem:[%s5762_s14 + $0x140] sm:$0xff]  ;;  %p5486_p8 = pneg %p5485_p4 }
 0x20f   : > { %v736_v42 = vadd.f32 %v735_v9, %v734_v6  ;;  %p5491_p9 = pnand %p5490_p11, %p5486_p8 }
 0x211   : > { %v7287_v60 = vpop.f32.mrf.mxu0  ;;  %v737_v1 = vrot.slane %v736_v42, 2 }
 0x213   : > { %v738_v51 = vadd.f32 %v737_v1, %v736_v42 }
 0x214   : > { %2596 = vmatmul.bf16.gmra.mxu0 %v8489_v45  ;;  %v1608_v45 = vmul.f32 %v8492_v56, %v1496_v31  ;;  %v1816_v31 = vld [vmem:[%s5762_s14 + $0x170] sm:$0xff] }
 0x215   : > { %v1880_v56 = vpack.c.bf16 %v1816_v31, %v1816_v31  ;;  %v739_v6 = vrot.slane %v738_v51, 1  ;;  %v1812_v31 = vld [vmem:[%s5762_s14 + $0x150] sm:$0xff] }
 0x216   : > { %v1672_v59 = vmul.f32 %v1608_v45, %v6870_v46  ;;  %v8493_v46 = vpack.c.bf16 %v6832_v13, %v6778_v14  ;;  %v1881_v45 = vpack.c.bf16 %v1817_v57, %v1817_v57  ;;  %v1813_v57 = vld [vmem:[%s5762_s14 + $0x158] sm:$0xff]  ;;  %v1876_v22 = vpack.c.bf16 %v1812_v31, %v1812_v31  ;;  %v1808_v31 = vld [vmem:[%s5762_s14 + $0x130] sm:$0xff]  ;;  %v1807_v13 = vld [vmem:[%s5762_s14 + $0x128] sm:$0xff] }
 0x217   : > { %v2266_v50 = vunpack.c.l.b16 %v1880_v56  ;;  %v1877_v42 = vpack.c.bf16 %v1813_v57, %v1813_v57  ;;  %v1811_v56 = vld [vmem:[%s5762_s14 + $0x148] sm:$0xff]  ;;  %v1809_v57 = vld [vmem:[%s5762_s14 + $0x138] sm:$0xff] }
 0x218   : > { %v1736_v17 = vpack.c.bf16 %v1672_v59, %v1672_v59  ;;  %v2267_v32 = vunpack.c.l.b16 %v1881_v45  ;;  %v1815_v59 = vld [vmem:[%s5762_s14 + $0x168] sm:$0xff] }
 0x219   : > { %v7310_v38 = vpop.f32.mrf.mxu0  ;;  %2177 = vmatmul.bf16.gmra.mxu1 %v7312_v15  ;;  %v1879_v4 = vpack.c.bf16 %v1815_v59, %v1815_v59  ;;  %v1802_v15 = vld [vmem:[%s5762_s14 + $0x100] sm:$0xff] }
 0x21a   : > { %v2073_v35 = vunpack.c.l.b16 %v1736_v17  ;;  %v2275_v53 = vpack.c.b16 %v2267_v32, %v2266_v50  ;;  %v7346_v17 = vpop.xlane.xlu1 %616  ;;  %v7351_v32 = vadd.f32 %v739_v6, %v738_v51 }
 0x21b   : > { %v2265_v9 = vunpack.c.l.b16 %v1879_v4  ;;  %5282 = vrsqrt.f32 %v7346_v17  ;;  %v2263_v4 = vunpack.c.l.b16 %v1877_v42  ;;  %vm1162_vm12 = vweird.f32 %v7346_v17 }
 0x21c   : > { %v7342_v14 = vpack.c.b16 %v2074_v24, %v2073_v35  ;;  %2284 = vmatpush.bf16.msra.mxu2 %v2275_v53  ;;  %v2262_v53 = vunpack.c.l.b16 %v1876_v22  ;;  %v1874_v35 = vpack.c.bf16 %v1810_v23, %v1810_v23  ;;  %v1875_v24 = vpack.c.bf16 %v1811_v56, %v1811_v56 }
 0x21d   : > { %v1872_v56 = vpack.c.bf16 %v1808_v31, %v1808_v31  ;;  %vm1560_vm15 = vweird.f32 %v7351_v32  ;;  %vm795_vm3 = vcmp.gt.f32.partialorder %v7346_v17, 0.0  ;;  %vm1532_vm7 = vcmp.gt.f32.partialorder %v7351_v32, 0.0 }
 0x21e   : > { %8494 = vst [vmem:[#allocation32_spill] sm:$0xff] %v7342_v14  ;;  %v2273_v45 = vpack.c.b16 %v2263_v4, %v2262_v53  ;;  %v2260_v6 = vunpack.c.l.b16 %v1874_v35 }
 0x221   : > { %v7331_v21 = vpop.f32.mrf.mxu0  ;;  %v5283_v1 = vpop.eup %5282 }
 0x222   : > { %v1157_v51 = vmul.f32 %v5283_v1, %v7346_v17  ;;  %vm1163_vm13 = vweird.f32 %v5283_v1 }
 0x223   : > { %vm7380_vm2 = vmor %vm1162_vm12, %vm1163_vm13 }
 0x224   : > { %2601 = vmatmul.bf16.gmra.mxu0 %v8493_v46  ;;  %v2274_v46 = vpack.c.b16 %v2265_v9, %v2264_v58  ;;  %v2261_v58 = vunpack.c.l.b16 %v1875_v24  ;;  %v1158_v42 = vmul.f32 %v5283_v1, %v1157_v51 }
 0x226   : > { %2285 = vmatpush.bf16.msra.mxu2 %v2274_v46  ;;  %v8495_v46 = vpack.c.bf16 %v6956_v34, %v6882_v27  ;;  %v2272_v4 = vpack.c.b16 %v2261_v58, %v2260_v6  ;;  %v1159_v35 = vmul.f32 0.5, %v1158_v42  ;;  %v2258_v34 = vunpack.c.l.b16 %v1872_v56 }
 0x228   : > { %v1160_v6 = vsub.f32 1.5, %v1159_v35 }
 0x229   : > { %v7340_v48 = vpop.f32.mrf.mxu0  ;;  %v7353_v50 = vpop.xlane.xlu0 %614  ;;  %2182 = vmatmul.bf16.gmra.mxu1 %v7342_v14 }
 0x22a   : > { %5284 = vrsqrt.f32 %v7353_v50  ;;  %2286 = vmatpush.bf16.msra.mxu2 %v2273_v45  ;;  %v1873_v45 = vpack.c.bf16 %v1809_v57, %v1809_v57  ;;  %vm1152_vm14 = vweird.f32 %v7353_v50  ;;  %vm794_vm6 = vcmp.gt.f32.partialorder %v7353_v50, 0.0 }
 0x22b   : > { %5286 = vrsqrt.f32 %v7351_v32 }
 0x22c   : > { %v2259_v51 = vunpack.c.l.b16 %v1873_v45 }
 0x22d   : > { %v7387_v45 = vpop.xlane.xlu2 %618 }
 0x22e   : > { %2287 = vmatpush.bf16.msra.mxu2 %v2272_v4  ;;  %v2271_v42 = vpack.c.b16 %v2259_v51, %v2258_v34  ;;  %5288 = vrsqrt.f32 %v7387_v45  ;;  %v1804_v34 = vld [vmem:[%s5762_s14 + $0x110] sm:$0xff]  ;;  %v1805_v51 = vld [vmem:[%s5762_s14 + $0x118] sm:$0xff]  ;;  %vm1172_vm8 = vweird.f32 %v7387_v45  ;;  %vm796_vm13 = vcmp.gt.f32.partialorder %v7387_v45, 0.0 }
 0x22f   : > { %v1868_v14 = vpack.c.bf16 %v1804_v34, %v1804_v34 }
 0x230   : > { %v5285_v9 = vpop.eup %5284 }
 0x231   : > { %v7360_v59 = vpop.f32.mrf.mxu0  ;;  %v5287_v22 = vpop.eup %5286  ;;  %v1147_v53 = vmul.f32 %v5285_v9, %v7353_v50  ;;  %vm1153_vm0 = vweird.f32 %v5285_v9 }
 0x232   : > { %v1555_v23 = vmul.f32 %v5287_v22, %v7351_v32  ;;  %vm1561_vm1 = vweird.f32 %v5287_v22  ;;  %vm7391_vm4 = vmor %vm1152_vm14, %vm1153_vm0  ;;  %2288 = vmatpush.bf16.msra.mxu2 %v2271_v42 }
 0x233   : > { %v1148_v24 = vmul.f32 %v5285_v9, %v1147_v53  ;;  %v1871_v53 = vpack.c.bf16 %v1807_v13, %v1807_v13  ;;  %v7396_v13 = vpop.xlane.xlu0 %620  ;;  %vm7403_vm5 = vmor %vm1560_vm15, %vm1561_vm1 }
 0x234   : > { %2606 = vmatmul.bf16.gmra.mxu0 %v8495_v46  ;;  %v1556_v27 = vmul.f32 %v5287_v22, %v1555_v23  ;;  %v1806_v46 = vld [vmem:[%s5762_s14 + $0x120] sm:$0xff]  ;;  %v1161_v23 = vmul.f32 %v5283_v1, %v1160_v6  ;;  %5290 = vrsqrt.f32 %v7396_v13  ;;  %vm1182_vm10 = vweird.f32 %v7396_v13 }
 0x235   : > { %v1149_v58 = vmul.f32 0.5, %v1148_v24  ;;  %v1870_v5 = vpack.c.bf16 %v1806_v46, %v1806_v46  ;;  %v2257_v42 = vunpack.c.l.b16 %v1871_v53  ;;  %v1867_v24 = vpack.c.bf16 %v1803_v63, %v1803_v63 }
 0x236   : > { %v1557_v31 = vmul.f32 0.5, %v1556_v27  ;;  %v1165_v6 = vsel %vm7380_vm2, %v5283_v1, %v1161_v23  ;;  %v1869_v1 = vpack.c.bf16 %v1805_v51, %v1805_v51  ;;  %vm797_vm15 = vcmp.gt.f32.partialorder %v7396_v13, 0.0 }
 0x237   : > { %v1150_v56 = vsub.f32 1.5, %v1149_v58  ;;  %v2256_v27 = vunpack.c.l.b16 %v1870_v5 }
 0x238   : > { %v1558_v35 = vsub.f32 1.5, %v1557_v31  ;;  %v1499_v31 = vsel %vm795_vm3, %v1165_v6, 0.0  ;;  %v2255_v53 = vunpack.c.l.b16 %v1869_v1  ;;  %v5289_v6 = vpop.eup %5288 }
 0x239   : > { %v7375_v11 = vpop.f32.mrf.mxu0  ;;  %v1151_v58 = vmul.f32 %v5285_v9, %v1150_v56  ;;  %v1611_v4 = vmul.f32 %v6918_v39, %v1499_v31  ;;  %v2270_v56 = vpack.c.b16 %v2257_v42, %v2256_v27  ;;  %v2253_v31 = vunpack.c.l.b16 %v1867_v24 }
 0x23a   : > { %v1559_v5 = vmul.f32 %v5287_v22, %v1558_v35  ;;  %v2254_v35 = vunpack.c.l.b16 %v1868_v14  ;;  %v5291_v51 = vpop.eup %5290  ;;  %vm1173_vm9 = vweird.f32 %v5289_v6 }
 0x23b   : > { %v1155_v57 = vsel %vm7391_vm4, %v5285_v9, %v1151_v58  ;;  %2289 = vmatpush.bf16.msra.mxu2 %v2270_v56  ;;  %v1866_v9 = vpack.c.bf16 %v1802_v15, %v1802_v15  ;;  %v1177_v58 = vmul.f32 %v5291_v51, %v7396_v13  ;;  %vm1183_vm11 = vweird.f32 %v5291_v51  ;;  %vm7443_vm12 = vmor %vm1172_vm8, %vm1173_vm9 }
 0x23c   : > { %v1563_v50 = vsel %vm7403_vm5, %v5287_v22, %v1559_v5  ;;  %v1498_v23 = vsel %vm794_vm6, %v1155_v57, 0.0  ;;  %v1167_v22 = vmul.f32 %v5289_v6, %v7387_v45  ;;  %v2269_v27 = vpack.c.b16 %v2255_v53, %v2254_v35  ;;  %vm1184_vm14 = vmor %vm1182_vm10, %vm1183_vm11 }
 0x23d   : > { %v7421_v32 = vsel %vm1532_vm7, %v1563_v50, 0.0  ;;  %v1610_v17 = vmul.f32 %v6938_v61, %v1498_v23  ;;  %v2252_v5 = vunpack.c.l.b16 %v1866_v9  ;;  %v8502_v61 = vpack.c.bf16 %v7065_v3, %v6996_v20 }
 0x23e   : > { %v1675_v34 = vmul.f32 %v1611_v4, %v7421_v32  ;;  %v1168_v14 = vmul.f32 %v5289_v6, %v1167_v22  ;;  %v1178_v63 = vmul.f32 %v5291_v51, %v1177_v58 }
 0x23f   : > { %v1674_v46 = vmul.f32 %v1610_v17, %v7421_v32  ;;  %2290 = vmatpush.bf16.msra.mxu2 %v2269_v27  ;;  %v2268_v57 = vpack.c.b16 %v2253_v31, %v2252_v5  ;;  %v7439_v17 = vpop.f32.mrf.mxu1  ;;  %v623_v27 = vpop.xlane.xlu1 %622 }
 0x240   : > { %v1739_v15 = vpack.c.bf16 %v1675_v34, %v1675_v34  ;;  %v1169_v4 = vmul.f32 0.5, %v1168_v14  ;;  %v1179_v23 = vmul.f32 0.5, %v1178_v63  ;;  %v625_v34 = vpop.xlane.xlu2 %624  ;;  %vm1192_vm2 = vweird.f32 %v623_v27 }
 0x241   : > { %v7424_v39 = vpop.f32.mrf.mxu0  ;;  %v1738_v42 = vpack.c.bf16 %v1674_v46, %v1674_v46  ;;  %5292 = vrsqrt.f32 %v625_v34  ;;  %vm1202_vm0 = vweird.f32 %v625_v34  ;;  %vm799_vm5 = vcmp.gt.f32.partialorder %v625_v34, 0.0 }
 0x242   : > { %v2205_v50 = vunpack.c.l.b16 %v1739_v15  ;;  %v1170_v56 = vsub.f32 1.5, %v1169_v4  ;;  %v1180_v53 = vsub.f32 1.5, %v1179_v23  ;;  %5294 = vrsqrt.f32 %v623_v27 }
 0x243   : > { %v2204_v1 = vunpack.c.l.b16 %v1738_v42  ;;  %2291 = vmatpush.bf16.msra.mxu2 %v2268_v57  ;;  %vm798_vm7 = vcmp.gt.f32.partialorder %v623_v27, 0.0 }
 0x244   : > { %2611 = vmatmul.bf16.gmra.mxu0 %v8502_v61  ;;  %v1171_v24 = vmul.f32 %v5289_v6, %v1170_v56  ;;  %v1181_v22 = vmul.f32 %v5291_v51, %v1180_v53 }
 0x245   : > { %v7435_v20 = vpack.c.b16 %v2205_v50, %v2204_v1 }
 0x246   : > { %v1175_v46 = vsel %vm7443_vm12, %v5289_v6, %v1171_v24  ;;  %v1185_v5 = vsel %vm1184_vm14, %v5291_v51, %v1181_v22  ;;  %v8505_v51 = vpack.c.bf16 %v7127_v8, %v7091_v36 }
 0x247   : > { %2292 = vmatmul.bf16.vlgmr.msra.gmra.mxu2 %v7435_v20  ;;  %v1500_v58 = vsel %vm796_vm13, %v1175_v46, 0.0  ;;  %v1501_v14 = vsel %vm797_vm15, %v1185_v5, 0.0  ;;  %v5293_v31 = vpop.eup %5292  ;;  %v7460_v6 = vpop.f32.mrf.mxu1 }
 0x248   : > { %v1612_v61 = vmul.f32 %v7019_v25, %v1500_v58  ;;  %v1613_v45 = vmul.f32 %v7031_v55, %v1501_v14  ;;  %v5295_v63 = vpop.eup %5294  ;;  %v1197_v4 = vmul.f32 %v5293_v31, %v625_v34  ;;  %vm1203_vm1 = vweird.f32 %v5293_v31 }
 0x249   : > { %v7437_v3 = vpop.f32.mrf.mxu0  ;;  %v1187_v57 = vmul.f32 %v5295_v63, %v623_v27  ;;  %vm1193_vm3 = vweird.f32 %v5295_v63  ;;  %vm7469_vm4 = vmor %vm1202_vm0, %vm1203_vm1 }
 0x24a   : > { %v1676_v13 = vmul.f32 %v1612_v61, %v7421_v32  ;;  %v1677_v15 = vmul.f32 %v1613_v45, %v7421_v32  ;;  %v1198_v25 = vmul.f32 %v5293_v31, %v1197_v4  ;;  %vm1194_vm6 = vmor %vm1192_vm2, %vm1193_vm3  ;;  %v629_v61 = vpop.xlane.xlu1 %628  ;;  %v627_v45 = vpop.xlane.xlu0 %626 }
 0x24b   : > { %v1188_v55 = vmul.f32 %v5295_v63, %v1187_v57  ;;  %5296 = vrsqrt.f32 %v629_v61  ;;  %vm1222_vm8 = vweird.f32 %v629_v61  ;;  %vm1212_vm10 = vweird.f32 %v627_v45 }
 0x24c   : > { %v1740_v1 = vpack.c.bf16 %v1676_v13, %v1676_v13  ;;  %v1741_v50 = vpack.c.bf16 %v1677_v15, %v1677_v15  ;;  %v1199_v56 = vmul.f32 0.5, %v1198_v25  ;;  %5298 = vrsqrt.f32 %v627_v45 }
 0x24d   : > { %v1189_v53 = vmul.f32 0.5, %v1188_v55  ;;  %vm801_vm13 = vcmp.gt.f32.partialorder %v629_v61, 0.0  ;;  %vm800_vm15 = vcmp.gt.f32.partialorder %v627_v45, 0.0 }
 0x24e   : > { %v2206_v23 = vunpack.c.l.b16 %v1740_v1  ;;  %v2207_v35 = vunpack.c.l.b16 %v1741_v50  ;;  %v1200_v24 = vsub.f32 1.5, %v1199_v56 }
 0x24f   : > { %v1190_v36 = vsub.f32 1.5, %v1189_v53  ;;  %v7478_v15 = vpop.f32.mrf.mxu1  ;;  %v8508_v53 = vpack.c.bf16 %v7172_v7, %v7145_v47 }
 0x250   : > { %v7465_v22 = vpack.c.b16 %v2207_v35, %v2206_v23  ;;  %v1201_v5 = vmul.f32 %v5293_v31, %v1200_v24 }
 0x251   : > { %v7456_v42 = vpop.f32.mrf.mxu0  ;;  %v1191_v14 = vmul.f32 %v5295_v63, %v1190_v36  ;;  %v5297_v25 = vpop.eup %5296 }
 0x252   : > { %v1205_v13 = vsel %vm7469_vm4, %v5293_v31, %v1201_v5  ;;  %v5299_v31 = vpop.eup %5298  ;;  %v1217_v23 = vmul.f32 %v5297_v25, %v629_v61  ;;  %vm1223_vm9 = vweird.f32 %v5297_v25  ;;  %v7503_v61 = vld [vmem:[%s8302_s3] ss:$0 sm:$0xff] }
 0x253   : > { %v1503_v4 = vsel %vm799_vm5, %v1205_v13, 0.0  ;;  %v1195_v57 = vsel %vm1194_vm6, %v5295_v63, %v1191_v14  ;;  %v1207_v56 = vmul.f32 %v5299_v31, %v627_v45  ;;  %vm1213_vm11 = vweird.f32 %v5299_v31  ;;  %vm1224_vm12 = vmor %vm1222_vm8, %vm1223_vm9 }
 0x254   : > { %2616 = vmatmul.bf16.gmra.mxu0 %v8505_v51  ;;  %v1615_v1 = vmul.f32 %v7102_v41, %v1503_v4  ;;  %v1502_v34 = vsel %vm798_vm7, %v1195_v57, 0.0  ;;  %v1218_v63 = vmul.f32 %v5297_v25, %v1217_v23  ;;  %vm1214_vm14 = vmor %vm1212_vm10, %vm1213_vm11 }
 0x255   : > { %v1614_v51 = vmul.f32 %v7104_v19, %v1502_v34  ;;  %v1208_v24 = vmul.f32 %v5299_v31, %v1207_v56  ;;  %v631_v34 = vpop.xlane.xlu2 %630 }
 0x256   : > { %v1679_v55 = vmul.f32 %v1615_v1, %v7421_v32  ;;  %v1219_v19 = vmul.f32 0.5, %v1218_v63  ;;  %5300 = vrsqrt.f32 %v631_v34  ;;  %vm1232_vm0 = vweird.f32 %v631_v34 }
 0x257   : > { %2297 = vmatmul.bf16.gmra.mxu2 %v7465_v22  ;;  %v1678_v50 = vmul.f32 %v1614_v51, %v7421_v32  ;;  %v7489_v5 = vpop.f32.mrf.mxu1  ;;  %v1209_v14 = vmul.f32 0.5, %v1208_v24  ;;  %vm802_vm5 = vcmp.gt.f32.partialorder %v631_v34, 0.0 }
 0x258   : > { %v1743_v41 = vpack.c.bf16 %v1679_v55, %v1679_v55  ;;  %v1220_v13 = vsub.f32 1.5, %v1219_v19 }
 0x259   : > { %v7467_v46 = vpop.f32.mrf.mxu0  ;;  %v1742_v35 = vpack.c.bf16 %v1678_v50, %v1678_v50  ;;  %v1210_v47 = vsub.f32 1.5, %v1209_v14  ;;  %v633_v50 = vpop.xlane.xlu0 %632 }
 0x25a   : > { %v2209_v36 = vunpack.c.l.b16 %v1743_v41  ;;  %v1221_v1 = vmul.f32 %v5297_v25, %v1220_v13  ;;  %5302 = vrsqrt.f32 %v633_v50  ;;  %vm1242_vm2 = vweird.f32 %v633_v50 }
 0x25b   : > { %v2208_v58 = vunpack.c.l.b16 %v1742_v35  ;;  %v1211_v51 = vmul.f32 %v5299_v31, %v1210_v47  ;;  %vm803_vm7 = vcmp.gt.f32.partialorder %v633_v50, 0.0 }
 0x25c   : > { %v1225_v55 = vsel %vm1224_vm12, %v5297_v25, %v1221_v1  ;;  %v5301_v45 = vpop.eup %5300 }
 0x25d   : > { %v7491_v4 = vpack.c.b16 %v2209_v36, %v2208_v58  ;;  %v1505_v23 = vsel %vm801_vm13, %v1225_v55, 0.0  ;;  %v1215_v56 = vsel %vm1214_vm14, %v5299_v31, %v1211_v51  ;;  %v1227_v31 = vmul.f32 %v5301_v45, %v631_v34 }
 0x25e   : > { %v1617_v35 = vmul.f32 %v7153_v49, %v1505_v23  ;;  %v2486_v49 = vpack.c.bf16 %v7460_v6, %v7439_v17  ;;  %vm1233_vm1 = vweird.f32 %v5301_v45 }
 0x25f   : > { %v7505_v41 = vpop.f32.mrf.mxu1  ;;  %v1228_v13 = vmul.f32 %v5301_v45, %v1227_v31  ;;  %vm7514_vm4 = vmor %vm1232_vm0, %vm1233_vm1 }
 0x260   : > { %v1681_v58 = vmul.f32 %v1617_v35, %v7421_v32  ;;  %v5303_v19 = vpop.eup %5302 }
 0x261   : > { %v7482_v27 = vpop.f32.mrf.mxu0  ;;  %v1237_v36 = vmul.f32 %v5303_v19, %v633_v50  ;;  %v1229_v55 = vmul.f32 0.5, %v1228_v13  ;;  %vm1243_vm3 = vweird.f32 %v5303_v19 }
 0x262   : > { %v1745_v47 = vpack.c.bf16 %v1681_v58, %v1681_v58  ;;  %vm7519_vm6 = vmor %vm1242_vm2, %vm1243_vm3 }
 0x263   : > { %v1238_v1 = vmul.f32 %v5303_v19, %v1237_v36 }
 0x264   : > { %2621 = vmatmul.bf16.gmra.mxu0 %v8508_v53  ;;  %v1504_v53 = vsel %vm800_vm15, %v1215_v56, 0.0  ;;  %v2211_v23 = vunpack.c.l.b16 %v1745_v47 }
 0x265   : > { %v1616_v63 = vmul.f32 %v7155_v12, %v1504_v53  ;;  %v1239_v56 = vmul.f32 0.5, %v1238_v1  ;;  %v1230_v53 = vsub.f32 1.5, %v1229_v55 }
 0x267   : > { %2302 = vmatmul.bf16.gmra.mxu2 %v7491_v4  ;;  %v1680_v25 = vmul.f32 %v1616_v63, %v7421_v32  ;;  %v1231_v58 = vmul.f32 %v5301_v45, %v1230_v53  ;;  %v7525_v36 = vpop.f32.mrf.mxu1 }
 0x269   : > { %v7493_v57 = vpop.f32.mrf.mxu0  ;;  %v1744_v12 = vpack.c.bf16 %v1680_v25, %v1680_v25  ;;  %v1235_v34 = vsel %vm7514_vm4, %v5301_v45, %v1231_v58  ;;  %v2487_v58 = vpack.c.bf16 %v7489_v5, %v7478_v15 }
 0x26a   : > { %v1506_v1 = vsel %vm802_vm5, %v1235_v34, 0.0 }
 0x26b   : > { %v2210_v51 = vunpack.c.l.b16 %v1744_v12  ;;  %v1618_v50 = vmul.f32 %v7199_v44, %v1506_v1 }
 0x26d   : > { %v7512_v17 = vpack.c.b16 %v2211_v23, %v2210_v51  ;;  %v7523_v31 = vpop.xlane.xlu2 %636  ;;  %v1682_v45 = vmul.f32 %v1618_v50, %v7421_v32 }
 0x26e   : > { %5304 = vrsqrt.f32 %v7523_v31  ;;  %vm1262_vm8 = vweird.f32 %v7523_v31  ;;  %vm805_vm13 = vcmp.gt.f32.partialorder %v7523_v31, 0.0 }
 0x26f   : > { %v7547_v34 = vpop.f32.mrf.mxu1 }
 0x271   : > { %v2587_v24 = vpop.f32.mrf.mxu0 }
 0x272   : > { %v2588_v14 = vadd.f32 %v7503_v61, %v2587_v24  ;;  %v1240_v24 = vsub.f32 1.5, %v1239_v56 }
 0x274   : > { %2626 = vmatmul.bf16.gmra.mxu0 %v2486_v49  ;;  %v2747_v35 = vmax.f32 %v2588_v14, 0.0  ;;  %v1241_v12 = vmul.f32 %v5303_v19, %v1240_v24  ;;  %v7528_v14 = vpop.xlane.xlu1 %634 }
 0x275   : > { %5306 = vrsqrt.f32 %v7528_v14  ;;  %vm1252_vm10 = vweird.f32 %v7528_v14  ;;  %vm804_vm15 = vcmp.gt.f32.partialorder %v7528_v14, 0.0 }
 0x276   : > { %v2811_v13 = vpack.c.bf16 %v2747_v35, %v2747_v35  ;;  %v1245_v51 = vsel %vm7519_vm6, %v5303_v19, %v1241_v12  ;;  %v1746_v12 = vpack.c.bf16 %v1682_v45, %v1682_v45 }
 0x277   : > { %2307 = vmatmul.bf16.gmra.mxu2 %v7512_v17  ;;  %v1507_v23 = vsel %vm803_vm7, %v1245_v51, 0.0 }
 0x278   : > { %v1619_v56 = vmul.f32 %v7201_v29, %v1507_v23  ;;  %v2891_v53 = vunpack.c.l.b16 %v2811_v13  ;;  %v2212_v51 = vunpack.c.l.b16 %v1746_v12  ;;  %v7567_v12 = vpop.xlane.xlu0 %638 }
 0x279   : > { %v2589_v6 = vpop.f32.mrf.mxu0  ;;  %vm1272_vm2 = vweird.f32 %v7567_v12  ;;  %vm806_vm7 = vcmp.gt.f32.partialorder %v7567_v12, 0.0 }
 0x27a   : > { %v2590_v25 = vadd.f32 %v7503_v61, %v2589_v6  ;;  %v5305_v6 = vpop.eup %5304  ;;  %v1683_v63 = vmul.f32 %v1619_v56, %v7421_v32 }
 0x27b   : > { %v1257_v19 = vmul.f32 %v5305_v6, %v7523_v31  ;;  %vm1263_vm9 = vweird.f32 %v5305_v6 }
 0x27c   : > { %v2748_v47 = vmax.f32 %v2590_v25, 0.0  ;;  %v5307_v25 = vpop.eup %5306  ;;  %vm7553_vm12 = vmor %vm1262_vm8, %vm1263_vm9 }
 0x27d   : > { %v1247_v44 = vmul.f32 %v5307_v25, %v7528_v14  ;;  %v1258_v13 = vmul.f32 %v5305_v6, %v1257_v19  ;;  %vm1253_vm11 = vweird.f32 %v5307_v25  ;;  %v7563_v19 = vpop.xlane.xlu1 %640 }
 0x27e   : > { %v2812_v55 = vpack.c.bf16 %v2748_v47, %v2748_v47  ;;  %v1747_v47 = vpack.c.bf16 %v1683_v63, %v1683_v63  ;;  %vm7559_vm14 = vmor %vm1252_vm10, %vm1253_vm11  ;;  %5308 = vrsqrt.f32 %v7563_v19  ;;  %vm1282_vm0 = vweird.f32 %v7563_v19 }
 0x27f   : > { %v1248_v1 = vmul.f32 %v5307_v25, %v1247_v44  ;;  %5310 = vrsqrt.f32 %v7567_v12  ;;  %vm807_vm5 = vcmp.gt.f32.partialorder %v7563_v19, 0.0 }
 0x280   : > { %v2892_v35 = vunpack.c.l.b16 %v2812_v55  ;;  %v1259_v55 = vmul.f32 0.5, %v1258_v13  ;;  %v2213_v15 = vunpack.c.l.b16 %v1747_v47 }
 0x281   : > { %v2592_v24 = vpop.f32.mrf.mxu0  ;;  %v1249_v5 = vmul.f32 0.5, %v1248_v1 }
 0x282   : > { %v7543_v49 = vpack.c.b16 %v2892_v35, %v2891_v53  ;;  %v2593_v29 = vadd.f32 %v7503_v61, %v2592_v24  ;;  %v1260_v23 = vsub.f32 1.5, %v1259_v55  ;;  %v7551_v56 = vpack.c.b16 %v2213_v15, %v2212_v51  ;;  %v7576_v15 = vpop.f32.mrf.mxu1 }
 0x283   : > { %v1250_v24 = vsub.f32 1.5, %v1249_v5 }
 0x284   : > { %2631 = vmatmul.bf16.gmra.mxu0 %v2487_v58  ;;  %v2749_v50 = vmax.f32 %v2593_v29, 0.0  ;;  %v1261_v63 = vmul.f32 %v5305_v6, %v1260_v23 }
 0x285   : > { %v1251_v44 = vmul.f32 %v5307_v25, %v1250_v24 }
 0x286   : > { %v2813_v29 = vpack.c.bf16 %v2749_v50, %v2749_v50  ;;  %v1265_v47 = vsel %vm7553_vm12, %v5305_v6, %v1261_v63 }
 0x287   : > { %2312 = vmatmul.bf16.gmra.mxu2 %v7551_v56  ;;  %v1509_v31 = vsel %vm805_vm13, %v1265_v47, 0.0  ;;  %v1255_v1 = vsel %vm7559_vm14, %v5307_v25, %v1251_v44  ;;  %v2488_v25 = vpack.c.bf16 %v7525_v36, %v7505_v41 }
 0x288   : > { %v1621_v14 = vmul.f32 %v7248_v28, %v1509_v31  ;;  %v1508_v55 = vsel %vm804_vm15, %v1255_v1, 0.0  ;;  %v2893_v50 = vunpack.c.l.b16 %v2813_v29 }
 0x289   : > { %v2594_v53 = vpop.f32.mrf.mxu0  ;;  %v1620_v5 = vmul.f32 %v7255_v2, %v1508_v55 }
 0x28a   : > { %v2595_v45 = vadd.f32 %v7503_v61, %v2594_v53  ;;  %v5309_v53 = vpop.eup %5308  ;;  %v1685_v24 = vmul.f32 %v1621_v14, %v7421_v32 }
 0x28b   : > { %v1684_v35 = vmul.f32 %v1620_v5, %v7421_v32  ;;  %v1277_v63 = vmul.f32 %v5309_v53, %v7563_v19  ;;  %vm1283_vm1 = vweird.f32 %v5309_v53  ;;  %v7592_v5 = vpop.xlane.xlu2 %642 }
 0x28c   : > { %v2750_v13 = vmax.f32 %v2595_v45, 0.0  ;;  %v5311_v45 = vpop.eup %5310  ;;  %vm1284_vm4 = vmor %vm1282_vm0, %vm1283_vm1  ;;  %5312 = vrsqrt.f32 %v7592_v5  ;;  %vm1292_vm8 = vweird.f32 %v7592_v5  ;;  %vm808_vm13 = vcmp.gt.f32.partialorder %v7592_v5, 0.0 }
 0x28d   : > { %v1267_v58 = vmul.f32 %v5311_v45, %v7567_v12  ;;  %v1748_v44 = vpack.c.bf16 %v1684_v35, %v1684_v35  ;;  %v1278_v29 = vmul.f32 %v5309_v53, %v1277_v63  ;;  %vm1273_vm3 = vweird.f32 %v5311_v45 }
 0x28e   : > { %v2814_v51 = vpack.c.bf16 %v2750_v13, %v2750_v13  ;;  %v1749_v13 = vpack.c.bf16 %v1685_v24, %v1685_v24  ;;  %vm1274_vm6 = vmor %vm1272_vm2, %vm1273_vm3 }
 0x28f   : > { %v1268_v47 = vmul.f32 %v5311_v45, %v1267_v58  ;;  %v2214_v31 = vunpack.c.l.b16 %v1748_v44  ;;  %v1279_v1 = vmul.f32 0.5, %v1278_v29 }
 0x290   : > { %v2894_v23 = vunpack.c.l.b16 %v2814_v51  ;;  %v2215_v51 = vunpack.c.l.b16 %v1749_v13 }
 0x291   : > { %v2597_v6 = vpop.f32.mrf.mxu0  ;;  %v1269_v41 = vmul.f32 0.5, %v1268_v47  ;;  %v1280_v14 = vsub.f32 1.5, %v1279_v1 }
 0x292   : > { %v7584_v28 = vpack.c.b16 %v2894_v23, %v2893_v50  ;;  %v2598_v2 = vadd.f32 %v7503_v61, %v2597_v6  ;;  %v7590_v55 = vpack.c.b16 %v2215_v51, %v2214_v31  ;;  %v7594_v50 = vpop.xlane.xlu0 %644  ;;  %v7596_v23 = vpop.f32.mrf.mxu1 }
 0x293   : > { %v1270_v35 = vsub.f32 1.5, %v1269_v41  ;;  %5314 = vrsqrt.f32 %v7594_v50  ;;  %v5313_v1 = vpop.eup %5312  ;;  %vm1302_vm10 = vweird.f32 %v7594_v50  ;;  %vm809_vm15 = vcmp.gt.f32.partialorder %v7594_v50, 0.0 }
 0x294   : > { %2636 = vmatmul.bf16.gmra.mxu0 %v2488_v25  ;;  %v2751_v36 = vmax.f32 %v2598_v2, 0.0  ;;  %v1281_v25 = vmul.f32 %v5309_v53, %v1280_v14  ;;  %v1287_v12 = vmul.f32 %v5313_v1, %v7592_v5  ;;  %vm1293_vm9 = vweird.f32 %v5313_v1 }
 0x295   : > { %v1271_v63 = vmul.f32 %v5311_v45, %v1270_v35  ;;  %vm1294_vm12 = vmor %vm1292_vm8, %vm1293_vm9 }
 0x296   : > { %v2815_v58 = vpack.c.bf16 %v2751_v36, %v2751_v36  ;;  %v1285_v2 = vsel %vm1284_vm4, %v5309_v53, %v1281_v25 }
 0x297   : > { %2317 = vmatmul.bf16.gmra.mxu2 %v7590_v55  ;;  %v1511_v29 = vsel %vm807_vm5, %v1285_v2, 0.0  ;;  %v1275_v13 = vsel %vm1274_vm6, %v5311_v45, %v1271_v63  ;;  %v2489_v45 = vpack.c.bf16 %v7576_v15, %v7547_v34 }
 0x298   : > { %v1623_v31 = vmul.f32 %v7300_v26, %v1511_v29  ;;  %v1510_v19 = vsel %vm806_vm7, %v1275_v13, 0.0  ;;  %v2895_v14 = vunpack.c.l.b16 %v2815_v58  ;;  %v1288_v26 = vmul.f32 %v5313_v1, %v1287_v12 }
 0x299   : > { %v2599_v6 = vpop.f32.mrf.mxu0  ;;  %v1622_v51 = vmul.f32 %v7302_v52, %v1510_v19  ;;  %v5315_v41 = vpop.eup %5314 }
 0x29a   : > { %v2600_v24 = vadd.f32 %v7503_v61, %v2599_v6  ;;  %v1297_v36 = vmul.f32 %v5315_v41, %v7594_v50  ;;  %v2170_v63 = vpop.f32.mrf.mxu1  ;;  %v1289_v29 = vmul.f32 0.5, %v1288_v26  ;;  %vm1303_vm11 = vweird.f32 %v5315_v41 }
 0x29b   : > { %v1686_v53 = vmul.f32 %v1622_v51, %v7421_v32  ;;  %vm1304_vm14 = vmor %vm1302_vm10, %vm1303_vm11 }
 0x29c   : > { %v2752_v44 = vmax.f32 %v2600_v24, 0.0  ;;  %v1687_v24 = vmul.f32 %v1623_v31, %v7421_v32  ;;  %v1298_v52 = vmul.f32 %v5315_v41, %v1297_v36  ;;  %v1290_v15 = vsub.f32 1.5, %v1289_v29 }
 0x29d   : > { %v1750_v58 = vpack.c.bf16 %v1686_v53, %v1686_v53 }
 0x29e   : > { %v2816_v47 = vpack.c.bf16 %v2752_v44, %v2752_v44  ;;  %v1751_v44 = vpack.c.bf16 %v1687_v24, %v1687_v24  ;;  %v1299_v13 = vmul.f32 0.5, %v1298_v52  ;;  %v1291_v51 = vmul.f32 %v5313_v1, %v1290_v15 }
 0x2a0   : > { %v2896_v6 = vunpack.c.l.b16 %v2816_v47  ;;  %v2216_v47 = vunpack.c.l.b16 %v1750_v58  ;;  %v2217_v34 = vunpack.c.l.b16 %v1751_v44  ;;  %v1300_v31 = vsub.f32 1.5, %v1299_v13 }
 0x2a1   : > { %v2602_v35 = vpop.f32.mrf.mxu0  ;;  %v1295_v36 = vsel %vm1294_vm12, %v5313_v1, %v1291_v51 }
 0x2a2   : > { %v7614_v25 = vpack.c.b16 %v2896_v6, %v2895_v14  ;;  %v2603_v2 = vadd.f32 %v7503_v61, %v2602_v35  ;;  %v7620_v14 = vpack.c.b16 %v2217_v34, %v2216_v47  ;;  %v1301_v12 = vmul.f32 %v5315_v41, %v1300_v31  ;;  %v2173_v58 = vpop.f32.mrf.mxu1 }
 0x2a3   : > { %v1512_v53 = vsel %vm808_vm13, %v1295_v36, 0.0 }
 0x2a4   : > { %2641 = vmatmul.bf16.gmra.mxu0 %v2489_v45  ;;  %v2753_v19 = vmax.f32 %v2603_v2, 0.0  ;;  %v1305_v24 = vsel %vm1304_vm14, %v5315_v41, %v1301_v12  ;;  %v1624_v5 = vmul.f32 %v7319_v62, %v1512_v53  ;;  %v2490_v41 = vpack.c.bf16 %v2170_v63, %v7596_v23 }
 0x2a5   : > { %v1513_v52 = vsel %vm809_vm15, %v1305_v24, 0.0 }
 0x2a6   : > { %v2817_v45 = vpack.c.bf16 %v2753_v19, %v2753_v19  ;;  %v1625_v44 = vmul.f32 %v7327_v43, %v1513_v52  ;;  %v1688_v47 = vmul.f32 %v1624_v5, %v7421_v32 }
 0x2a7   : > { %2322 = vmatmul.bf16.gmra.mxu2 %v7620_v14 }
 0x2a8   : > { %v2897_v29 = vunpack.c.l.b16 %v2817_v45  ;;  %v1689_v1 = vmul.f32 %v1625_v44, %v7421_v32  ;;  %v1752_v15 = vpack.c.bf16 %v1688_v47, %v1688_v47 }
 0x2a9   : > { %v2604_v6 = vpop.f32.mrf.mxu0 }
 0x2aa   : > { %v2605_v35 = vadd.f32 %v7503_v61, %v2604_v6  ;;  %v1753_v31 = vpack.c.bf16 %v1689_v1, %v1689_v1  ;;  %v2218_v19 = vunpack.c.l.b16 %v1752_v15  ;;  %v2175_v62 = vpop.f32.mrf.mxu1 }
 0x2ab   : > { %v2491_v36 = vpack.c.bf16 %v2175_v62, %v2173_v58 }
 0x2ac   : > { %v2754_v26 = vmax.f32 %v2605_v35, 0.0  ;;  %v2219_v51 = vunpack.c.l.b16 %v1753_v31 }
 0x2ae   : > { %v2818_v2 = vpack.c.bf16 %v2754_v26, %v2754_v26  ;;  %v7632_v6 = vpack.c.b16 %v2219_v51, %v2218_v19 }
 0x2b0   : > { %v2898_v13 = vunpack.c.l.b16 %v2818_v2  ;;  %8517 = vst [vmem:[#allocation31_spill] sm:$0xff] %v7632_v6 }
 0x2b1   : > { %v2607_v50 = vpop.f32.mrf.mxu0 }
 0x2b2   : > { %v7630_v34 = vpack.c.b16 %v2898_v13, %v2897_v29  ;;  %v2178_v12 = vpop.f32.mrf.mxu1 }
 0x2b4   : > { %2646 = vmatmul.bf16.gmra.mxu0 %v2490_v41 }
 0x2b7   : > { %2327 = vmatmul.bf16.gmra.mxu2 %v7632_v6 }
 0x2b9   : > { %v2609_v43 = vpop.f32.mrf.mxu0 }
 0x2ba   : > { %v2180_v53 = vpop.f32.mrf.mxu1 }
 0x2bb   : > { %v2492_v24 = vpack.c.bf16 %v2180_v53, %v2178_v12 }
 0x2c1   : > { %v2612_v35 = vpop.f32.mrf.mxu0 }
 0x2c2   : > { %v2183_v45 = vpop.f32.mrf.mxu1  ;;  %v2613_v62 = vadd.f32 %v7503_v61, %v2612_v35 }
 0x2c4   : > { %2651 = vmatmul.bf16.gmra.mxu0 %v2491_v36 }
 0x2c9   : > { %v2614_v32 = vpop.f32.mrf.mxu0 }
 0x2ca   : > { %v2293_v23 = vpop.f32.mrf.mxu2  ;;  %v2185_v5 = vpop.f32.mrf.mxu1  ;;  %v2615_v31 = vadd.f32 %v7503_v61, %v2614_v32 }
 0x2cb   : > { %v2493_v29 = vpack.c.bf16 %v2185_v5, %v2183_v45 }
 0x2cc   : > { %v2758_v45 = vmax.f32 %v2615_v31, 0.0 }
 0x2ce   : > { %v2822_v9 = vpack.c.bf16 %v2758_v45, %v2758_v45 }
 0x2d1   : > { %v2617_v63 = vpop.f32.mrf.mxu0 }
 0x2d2   : > { %v2295_v26 = vpop.f32.mrf.mxu2  ;;  %v2618_v1 = vadd.f32 %v7503_v61, %v2617_v63  ;;  %v2757_v63 = vmax.f32 %v2613_v62, 0.0 }
 0x2d4   : > { %2656 = vmatmul.bf16.gmra.mxu0 %v2492_v24  ;;  %v2759_v12 = vmax.f32 %v2618_v1, 0.0  ;;  %v2610_v24 = vadd.f32 %v7503_v61, %v2609_v43 }
 0x2d9   : > { %v2619_v52 = vpop.f32.mrf.mxu0 }
 0x2da   : > { %v7635_v44 = vpop.f32.mrf.mxu2  ;;  %v2620_v58 = vadd.f32 %v7503_v61, %v2619_v52 }
 0x2dc   : > { %v2760_v19 = vmax.f32 %v2620_v58, 0.0  ;;  %v2494_v58 = vpack.c.bf16 %v2295_v26, %v2293_v23 }
 0x2de   : > { %v2824_v5 = vpack.c.bf16 %v2760_v19, %v2760_v19 }
 0x2e0   : > { %v2904_v35 = vunpack.c.l.b16 %v2824_v5 }
 0x2e1   : > { %v2622_v2 = vpop.f32.mrf.mxu0 }
 0x2e2   : > { %v2623_v13 = vadd.f32 %v7503_v61, %v2622_v2  ;;  %v2300_v47 = vpop.f32.mrf.mxu2  ;;  %v2608_v2 = vadd.f32 %v7503_v61, %v2607_v50  ;;  %v2902_v50 = vunpack.c.l.b16 %v2822_v9 }
 0x2e3   : > { %v2495_v9 = vpack.c.bf16 %v2300_v47, %v7635_v44 }
 0x2e4   : > { %2661 = vmatmul.bf16.gmra.mxu0 %v2493_v29  ;;  %v2761_v41 = vmax.f32 %v2623_v13, 0.0  ;;  %v2823_v13 = vpack.c.bf16 %v2759_v12, %v2759_v12 }
 0x2e6   : > { %v2825_v36 = vpack.c.bf16 %v2761_v41, %v2761_v41  ;;  %v2755_v41 = vmax.f32 %v2608_v2, 0.0  ;;  %v2903_v6 = vunpack.c.l.b16 %v2823_v13 }
 0x2e8   : > { %v2905_v7 = vunpack.c.l.b16 %v2825_v36  ;;  %v2913_v19 = vpack.c.b16 %v2904_v35, %v2903_v6  ;;  %v2819_v62 = vpack.c.bf16 %v2755_v41, %v2755_v41 }
 0x2e9   : > { %v2624_v15 = vpop.f32.mrf.mxu0 }
 0x2ea   : > { %v2625_v51 = vadd.f32 %v7503_v61, %v2624_v15  ;;  %v2303_v29 = vpop.f32.mrf.mxu2  ;;  %v2756_v15 = vmax.f32 %v2610_v24, 0.0  ;;  %v2899_v45 = vunpack.c.l.b16 %v2819_v62 }
 0x2ec   : > { %v2762_v53 = vmax.f32 %v2625_v51, 0.0  ;;  %v2821_v51 = vpack.c.bf16 %v2757_v63, %v2757_v63  ;;  %v2820_v31 = vpack.c.bf16 %v2756_v15, %v2756_v15 }
 0x2ee   : > { %v2826_v52 = vpack.c.bf16 %v2762_v53, %v2762_v53  ;;  %v2901_v12 = vunpack.c.l.b16 %v2821_v51  ;;  %v2900_v53 = vunpack.c.l.b16 %v2820_v31 }
 0x2f0   : > { %v2906_v32 = vunpack.c.l.b16 %v2826_v52  ;;  %v2911_v2 = vpack.c.b16 %v2900_v53, %v2899_v45 }
 0x2f1   : > { %v2627_v8 = vpop.f32.mrf.mxu0 }
 0x2f2   : > { %v2914_v1 = vpack.c.b16 %v2906_v32, %v2905_v7  ;;  %v2628_v43 = vadd.f32 %v7503_v61, %v2627_v8  ;;  %v2305_v26 = vpop.f32.mrf.mxu2  ;;  %v2912_v7 = vpack.c.b16 %v2902_v50, %v2901_v12 }
 0x2f4   : > { %2666 = vmatmul.bf16.gmra.mxu0 %v2494_v58  ;;  %2923 = vmatpush.bf16.msrb.mxu1 %v2914_v1  ;;  %v2763_v36 = vmax.f32 %v2628_v43, 0.0 }
 0x2f6   : > { %v2827_v5 = vpack.c.bf16 %v2763_v36, %v2763_v36 }
 0x2f8   : > { %2924 = vmatpush.bf16.msrb.mxu1 %v2913_v19  ;;  %v2988_v63 = vunpack.c.l.b16 %v2827_v5  ;;  %v2496_v19 = vpack.c.bf16 %v2305_v26, %v2303_v29 }
 0x2f9   : > { %v2629_v23 = vpop.f32.mrf.mxu0 }
 0x2fa   : > { %v2630_v24 = vadd.f32 %v7503_v61, %v2629_v23  ;;  %v2308_v58 = vpop.f32.mrf.mxu2 }
 0x2fc   : > { %v2764_v52 = vmax.f32 %v2630_v24, 0.0  ;;  %2925 = vmatpush.bf16.msrb.mxu1 %v2912_v7 }
 0x2fe   : > { %v2828_v8 = vpack.c.bf16 %v2764_v52, %v2764_v52 }
 0x300   : > { %v2989_v13 = vunpack.c.l.b16 %v2828_v8  ;;  %2926 = vmatpush.bf16.msrb.mxu1 %v2911_v2  ;;  %v8519_v2 = vld [vmem:[#allocation22_spill] sm:$0xff] }
 0x301   : > { %v2632_v6 = vpop.f32.mrf.mxu0 }
 0x302   : > { %v7648_v32 = vpack.c.b16 %v2989_v13, %v2988_v63  ;;  %v2633_v15 = vadd.f32 %v7503_v61, %v2632_v6  ;;  %v2310_v44 = vpop.f32.mrf.mxu2 }
 0x304   : > { %2671 = vmatmul.bf16.gmra.mxu0 %v2495_v9  ;;  %2927 = vmatpush.bf16.msrb.mxu1 %v7630_v34  ;;  %v2765_v35 = vmax.f32 %v2633_v15, 0.0  ;;  %v8518_v34 = vld [vmem:[#allocation21_spill] sm:$0xff] }
 0x306   : > { %v2829_v51 = vpack.c.bf16 %v2765_v35, %v2765_v35 }
 0x308   : > { %2928 = vmatpush.bf16.msrb.mxu1 %v7614_v25  ;;  %v2990_v31 = vunpack.c.l.b16 %v2829_v51 }
 0x309   : > { %v2634_v1 = vpop.f32.mrf.mxu0 }
 0x30a   : > { %v2635_v41 = vadd.f32 %v7503_v61, %v2634_v1  ;;  %v2313_v36 = vpop.f32.mrf.mxu2 }
 0x30c   : > { %v2766_v43 = vmax.f32 %v2635_v41, 0.0  ;;  %2929 = vmatpush.bf16.msrb.mxu1 %v7584_v28 }
 0x30e   : > { %v2830_v47 = vpack.c.bf16 %v2766_v43, %v2766_v43 }
 0x310   : > { %v2991_v50 = vunpack.c.l.b16 %v2830_v47  ;;  %2930 = vmatpush.bf16.msrb.mxu1 %v7543_v49  ;;  %v2497_v49 = vpack.c.bf16 %v2310_v44, %v2308_v58 }
 0x311   : > { %v2637_v62 = vpop.f32.mrf.mxu0 }
 0x312   : > { %v7656_v12 = vpack.c.b16 %v2991_v50, %v2990_v31  ;;  %v2638_v25 = vadd.f32 %v7503_v61, %v2637_v62  ;;  %v2315_v26 = vpop.f32.mrf.mxu2  ;;  %v8520_v31 = vld [vmem:[#allocation23_spill] sm:$0xff] }
 0x313   : > { %2931 = vmatmul.bf16.vlgmr.msrb.gmra.mxu1 %v8518_v34  ;;  %v2498_v58 = vpack.c.bf16 %v2315_v26, %v2313_v36 }
 0x314   : > { %2676 = vmatmul.bf16.gmra.mxu0 %v2496_v19  ;;  %v2767_v23 = vmax.f32 %v2638_v25, 0.0 }
 0x316   : > { %v2831_v24 = vpack.c.bf16 %v2767_v23, %v2767_v23 }
 0x318   : > { %v2992_v5 = vunpack.c.l.b16 %v2831_v24 }
 0x319   : > { %v2639_v53 = vpop.f32.mrf.mxu0 }
 0x31a   : > { %v2640_v28 = vadd.f32 %v7503_v61, %v2639_v53  ;;  %v2318_v15 = vpop.f32.mrf.mxu2  ;;  %v8521_v53 = vld [vmem:[#allocation24_spill] sm:$0xff] }
 0x31c   : > { %v2768_v7 = vmax.f32 %v2640_v28, 0.0 }
 0x31e   : > { %v2832_v45 = vpack.c.bf16 %v2768_v7, %v2768_v7 }
 0x320   : > { %v2993_v52 = vunpack.c.l.b16 %v2832_v45 }
 0x321   : > { %v2642_v29 = vpop.f32.mrf.mxu0 }
 0x322   : > { %v7661_v8 = vpack.c.b16 %v2993_v52, %v2992_v5  ;;  %v2643_v63 = vadd.f32 %v7503_v61, %v2642_v29  ;;  %v2320_v50 = vpop.f32.mrf.mxu2  ;;  %v8522_v5 = vld [vmem:[#allocation25_spill] sm:$0xff] }
 0x323   : > { %2936 = vmatmul.bf16.gmra.mxu1 %v8519_v2  ;;  %v2499_v25 = vpack.c.bf16 %v2320_v50, %v2318_v15 }
 0x324   : > { %2681 = vmatmul.bf16.gmra.mxu0 %v2497_v49  ;;  %v2769_v13 = vmax.f32 %v2643_v63, 0.0  ;;  %v8523_v63 = vld [vmem:[#allocation26_spill] sm:$0xff] }
 0x326   : > { %v2833_v35 = vpack.c.bf16 %v2769_v13, %v2769_v13 }
 0x328   : > { %v2994_v51 = vunpack.c.l.b16 %v2833_v35 }
 0x329   : > { %v2644_v9 = vpop.f32.mrf.mxu0 }
 0x32a   : > { %v2645_v6 = vadd.f32 %v7503_v61, %v2644_v9  ;;  %v2323_v62 = vpop.f32.mrf.mxu2 }
 0x32c   : > { %v2770_v1 = vmax.f32 %v2645_v6, 0.0 }
 0x32e   : > { %v2834_v41 = vpack.c.bf16 %v2770_v1, %v2770_v1 }
 0x330   : > { %v2995_v43 = vunpack.c.l.b16 %v2834_v41 }
 0x331   : > { %v2647_v44 = vpop.f32.mrf.mxu0 }
 0x332   : > { %v7666_v47 = vpack.c.b16 %v2995_v43, %v2994_v51  ;;  %v2325_v24 = vpop.f32.mrf.mxu2 }
 0x333   : > { %2941 = vmatmul.bf16.gmra.mxu1 %v8520_v31  ;;  %v2500_v7 = vpack.c.bf16 %v2325_v24, %v2323_v62 }
 0x334   : > { %2686 = vmatmul.bf16.gmra.mxu0 %v2498_v58 }
 0x339   : > { %v2649_v19 = vpop.f32.mrf.mxu0 }
 0x33a   : > { %v2328_v36 = vpop.f32.mrf.mxu2 }
 0x341   : > { %v2652_v23 = vpop.f32.mrf.mxu0 }
 0x342   : > { %v2330_v49 = vpop.f32.mrf.mxu2  ;;  %v2653_v43 = vadd.f32 %v7503_v61, %v2652_v23  ;;  %v8524_v23 = vld [vmem:[#allocation27_spill] sm:$0xff] }
 0x343   : > { %2946 = vmatmul.bf16.gmra.mxu1 %v8521_v53  ;;  %v2501_v29 = vpack.c.bf16 %v2330_v49, %v2328_v36 }
 0x344   : > { %2691 = vmatmul.bf16.gmra.mxu0 %v2499_v25  ;;  %v2650_v25 = vadd.f32 %v7503_v61, %v2649_v19  ;;  %v8525_v19 = vpack.c.bf16 %v7218_v16, %v7191_v54  ;;  %v8527_v54 = vpack.c.bf16 %v7267_v40, %v7236_v37  ;;  %v8529_v37 = vpack.c.bf16 %v7340_v48, %v7331_v21 }
 0x349   : > { %v2654_v28 = vpop.f32.mrf.mxu0 }
 0x34a   : > { %v2655_v1 = vadd.f32 %v7503_v61, %v2654_v28 }
 0x34c   : > { %v2774_v24 = vmax.f32 %v2655_v1, 0.0 }
 0x351   : > { %v2657_v45 = vpop.f32.mrf.mxu0 }
 0x352   : > { %v2658_v6 = vadd.f32 %v7503_v61, %v2657_v45  ;;  %v2773_v45 = vmax.f32 %v2653_v43, 0.0 }
 0x353   : > { %2951 = vmatmul.bf16.gmra.mxu1 %v8522_v5 }
 0x354   : > { %2696 = vmatmul.bf16.gmra.mxu0 %v2500_v7  ;;  %v2775_v58 = vmax.f32 %v2658_v6, 0.0 }
 0x356   : > { %v2839_v49 = vpack.c.bf16 %v2775_v58, %v2775_v58 }
 0x359   : > { %v2659_v52 = vpop.f32.mrf.mxu0 }
 0x35a   : > { %v2660_v9 = vadd.f32 %v7503_v61, %v2659_v52  ;;  %v2648_v52 = vadd.f32 %v7503_v61, %v2647_v44 }
 0x35c   : > { %v2776_v41 = vmax.f32 %v2660_v9, 0.0  ;;  %v2838_v9 = vpack.c.bf16 %v2774_v24, %v2774_v24  ;;  %v2771_v6 = vmax.f32 %v2648_v52, 0.0  ;;  %v8526_v52 = vld [vmem:[#allocation28_spill] sm:$0xff] }
 0x35e   : > { %v2840_v7 = vpack.c.bf16 %v2776_v41, %v2776_v41  ;;  %v2999_v1 = vunpack.c.l.b16 %v2838_v9  ;;  %v2835_v43 = vpack.c.bf16 %v2771_v6, %v2771_v6 }
 0x360   : > { %v2996_v24 = vunpack.c.l.b16 %v2835_v43 }
 0x361   : > { %v2662_v26 = vpop.f32.mrf.mxu0 }
 0x362   : > { %v2663_v13 = vadd.f32 %v7503_v61, %v2662_v26 }
 0x363   : > { %2956 = vmatmul.bf16.gmra.mxu1 %v8523_v63 }
 0x364   : > { %2701 = vmatmul.bf16.gmra.mxu0 %v2501_v29  ;;  %v2777_v15 = vmax.f32 %v2663_v13, 0.0  ;;  %v2772_v13 = vmax.f32 %v2650_v25, 0.0 }
 0x366   : > { %v2841_v50 = vpack.c.bf16 %v2777_v15, %v2777_v15  ;;  %v2837_v15 = vpack.c.bf16 %v2773_v45, %v2773_v45  ;;  %v2836_v44 = vpack.c.bf16 %v2772_v13, %v2772_v13  ;;  %v8528_v45 = vpack.c.bf16 %v7310_v38, %v7287_v60 }
 0x367   : > { %v8530_v13 = vpack.c.bf16 %v7375_v11, %v7360_v59  ;;  %v8531_v11 = vpack.c.bf16 %v7437_v3, %v7424_v39  ;;  %v8532_v39 = vpack.c.bf16 %v7467_v46, %v7456_v42  ;;  %v4725_v42 = vld [vmem:[#allocation8 + $0x20] sm:$0xff] }
 0x368   : > { %v3002_v29 = vunpack.c.l.b16 %v2841_v50  ;;  %v2998_v58 = vunpack.c.l.b16 %v2837_v15 }
 0x369   : > { %v2664_v35 = vpop.f32.mrf.mxu0 }
 0x36a   : > { %v2665_v51 = vadd.f32 %v7503_v61, %v2664_v35  ;;  %v3001_v35 = vunpack.c.l.b16 %v2840_v7  ;;  %v3009_v25 = vpack.c.b16 %v2999_v1, %v2998_v58 }
 0x36c   : > { %v2778_v62 = vmax.f32 %v2665_v51, 0.0  ;;  %v3000_v51 = vunpack.c.l.b16 %v2839_v49 }
 0x36e   : > { %v2842_v36 = vpack.c.bf16 %v2778_v62, %v2778_v62  ;;  %v3010_v41 = vpack.c.b16 %v3001_v35, %v3000_v51  ;;  %v2997_v62 = vunpack.c.l.b16 %v2836_v44 }
 0x370   : > { %v3003_v26 = vunpack.c.l.b16 %v2842_v36  ;;  %v3008_v7 = vpack.c.b16 %v2997_v62, %v2996_v24 }
 0x371   : > { %v2667_v28 = vpop.f32.mrf.mxu0 }
 0x372   : > { %v3011_v63 = vpack.c.b16 %v3003_v26, %v3002_v29 }
 0x373   : > { %2961 = vmatmul.bf16.gmra.mxu1 %v8524_v23 }
 0x374   : > { %2706 = vmatmul.bf16.gmra.mxu0 %v8525_v19  ;;  %3020 = vmatpush.bf16.msrb.mxu2 %v3011_v63 }
 0x378   : > { %3021 = vmatpush.bf16.msrb.mxu2 %v3010_v41 }
 0x379   : > { %v2669_v50 = vpop.f32.mrf.mxu0 }
 0x37c   : > { %3022 = vmatpush.bf16.msrb.mxu2 %v3009_v25 }
 0x380   : > { %3023 = vmatpush.bf16.msrb.mxu2 %v3008_v7 }
 0x381   : > { %v2672_v36 = vpop.f32.mrf.mxu0 }
 0x383   : > { %2966 = vmatmul.bf16.gmra.mxu1 %v8526_v52 }
 0x384   : > { %2711 = vmatmul.bf16.gmra.mxu0 %v8527_v54  ;;  %3024 = vmatpush.bf16.msrb.mxu2 %v7666_v47 }
 0x388   : > { %3025 = vmatpush.bf16.msrb.mxu2 %v7661_v8 }
 0x389   : > { %v2674_v16 = vpop.f32.mrf.mxu0 }
 0x38a   : > { %v2675_v35 = vadd.f32 %v7503_v61, %v2674_v16 }
 0x38c   : > { %3026 = vmatpush.bf16.msrb.mxu2 %v7656_v12  ;;  %v2668_v12 = vadd.f32 %v7503_v61, %v2667_v28  ;;  %v2673_v28 = vadd.f32 %v7503_v61, %v2672_v36  ;;  %v2782_v51 = vmax.f32 %v2675_v35, 0.0 }
 0x38e   : > { %v2779_v8 = vmax.f32 %v2668_v12, 0.0  ;;  %v2781_v15 = vmax.f32 %v2673_v28, 0.0  ;;  %v2846_v1 = vpack.c.bf16 %v2782_v51, %v2782_v51 }
 0x390   : > { %3027 = vmatpush.bf16.msrb.mxu2 %v7648_v32  ;;  %v2670_v32 = vadd.f32 %v7503_v61, %v2669_v50  ;;  %v2843_v60 = vpack.c.bf16 %v2779_v8, %v2779_v8  ;;  %v2845_v44 = vpack.c.bf16 %v2781_v15, %v2781_v15  ;;  %v3088_v41 = vunpack.c.l.b16 %v2846_v1  ;;  %v4727_v8 = vld [vmem:[#allocation8 + $0x30] sm:$0xff] }
 0x391   : > { %v2677_v63 = vpop.f32.mrf.mxu0  ;;  %v8534_v15 = vpack.c.bf16 %v7493_v57, %v7482_v27 }
 0x392   : > { %v2780_v47 = vmax.f32 %v2670_v32, 0.0  ;;  %v3085_v9 = vunpack.c.l.b16 %v2843_v60  ;;  %v3087_v59 = vunpack.c.l.b16 %v2845_v44  ;;  %v2678_v58 = vadd.f32 %v7503_v61, %v2677_v63  ;;  %v4728_v63 = vld [vmem:[#allocation8 + $0x38] sm:$0xff] }
 0x393   : > { %3028 = vmatmul.bf16.vlgmr.msrb.gmra.mxu2 %v6962_v0  ;;  %v4724_v44 = vld [vmem:[#allocation8 + $0x18] sm:$0xff] }
 0x394   : > { %2716 = vmatmul.bf16.gmra.mxu0 %v8528_v45  ;;  %v2844_v38 = vpack.c.bf16 %v2780_v47, %v2780_v47  ;;  %v7720_v62 = vpack.c.b16 %v3088_v41, %v3087_v59  ;;  %v2783_v25 = vmax.f32 %v2678_v58, 0.0  ;;  %3363 = vmatpush.bf16.msra.mxu2 %v4728_v63  ;;  %v7740_v59 = vpop.f32.mrf.mxu1 }
 0x396   : > { %v3086_v48 = vunpack.c.l.b16 %v2844_v38  ;;  %v2847_v36 = vpack.c.bf16 %v2783_v25, %v2783_v25 }
 0x398   : > { %v7712_v6 = vpack.c.b16 %v3086_v48, %v3085_v9  ;;  %v3089_v45 = vunpack.c.l.b16 %v2847_v36  ;;  %3364 = vmatpush.bf16.msra.mxu2 %v4727_v8  ;;  %v8533_v48 = vld [vmem:[#allocation39_spill] sm:$0xff] }
 0x399   : > { %v2679_v49 = vpop.f32.mrf.mxu0 }
 0x39a   : > { %v2680_v50 = vadd.f32 %v7503_v61, %v2679_v49 }
 0x39c   : > { %v2784_v24 = vmax.f32 %v2680_v50, 0.0 }
 0x39e   : > { %v2848_v54 = vpack.c.bf16 %v2784_v24, %v2784_v24  ;;  %v4723_v24 = vld [vmem:[#allocation8 + $0x10] sm:$0xff] }
 0x3a0   : > { %v3090_v49 = vunpack.c.l.b16 %v2848_v54 }
 0x3a1   : > { %v2682_v29 = vpop.f32.mrf.mxu0 }
 0x3a2   : > { %v2683_v3 = vadd.f32 %v7503_v61, %v2682_v29  ;;  %v7728_v47 = vpack.c.b16 %v3090_v49, %v3089_v45 }
 0x3a3   : > { %3033 = vmatmul.bf16.gmra.mxu2 %v7070_v18 }
 0x3a4   : > { %2721 = vmatmul.bf16.gmra.mxu0 %v8529_v37  ;;  %v2785_v37 = vmax.f32 %v2683_v3, 0.0 }
 0x3a6   : > { %v2849_v60 = vpack.c.bf16 %v2785_v37, %v2785_v37 }
 0x3a8   : > { %v3091_v46 = vunpack.c.l.b16 %v2849_v60 }
 0x3a9   : > { %v2684_v40 = vpop.f32.mrf.mxu0 }
 0x3aa   : > { %v2685_v16 = vadd.f32 %v7503_v61, %v2684_v40 }
 0x3ac   : > { %v2786_v12 = vmax.f32 %v2685_v16, 0.0 }
 0x3ae   : > { %v2850_v38 = vpack.c.bf16 %v2786_v12, %v2786_v12 }
 0x3b0   : > { %v3092_v29 = vunpack.c.l.b16 %v2850_v38 }
 0x3b1   : > { %v7702_v26 = vpop.f32.mrf.mxu0 }
 0x3b2   : > { %v7737_v51 = vpack.c.b16 %v3092_v29, %v3091_v46  ;;  %v2688_v57 = vadd.f32 %v7503_v61, %v7702_v26  ;;  %v4721_v26 = vld [vmem:[#allocation8] sm:$0xff]  ;;  %v8535_v29 = vld [vmem:[#allocation40_spill] sm:$0xff] }
 0x3b3   : > { %3038 = vmatmul.bf16.gmra.mxu2 %v7131_v10 }
 0x3b4   : > { %2726 = vmatmul.bf16.gmra.mxu0 %v8530_v13  ;;  %v4726_v13 = vld [vmem:[#allocation8 + $0x28] sm:$0xff]  ;;  %v2787_v49 = vmax.f32 %v2688_v57, 0.0 }
 0x3b5   : > { %3365 = vmatpush.bf16.msra.mxu2 %v4726_v13 }
 0x3b9   : > { %v7708_v21 = vpop.f32.mrf.mxu0  ;;  %3366 = vmatpush.bf16.msra.mxu2 %v4725_v42  ;;  %v2851_v42 = vpack.c.bf16 %v2787_v49, %v2787_v49 }
 0x3ba   : > { %v2690_v36 = vadd.f32 %v7503_v61, %v7708_v21 }
 0x3bc   : > { %v2788_v37 = vmax.f32 %v2690_v36, 0.0 }
 0x3bd   : > { %3367 = vmatpush.bf16.msra.mxu2 %v4724_v44  ;;  %v3093_v44 = vunpack.c.l.b16 %v2851_v42 }
 0x3be   : > { %v2852_v46 = vpack.c.bf16 %v2788_v37, %v2788_v37 }
 0x3c1   : > { %v2692_v19 = vpop.f32.mrf.mxu0  ;;  %3368 = vmatpush.bf16.msra.mxu2 %v4723_v24 }
 0x3c3   : > { %3043 = vmatmul.bf16.gmra.mxu2 %v7176_v33 }
 0x3c4   : > { %2731 = vmatmul.bf16.gmra.mxu0 %v8531_v11  ;;  %v2693_v11 = vadd.f32 %v7503_v61, %v2692_v19 }
 0x3c6   : > { %v2789_v54 = vmax.f32 %v2693_v11, 0.0 }
 0x3c8   : > { %v2853_v12 = vpack.c.bf16 %v2789_v54, %v2789_v54 }
 0x3c9   : > { %v2694_v43 = vpop.f32.mrf.mxu0 }
 0x3ca   : > { %v2695_v41 = vadd.f32 %v7503_v61, %v2694_v43  ;;  %v4722_v43 = vld [vmem:[#allocation8 + $0x8] sm:$0xff] }
 0x3cb   : > { %3369 = vmatpush.bf16.msra.mxu2 %v4722_v43 }
 0x3cc   : > { %v2790_v19 = vmax.f32 %v2695_v41, 0.0 }
 0x3cf   : > { %3370 = vmatpush.bf16.msra.mxu2 %v4721_v26 }
 0x3d1   : > { %v2697_v7 = vpop.f32.mrf.mxu0 }
 0x3d2   : > { %v2698_v28 = vadd.f32 %v7503_v61, %v2697_v7 }
 0x3d3   : > { %3048 = vmatmul.bf16.gmra.mxu2 %v7222_v30 }
 0x3d4   : > { %2736 = vmatmul.bf16.gmra.mxu0 %v8532_v39  ;;  %v2791_v58 = vmax.f32 %v2698_v28, 0.0  ;;  %v7752_v28 = vld [vmem:[%s8302_s3] ss:$0 sm:$0xff] }
 0x3d6   : > { %v2855_v39 = vpack.c.bf16 %v2791_v58, %v2791_v58 }
 0x3d8   : > { %v3097_v8 = vunpack.c.l.b16 %v2855_v39 }
 0x3d9   : > { %v2699_v32 = vpop.f32.mrf.mxu0 }
 0x3da   : > { %v2700_v35 = vadd.f32 %v7503_v61, %v2699_v32  ;;  %v2854_v32 = vpack.c.bf16 %v2790_v19, %v2790_v19 }
 0x3dc   : > { %v2792_v50 = vmax.f32 %v2700_v35, 0.0 }
 0x3de   : > { %v2856_v3 = vpack.c.bf16 %v2792_v50, %v2792_v50 }
 0x3e0   : > { %v3098_v60 = vunpack.c.l.b16 %v2856_v3  ;;  %v8536_v3 = vld [vmem:[#allocation32_spill] sm:$0xff] }
 0x3e1   : > { %v2702_v9 = vpop.f32.mrf.mxu0 }
 0x3e2   : > { %v2703_v40 = vadd.f32 %v7503_v61, %v2702_v9  ;;  %v3095_v9 = vunpack.c.l.b16 %v2853_v12 }
 0x3e3   : > { %3053 = vmatmul.bf16.gmra.mxu2 %v8533_v48 }
 0x3e4   : > { %2741 = vmatmul.bf16.gmra.mxu0 %v8534_v15  ;;  %v2793_v1 = vmax.f32 %v2703_v40, 0.0  ;;  %v3096_v40 = vunpack.c.l.b16 %v2854_v32  ;;  %v3107_v15 = vpack.c.b16 %v3098_v60, %v3097_v8 }
 0x3e6   : > { %v2857_v7 = vpack.c.bf16 %v2793_v1, %v2793_v1  ;;  %v3094_v1 = vunpack.c.l.b16 %v2852_v46  ;;  %v3106_v41 = vpack.c.b16 %v3096_v40, %v3095_v9 }
 0x3e8   : > { %v3099_v63 = vunpack.c.l.b16 %v2857_v7 }
 0x3e9   : > { %v2704_v25 = vpop.f32.mrf.mxu0 }
 0x3ea   : > { %v2705_v27 = vadd.f32 %v7503_v61, %v2704_v25  ;;  %v2934_v61 = vpop.f32.mrf.mxu1 }
 0x3eb   : > { %v3263_v26 = vpack.c.bf16 %v2934_v61, %v7740_v59 }
 0x3ec   : > { %v2794_v16 = vmax.f32 %v2705_v27, 0.0  ;;  %v3105_v27 = vpack.c.b16 %v3094_v1, %v3093_v44 }
 0x3ee   : > { %v2858_v45 = vpack.c.bf16 %v2794_v16, %v2794_v16 }
 0x3f0   : > { %v3100_v38 = vunpack.c.l.b16 %v2858_v45 }
 0x3f1   : > { %v2707_v13 = vpop.f32.mrf.mxu0 }
 0x3f2   : > { %v3108_v21 = vpack.c.b16 %v3100_v38, %v3099_v63  ;;  %v2708_v35 = vadd.f32 %v7752_v28, %v2707_v13  ;;  %v2937_v25 = vpop.f32.mrf.mxu1 }
 0x3f3   : > { %3058 = vmatmul.bf16.gmra.mxu2 %v8535_v29 }
 0x3f4   : > { %3117 = vmatpush.bf16.msra.mxu1 %v3108_v21  ;;  %v2795_v11 = vmax.f32 %v2708_v35, 0.0 }
 0x3f6   : > { %v2859_v24 = vpack.c.bf16 %v2795_v11, %v2795_v11 }
 0x3f8   : > { %3118 = vmatpush.bf16.msra.mxu1 %v3107_v15  ;;  %v3182_v36 = vunpack.c.l.b16 %v2859_v24 }
 0x3f9   : > { %v2709_v58 = vpop.f32.mrf.mxu0 }
 0x3fa   : > { %v2710_v50 = vadd.f32 %v7752_v28, %v2709_v58  ;;  %v2939_v43 = vpop.f32.mrf.mxu1 }
 0x3fb   : > { %v3264_v1 = vpack.c.bf16 %v2939_v43, %v2937_v25 }
 0x3fc   : > { %v2796_v7 = vmax.f32 %v2710_v50, 0.0  ;;  %3119 = vmatpush.bf16.msra.mxu1 %v3106_v41 }
 0x3fe   : > { %v2860_v57 = vpack.c.bf16 %v2796_v7, %v2796_v7 }
 0x400   : > { %v3183_v54 = vunpack.c.l.b16 %v2860_v57  ;;  %3120 = vmatpush.bf16.msra.mxu1 %v3105_v27 }
 0x401   : > { %v2712_v19 = vpop.f32.mrf.mxu0 }
 0x402   : > { %v7756_v39 = vpack.c.b16 %v3183_v54, %v3182_v36  ;;  %v2713_v16 = vadd.f32 %v7752_v28, %v2712_v19  ;;  %v2942_v8 = vpop.f32.mrf.mxu1 }
 0x403   : > { %3063 = vmatmul.bf16.gmra.mxu2 %v8536_v3 }
 0x404   : > { %3121 = vmatpush.bf16.msra.mxu1 %v7737_v51  ;;  %v2797_v63 = vmax.f32 %v2713_v16, 0.0 }
 0x406   : > { %v2861_v37 = vpack.c.bf16 %v2797_v63, %v2797_v63 }
 0x408   : > { %3122 = vmatpush.bf16.msra.mxu1 %v7728_v47  ;;  %v3184_v60 = vunpack.c.l.b16 %v2861_v37 }
 0x409   : > { %v2714_v45 = vpop.f32.mrf.mxu0 }
 0x40a   : > { %v2715_v49 = vadd.f32 %v7752_v28, %v2714_v45  ;;  %v2944_v46 = vpop.f32.mrf.mxu1 }
 0x40c   : > { %v2798_v12 = vmax.f32 %v2715_v49, 0.0  ;;  %3123 = vmatpush.bf16.msra.mxu1 %v7720_v62  ;;  %v3265_v49 = vpack.c.bf16 %v2944_v46, %v2942_v8 }
 0x40e   : > { %v2862_v32 = vpack.c.bf16 %v2798_v12, %v2798_v12 }
 0x410   : > { %v3185_v38 = vunpack.c.l.b16 %v2862_v32  ;;  %3124 = vmatpush.bf16.msra.mxu1 %v7712_v6 }
 0x411   : > { %v2717_v51 = vpop.f32.mrf.mxu0 }
 0x412   : > { %v7766_v13 = vpack.c.b16 %v3185_v38, %v3184_v60  ;;  %v2718_v47 = vadd.f32 %v7752_v28, %v2717_v51  ;;  %v2947_v58 = vpop.f32.mrf.mxu1 }
 0x413   : > { %3125 = vmatmul.bf16.vlgmr.msra.gmra.mxu1 %v7435_v20  ;;  %3371 = vmatmul.bf16.vlgmr.msra.gmra.mxu2 %v3263_v26 }
 0x414   : > { %v2799_v42 = vmax.f32 %v2718_v47, 0.0 }
 0x416   : > { %v7770_v21 = vpop.f32.mrf.mxu2  ;;  %v2863_v40 = vpack.c.bf16 %v2799_v42, %v2799_v42 }
 0x418   : > { %v3186_v61 = vunpack.c.l.b16 %v2863_v40 }
 0x419   : > { %v2719_v62 = vpop.f32.mrf.mxu0 }
 0x41a   : > { %v2720_v9 = vadd.f32 %v7752_v28, %v2719_v62  ;;  %v2949_v19 = vpop.f32.mrf.mxu1 }
 0x41b   : > { %v3266_v47 = vpack.c.bf16 %v2949_v19, %v2947_v58 }
 0x41c   : > { %v2800_v35 = vmax.f32 %v2720_v9, 0.0 }
 0x41e   : > { %v2864_v6 = vpack.c.bf16 %v2800_v35, %v2800_v35  ;;  %v7773_v15 = vpop.f32.mrf.mxu2 }
 0x420   : > { %v3187_v44 = vunpack.c.l.b16 %v2864_v6 }
 0x421   : > { %v2722_v11 = vpop.f32.mrf.mxu0 }
 0x422   : > { %v7777_v41 = vpack.c.b16 %v3187_v44, %v3186_v61  ;;  %v2723_v50 = vadd.f32 %v7752_v28, %v2722_v11  ;;  %v2952_v60 = vpop.f32.mrf.mxu1 }
 0x423   : > { %3130 = vmatmul.bf16.gmra.mxu1 %v7465_v22  ;;  %3376 = vmatmul.bf16.gmra.mxu2 %v3264_v1 }
 0x424   : > { %v2801_v7 = vmax.f32 %v2723_v50, 0.0 }
 0x426   : > { %v7781_v24 = vpop.f32.mrf.mxu2  ;;  %v2865_v36 = vpack.c.bf16 %v2801_v7, %v2801_v7 }
 0x428   : > { %v3188_v63 = vunpack.c.l.b16 %v2865_v36 }
 0x429   : > { %v2724_v27 = vpop.f32.mrf.mxu0 }
 0x42a   : > { %v2725_v57 = vadd.f32 %v7752_v28, %v2724_v27  ;;  %v2954_v62 = vpop.f32.mrf.mxu1 }
 0x42b   : > { %v3267_v6 = vpack.c.bf16 %v2954_v62, %v2952_v60 }
 0x42c   : > { %v2802_v54 = vmax.f32 %v2725_v57, 0.0 }
 0x42e   : > { %v2866_v16 = vpack.c.bf16 %v2802_v54, %v2802_v54  ;;  %v7784_v25 = vpop.f32.mrf.mxu2 }
 0x430   : > { %v3189_v45 = vunpack.c.l.b16 %v2866_v16 }
 0x431   : > { %v2727_v37 = vpop.f32.mrf.mxu0 }
 0x432   : > { %v7788_v12 = vpack.c.b16 %v3189_v45, %v3188_v63  ;;  %v2957_v9 = vpop.f32.mrf.mxu1 }
 0x433   : > { %3135 = vmatmul.bf16.gmra.mxu1 %v7491_v4  ;;  %3381 = vmatmul.bf16.gmra.mxu2 %v3265_v49 }
 0x436   : > { %v7791_v32 = vpop.f32.mrf.mxu2 }
 0x439   : > { %v2729_v38 = vpop.f32.mrf.mxu0 }
 0x43a   : > { %v2959_v44 = vpop.f32.mrf.mxu1 }
 0x43b   : > { %v3268_v27 = vpack.c.bf16 %v2959_v44, %v2957_v9 }
 0x43e   : > { %v7793_v26 = vpop.f32.mrf.mxu2 }
 0x441   : > { %v2732_v42 = vpop.f32.mrf.mxu0 }
 0x442   : > { %v2962_v7 = vpop.f32.mrf.mxu1  ;;  %v2733_v9 = vadd.f32 %v7752_v28, %v2732_v42 }
 0x443   : > { %3140 = vmatmul.bf16.gmra.mxu1 %v7512_v17  ;;  %3386 = vmatmul.bf16.gmra.mxu2 %v3266_v47 }
 0x446   : > { %v7798_v8 = vpop.f32.mrf.mxu2 }
 0x449   : > { %v2734_v46 = vpop.f32.mrf.mxu0 }
 0x44a   : > { %v2964_v49 = vpop.f32.mrf.mxu1  ;;  %v2735_v60 = vadd.f32 %v7752_v28, %v2734_v46 }
 0x44b   : > { %v3269_v42 = vpack.c.bf16 %v2964_v49, %v2962_v7 }
 0x44e   : > { %v7800_v40 = vpop.f32.mrf.mxu2 }
 0x451   : > { %v2737_v61 = vpop.f32.mrf.mxu0 }
 0x452   : > { %v2738_v16 = vadd.f32 %v7752_v28, %v2737_v61  ;;  %v2728_v61 = vadd.f32 %v7752_v28, %v2727_v37 }
 0x453   : > { %3145 = vmatmul.bf16.gmra.mxu1 %v7551_v56  ;;  %3391 = vmatmul.bf16.gmra.mxu2 %v3267_v6 }
 0x454   : > { %v2807_v6 = vmax.f32 %v2738_v16, 0.0 }
 0x456   : > { %v7805_v1 = vpop.f32.mrf.mxu2 }
 0x459   : > { %v2739_v11 = vpop.f32.mrf.mxu0 }
 0x45a   : > { %v2740_v54 = vadd.f32 %v7752_v28, %v2739_v11  ;;  %v2806_v11 = vmax.f32 %v2735_v60, 0.0  ;;  %v2803_v60 = vmax.f32 %v2728_v61, 0.0  ;;  %v8537_v61 = vld [vmem:[#allocation31_spill] sm:$0xff] }
 0x45c   : > { %v2808_v47 = vmax.f32 %v2740_v54, 0.0  ;;  %v2871_v54 = vpack.c.bf16 %v2807_v6, %v2807_v6  ;;  %v2867_v6 = vpack.c.bf16 %v2803_v60, %v2803_v60 }
 0x45e   : > { %v7807_v58 = vpop.f32.mrf.mxu2  ;;  %v2872_v50 = vpack.c.bf16 %v2808_v47, %v2808_v47 }
 0x461   : > { %v2742_v57 = vpop.f32.mrf.mxu0 }
 0x462   : > { %v2743_v36 = vadd.f32 %v7752_v28, %v2742_v57  ;;  %v2730_v57 = vadd.f32 %v7752_v28, %v2729_v38  ;;  %v2967_v38 = vpop.f32.mrf.mxu1 }
 0x463   : > { %3150 = vmatmul.bf16.gmra.mxu1 %v7590_v55  ;;  %3396 = vmatmul.bf16.gmra.mxu2 %v3268_v27 }
 0x464   : > { %v2809_v63 = vmax.f32 %v2743_v36, 0.0  ;;  %v2805_v36 = vmax.f32 %v2733_v9, 0.0  ;;  %v2804_v16 = vmax.f32 %v2730_v57, 0.0 }
 0x466   : > { %v7814_v19 = vpop.f32.mrf.mxu2  ;;  %v2873_v44 = vpack.c.bf16 %v2809_v63, %v2809_v63  ;;  %v2870_v63 = vpack.c.bf16 %v2806_v11, %v2806_v11  ;;  %v2869_v47 = vpack.c.bf16 %v2805_v36, %v2805_v36 }
 0x468   : > { %v3193_v37 = vunpack.c.l.b16 %v2870_v63 }
 0x469   : > { %v2744_v45 = vpop.f32.mrf.mxu0 }
 0x46a   : > { %v2745_v62 = vadd.f32 %v7752_v28, %v2744_v45  ;;  %v3196_v45 = vunpack.c.l.b16 %v2873_v44  ;;  %v2868_v28 = vpack.c.bf16 %v2804_v16, %v2804_v16  ;;  %v8539_v16 = vpack.c.bf16 %v7773_v15, %v7770_v21 }
 0x46b   : > { %v8541_v21 = vpack.c.bf16 %v7784_v25, %v7781_v24  ;;  %v8543_v24 = vpack.c.bf16 %v7793_v26, %v7791_v32  ;;  %v8545_v32 = vpack.c.bf16 %v7800_v40, %v7798_v8  ;;  %v8547_v8 = vpack.c.bf16 %v7807_v58, %v7805_v1  ;;  %v8550_v58 = vld [vmem:[#allocation37_spill] sm:$0xff] }
 0x46c   : > { %v2810_v27 = vmax.f32 %v2745_v62, 0.0  ;;  %v3195_v62 = vunpack.c.l.b16 %v2872_v50  ;;  %v3191_v7 = vunpack.c.l.b16 %v2868_v28  ;;  %v3190_v50 = vunpack.c.l.b16 %v2867_v6 }
 0x46e   : > { %v2874_v35 = vpack.c.bf16 %v2810_v27, %v2810_v27  ;;  %v7821_v51 = vpop.f32.mrf.mxu2  ;;  %v3194_v27 = vunpack.c.l.b16 %v2871_v54  ;;  %v3202_v57 = vpack.c.b16 %v3191_v7, %v3190_v50 }
 0x470   : > { %v3197_v43 = vunpack.c.l.b16 %v2874_v35  ;;  %v3204_v9 = vpack.c.b16 %v3195_v62, %v3194_v27  ;;  %v3192_v35 = vunpack.c.l.b16 %v2869_v47  ;;  %v8540_v27 = vld [vmem:[#allocation30_spill] sm:$0xff] }
 0x472   : > { %v3205_v59 = vpack.c.b16 %v3197_v43, %v3196_v45  ;;  %v3203_v49 = vpack.c.b16 %v3193_v37, %v3192_v35  ;;  %v2969_v43 = vpop.f32.mrf.mxu1 }
 0x473   : > { %3155 = vmatmul.bf16.gmra.mxu1 %v7620_v14  ;;  %3401 = vmatmul.bf16.gmra.mxu2 %v3269_v42  ;;  %v8538_v42 = vld [vmem:[#allocation29_spill] sm:$0xff] }
 0x474   : > { %3214 = vmatpush.bf16.msrb.mxu1 %v3205_v59  ;;  %v3270_v59 = vpack.c.bf16 %v2969_v43, %v2967_v38 }
 0x476   : > { %v7827_v46 = vpop.f32.mrf.mxu2 }
 0x478   : > { %3215 = vmatpush.bf16.msrb.mxu1 %v3204_v9 }
 0x47c   : > { %3216 = vmatpush.bf16.msrb.mxu1 %v3203_v49 }
 0x47e   : > { %v7829_v44 = vpop.f32.mrf.mxu2 }
 0x47f   : > { %v3277_v11 = vpack.c.bf16 %v7829_v44, %v7827_v46 }
 0x480   : > { %3217 = vmatpush.bf16.msrb.mxu1 %v3202_v57 }
 0x483   : > { %3160 = vmatmul.bf16.gmra.mxu1 %v8537_v61  ;;  %3406 = vmatmul.bf16.gmra.mxu2 %v3270_v59  ;;  %v8542_v59 = vld [vmem:[#allocation33_spill] sm:$0xff] }
 0x484   : > { %3218 = vmatpush.bf16.msrb.mxu1 %v7788_v12  ;;  %v7851_v12 = vld [vmem:[%s8304_s5] ss:$0 sm:$0xff] }
 0x486   : > { %v7835_v36 = vpop.f32.mrf.mxu2 }
 0x488   : > { %3219 = vmatpush.bf16.msrb.mxu1 %v7777_v41 }
 0x48c   : > { %3220 = vmatpush.bf16.msrb.mxu1 %v7766_v13 }
 0x48e   : > { %v7839_v54 = vpop.f32.mrf.mxu2 }
 0x48f   : > { %v3278_v45 = vpack.c.bf16 %v7839_v54, %v7835_v36 }
 0x490   : > { %3221 = vmatpush.bf16.msrb.mxu1 %v7756_v39 }
 0x493   : > { %3222 = vmatmul.bf16.vlgmr.msrb.gmra.mxu1 %v8538_v42  ;;  %3411 = vmatmul.bf16.gmra.mxu2 %v8539_v16 }
 0x496   : > { %v3372_v41 = vpop.f32.mrf.mxu2 }
 0x497   : > { %v3373_v13 = vadd.f32 %v7851_v12, %v3372_v41 }
 0x499   : > { %v3532_v63 = vmax.f32 %v3373_v13, 0.0 }
 0x49b   : > { %v3596_v60 = vpack.c.bf16 %v3532_v63, %v3532_v63 }
 0x49d   : > { %v3676_v15 = vunpack.c.l.b16 %v3596_v60 }
 0x49e   : > { %v3374_v62 = vpop.f32.mrf.mxu2 }
 0x49f   : > { %v3375_v38 = vadd.f32 %v7851_v12, %v3374_v62  ;;  %v3126_v62 = vpop.f32.mrf.mxu1 }
 0x4a1   : > { %v3533_v39 = vmax.f32 %v3375_v38, 0.0 }
 0x4a3   : > { %v3597_v47 = vpack.c.bf16 %v3533_v39, %v3533_v39  ;;  %3227 = vmatmul.bf16.gmra.mxu1 %v8540_v27  ;;  %3416 = vmatmul.bf16.gmra.mxu2 %v8541_v21 }
 0x4a5   : > { %v3677_v28 = vunpack.c.l.b16 %v3597_v47 }
 0x4a6   : > { %v3377_v37 = vpop.f32.mrf.mxu2 }
 0x4a7   : > { %v7859_v9 = vpack.c.b16 %v3677_v28, %v3676_v15  ;;  %v3378_v6 = vadd.f32 %v7851_v12, %v3377_v37  ;;  %v8544_v28 = vld [vmem:[#allocation34_spill] sm:$0xff] }
 0x4a9   : > { %v3534_v35 = vmax.f32 %v3378_v6, 0.0 }
 0x4ab   : > { %v3598_v50 = vpack.c.bf16 %v3534_v35, %v3534_v35  ;;  %v3128_v35 = vpop.f32.mrf.mxu1 }
 0x4ad   : > { %v3678_v25 = vunpack.c.l.b16 %v3598_v50 }
 0x4ae   : > { %v3379_v7 = vpop.f32.mrf.mxu2 }
 0x4af   : > { %v3380_v49 = vadd.f32 %v7851_v12, %v3379_v7 }
 0x4b1   : > { %v3535_v43 = vmax.f32 %v3380_v49, 0.0 }
 0x4b3   : > { %v3599_v57 = vpack.c.bf16 %v3535_v43, %v3535_v43  ;;  %3232 = vmatmul.bf16.gmra.mxu1 %v8542_v59  ;;  %3421 = vmatmul.bf16.gmra.mxu2 %v8543_v24  ;;  %v7879_v24 = vpop.f32.mrf.mxu1 }
 0x4b5   : > { %v3679_v16 = vunpack.c.l.b16 %v3599_v57 }
 0x4b6   : > { %v3382_v41 = vpop.f32.mrf.mxu2 }
 0x4b7   : > { %v7867_v13 = vpack.c.b16 %v3679_v16, %v3678_v25  ;;  %v3383_v63 = vadd.f32 %v7851_v12, %v3382_v41 }
 0x4b9   : > { %v3536_v38 = vmax.f32 %v3383_v63, 0.0  ;;  %v8546_v63 = vld [vmem:[#allocation35_spill] sm:$0xff] }
 0x4bb   : > { %v3600_v47 = vpack.c.bf16 %v3536_v38, %v3536_v38 }
 0x4bd   : > { %v3680_v26 = vunpack.c.l.b16 %v3600_v47  ;;  %v7887_v47 = vpop.f32.mrf.mxu1 }
 0x4be   : > { %v3384_v60 = vpop.f32.mrf.mxu2 }
 0x4bf   : > { %v3385_v39 = vadd.f32 %v7851_v12, %v3384_v60 }
 0x4c1   : > { %v3537_v21 = vmax.f32 %v3385_v39, 0.0 }
 0x4c3   : > { %v3601_v15 = vpack.c.bf16 %v3537_v21, %v3537_v21  ;;  %3237 = vmatmul.bf16.gmra.mxu1 %v8544_v28  ;;  %3426 = vmatmul.bf16.gmra.mxu2 %v8545_v32  ;;  %v8549_v32 = vpack.c.bf16 %v7821_v51, %v7814_v19  ;;  %v8551_v51 = vld [vmem:[#allocation38_spill] sm:$0xff] }
 0x4c5   : > { %v3681_v37 = vunpack.c.l.b16 %v3601_v15  ;;  %v8548_v15 = vld [vmem:[#allocation36_spill] sm:$0xff] }
 0x4c6   : > { %v3387_v6 = vpop.f32.mrf.mxu2 }
 0x4c7   : > { %v7875_v7 = vpack.c.b16 %v3681_v37, %v3680_v26  ;;  %v3388_v49 = vadd.f32 %v7851_v12, %v3387_v6  ;;  %v7893_v26 = vpop.f32.mrf.mxu1 }
 0x4c9   : > { %v3538_v50 = vmax.f32 %v3388_v49, 0.0 }
 0x4cb   : > { %v3602_v25 = vpack.c.bf16 %v3538_v50, %v3538_v50 }
 0x4cd   : > { %v3682_v40 = vunpack.c.l.b16 %v3602_v25 }
 0x4ce   : > { %v3389_v43 = vpop.f32.mrf.mxu2 }
 0x4cf   : > { %v3390_v57 = vadd.f32 %v7851_v12, %v3389_v43  ;;  %v7895_v1 = vpop.f32.mrf.mxu1 }
 0x4d1   : > { %v3539_v16 = vmax.f32 %v3390_v57, 0.0 }
 0x4d3   : > { %v3603_v41 = vpack.c.bf16 %v3539_v16, %v3539_v16  ;;  %3242 = vmatmul.bf16.gmra.mxu1 %v8546_v63  ;;  %3431 = vmatmul.bf16.gmra.mxu2 %v8547_v8 }
 0x4d5   : > { %v3683_v38 = vunpack.c.l.b16 %v3603_v41 }
 0x4d6   : > { %v3392_v60 = vpop.f32.mrf.mxu2 }
 0x4d7   : > { %v7885_v39 = vpack.c.b16 %v3683_v38, %v3682_v40  ;;  %v7901_v50 = vpop.f32.mrf.mxu1  ;;  %v3279_v38 = vpack.c.bf16 %v3128_v35, %v3126_v62 }
 0x4de   : > { %v3394_v21 = vpop.f32.mrf.mxu2 }
 0x4df   : > { %v7903_v57 = vpop.f32.mrf.mxu1 }
 0x4e3   : > { %3247 = vmatmul.bf16.gmra.mxu1 %v8548_v15  ;;  %3436 = vmatmul.bf16.gmra.mxu2 %v8549_v32 }
 0x4e6   : > { %v3397_v37 = vpop.f32.mrf.mxu2 }
 0x4e7   : > { %v3398_v32 = vadd.f32 %v7851_v12, %v3397_v37 }
 0x4ee   : > { %v3399_v6 = vpop.f32.mrf.mxu2 }
 0x4ef   : > { %v3400_v41 = vadd.f32 %v7851_v12, %v3399_v6 }
 0x4f3   : > { %3252 = vmatmul.bf16.gmra.mxu1 %v8550_v58  ;;  %3441 = vmatmul.bf16.gmra.mxu2 %v3277_v11 }
 0x4f6   : > { %v3402_v49 = vpop.f32.mrf.mxu2 }
 0x4f7   : > { %v3403_v46 = vadd.f32 %v7851_v12, %v3402_v49  ;;  %v3393_v49 = vadd.f32 %v7851_v12, %v3392_v60 }
 0x4fe   : > { %v3404_v43 = vpop.f32.mrf.mxu2 }
 0x4ff   : > { %v3405_v16 = vadd.f32 %v7851_v12, %v3404_v43 }
 0x501   : > { %v3545_v8 = vmax.f32 %v3405_v16, 0.0 }
 0x503   : > { %3257 = vmatmul.bf16.gmra.mxu1 %v8551_v51  ;;  %3446 = vmatmul.bf16.gmra.mxu2 %v3278_v45  ;;  %v3544_v51 = vmax.f32 %v3403_v46, 0.0  ;;  %v3395_v45 = vadd.f32 %v7851_v12, %v3394_v21  ;;  %v3609_v58 = vpack.c.bf16 %v3545_v8, %v3545_v8  ;;  %v7917_v46 = vpop.f32.mrf.mxu1 }
 0x505   : > { %v3608_v15 = vpack.c.bf16 %v3544_v51, %v3544_v51  ;;  %v3689_v35 = vunpack.c.l.b16 %v3609_v58 }
 0x506   : > { %v3407_v19 = vpop.f32.mrf.mxu2 }
 0x507   : > { %v3408_v25 = vadd.f32 %v7851_v12, %v3407_v19  ;;  %v3543_v19 = vmax.f32 %v3400_v41, 0.0  ;;  %v3688_v21 = vunpack.c.l.b16 %v3608_v15 }
 0x509   : > { %v3546_v44 = vmax.f32 %v3408_v25, 0.0  ;;  %v3542_v25 = vmax.f32 %v3398_v32, 0.0  ;;  %v3607_v62 = vpack.c.bf16 %v3543_v19, %v3543_v19  ;;  %v3698_v60 = vpack.c.b16 %v3689_v35, %v3688_v21 }
 0x50b   : > { %v3610_v36 = vpack.c.bf16 %v3546_v44, %v3546_v44  ;;  %v3540_v44 = vmax.f32 %v3393_v49, 0.0 }
 0x50d   : > { %v3690_v6 = vunpack.c.l.b16 %v3610_v36  ;;  %v3604_v32 = vpack.c.bf16 %v3540_v44, %v3540_v44 }
 0x50e   : > { %v3409_v11 = vpop.f32.mrf.mxu2 }
 0x50f   : > { %v3410_v40 = vadd.f32 %v7851_v12, %v3409_v11  ;;  %v3541_v11 = vmax.f32 %v3395_v45, 0.0  ;;  %v3684_v49 = vunpack.c.l.b16 %v3604_v32 }
 0x511   : > { %v3547_v54 = vmax.f32 %v3410_v40, 0.0  ;;  %v3606_v40 = vpack.c.bf16 %v3542_v25, %v3542_v25  ;;  %v3605_v8 = vpack.c.bf16 %v3541_v11, %v3541_v11 }
 0x513   : > { %3451 = vmatmul.bf16.gmra.mxu2 %v3279_v38  ;;  %v3611_v43 = vpack.c.bf16 %v3547_v54, %v3547_v54  ;;  %v3687_v38 = vunpack.c.l.b16 %v3607_v62  ;;  %v3686_v51 = vunpack.c.l.b16 %v3606_v40  ;;  %v3685_v45 = vunpack.c.l.b16 %v3605_v8 }
 0x515   : > { %v3691_v16 = vunpack.c.l.b16 %v3611_v43  ;;  %v3697_v19 = vpack.c.b16 %v3687_v38, %v3686_v51  ;;  %v3280_v43 = vpack.c.bf16 %v7887_v47, %v7879_v24 }
 0x516   : > { %v3412_v63 = vpop.f32.mrf.mxu2 }
 0x517   : > { %v3699_v37 = vpack.c.b16 %v3691_v16, %v3690_v6  ;;  %v3413_v41 = vadd.f32 %v7851_v12, %v3412_v63  ;;  %v3148_v63 = vpop.f32.mrf.mxu1  ;;  %v3696_v16 = vpack.c.b16 %v3685_v45, %v3684_v49 }
 0x519   : > { %3708 = vmatpush.bf16.msra.mxu3 %v3699_v37  ;;  %v3548_v36 = vmax.f32 %v3413_v41, 0.0  ;;  %v3281_v41 = vpack.c.bf16 %v7895_v1, %v7893_v26 }
 0x51b   : > { %v3612_v15 = vpack.c.bf16 %v3548_v36, %v3548_v36 }
 0x51d   : > { %3709 = vmatpush.bf16.msra.mxu3 %v3698_v60  ;;  %v3773_v11 = vunpack.c.l.b16 %v3612_v15 }
 0x51e   : > { %v3414_v54 = vpop.f32.mrf.mxu2 }
 0x51f   : > { %v3415_v58 = vadd.f32 %v7851_v12, %v3414_v54  ;;  %v3151_v40 = vpop.f32.mrf.mxu1 }
 0x521   : > { %v3549_v25 = vmax.f32 %v3415_v58, 0.0  ;;  %3710 = vmatpush.bf16.msra.mxu3 %v3697_v19 }
 0x523   : > { %v3613_v6 = vpack.c.bf16 %v3549_v25, %v3549_v25  ;;  %3456 = vmatmul.bf16.gmra.mxu2 %v3280_v43 }
 0x525   : > { %v3774_v62 = vunpack.c.l.b16 %v3613_v6  ;;  %3711 = vmatpush.bf16.msra.mxu3 %v3696_v16 }
 0x526   : > { %v3417_v35 = vpop.f32.mrf.mxu2 }
 0x527   : > { %v7923_v37 = vpack.c.b16 %v3774_v62, %v3773_v11  ;;  %v3418_v44 = vadd.f32 %v7851_v12, %v3417_v35 }
 0x529   : > { %3712 = vmatpush.bf16.msra.mxu3 %v7885_v39  ;;  %v3550_v24 = vmax.f32 %v3418_v44, 0.0  ;;  %v3153_v39 = vpop.f32.mrf.mxu1 }
 0x52b   : > { %v3614_v8 = vpack.c.bf16 %v3550_v24, %v3550_v24 }
 0x52d   : > { %3713 = vmatpush.bf16.msra.mxu3 %v7875_v7  ;;  %v3775_v32 = vunpack.c.l.b16 %v3614_v8 }
 0x52e   : > { %v3419_v47 = vpop.f32.mrf.mxu2 }
 0x52f   : > { %v3420_v21 = vadd.f32 %v7851_v12, %v3419_v47 }
 0x531   : > { %v3551_v38 = vmax.f32 %v3420_v21, 0.0  ;;  %3714 = vmatpush.bf16.msra.mxu3 %v7867_v13  ;;  %v3156_v58 = vpop.f32.mrf.mxu1  ;;  %v3282_v13 = vpack.c.bf16 %v7903_v57, %v7901_v50  ;;  %v3283_v50 = vpack.c.bf16 %v3148_v63, %v7917_v46 }
 0x533   : > { %v3615_v60 = vpack.c.bf16 %v3551_v38, %v3551_v38  ;;  %3461 = vmatmul.bf16.gmra.mxu2 %v3281_v41 }
 0x535   : > { %v3776_v51 = vunpack.c.l.b16 %v3615_v60  ;;  %3715 = vmatpush.bf16.msra.mxu3 %v7859_v9 }
 0x536   : > { %v3422_v36 = vpop.f32.mrf.mxu2 }
 0x537   : > { %v7933_v54 = vpack.c.b16 %v3776_v51, %v3775_v32  ;;  %v3423_v7 = vadd.f32 %v7851_v12, %v3422_v36  ;;  %v3284_v32 = vpack.c.bf16 %v3153_v39, %v3151_v40 }
 0x538   : > { %3716 = vmatmul.bf16.vlgmr.msra.gmra.mxu3 %v8518_v34 }
 0x539   : > { %v3552_v45 = vmax.f32 %v3423_v7, 0.0  ;;  %v3158_v16 = vpop.f32.mrf.mxu1 }
 0x53a   : > { %v3285_v63 = vpack.c.bf16 %v3158_v16, %v3156_v58 }
 0x53b   : > { %v3616_v19 = vpack.c.bf16 %v3552_v45, %v3552_v45 }
 0x53d   : > { %v3777_v9 = vunpack.c.l.b16 %v3616_v19 }
 0x53e   : > { %v3424_v26 = vpop.f32.mrf.mxu2 }
 0x53f   : > { %v3425_v1 = vadd.f32 %v7851_v12, %v3424_v26 }
 0x541   : > { %v3553_v43 = vmax.f32 %v3425_v1, 0.0  ;;  %v3161_v47 = vpop.f32.mrf.mxu1 }
 0x543   : > { %v3617_v49 = vpack.c.bf16 %v3553_v43, %v3553_v43  ;;  %3466 = vmatmul.bf16.gmra.mxu2 %v3282_v13  ;;  %v8552_v43 = vld [vmem:[#allocation26_spill] sm:$0xff] }
 0x545   : > { %v3778_v15 = vunpack.c.l.b16 %v3617_v49 }
 0x546   : > { %v3427_v25 = vpop.f32.mrf.mxu2 }
 0x547   : > { %v7940_v6 = vpack.c.b16 %v3778_v15, %v3777_v9  ;;  %v3428_v34 = vadd.f32 %v7851_v12, %v3427_v25 }
 0x548   : > { %3721 = vmatmul.bf16.gmra.mxu3 %v8519_v2 }
 0x549   : > { %v3554_v11 = vmax.f32 %v3428_v34, 0.0  ;;  %v3163_v2 = vpop.f32.mrf.mxu1 }
 0x54a   : > { %v3286_v13 = vpack.c.bf16 %v3163_v2, %v3161_v47 }
 0x54b   : > { %v3618_v57 = vpack.c.bf16 %v3554_v11, %v3554_v11 }
 0x54d   : > { %v3779_v21 = vunpack.c.l.b16 %v3618_v57 }
 0x54e   : > { %v3429_v62 = vpop.f32.mrf.mxu2 }
 0x54f   : > { %v3430_v35 = vadd.f32 %v7851_v12, %v3429_v62 }
 0x551   : > { %v3555_v44 = vmax.f32 %v3430_v35, 0.0  ;;  %v3223_v36 = vpop.f32.mrf.mxu1 }
 0x553   : > { %v3619_v24 = vpack.c.bf16 %v3555_v44, %v3555_v44  ;;  %3471 = vmatmul.bf16.gmra.mxu2 %v3283_v50 }
 0x555   : > { %v3780_v41 = vunpack.c.l.b16 %v3619_v24 }
 0x556   : > { %v3432_v8 = vpop.f32.mrf.mxu2 }
 0x557   : > { %v7946_v38 = vpack.c.b16 %v3780_v41, %v3779_v21  ;;  %v3433_v47 = vadd.f32 %v7851_v12, %v3432_v8 }
 0x558   : > { %3726 = vmatmul.bf16.gmra.mxu3 %v8520_v31 }
 0x559   : > { %v3225_v7 = vpop.f32.mrf.mxu1 }
 0x55a   : > { %v3287_v25 = vpack.c.bf16 %v3225_v7, %v3223_v36 }
 0x55e   : > { %v3434_v60 = vpop.f32.mrf.mxu2 }
 0x55f   : > { %v3435_v50 = vadd.f32 %v7851_v12, %v3434_v60 }
 0x561   : > { %v3228_v26 = vpop.f32.mrf.mxu1 }
 0x563   : > { %3476 = vmatmul.bf16.gmra.mxu2 %v3284_v32 }
 0x566   : > { %v3437_v51 = vpop.f32.mrf.mxu2 }
 0x567   : > { %v3438_v16 = vadd.f32 %v7851_v12, %v3437_v51 }
 0x568   : > { %3731 = vmatmul.bf16.gmra.mxu3 %v8521_v53 }
 0x569   : > { %v3230_v31 = vpop.f32.mrf.mxu1  ;;  %v3558_v21 = vmax.f32 %v3438_v16, 0.0 }
 0x56e   : > { %v3439_v46 = vpop.f32.mrf.mxu2 }
 0x56f   : > { %v3440_v9 = vadd.f32 %v7851_v12, %v3439_v46  ;;  %v3557_v46 = vmax.f32 %v3435_v50, 0.0 }
 0x571   : > { %v7957_v34 = vpop.f32.mrf.mxu1  ;;  %v3559_v57 = vmax.f32 %v3440_v9, 0.0 }
 0x573   : > { %3481 = vmatmul.bf16.gmra.mxu2 %v3285_v63  ;;  %v3623_v63 = vpack.c.bf16 %v3559_v57, %v3559_v57 }
 0x575   : > { %v3784_v8 = vunpack.c.l.b16 %v3623_v63 }
 0x576   : > { %v3442_v45 = vpop.f32.mrf.mxu2 }
 0x577   : > { %v3443_v53 = vadd.f32 %v7851_v12, %v3442_v45  ;;  %v3556_v45 = vmax.f32 %v3433_v47, 0.0 }
 0x578   : > { %3736 = vmatmul.bf16.gmra.mxu3 %v8522_v5 }
 0x579   : > { %v3560_v11 = vmax.f32 %v3443_v53, 0.0 }
 0x57b   : > { %v3624_v41 = vpack.c.bf16 %v3560_v11, %v3560_v11 }
 0x57d   : > { %v3785_v60 = vunpack.c.l.b16 %v3624_v41 }
 0x57e   : > { %v3444_v1 = vpop.f32.mrf.mxu2 }
 0x57f   : > { %v3445_v39 = vadd.f32 %v7851_v12, %v3444_v1  ;;  %v3622_v1 = vpack.c.bf16 %v3558_v21, %v3558_v21 }
 0x581   : > { %v3561_v15 = vmax.f32 %v3445_v39, 0.0  ;;  %v3620_v39 = vpack.c.bf16 %v3556_v45, %v3556_v45  ;;  %v3783_v53 = vunpack.c.l.b16 %v3622_v1 }
 0x583   : > { %3486 = vmatmul.bf16.gmra.mxu2 %v3286_v13  ;;  %v3625_v44 = vpack.c.bf16 %v3561_v15, %v3561_v15 }
 0x585   : > { %v3786_v7 = vunpack.c.l.b16 %v3625_v44 }
 0x586   : > { %v3447_v19 = vpop.f32.mrf.mxu2 }
 0x587   : > { %v3448_v40 = vadd.f32 %v7851_v12, %v3447_v19  ;;  %v3235_v19 = vpop.f32.mrf.mxu1 }
 0x588   : > { %3741 = vmatmul.bf16.gmra.mxu3 %v8552_v43  ;;  %v3621_v43 = vpack.c.bf16 %v3557_v46, %v3557_v46 }
 0x589   : > { %v3562_v58 = vmax.f32 %v3448_v40, 0.0  ;;  %v3795_v40 = vpack.c.b16 %v3786_v7, %v3785_v60 }
 0x58a   : > { %v3782_v9 = vunpack.c.l.b16 %v3621_v43 }
 0x58b   : > { %v3626_v62 = vpack.c.bf16 %v3562_v58, %v3562_v58 }
 0x58d   : > { %v3787_v2 = vunpack.c.l.b16 %v3626_v62 }
 0x58e   : > { %v3449_v49 = vpop.f32.mrf.mxu2 }
 0x58f   : > { %v3450_v5 = vadd.f32 %v7851_v12, %v3449_v49  ;;  %v3238_v50 = vpop.f32.mrf.mxu1 }
 0x591   : > { %v3563_v35 = vmax.f32 %v3450_v5, 0.0  ;;  %v3794_v5 = vpack.c.b16 %v3784_v8, %v3783_v53 }
 0x593   : > { %v3627_v24 = vpack.c.bf16 %v3563_v35, %v3563_v35  ;;  %3491 = vmatmul.bf16.gmra.mxu2 %v3287_v25  ;;  %v3781_v25 = vunpack.c.l.b16 %v3620_v39 }
 0x595   : > { %v3788_v32 = vunpack.c.l.b16 %v3627_v24  ;;  %v3793_v35 = vpack.c.b16 %v3782_v9, %v3781_v25 }
 0x596   : > { %v3452_v36 = vpop.f32.mrf.mxu2 }
 0x597   : > { %v3796_v51 = vpack.c.b16 %v3788_v32, %v3787_v2  ;;  %v3453_v13 = vadd.f32 %v7851_v12, %v3452_v36  ;;  %v3289_v32 = vpack.c.bf16 %v3235_v19, %v7957_v34 }
 0x598   : > { %3746 = vmatmul.bf16.gmra.mxu3 %v8524_v23  ;;  %v3288_v23 = vpack.c.bf16 %v3230_v31, %v3228_v26  ;;  %v3240_v31 = vpop.f32.mrf.mxu1 }
 0x599   : > { %3805 = vmatpush.bf16.msra.mxu1 %v3796_v51  ;;  %v3564_v58 = vmax.f32 %v3453_v13, 0.0  ;;  %v3290_v13 = vpack.c.bf16 %v3240_v31, %v3238_v50 }
 0x59b   : > { %v3628_v16 = vpack.c.bf16 %v3564_v58, %v3564_v58 }
 0x59d   : > { %3806 = vmatpush.bf16.msra.mxu1 %v3795_v40  ;;  %v3870_v57 = vunpack.c.l.b16 %v3628_v16 }
 0x59e   : > { %v3454_v49 = vpop.f32.mrf.mxu2 }
 0x59f   : > { %v3455_v15 = vadd.f32 %v7851_v12, %v3454_v49 }
 0x5a1   : > { %v3565_v11 = vmax.f32 %v3455_v15, 0.0  ;;  %3807 = vmatpush.bf16.msra.mxu1 %v3794_v5 }
 0x5a3   : > { %v3629_v62 = vpack.c.bf16 %v3565_v11, %v3565_v11  ;;  %3496 = vmatmul.bf16.gmra.mxu2 %v3288_v23 }
 0x5a5   : > { %v3871_v44 = vunpack.c.l.b16 %v3629_v62  ;;  %3808 = vmatpush.bf16.msra.mxu1 %v3793_v35 }
 0x5a6   : > { %v3457_v24 = vpop.f32.mrf.mxu2 }
 0x5a7   : > { %v7965_v47 = vpack.c.b16 %v3871_v44, %v3870_v57  ;;  %v3458_v21 = vadd.f32 %v7851_v12, %v3457_v24 }
 0x5a8   : > { %3751 = vmatmul.bf16.gmra.mxu3 %v8526_v52 }
 0x5a9   : > { %3809 = vmatpush.bf16.msra.mxu1 %v7946_v38  ;;  %v3566_v26 = vmax.f32 %v3458_v21, 0.0 }
 0x5ab   : > { %v3630_v36 = vpack.c.bf16 %v3566_v26, %v3566_v26 }
 0x5ad   : > { %3810 = vmatpush.bf16.msra.mxu1 %v7940_v6  ;;  %v3872_v52 = vunpack.c.l.b16 %v3630_v36  ;;  %v3243_v6 = vpop.f32.mrf.mxu1 }
 0x5ae   : > { %v3459_v41 = vpop.f32.mrf.mxu2 }
 0x5af   : > { %v3460_v2 = vadd.f32 %v7851_v12, %v3459_v41 }
 0x5b1   : > { %v3567_v46 = vmax.f32 %v3460_v2, 0.0  ;;  %3811 = vmatpush.bf16.msra.mxu1 %v7933_v54 }
 0x5b3   : > { %v3631_v63 = vpack.c.bf16 %v3567_v46, %v3567_v46  ;;  %3501 = vmatmul.bf16.gmra.mxu2 %v3289_v32 }
 0x5b5   : > { %v3873_v7 = vunpack.c.l.b16 %v3631_v63  ;;  %3812 = vmatpush.bf16.msra.mxu1 %v7923_v37  ;;  %v3245_v43 = vpop.f32.mrf.mxu1 }
 0x5b6   : > { %v3462_v38 = vpop.f32.mrf.mxu2  ;;  %v3291_v5 = vpack.c.bf16 %v3245_v43, %v3243_v6 }
 0x5b7   : > { %v7975_v51 = vpack.c.b16 %v3873_v7, %v3872_v52  ;;  %v3463_v45 = vadd.f32 %v7851_v12, %v3462_v38 }
 0x5b8   : > { %3813 = vmatmul.bf16.vlgmr.msra.gmra.mxu1 %v6962_v0 }
 0x5b9   : > { %v3568_v1 = vmax.f32 %v3463_v45, 0.0 }
 0x5bb   : > { %v3632_v54 = vpack.c.bf16 %v3568_v1, %v3568_v1 }
 0x5bd   : > { %v3874_v40 = vunpack.c.l.b16 %v3632_v54  ;;  %v3248_v58 = vpop.f32.mrf.mxu1 }
 0x5be   : > { %v3464_v34 = vpop.f32.mrf.mxu2 }
 0x5bf   : > { %v3465_v60 = vadd.f32 %v7851_v12, %v3464_v34 }
 0x5c1   : > { %v3569_v19 = vmax.f32 %v3465_v60, 0.0 }
 0x5c3   : > { %v3633_v8 = vpack.c.bf16 %v3569_v19, %v3569_v19  ;;  %3506 = vmatmul.bf16.gmra.mxu2 %v3290_v13 }
 0x5c5   : > { %v3875_v37 = vunpack.c.l.b16 %v3633_v8  ;;  %v3250_v35 = vpop.f32.mrf.mxu1 }
 0x5c6   : > { %v3467_v39 = vpop.f32.mrf.mxu2  ;;  %v3292_v24 = vpack.c.bf16 %v3250_v35, %v3248_v58 }
 0x5c7   : > { %v7980_v53 = vpack.c.b16 %v3875_v37, %v3874_v40  ;;  %v3468_v0 = vadd.f32 %v7851_v12, %v3467_v39 }
 0x5c8   : > { %3818 = vmatmul.bf16.gmra.mxu1 %v7070_v18 }
 0x5c9   : > { %v3570_v49 = vmax.f32 %v3468_v0, 0.0 }
 0x5cb   : > { %v3634_v23 = vpack.c.bf16 %v3570_v49, %v3570_v49 }
 0x5cd   : > { %v3876_v11 = vunpack.c.l.b16 %v3634_v23  ;;  %v3253_v44 = vpop.f32.mrf.mxu1 }
 0x5ce   : > { %v3469_v9 = vpop.f32.mrf.mxu2 }
 0x5cf   : > { %v3470_v15 = vadd.f32 %v7851_v12, %v3469_v9 }
 0x5d1   : > { %v3571_v25 = vmax.f32 %v3470_v15, 0.0 }
 0x5d3   : > { %v3635_v16 = vpack.c.bf16 %v3571_v25, %v3571_v25  ;;  %3511 = vmatmul.bf16.gmra.mxu2 %v3291_v5 }
 0x5d5   : > { %v3877_v62 = vunpack.c.l.b16 %v3635_v16  ;;  %v3255_v26 = vpop.f32.mrf.mxu1 }
 0x5d6   : > { %v3472_v50 = vpop.f32.mrf.mxu2  ;;  %v3293_v41 = vpack.c.bf16 %v3255_v26, %v3253_v44  ;;  %v8001_v44 = vpop.f32.mrf.mxu3 }
 0x5d7   : > { %v7985_v57 = vpack.c.b16 %v3877_v62, %v3876_v11  ;;  %v3473_v40 = vadd.f32 %v7851_v12, %v3472_v50 }
 0x5d8   : > { %3823 = vmatmul.bf16.gmra.mxu1 %v7131_v10 }
 0x5d9   : > { %v3572_v25 = vmax.f32 %v3473_v40, 0.0 }
 0x5dd   : > { %v3258_v2 = vpop.f32.mrf.mxu1 }
 0x5de   : > { %v3474_v18 = vpop.f32.mrf.mxu2 }
 0x5e3   : > { %3516 = vmatmul.bf16.gmra.mxu2 %v3292_v24  ;;  %v3636_v24 = vpack.c.bf16 %v3572_v25, %v3572_v25 }
 0x5e5   : > { %v3260_v36 = vpop.f32.mrf.mxu1 }
 0x5e6   : > { %v3477_v21 = vpop.f32.mrf.mxu2  ;;  %v3294_v63 = vpack.c.bf16 %v3260_v36, %v3258_v2 }
 0x5e7   : > { %v3478_v34 = vadd.f32 %v7851_v12, %v3477_v21 }
 0x5e8   : > { %3828 = vmatmul.bf16.gmra.mxu1 %v7176_v33 }
 0x5e9   : > { %v3574_v37 = vmax.f32 %v3478_v34, 0.0 }
 0x5eb   : > { %v3638_v16 = vpack.c.bf16 %v3574_v37, %v3574_v37 }
 0x5ed   : > { %v3880_v21 = vunpack.c.l.b16 %v3638_v16 }
 0x5ee   : > { %v3479_v31 = vpop.f32.mrf.mxu2 }
 0x5ef   : > { %v3480_v45 = vadd.f32 %v7851_v12, %v3479_v31 }
 0x5f1   : > { %v3575_v19 = vmax.f32 %v3480_v45, 0.0 }
 0x5f3   : > { %3521 = vmatmul.bf16.gmra.mxu2 %v3293_v41  ;;  %v3639_v15 = vpack.c.bf16 %v3575_v19, %v3575_v19 }
 0x5f6   : > { %v3482_v32 = vpop.f32.mrf.mxu2 }
 0x5f7   : > { %v3483_v33 = vadd.f32 %v7851_v12, %v3482_v32  ;;  %v3878_v32 = vunpack.c.l.b16 %v3636_v24 }
 0x5f8   : > { %3833 = vmatmul.bf16.gmra.mxu1 %v7222_v30 }
 0x5f9   : > { %v3576_v60 = vmax.f32 %v3483_v33, 0.0 }
 0x5fb   : > { %v3640_v39 = vpack.c.bf16 %v3576_v60, %v3576_v60 }
 0x5fd   : > { %v3882_v11 = vunpack.c.l.b16 %v3640_v39 }
 0x5fe   : > { %v3484_v46 = vpop.f32.mrf.mxu2 }
 0x5ff   : > { %v3485_v7 = vadd.f32 %v7851_v12, %v3484_v46 }
 0x601   : > { %v3577_v1 = vmax.f32 %v3485_v7, 0.0 }
 0x603   : > { %3526 = vmatmul.bf16.gmra.mxu2 %v3294_v63  ;;  %v3641_v43 = vpack.c.bf16 %v3577_v1, %v3577_v1 }
 0x605   : > { %v3883_v5 = vunpack.c.l.b16 %v3641_v43 }
 0x606   : > { %v3487_v10 = vpop.f32.mrf.mxu2 }
 0x607   : > { %v3488_v52 = vadd.f32 %v7851_v12, %v3487_v10  ;;  %v3892_v50 = vpack.c.b16 %v3883_v5, %v3882_v11 }
 0x608   : > { %3838 = vmatmul.bf16.gmra.mxu1 %v8533_v48  ;;  %v3475_v48 = vadd.f32 %v7851_v12, %v3474_v18  ;;  %v3881_v18 = vunpack.c.l.b16 %v3639_v15 }
 0x609   : > { %v3578_v38 = vmax.f32 %v3488_v52, 0.0 }
 0x60a   : > { %v3573_v9 = vmax.f32 %v3475_v48, 0.0 }
 0x60b   : > { %v3642_v13 = vpack.c.bf16 %v3578_v38, %v3578_v38  ;;  %v8004_v38 = vpop.f32.mrf.mxu3 }
 0x60c   : > { %v3637_v35 = vpack.c.bf16 %v3573_v9, %v3573_v9 }
 0x60d   : > { %v3884_v0 = vunpack.c.l.b16 %v3642_v13 }
 0x60e   : > { %v3489_v6 = vpop.f32.mrf.mxu2  ;;  %v3879_v41 = vunpack.c.l.b16 %v3637_v35 }
 0x60f   : > { %v3490_v30 = vadd.f32 %v7851_v12, %v3489_v6 }
 0x610   : > { %v3890_v10 = vpack.c.b16 %v3879_v41, %v3878_v32 }
 0x611   : > { %v3579_v54 = vmax.f32 %v3490_v30, 0.0 }
 0x613   : > { %v3643_v8 = vpack.c.bf16 %v3579_v54, %v3579_v54  ;;  %v8013_v60 = vpop.f32.mrf.mxu3 }
 0x615   : > { %v3885_v58 = vunpack.c.l.b16 %v3643_v8 }
 0x616   : > { %v3492_v49 = vpop.f32.mrf.mxu2 }
 0x617   : > { %v3893_v23 = vpack.c.b16 %v3885_v58, %v3884_v0  ;;  %v3493_v62 = vadd.f32 %v7851_v12, %v3492_v49 }
 0x618   : > { %3843 = vmatmul.bf16.gmra.mxu1 %v8535_v29  ;;  %v3891_v29 = vpack.c.b16 %v3881_v18, %v3880_v21 }
 0x619   : > { %3902 = vmatpush.bf16.msrb.mxu3 %v3893_v23  ;;  %v3580_v26 = vmax.f32 %v3493_v62, 0.0 }
 0x61b   : > { %v3644_v36 = vpack.c.bf16 %v3580_v26, %v3580_v26 }
 0x61d   : > { %3903 = vmatpush.bf16.msrb.mxu3 %v3892_v50  ;;  %v3967_v52 = vunpack.c.l.b16 %v3644_v36 }
 0x61e   : > { %v3494_v31 = vpop.f32.mrf.mxu2 }
 0x61f   : > { %v3495_v2 = vadd.f32 %v7851_v12, %v3494_v31 }
 0x621   : > { %v3581_v46 = vmax.f32 %v3495_v2, 0.0  ;;  %3904 = vmatpush.bf16.msrb.mxu3 %v3891_v29 }
 0x623   : > { %v3645_v63 = vpack.c.bf16 %v3581_v46, %v3581_v46 }
 0x625   : > { %v3968_v7 = vunpack.c.l.b16 %v3645_v63  ;;  %3905 = vmatpush.bf16.msrb.mxu3 %v3890_v10  ;;  %v4736_v63 = vld [vmem:[#allocation10 + $0x38] sm:$0xff] }
 0x626   : > { %v3497_v33 = vpop.f32.mrf.mxu2 }
 0x627   : > { %v8006_v6 = vpack.c.b16 %v3968_v7, %v3967_v52  ;;  %v3498_v45 = vadd.f32 %v7851_v12, %v3497_v33  ;;  %v4734_v7 = vld [vmem:[#allocation10 + $0x28] sm:$0xff]  ;;  %v4733_v33 = vld [vmem:[#allocation10 + $0x20] sm:$0xff] }
 0x628   : > { %3848 = vmatmul.bf16.gmra.mxu1 %v8536_v3 }
 0x629   : > { %3906 = vmatpush.bf16.msrb.mxu3 %v7985_v57  ;;  %v3582_v1 = vmax.f32 %v3498_v45, 0.0  ;;  %v8021_v57 = vpop.f32.mrf.mxu3 }
 0x62b   : > { %v3646_v13 = vpack.c.bf16 %v3582_v1, %v3582_v1  ;;  %v4732_v1 = vld [vmem:[#allocation10 + $0x18] sm:$0xff] }
 0x62d   : > { %3907 = vmatpush.bf16.msrb.mxu3 %v7980_v53  ;;  %v3969_v19 = vunpack.c.l.b16 %v3646_v13 }
 0x62e   : > { %v3499_v30 = vpop.f32.mrf.mxu2 }
 0x62f   : > { %v3500_v34 = vadd.f32 %v7851_v12, %v3499_v30 }
 0x631   : > { %v3583_v54 = vmax.f32 %v3500_v34, 0.0  ;;  %3908 = vmatpush.bf16.msrb.mxu3 %v7975_v51  ;;  %v8024_v49 = vpop.f32.mrf.mxu3 }
 0x633   : > { %v3647_v48 = vpack.c.bf16 %v3583_v54, %v3583_v54 }
 0x635   : > { %v3970_v43 = vunpack.c.l.b16 %v3647_v48  ;;  %3909 = vmatpush.bf16.msrb.mxu3 %v7965_v47  ;;  %v4731_v48 = vld [vmem:[#allocation10 + $0x10] sm:$0xff] }
 0x636   : > { %v3502_v3 = vpop.f32.mrf.mxu2 }
 0x637   : > { %v8017_v8 = vpack.c.b16 %v3970_v43, %v3969_v19  ;;  %v3503_v53 = vadd.f32 %v7851_v12, %v3502_v3 }
 0x638   : > { %3910 = vmatmul.bf16.vlgmr.msrb.gmra.mxu3 %v7435_v20 }
 0x639   : > { %v3584_v40 = vmax.f32 %v3503_v53, 0.0  ;;  %v8030_v16 = vpop.f32.mrf.mxu3  ;;  %4148 = vmatpush.bf16.msra.mxu3 %v4736_v63 }
 0x63b   : > { %v3648_v0 = vpack.c.bf16 %v3584_v40, %v3584_v40 }
 0x63d   : > { %v3971_v9 = vunpack.c.l.b16 %v3648_v0 }
 0x63e   : > { %v3504_v37 = vpop.f32.mrf.mxu2 }
 0x63f   : > { %v3505_v39 = vadd.f32 %v7851_v12, %v3504_v37 }
 0x641   : > { %v3585_v51 = vmax.f32 %v3505_v39, 0.0  ;;  %v8036_v31 = vpop.f32.mrf.mxu3  ;;  %v4730_v39 = vld [vmem:[#allocation10 + $0x8] sm:$0xff] }
 0x643   : > { %v3649_v58 = vpack.c.bf16 %v3585_v51, %v3585_v51 }
 0x645   : > { %v3972_v47 = vunpack.c.l.b16 %v3649_v58 }
 0x646   : > { %v3507_v15 = vpop.f32.mrf.mxu2 }
 0x647   : > { %v8026_v5 = vpack.c.b16 %v3972_v47, %v3971_v9  ;;  %v3508_v20 = vadd.f32 %v7851_v12, %v3507_v15 }
 0x648   : > { %3915 = vmatmul.bf16.gmra.mxu3 %v7465_v22 }
 0x649   : > { %v3586_v23 = vmax.f32 %v3508_v20, 0.0  ;;  %v8038_v41 = vpop.f32.mrf.mxu3 }
 0x64b   : > { %v3650_v62 = vpack.c.bf16 %v3586_v23, %v3586_v23 }
 0x64d   : > { %v3973_v50 = vunpack.c.l.b16 %v3650_v62  ;;  %v4729_v62 = vld [vmem:[#allocation10] sm:$0xff] }
 0x64e   : > { %v3509_v25 = vpop.f32.mrf.mxu2 }
 0x64f   : > { %v3510_v11 = vadd.f32 %v7851_v12, %v3509_v25 }
 0x651   : > { %v3587_v35 = vmax.f32 %v3510_v11, 0.0  ;;  %v8041_v29 = vpop.f32.mrf.mxu3 }
 0x653   : > { %v3651_v18 = vpack.c.bf16 %v3587_v35, %v3587_v35 }
 0x655   : > { %v3974_v24 = vunpack.c.l.b16 %v3651_v18 }
 0x656   : > { %v3512_v21 = vpop.f32.mrf.mxu2 }
 0x657   : > { %v8033_v26 = vpack.c.b16 %v3974_v24, %v3973_v50  ;;  %v3513_v47 = vadd.f32 %v7851_v12, %v3512_v21 }
 0x658   : > { %3920 = vmatmul.bf16.gmra.mxu3 %v7491_v4  ;;  %v4735_v4 = vld [vmem:[#allocation10 + $0x30] sm:$0xff] }
 0x659   : > { %v8043_v46 = vpop.f32.mrf.mxu3  ;;  %4149 = vmatpush.bf16.msra.mxu3 %v4735_v4 }
 0x65d   : > { %4150 = vmatpush.bf16.msra.mxu3 %v4734_v7 }
 0x65e   : > { %v3514_v22 = vpop.f32.mrf.mxu2 }
 0x65f   : > { %v3515_v0 = vadd.f32 %v7851_v12, %v3514_v22  ;;  %v3588_v22 = vmax.f32 %v3513_v47, 0.0 }
 0x661   : > { %v8046_v52 = vpop.f32.mrf.mxu3  ;;  %4151 = vmatpush.bf16.msra.mxu3 %v4733_v33  ;;  %v3589_v35 = vmax.f32 %v3515_v0, 0.0  ;;  %v3652_v63 = vpack.c.bf16 %v3588_v22, %v3588_v22 }
 0x665   : > { %4152 = vmatpush.bf16.msra.mxu3 %v4732_v1 }
 0x666   : > { %v3517_v2 = vpop.f32.mrf.mxu2 }
 0x668   : > { %3925 = vmatmul.bf16.gmra.mxu3 %v7512_v17 }
 0x669   : > { %v8050_v30 = vpop.f32.mrf.mxu3  ;;  %4153 = vmatpush.bf16.msra.mxu3 %v4731_v48  ;;  %v4052_v48 = vpack.c.bf16 %v8043_v46, %v8041_v29 }
 0x66d   : > { %4154 = vmatpush.bf16.msra.mxu3 %v4730_v39 }
 0x66e   : > { %v3519_v32 = vpop.f32.mrf.mxu2 }
 0x66f   : > { %v3520_v19 = vadd.f32 %v7851_v12, %v3519_v32 }
 0x671   : > { %v3591_v51 = vmax.f32 %v3520_v19, 0.0  ;;  %v8059_v15 = vpop.f32.mrf.mxu3  ;;  %4155 = vmatpush.bf16.msra.mxu3 %v4729_v62 }
 0x673   : > { %v3655_v18 = vpack.c.bf16 %v3591_v51, %v3591_v51  ;;  %v8555_v51 = vld [vmem:[#allocation37_spill] sm:$0xff] }
 0x675   : > { %v3978_v21 = vunpack.c.l.b16 %v3655_v18  ;;  %v8139_v18 = vld [vmem:[%s8306_s7] ss:$0 sm:$0xff] }
 0x676   : > { %v3522_v36 = vpop.f32.mrf.mxu2 }
 0x677   : > { %v3523_v34 = vadd.f32 %v7851_v12, %v3522_v36 }
 0x678   : > { %3930 = vmatmul.bf16.gmra.mxu3 %v7551_v56 }
 0x679   : > { %v3592_v53 = vmax.f32 %v3523_v34, 0.0  ;;  %v3749_v4 = vpop.f32.mrf.mxu3 }
 0x67a   : > { %v4054_v0 = vpack.c.bf16 %v3749_v4, %v8059_v15 }
 0x67b   : > { %v3656_v23 = vpack.c.bf16 %v3592_v53, %v3592_v53  ;;  %v8554_v53 = vld [vmem:[#allocation36_spill] sm:$0xff] }
 0x67d   : > { %v3979_v32 = vunpack.c.l.b16 %v3656_v23  ;;  %v8556_v23 = vld [vmem:[#allocation38_spill] sm:$0xff] }
 0x67e   : > { %v3524_v10 = vpop.f32.mrf.mxu2 }
 0x67f   : > { %v3525_v56 = vadd.f32 %v7851_v12, %v3524_v10 }
 0x681   : > { %v3593_v43 = vmax.f32 %v3525_v56, 0.0  ;;  %v4048_v56 = vpack.c.bf16 %v8004_v38, %v8001_v44  ;;  %v4050_v44 = vpack.c.bf16 %v8030_v16, %v8024_v49 }
 0x683   : > { %v3657_v58 = vpack.c.bf16 %v3593_v43, %v3593_v43  ;;  %v8553_v43 = vld [vmem:[#allocation35_spill] sm:$0xff] }
 0x685   : > { %v3980_v50 = vunpack.c.l.b16 %v3657_v58 }
 0x686   : > { %v3527_v45 = vpop.f32.mrf.mxu2 }
 0x687   : > { %v3528_v17 = vadd.f32 %v7851_v12, %v3527_v45  ;;  %v3989_v36 = vpack.c.b16 %v3980_v50, %v3979_v32  ;;  %v3975_v45 = vunpack.c.l.b16 %v3652_v63 }
 0x688   : > { %3935 = vmatmul.bf16.gmra.mxu3 %v7590_v55  ;;  %v3518_v55 = vadd.f32 %v7851_v12, %v3517_v2 }
 0x689   : > { %v3594_v13 = vmax.f32 %v3528_v17, 0.0 }
 0x68a   : > { %v3590_v20 = vmax.f32 %v3518_v55, 0.0  ;;  %v4053_v55 = vpack.c.bf16 %v8050_v30, %v8046_v52 }
 0x68b   : > { %v3658_v40 = vpack.c.bf16 %v3594_v13, %v3594_v13 }
 0x68c   : > { %v3654_v2 = vpack.c.bf16 %v3590_v20, %v3590_v20 }
 0x68d   : > { %v3981_v25 = vunpack.c.l.b16 %v3658_v40 }
 0x68e   : > { %v3529_v54 = vpop.f32.mrf.mxu2  ;;  %v3977_v10 = vunpack.c.l.b16 %v3654_v2 }
 0x68f   : > { %v3530_v3 = vadd.f32 %v7851_v12, %v3529_v54  ;;  %v3653_v12 = vpack.c.bf16 %v3589_v35, %v3589_v35 }
 0x690   : > { %v3988_v33 = vpack.c.b16 %v3978_v21, %v3977_v10 }
 0x691   : > { %v3595_v37 = vmax.f32 %v3530_v3, 0.0  ;;  %v3976_v7 = vunpack.c.l.b16 %v3653_v12 }
 0x693   : > { %v3659_v9 = vpack.c.bf16 %v3595_v37, %v3595_v37  ;;  %v3987_v17 = vpack.c.b16 %v3976_v7, %v3975_v45 }
 0x695   : > { %v3982_v11 = vunpack.c.l.b16 %v3659_v9 }
 0x697   : > { %v3990_v24 = vpack.c.b16 %v3982_v11, %v3981_v25 }
 0x698   : > { %3940 = vmatmul.bf16.gmra.mxu3 %v7620_v14  ;;  %v3752_v14 = vpop.f32.mrf.mxu3 }
 0x699   : > { %3999 = vmatpush.bf16.msrb.mxu1 %v3990_v24 }
 0x69d   : > { %4000 = vmatpush.bf16.msrb.mxu1 %v3989_v36 }
 0x6a0   : > { %v3754_v1 = vpop.f32.mrf.mxu3 }
 0x6a1   : > { %4001 = vmatpush.bf16.msrb.mxu1 %v3988_v33  ;;  %v4055_v47 = vpack.c.bf16 %v3754_v1, %v3752_v14 }
 0x6a5   : > { %4002 = vmatpush.bf16.msrb.mxu1 %v3987_v17 }
 0x6a8   : > { %3945 = vmatmul.bf16.gmra.mxu3 %v8537_v61 }
 0x6a9   : > { %4003 = vmatpush.bf16.msrb.mxu1 %v8033_v26  ;;  %v3814_v26 = vpop.f32.mrf.mxu1 }
 0x6ad   : > { %4004 = vmatpush.bf16.msrb.mxu1 %v8026_v5  ;;  %v4049_v5 = vpack.c.bf16 %v8021_v57, %v8013_v60  ;;  %v4051_v57 = vpack.c.bf16 %v8038_v41, %v8036_v31 }
 0x6b1   : > { %4005 = vmatpush.bf16.msrb.mxu1 %v8017_v8  ;;  %v3816_v49 = vpop.f32.mrf.mxu1 }
 0x6b2   : > { %v4056_v62 = vpack.c.bf16 %v3816_v49, %v3814_v26 }
 0x6b5   : > { %4006 = vmatpush.bf16.msrb.mxu1 %v8006_v6 }
 0x6b8   : > { %4007 = vmatmul.bf16.vlgmr.msrb.gmra.mxu1 %v8538_v42  ;;  %4156 = vmatmul.bf16.vlgmr.msra.gmra.mxu3 %v4048_v56 }
 0x6b9   : > { %v3819_v19 = vpop.f32.mrf.mxu1 }
 0x6bb   : > { %v8070_v34 = vpop.f32.mrf.mxu3 }
 0x6c1   : > { %v3821_v31 = vpop.f32.mrf.mxu1 }
 0x6c2   : > { %v4057_v2 = vpack.c.bf16 %v3821_v31, %v3819_v19 }
 0x6c3   : > { %v8072_v13 = vpop.f32.mrf.mxu3 }
 0x6c4   : > { %v4064_v61 = vpack.c.bf16 %v8072_v13, %v8070_v34 }
 0x6c8   : > { %4012 = vmatmul.bf16.gmra.mxu1 %v8540_v27  ;;  %4161 = vmatmul.bf16.gmra.mxu3 %v4049_v5 }
 0x6c9   : > { %v3824_v40 = vpop.f32.mrf.mxu1 }
 0x6cb   : > { %v8079_v6 = vpop.f32.mrf.mxu3 }
 0x6d1   : > { %v3826_v37 = vpop.f32.mrf.mxu1 }
 0x6d2   : > { %v4058_v10 = vpack.c.bf16 %v3826_v37, %v3824_v40 }
 0x6d3   : > { %v8081_v8 = vpop.f32.mrf.mxu3 }
 0x6d4   : > { %v4065_v42 = vpack.c.bf16 %v8081_v8, %v8079_v6 }
 0x6d8   : > { %4017 = vmatmul.bf16.gmra.mxu1 %v8542_v59  ;;  %4166 = vmatmul.bf16.gmra.mxu3 %v4050_v44 }
 0x6d9   : > { %v3829_v52 = vpop.f32.mrf.mxu1 }
 0x6db   : > { %v8088_v38 = vpop.f32.mrf.mxu3 }
 0x6e1   : > { %v3831_v20 = vpop.f32.mrf.mxu1 }
 0x6e2   : > { %v4059_v1 = vpack.c.bf16 %v3831_v20, %v3829_v52 }
 0x6e3   : > { %v8090_v60 = vpop.f32.mrf.mxu3 }
 0x6e4   : > { %v4066_v27 = vpack.c.bf16 %v8090_v60, %v8088_v38 }
 0x6e8   : > { %4022 = vmatmul.bf16.gmra.mxu1 %v8544_v28  ;;  %4171 = vmatmul.bf16.gmra.mxu3 %v4051_v57 }
 0x6e9   : > { %v3834_v33 = vpop.f32.mrf.mxu1 }
 0x6eb   : > { %v8097_v54 = vpop.f32.mrf.mxu3 }
 0x6f1   : > { %v3836_v5 = vpop.f32.mrf.mxu1 }
 0x6f2   : > { %v4060_v19 = vpack.c.bf16 %v3836_v5, %v3834_v33 }
 0x6f3   : > { %v8099_v16 = vpop.f32.mrf.mxu3 }
 0x6f4   : > { %v4067_v59 = vpack.c.bf16 %v8099_v16, %v8097_v54 }
 0x6f8   : > { %4027 = vmatmul.bf16.gmra.mxu1 %v8553_v43  ;;  %4176 = vmatmul.bf16.gmra.mxu3 %v4052_v48 }
 0x6f9   : > { %v3839_v26 = vpop.f32.mrf.mxu1 }
 0x6fb   : > { %v8106_v3 = vpop.f32.mrf.mxu3 }
 0x701   : > { %v3841_v31 = vpop.f32.mrf.mxu1 }
 0x703   : > { %v8108_v28 = vpop.f32.mrf.mxu3 }
 0x704   : > { %v4068_v41 = vpack.c.bf16 %v8108_v28, %v8106_v3 }
 0x708   : > { %4032 = vmatmul.bf16.gmra.mxu1 %v8554_v53  ;;  %4181 = vmatmul.bf16.gmra.mxu3 %v4053_v55 }
 0x70b   : > { %v8115_v29 = vpop.f32.mrf.mxu3 }
 0x713   : > { %v8117_v46 = vpop.f32.mrf.mxu3 }
 0x714   : > { %v4069_v39 = vpack.c.bf16 %v8117_v46, %v8115_v29 }
 0x718   : > { %4037 = vmatmul.bf16.gmra.mxu1 %v8555_v51  ;;  %4186 = vmatmul.bf16.gmra.mxu3 %v4054_v0  ;;  %v3844_v0 = vpop.f32.mrf.mxu1  ;;  %v4061_v51 = vpack.c.bf16 %v3841_v31, %v3839_v26 }
 0x71b   : > { %v8123_v58 = vpop.f32.mrf.mxu3 }
 0x720   : > { %v3846_v20 = vpop.f32.mrf.mxu1 }
 0x723   : > { %v8125_v30 = vpop.f32.mrf.mxu3 }
 0x724   : > { %v4070_v9 = vpack.c.bf16 %v8125_v30, %v8123_v58 }
 0x728   : > { %4042 = vmatmul.bf16.gmra.mxu1 %v8556_v23  ;;  %4191 = vmatmul.bf16.gmra.mxu3 %v4055_v47 }
 0x72b   : > { %v8130_v25 = vpop.f32.mrf.mxu3 }
 0x733   : > { %v8132_v15 = vpop.f32.mrf.mxu3 }
 0x734   : > { %v4071_v11 = vpack.c.bf16 %v8132_v15, %v8130_v25 }
 0x738   : > { %4196 = vmatmul.bf16.gmra.mxu3 %v4056_v62 }
 0x73b   : > { %v4157_v35 = vpop.f32.mrf.mxu3 }
 0x73c   : > { %v4158_v24 = vadd.f32 %v8139_v18, %v4157_v35 }
 0x743   : > { %v4159_v50 = vpop.f32.mrf.mxu3 }
 0x744   : > { %v4160_v22 = vadd.f32 %v8139_v18, %v4159_v50  ;;  %v4062_v50 = vpack.c.bf16 %v3846_v20, %v3844_v0 }
 0x746   : > { %v4870_v32 = vpack.c.bf16 %v4160_v22, %v4158_v24  ;;  %v3849_v22 = vpop.f32.mrf.mxu1 }
 0x748   : > { %4871 = vst [vmem:[%s8145_s18] sm:$0xff] %v4870_v32   ;;  %4201 = vmatmul.bf16.gmra.mxu3 %v4057_v2 }
 0x74b   : > { %v4162_v12 = vpop.f32.mrf.mxu3 }
 0x74c   : > { %v4163_v36 = vadd.f32 %v8139_v18, %v4162_v12 }
 0x74e   : > { %v3851_v32 = vpop.f32.mrf.mxu1 }
 0x753   : > { %v4164_v21 = vpop.f32.mrf.mxu3 }
 0x754   : > { %v4165_v63 = vadd.f32 %v8139_v18, %v4164_v21 }
 0x756   : > { %v4875_v4 = vpack.c.bf16 %v4165_v63, %v4163_v36  ;;  %v4063_v63 = vpack.c.bf16 %v3851_v32, %v3849_v22 }
 0x758   : > { %5058 = vst [vmem:[%s8145_s18 + $0x8] sm:$0xff] %v4875_v4   ;;  %4206 = vmatmul.bf16.gmra.mxu3 %v4058_v10 }
 0x75b   : > { %v4167_v7 = vpop.f32.mrf.mxu3 }
 0x75c   : > { %v4168_v17 = vadd.f32 %v8139_v18, %v4167_v7 }
 0x763   : > { %v4169_v45 = vpop.f32.mrf.mxu3 }
 0x764   : > { %v4170_v14 = vadd.f32 %v8139_v18, %v4169_v45 }
 0x766   : > { %v4880_v56 = vpack.c.bf16 %v4170_v14, %v4168_v17 }
 0x768   : > { %5059 = vst [vmem:[%s8145_s18 + $0x10] sm:$0xff] %v4880_v56   ;;  %4211 = vmatmul.bf16.gmra.mxu3 %v4059_v1 }
 0x76b   : > { %v4172_v44 = vpop.f32.mrf.mxu3 }
 0x76c   : > { %v4173_v49 = vadd.f32 %v8139_v18, %v4172_v44 }
 0x773   : > { %v4174_v57 = vpop.f32.mrf.mxu3 }
 0x774   : > { %v4175_v48 = vadd.f32 %v8139_v18, %v4174_v57 }
 0x776   : > { %v4885_v43 = vpack.c.bf16 %v4175_v48, %v4173_v49 }
 0x778   : > { %5060 = vst [vmem:[%s8145_s18 + $0x18] sm:$0xff] %v4885_v43   ;;  %4216 = vmatmul.bf16.gmra.mxu3 %v4060_v19 }
 0x77b   : > { %v4177_v55 = vpop.f32.mrf.mxu3 }
 0x77c   : > { %v4178_v40 = vadd.f32 %v8139_v18, %v4177_v55 }
 0x783   : > { %v4179_v53 = vpop.f32.mrf.mxu3 }
 0x784   : > { %v4180_v37 = vadd.f32 %v8139_v18, %v4179_v53 }
 0x786   : > { %v4890_v52 = vpack.c.bf16 %v4180_v37, %v4178_v40  ;;  %v4008_v40 = vpop.f32.mrf.mxu1 }
 0x788   : > { %5061 = vst [vmem:[%s8145_s18 + $0x20] sm:$0xff] %v4890_v52   ;;  %4221 = vmatmul.bf16.gmra.mxu3 %v4061_v51 }
 0x78b   : > { %v4182_v47 = vpop.f32.mrf.mxu3 }
 0x78c   : > { %v4183_v62 = vadd.f32 %v8139_v18, %v4182_v47 }
 0x78e   : > { %v4010_v0 = vpop.f32.mrf.mxu1 }
 0x793   : > { %v4184_v23 = vpop.f32.mrf.mxu3 }
 0x794   : > { %v4185_v35 = vadd.f32 %v8139_v18, %v4184_v23 }
 0x796   : > { %v4895_v24 = vpack.c.bf16 %v4185_v35, %v4183_v62  ;;  %v4013_v52 = vpop.f32.mrf.mxu1  ;;  %v4072_v35 = vpack.c.bf16 %v4010_v0, %v4008_v40 }
 0x798   : > { %5062 = vst [vmem:[%s8145_s18 + $0x28] sm:$0xff] %v4895_v24   ;;  %4226 = vmatmul.bf16.gmra.mxu3 %v4062_v50 }
 0x79b   : > { %v4187_v2 = vpop.f32.mrf.mxu3 }
 0x79c   : > { %v4188_v21 = vadd.f32 %v8139_v18, %v4187_v2 }
 0x79e   : > { %v4015_v20 = vpop.f32.mrf.mxu1 }
 0x7a3   : > { %v4189_v12 = vpop.f32.mrf.mxu3 }
 0x7a4   : > { %v4190_v36 = vadd.f32 %v8139_v18, %v4189_v12 }
 0x7a6   : > { %v4900_v10 = vpack.c.bf16 %v4190_v36, %v4188_v21 }
 0x7a8   : > { %5063 = vst [vmem:[%s8145_s18 + $0x30] sm:$0xff] %v4900_v10   ;;  %4231 = vmatmul.bf16.gmra.mxu3 %v4063_v63 }
 0x7ab   : > { %v4192_v4 = vpop.f32.mrf.mxu3 }
 0x7ac   : > { %v4193_v33 = vadd.f32 %v8139_v18, %v4192_v4 }
 0x7b3   : > { %v4194_v7 = vpop.f32.mrf.mxu3 }
 0x7b4   : > { %v4195_v45 = vadd.f32 %v8139_v18, %v4194_v7 }
 0x7b6   : > { %v4905_v17 = vpack.c.bf16 %v4195_v45, %v4193_v33 }
 0x7b8   : > { %5064 = vst [vmem:[%s8145_s18 + $0x38] sm:$0xff] %v4905_v17   ;;  %4236 = vmatmul.bf16.gmra.mxu3 %v4064_v61 }
 0x7bb   : > { %v4197_v14 = vpop.f32.mrf.mxu3 }
 0x7bc   : > { %v4198_v56 = vadd.f32 %v8139_v18, %v4197_v14 }
 0x7c3   : > { %v4199_v1 = vpop.f32.mrf.mxu3 }
 0x7c4   : > { %v4200_v5 = vadd.f32 %v8139_v18, %v4199_v1 }
 0x7c6   : > { %v4910_v44 = vpack.c.bf16 %v4200_v5, %v4198_v56 }
 0x7c8   : > { %5065 = vst [vmem:[%s8145_s18 + $0x40] sm:$0xff] %v4910_v44   ;;  %4241 = vmatmul.bf16.gmra.mxu3 %v4065_v42 }
 0x7cb   : > { %v4202_v26 = vpop.f32.mrf.mxu3 }
 0x7cc   : > { %v4203_v49 = vadd.f32 %v8139_v18, %v4202_v26 }
 0x7d3   : > { %v4204_v57 = vpop.f32.mrf.mxu3 }
 0x7d4   : > { %v4205_v34 = vadd.f32 %v8139_v18, %v4204_v57 }
 0x7d6   : > { %v4915_v13 = vpack.c.bf16 %v4205_v34, %v4203_v49 }
 0x7d8   : > { %5066 = vst [vmem:[%s8145_s18 + $0x48] sm:$0xff] %v4915_v13   ;;  %4246 = vmatmul.bf16.gmra.mxu3 %v4066_v27 }
 0x7db   : > { %v4207_v61 = vpop.f32.mrf.mxu3 }
 0x7dc   : > { %v4208_v19 = vadd.f32 %v8139_v18, %v4207_v61 }
 0x7e3   : > { %v4209_v48 = vpop.f32.mrf.mxu3 }
 0x7e4   : > { %v4210_v6 = vadd.f32 %v8139_v18, %v4209_v48 }
 0x7e6   : > { %v4920_v8 = vpack.c.bf16 %v4210_v6, %v4208_v19 }
 0x7e8   : > { %5067 = vst [vmem:[%s8145_s18 + $0x50] sm:$0xff] %v4920_v8   ;;  %4251 = vmatmul.bf16.gmra.mxu3 %v4067_v59 }
 0x7eb   : > { %v4212_v42 = vpop.f32.mrf.mxu3 }
 0x7ec   : > { %v4213_v31 = vadd.f32 %v8139_v18, %v4212_v42 }
 0x7f3   : > { %v4214_v43 = vpop.f32.mrf.mxu3 }
 0x7f4   : > { %v4215_v38 = vadd.f32 %v8139_v18, %v4214_v43 }
 0x7f6   : > { %v4925_v60 = vpack.c.bf16 %v4215_v38, %v4213_v31 }
 0x7f8   : > { %5068 = vst [vmem:[%s8145_s18 + $0x58] sm:$0xff] %v4925_v60   ;;  %4256 = vmatmul.bf16.gmra.mxu3 %v4068_v41 }
 0x7fb   : > { %v4217_v27 = vpop.f32.mrf.mxu3 }
 0x7fc   : > { %v4218_v53 = vadd.f32 %v8139_v18, %v4217_v27 }
 0x803   : > { %v4219_v55 = vpop.f32.mrf.mxu3 }
 0x804   : > { %v4220_v54 = vadd.f32 %v8139_v18, %v4219_v55 }
 0x806   : > { %v4930_v16 = vpack.c.bf16 %v4220_v54, %v4218_v53 }
 0x808   : > { %5069 = vst [vmem:[%s8145_s18 + $0x60] sm:$0xff] %v4930_v16   ;;  %4261 = vmatmul.bf16.gmra.mxu3 %v4069_v39 }
 0x80b   : > { %v4222_v59 = vpop.f32.mrf.mxu3 }
 0x80c   : > { %v4223_v3 = vadd.f32 %v8139_v18, %v4222_v59 }
 0x813   : > { %v4224_v37 = vpop.f32.mrf.mxu3 }
 0x814   : > { %v4225_v28 = vadd.f32 %v8139_v18, %v4224_v37 }
 0x816   : > { %v4935_v41 = vpack.c.bf16 %v4225_v28, %v4223_v3 }
 0x818   : > { %5070 = vst [vmem:[%s8145_s18 + $0x68] sm:$0xff] %v4935_v41   ;;  %4266 = vmatmul.bf16.gmra.mxu3 %v4070_v9  ;;  %v4018_v9 = vpop.f32.mrf.mxu1 }
 0x81b   : > { %v4227_v51 = vpop.f32.mrf.mxu3 }
 0x81c   : > { %v4228_v46 = vadd.f32 %v8139_v18, %v4227_v51 }
 0x820   : > { %v4020_v22 = vpop.f32.mrf.mxu1 }
 0x821   : > { %v4074_v7 = vpack.c.bf16 %v4020_v22, %v4018_v9 }
 0x823   : > { %v4229_v29 = vpop.f32.mrf.mxu3 }
 0x824   : > { %v4230_v39 = vadd.f32 %v8139_v18, %v4229_v29 }
 0x826   : > { %v4940_v47 = vpack.c.bf16 %v4230_v39, %v4228_v46 }
 0x828   : > { %5071 = vst [vmem:[%s8145_s18 + $0x70] sm:$0xff] %v4940_v47   ;;  %4271 = vmatmul.bf16.gmra.mxu3 %v4071_v11  ;;  %v4073_v11 = vpack.c.bf16 %v4015_v20, %v4013_v52  ;;  %v4023_v12 = vpop.f32.mrf.mxu1 }
 0x82b   : > { %v4232_v23 = vpop.f32.mrf.mxu3 }
 0x82c   : > { %v4233_v58 = vadd.f32 %v8139_v18, %v4232_v23 }
 0x830   : > { %v4025_v36 = vpop.f32.mrf.mxu1 }
 0x831   : > { %v4075_v5 = vpack.c.bf16 %v4025_v36, %v4023_v12 }
 0x833   : > { %v4234_v62 = vpop.f32.mrf.mxu3 }
 0x834   : > { %v4235_v30 = vadd.f32 %v8139_v18, %v4234_v62 }
 0x836   : > { %v4945_v50 = vpack.c.bf16 %v4235_v30, %v4233_v58 }
 0x838   : > { %5072 = vst [vmem:[%s8145_s18 + $0x78] sm:$0xff] %v4945_v50   ;;  %4276 = vmatmul.bf16.gmra.mxu3 %v4072_v35  ;;  %v4028_v17 = vpop.f32.mrf.mxu1 }
 0x83b   : > { %v4237_v24 = vpop.f32.mrf.mxu3 }
 0x83c   : > { %v4238_v25 = vadd.f32 %v8139_v18, %v4237_v24 }
 0x840   : > { %v4030_v26 = vpop.f32.mrf.mxu1 }
 0x841   : > { %v4076_v48 = vpack.c.bf16 %v4030_v26, %v4028_v17 }
 0x843   : > { %v4239_v2 = vpop.f32.mrf.mxu3 }
 0x844   : > { %v4240_v15 = vadd.f32 %v8139_v18, %v4239_v2 }
 0x846   : > { %v4950_v32 = vpack.c.bf16 %v4240_v15, %v4238_v25 }
 0x848   : > { %5073 = vst [vmem:[%s8145_s18 + $0x80] sm:$0xff] %v4950_v32   ;;  %4281 = vmatmul.bf16.gmra.mxu3 %v4073_v11  ;;  %v4033_v49 = vpop.f32.mrf.mxu1 }
 0x84b   : > { %v4242_v21 = vpop.f32.mrf.mxu3 }
 0x84c   : > { %v4243_v10 = vadd.f32 %v8139_v18, %v4242_v21 }
 0x850   : > { %v4035_v6 = vpop.f32.mrf.mxu1 }
 0x851   : > { %v4077_v60 = vpack.c.bf16 %v4035_v6, %v4033_v49 }
 0x853   : > { %v4244_v63 = vpop.f32.mrf.mxu3 }
 0x854   : > { %v4245_v4 = vadd.f32 %v8139_v18, %v4244_v63 }
 0x856   : > { %v4955_v33 = vpack.c.bf16 %v4245_v4, %v4243_v10 }
 0x858   : > { %5074 = vst [vmem:[%s8145_s18 + $0x88] sm:$0xff] %v4955_v33   ;;  %4286 = vmatmul.bf16.gmra.mxu3 %v4074_v7  ;;  %v4038_v38 = vpop.f32.mrf.mxu1 }
 0x85b   : > { %v4247_v45 = vpop.f32.mrf.mxu3 }
 0x85c   : > { %v4248_v1 = vadd.f32 %v8139_v18, %v4247_v45 }
 0x860   : > { %v4040_v53 = vpop.f32.mrf.mxu1 }
 0x861   : > { %v4078_v40 = vpack.c.bf16 %v4040_v53, %v4038_v38 }
 0x863   : > { %v4249_v14 = vpop.f32.mrf.mxu3 }
 0x864   : > { %v4250_v56 = vadd.f32 %v8139_v18, %v4249_v14 }
 0x866   : > { %v4960_v44 = vpack.c.bf16 %v4250_v56, %v4248_v1 }
 0x868   : > { %5075 = vst [vmem:[%s8145_s18 + $0x90] sm:$0xff] %v4960_v44   ;;  %4291 = vmatmul.bf16.gmra.mxu3 %v4075_v5  ;;  %v4043_v3 = vpop.f32.mrf.mxu1 }
 0x86b   : > { %v4252_v57 = vpop.f32.mrf.mxu3 }
 0x86c   : > { %v4253_v13 = vadd.f32 %v8139_v18, %v4252_v57 }
 0x870   : > { %v4045_v41 = vpop.f32.mrf.mxu1 }
 0x871   : > { %v4079_v29 = vpack.c.bf16 %v4045_v41, %v4043_v3 }
 0x873   : > { %v4254_v34 = vpop.f32.mrf.mxu3 }
 0x874   : > { %v4255_v61 = vadd.f32 %v8139_v18, %v4254_v34 }
 0x876   : > { %v4965_v19 = vpack.c.bf16 %v4255_v61, %v4253_v13 }
 0x878   : > { %5076 = vst [vmem:[%s8145_s18 + $0x98] sm:$0xff] %v4965_v19   ;;  %4296 = vmatmul.bf16.gmra.mxu3 %v4076_v48 }
 0x87b   : > { %v4257_v8 = vpop.f32.mrf.mxu3 }
 0x87c   : > { %v4258_v43 = vadd.f32 %v8139_v18, %v4257_v8 }
 0x883   : > { %v4259_v42 = vpop.f32.mrf.mxu3 }
 0x884   : > { %v4260_v31 = vadd.f32 %v8139_v18, %v4259_v42 }
 0x886   : > { %v4970_v27 = vpack.c.bf16 %v4260_v31, %v4258_v43 }
 0x888   : > { %5077 = vst [vmem:[%s8145_s18 + $0xa0] sm:$0xff] %v4970_v27   ;;  %4301 = vmatmul.bf16.gmra.mxu3 %v4077_v60 }
 0x88b   : > { %v4262_v55 = vpop.f32.mrf.mxu3 }
 0x88c   : > { %v4263_v16 = vadd.f32 %v8139_v18, %v4262_v55 }
 0x893   : > { %v4264_v54 = vpop.f32.mrf.mxu3 }
 0x894   : > { %v4265_v59 = vadd.f32 %v8139_v18, %v4264_v54 }
 0x896   : > { %v4975_v37 = vpack.c.bf16 %v4265_v59, %v4263_v16 }
 0x898   : > { %5078 = vst [vmem:[%s8145_s18 + $0xa8] sm:$0xff] %v4975_v37   ;;  %4306 = vmatmul.bf16.gmra.mxu3 %v4078_v40 }
 0x89b   : > { %v4267_v28 = vpop.f32.mrf.mxu3 }
 0x89c   : > { %v4268_v51 = vadd.f32 %v8139_v18, %v4267_v28 }
 0x8a3   : > { %v4269_v0 = vpop.f32.mrf.mxu3 }
 0x8a4   : > { %v4270_v52 = vadd.f32 %v8139_v18, %v4269_v0 }
 0x8a6   : > { %v4980_v46 = vpack.c.bf16 %v4270_v52, %v4268_v51 }
 0x8a8   : > { %5079 = vst [vmem:[%s8145_s18 + $0xb0] sm:$0xff] %v4980_v46   ;;  %4311 = vmatmul.bf16.gmra.mxu3 %v4079_v29 }
 0x8ab   : > { %v4272_v39 = vpop.f32.mrf.mxu3 }
 0x8ac   : > { %v4273_v20 = vadd.f32 %v8139_v18, %v4272_v39 }
 0x8b3   : > { %v4274_v47 = vpop.f32.mrf.mxu3 }
 0x8b4   : > { %v4275_v23 = vadd.f32 %v8139_v18, %v4274_v47 }
 0x8b6   : > { %v4985_v62 = vpack.c.bf16 %v4275_v23, %v4273_v20 }
 0x8b8   : > { %5080 = vst [vmem:[%s8145_s18 + $0xb8] sm:$0xff] %v4985_v62  }
 0x8bb   : > { %v4277_v58 = vpop.f32.mrf.mxu3 }
 0x8bc   : > { %v4278_v9 = vadd.f32 %v8139_v18, %v4277_v58 }
 0x8c3   : > { %v4279_v30 = vpop.f32.mrf.mxu3 }
 0x8c4   : > { %v4280_v35 = vadd.f32 %v8139_v18, %v4279_v30 }
 0x8c6   : > { %v4990_v50 = vpack.c.bf16 %v4280_v35, %v4278_v9 }
 0x8c8   : > { %5081 = vst [vmem:[%s8145_s18 + $0xc0] sm:$0xff] %v4990_v50  }
 0x8cb   : > { %v4282_v24 = vpop.f32.mrf.mxu3 }
 0x8cc   : > { %v4283_v2 = vadd.f32 %v8139_v18, %v4282_v24 }
 0x8d3   : > { %v4284_v22 = vpop.f32.mrf.mxu3 }
 0x8d4   : > { %v4285_v25 = vadd.f32 %v8139_v18, %v4284_v22 }
 0x8d6   : > { %v4995_v15 = vpack.c.bf16 %v4285_v25, %v4283_v2 }
 0x8d8   : > { %5082 = vst [vmem:[%s8145_s18 + $0xc8] sm:$0xff] %v4995_v15  }
 0x8db   : > { %v4287_v11 = vpop.f32.mrf.mxu3 }
 0x8dc   : > { %v4288_v12 = vadd.f32 %v8139_v18, %v4287_v11 }
 0x8e3   : > { %v4289_v32 = vpop.f32.mrf.mxu3 }
 0x8e4   : > { %v4290_v21 = vadd.f32 %v8139_v18, %v4289_v32 }
 0x8e6   : > { %v5000_v36 = vpack.c.bf16 %v4290_v21, %v4288_v12 }
 0x8e8   : > { %5083 = vst [vmem:[%s8145_s18 + $0xd0] sm:$0xff] %v5000_v36  }
 0x8eb   : > { %v4292_v63 = vpop.f32.mrf.mxu3 }
 0x8ec   : > { %v4293_v4 = vadd.f32 %v8139_v18, %v4292_v63 }
 0x8f3   : > { %v4294_v10 = vpop.f32.mrf.mxu3 }
 0x8f4   : > { %v4295_v7 = vadd.f32 %v8139_v18, %v4294_v10 }
 0x8f6   : > { %v5005_v33 = vpack.c.bf16 %v4295_v7, %v4293_v4 }
 0x8f8   : > { %5084 = vst [vmem:[%s8145_s18 + $0xd8] sm:$0xff] %v5005_v33  }
 0x8fb   : > { %v4297_v45 = vpop.f32.mrf.mxu3 }
 0x8fc   : > { %v4298_v14 = vadd.f32 %v8139_v18, %v4297_v45 }
 0x903   : > { %v4299_v17 = vpop.f32.mrf.mxu3 }
 0x904   : > { %v4300_v1 = vadd.f32 %v8139_v18, %v4299_v17 }
 0x906   : > { %v5010_v56 = vpack.c.bf16 %v4300_v1, %v4298_v14 }
 0x908   : > { %5085 = vst [vmem:[%s8145_s18 + $0xe0] sm:$0xff] %v5010_v56  }
 0x90b   : > { %v4302_v5 = vpop.f32.mrf.mxu3 }
 0x90c   : > { %v4303_v26 = vadd.f32 %v8139_v18, %v4302_v5 }
 0x913   : > { %v4304_v44 = vpop.f32.mrf.mxu3 }
 0x914   : > { %v4305_v57 = vadd.f32 %v8139_v18, %v4304_v44 }
 0x916   : > { %v5015_v49 = vpack.c.bf16 %v4305_v57, %v4303_v26 }
 0x918   : > { %5086 = vst [vmem:[%s8145_s18 + $0xe8] sm:$0xff] %v5015_v49  }
 0x91b   : > { %v4307_v34 = vpop.f32.mrf.mxu3 }
 0x91c   : > { %v4308_v61 = vadd.f32 %v8139_v18, %v4307_v34 }
 0x923   : > { %v4309_v13 = vpop.f32.mrf.mxu3 }
 0x924   : > { %v4310_v48 = vadd.f32 %v8139_v18, %v4309_v13 }
 0x926   : > { %v5020_v19 = vpack.c.bf16 %v4310_v48, %v4308_v61 }
 0x928   : > { %5087 = vst [vmem:[%s8145_s18 + $0xf0] sm:$0xff] %v5020_v19  }
 0x92b   : > { %v4312_v6 = vpop.f32.mrf.mxu3 }
 0x92c   : > { %v4313_v42 = vadd.f32 %v8139_v18, %v4312_v6 }
 0x933   : > { %v4314_v8 = vpop.f32.mrf.mxu3 }
 0x934   : > { %v4315_v43 = vadd.f32 %v8139_v18, %v4314_v8 }
 0x936   : > { %v5025_v31 = vpack.c.bf16 %v4315_v43, %v4313_v42 }
 0x938   : > { %5088 = vst [vmem:[%s8145_s18 + $0xf8] sm:$0xff] %v5025_v31  }
 0x939   : > { %5494 = shalt.err (!%p5491_p9)
}
 0x93a   : > { %s5554_s24 = smov 64   ;;  %s5555_s13 = smov 4  }
 0x93b   : > { %5105 = dma.vmem_to_hbm [thread:$0]  (%p5693_p7), %s4460_s20, 4096, %s4462_s10, %s4446_s16, %s5554_s24, %s5554_s24, %s5555_s13  }
 0x93c PF: > { %s4476_s4 = sand.u32 1, %s5533_s27   ;;  %p8558_p12 = scmp.ge.s32.totalorder %s5545_s30, 2 }
 0x93d   : > { %s4477_s17 = scalar_lea.sflag [#allocation4], %s4476_s4 }
 0x93e   : > { %p5125_p13 = pnand %p8558_p12, %p5636_p6 }
 0x940   : > { %p5126_p0 = pneg %p5125_p13 }
 0x942   : > { %5528 = dma.done.wait (%p5126_p0), %s4477_s17, 4096  }
 0x943   : > { %5530 = vsyncadd (%p5126_p0), %s4477_s17, 4294963200  ;;  %s8559_s30 = sld [smem:[#allocation19_spill]]  ;;  %s8562_s27 = smov %s5537_s28 }
 0x944   : > { %s8560_s2 = sld [smem:[#allocation17_spill]] }
 0x945   : > { %s8561_s29 = sld [smem:[#allocation20_spill]] }
 0x949   : > { %p25_p3 = scmp.ge.s32.totalorder %s8559_s30, 4  }
 0x94a   : > { %s8563_s28 = smov %s8560_s2 }
 0x94b   :  { %27 = sbr.rel (!%p25_p3) target bundleno = 12 (0xc), region = 122 }
 0x950   :  { %4483 = vsyncpa [#allocation3], 1 }
 0x951   :  { %4485 = vsyncpa [#allocation3 + $0x1], 1 }
 0x952   :  { %4486 = vsyncpa [#allocation6], 1 }
 0x953   :  { %4488 = vsyncpa [#allocation6 + $0x1], 1 }
 0x954   :  { %4489 = vsyncpa [#allocation9], 1 }
 0x955   :  { %4490 = vsyncpa [#allocation4], 1 }
 0x956   :  { %4492 = vsyncpa [#allocation4 + $0x1], 1 }

// kernel: tpu_custom_call.1
= control target key start
LH: loop header
LB: loop body
LE: loop exit
PB: predicated region body
PF: predicated region fallthrough
CT: control target
= control target key end

     0   :  { %s8299_s0 = inlined_call_operand.hbm [shape: bf16[8,128,128], index: 0, kind: input, shape index: {}]   ;;  %s8300_s1 = inlined_call_operand.hbm [shape: f32[8,128,128], index: 1, kind: input, shape index: {}]   ;;  %s8301_s2 = inlined_call_operand.hbm [shape: bf16[128,128], index: 2, kind: input, shape index: {}]   ;;  %s8302_s3 = inlined_call_operand.vmem [shape: f32[1,128], index: 3, kind: input, shape index: {}]   ;;  %s8303_s4 = inlined_call_operand.hbm [shape: bf16[128,128], index: 4, kind: input, shape index: {}]   ;;  %s8304_s5 = inlined_call_operand.vmem [shape: f32[1,128], index: 5, kind: input, shape index: {}]   ;;  %s8305_s6 = inlined_call_operand.hbm [shape: bf16[128,128], index: 6, kind: input, shape index: {}]   ;;  %s8306_s7 = inlined_call_operand.vmem [shape: f32[1,128], index: 7, kind: input, shape index: {}]   ;;  %s8307_s8 = inlined_call_operand.hbm [shape: bf16[8,128,128], index: 8, kind: output, shape index: {}]  }
   0x1   :  { %8356 = sst [smem:[#allocation41_spill]] %s8301_s2 }
   0x2   :  { %8357 = sst [smem:[#allocation42_spill]] %s8303_s4 }
   0x3   :  { %8358 = sst [smem:[#allocation43_spill]] %s8305_s6 }
   0x4   :  { %13 = vsyncpa [#allocation3], 0 }
   0x5   :  { %15 = vsyncpa [#allocation3 + $0x1], 0 }
   0x6   :  { %16 = vsyncpa [#allocation6], 0 }
   0x7   :  { %18 = vsyncpa [#allocation6 + $0x1], 0 }
   0x8   :  { %19 = vsyncpa [#allocation9], 0 }
   0x9   :  { %20 = vsyncpa [#allocation4], 0 }
   0xa   :  { %22 = vsyncpa [#allocation4 + $0x1], 0  ;;  %s5601_s27 = smov 0   ;;  %s5603_s28 = smov 0  }
   0xb   :  { %s5605_s29 = smov 0   ;;  %s5607_s30 = smov 0  }
   0xc LB: > { %8359 = sst [smem:[#allocation17_spill]] %s5541_s29  ;;  %s5622_s9 = sadd.s32 4294967295, %s5545_s30   ;;  %s5545_s30 = sphi %s5607_s30, %s8559_s30   ;;  %s5541_s29 = sphi %s5605_s29, %s8561_s29   ;;  %s5537_s28 = sphi %s5603_s28, %s8563_s28   ;;  %s5533_s27 = sphi %s5601_s27, %s8562_s27  }
   0xd   : > { %s4586_s10 = sadd.s32 4294967294, %s5545_s30   ;;  %p48_p0 = scmp.ne.s32.totalorder %s5537_s28, %s5533_s27 }
   0xe   : > { %p49_p1 = scmp.eq.s32.totalorder %s5622_s9, 0  ;;  %p224_p2 = scmp.eq.s32.totalorder %s5622_s9, 1 }
   0xf   : > { %p230_p3 = scmp.eq.s32.totalorder %s4586_s10, 1  ;;  %p4587_p5 = scmp.ge.s32.totalorder %s5545_s30, 1 }
  0x10   : > { %p5631_p4 = por %p49_p1, %p48_p0  ;;  %p237_p7 = scmp.lt.s32.totalorder %s5545_s30, 3 }
  0x11   : > { %p5636_p6 = por %p230_p3, %p48_p0  ;;  %s8363_s2 = sld [smem:[#allocation41_spill]] }
  0x12   : > { %p5644_p8 = pnand %p4587_p5, %p237_p7  ;;  %s5547_s17 = smov [#allocation7]  }
  0x13   : > { %s8361_s12 = scalar_select %p5636_p6, 1, 0 }
  0x14   : > { %p5107_p9 = pneg %p5644_p8  ;;  %s250_s18 = sshll.u32 %s5547_s17, 4  ;;  %s251_s18 = int_to_ptr.vmem [resolvable:$true] %s250_s18 }
  0x15   : > { %8362 = sst [smem:[#allocation18_spill]] %s8361_s12  ;;  %s8308_s23 = smov 64  }
  0x16   : > { %p5652_p10 = pnand %p5107_p9, %p49_p1  ;;  %s8366_s4 = sld [smem:[#allocation42_spill]] }
  0x17   : > { %s248_s15 = sshll.u32 %s8363_s2, 4  ;;  %s8309_s24 = smov 4   ;;  %s249_s15 = int_to_ptr.hbm [resolvable:$true] %s248_s15 }
  0x18   : > { %5110 = dma.hbm_to_vmem [thread:$0]  (!%p5652_p10), %s249_s15, 1024, %s251_s18, [#allocation6], %s8308_s23, %s8308_s23, %s8309_s24  }
  0x19   : > { %s5550_s25 = smov [#allocation8]   ;;  %s8367_s6 = sld [smem:[#allocation43_spill]] }
  0x1a   : > { %s267_s26 = sshll.u32 %s5550_s25, 4  ;;  %s5551_s15 = smov [#allocation10]   ;;  %s268_s26 = int_to_ptr.vmem [resolvable:$true] %s267_s26 }
  0x1b   : > { %s284_s17 = sshll.u32 %s5551_s15, 4  ;;  %s5674_s18 = sadd.s32 1, %s5545_s30   ;;  %s285_s17 = int_to_ptr.vmem [resolvable:$true] %s284_s17 }
  0x1c   : > { %s265_s22 = sshll.u32 %s8366_s4, 4  ;;  %8368 = sst [smem:[#allocation19_spill]] %s5674_s18  ;;  %s266_s22 = int_to_ptr.hbm [resolvable:$true] %s265_s22 }
  0x1d   : > { %5113 = dma.hbm_to_vmem [thread:$0]  (!%p5652_p10), %s266_s22, 1024, %s268_s26, [#allocation9], %s8308_s23, %s8308_s23, %s8309_s24  }
  0x1e   : > { %s32_s20 = ssub.s32 %s5545_s30, %s5674_s18  ;;  %s35_s21 = sadd.s32 1, %s5541_s29 }
  0x1f   : > { %s282_s14 = sshll.u32 %s8367_s6, 4  ;;  %p33_p12 = scmp.eq.s32.totalorder %s32_s20, 0  ;;  %s283_s14 = int_to_ptr.hbm [resolvable:$true] %s282_s14 }
  0x20   : > { %5116 = dma.hbm_to_vmem [thread:$0]  (!%p5652_p10), %s283_s14, 1024, %s285_s17, [#allocation9], %s8308_s23, %s8308_s23, %s8309_s24  }
  0x21   : > { %p42_p13 = scmp.ne.s32.totalorder %s5541_s29, %s5537_s28  ;;  %p43_p0 = scmp.eq.s32.totalorder %s5545_s30, 0 }
  0x22   : > { %p5131_p3 = scmp.lt.s32.totalorder %s5545_s30, 2  ;;  %s5698_s19 = sand.u32 1, %s5541_s29  }
  0x23   : > { %s5689_s22 = scalar_select %p33_p12, %s5541_s29, %s35_s21  }
  0x24   : > { %p44_p5 = por %p43_p0, %p42_p13  ;;  %p5693_p7 = por %p224_p2, %p42_p13 }
  0x25   : > { %8369 = sst [smem:[#allocation20_spill]] %s5689_s22  ;;  %s4710_s26 = sshll.u32 %s5545_s30, 8 }
  0x26   : > { %s4592_s10 = sshll.u32 %s5698_s19, 8  ;;  %s311_s15 = scalar_lea.hbm %s8299_s0, %s4710_s26 }
  0x27   : > { %s312_s17 = sshll.u32 %s311_s15, 4  ;;  %s305_s20 = scalar_lea.vmem [#allocation2], %s4592_s10  ;;  %s313_s17 = int_to_ptr.hbm [resolvable:$true] %s312_s17 }
  0x28   : > { %s314_s21 = sshll.u32 %s305_s20, 4  ;;  %p5707_p2 = pnand %p5131_p3, %p44_p5  ;;  %s315_s21 = int_to_ptr.vmem [resolvable:$true] %s314_s21 }
  0x29   : > { %s324_s24 = sand.u32 1, %s5545_s30   ;;  %s4596_s2 = sshll.u32 %s5698_s19, 9 }
  0x2a   : > { %s302_s4 = scalar_lea.sflag [#allocation3], %s5698_s19  ;;  %s5407_s6 = sshra.s32 %s313_s17, 4  ;;  %s5408_s6 = int_to_ptr.hbm [resolvable:$true] %s5407_s6 }
  0x2b   : > { %s5409_s22 = scalar_lea.hbm %s5408_s6, 256  ;;  %p5411_p10 = pneg %p5707_p2 }
  0x2c   : > { %p5410_p9 = scmp.ne.s32.totalorder %s5408_s6, %s5409_s22  ;;  %s5414_s13 = scalar_lea.hbm %s8299_s0, 512 }
  0x2d   : > { %p5415_p0 = scmp.lt.s32.totalorder %s5408_s6, %s8299_s0  ;;  %p5416_p3 = scmp.lt.s32.totalorder %s5414_s13, %s5409_s22 }
  0x2e   : > { %p5412_p12 = pnand %p5411_p10, %p5410_p9 }
  0x2f   : > { %p5417_p5 = por %p5416_p3, %p5415_p0 }
  0x30   : > { %p5413_p13 = pneg %p5412_p12 }
  0x32   : > { %p5418_p11 = pnand %p5417_p5, %p5413_p13 }
  0x34   : > { %5421 = shalt.err (!%p5418_p11)
}
  0x35   : > { %s8372_s19 = smov 4   ;;  %s8373_s20 = smov 64  }
  0x36   : > { %5120 = dma.hbm_to_vmem [thread:$0]  (!%p5707_p2), %s313_s17, 4096, %s315_s21, %s302_s4, %s8373_s20, %s8373_s20, %s8372_s19  }
  0x37   : > { %s4712_s29 = sshll.u32 %s5545_s30, 9  ;;  %s328_s18 = scalar_lea.vmem [#allocation5], %s4596_s2 }
  0x38   : > { %s337_s26 = sshll.u32 %s328_s18, 4  ;;  %s334_s14 = scalar_lea.hbm %s8300_s1, %s4712_s29  ;;  %s338_s26 = int_to_ptr.vmem [resolvable:$true] %s337_s26 }
  0x39   : > { %s335_s6 = sshll.u32 %s334_s14, 4  ;;  %s325_s22 = scalar_lea.sflag [#allocation6], %s324_s24  ;;  %s336_s6 = int_to_ptr.hbm [resolvable:$true] %s335_s6 }
  0x3a   : > { %s5437_s13 = sshra.s32 %s336_s6, 4  ;;  %s5444_s2 = scalar_lea.hbm %s8300_s1, 1024  ;;  %s5438_s13 = int_to_ptr.hbm [resolvable:$true] %s5437_s13 }
  0x3b   : > { %s5439_s15 = scalar_lea.hbm %s5438_s13, 512  ;;  %p5445_p13 = scmp.lt.s32.totalorder %s5438_s13, %s8300_s1 }
  0x3c   : > { %p5440_p11 = scmp.ne.s32.totalorder %s5438_s13, %s5439_s15  ;;  %p5446_p0 = scmp.lt.s32.totalorder %s5444_s2, %s5439_s15 }
  0x3e   : > { %p5442_p9 = pnand %p5440_p11, %p5411_p10  ;;  %p5447_p3 = por %p5446_p0, %p5445_p13 }
  0x40   : > { %p5443_p12 = pneg %p5442_p9 }
  0x42   : > { %p5448_p5 = pnand %p5447_p3, %p5443_p12 }
  0x44   : > { %5451 = shalt.err (!%p5448_p5)
}
  0x45   : > { %s5552_s29 = smov 128   ;;  %s5553_s12 = smov 8  }
  0x46   : > { %5123 = dma.hbm_to_vmem [thread:$0]  (!%p5707_p2), %s336_s6, 8192, %s338_s26, %s325_s22, %s5552_s29, %s5552_s29, %s5553_s12  }
  0x47   : > { %349 = sbr.rel (%p5644_p8) target bundleno = 2364 (0x93c), region = 52 }
  0x4c   : > { %s5748_s24 = sand.u32 1, %s5537_s28  }
  0x4d   : > { %s4601_s19 = sshll.u32 %s5748_s24, 8  ;;  %s352_s20 = scalar_lea.sflag [#allocation3], %s5748_s24 }
  0x4e   : > { %s5754_s10 = scalar_lea.vmem [#allocation2], %s4601_s19 }
  0x4f   : > { %5512 = dma.done.wait (%p5631_p4), %s352_s20, 4096  }
  0x50   : > { %5514 = vsyncadd (%p5631_p4), %s352_s20, 4294963200  ;;  %s361_s16 = sand.u32 1, %s5622_s9   ;;  %s4602_s23 = sshll.u32 %s5748_s24, 9 }
  0x51   : > { %s362_s26 = scalar_lea.sflag [#allocation6], %s361_s16  ;;  %s5762_s14 = scalar_lea.vmem [#allocation5], %s4602_s23 }
  0x52   : > { %5516 = dma.done.wait (%p5631_p4), %s362_s26, 8192  }
  0x53   : > { %5518 = vsyncadd (%p5631_p4), %s362_s26, 4294959104 }
  0x54   : > { %5520 = dma.done.wait (%p49_p1), [#allocation6], 1024  }
  0x55   : > { %5522 = vsyncadd (%p49_p1), [#allocation6], 4294966272 }
  0x56   : > { %5524 = dma.done.wait (%p49_p1), [#allocation9], 2048  }
  0x57   : > { %5526 = vsyncadd (%p49_p1), [#allocation9], 4294965248  ;;  %v5027_v0 = vld [vmem:[%s5754_s10 + $0x8] sm:$0xff]   ;;  %v4740_v1 = vld [vmem:[%s5754_s10] sm:$0xff]   ;;  %s8145_s18 = scalar_lea.vmem [#allocation11], %s4601_s19  ;;  %s4738_s21 = sshll.u32 %s5622_s9, 8 }
  0x58   : > { %v5028_v2 = vld [vmem:[%s5754_s10 + $0x10] sm:$0xff]   ;;  %v5779_v3 = vunpack.c.l.bf16 %v5027_v0  ;;  %v5781_v4 = vunpack.c.l.bf16 %v4740_v1  ;;  %v5788_v6 = vunpack.c.h.bf16 %v5027_v0  ;;  %v5790_v7 = vunpack.c.h.bf16 %v4740_v1  ;;  %v5029_v9 = vld [vmem:[%s5754_s10 + $0x18] sm:$0xff]   ;;  %v5030_v10 = vld [vmem:[%s5754_s10 + $0x20] sm:$0xff]   ;;  %s4458_s19 = scalar_lea.hbm %s8307_s8, %s4738_s21  ;;  %s4459_s20 = sshll.u32 %s8145_s18, 4  ;;  %s4460_s20 = int_to_ptr.vmem [resolvable:$true] %s4459_s20 }
  0x59   : > { %v5783_v5 = vunpack.c.l.bf16 %v5028_v2  ;;  %v5792_v8 = vunpack.c.h.bf16 %v5028_v2  ;;  %v5799_v11 = vunpack.c.h.bf16 %v5029_v9  ;;  %v5801_v12 = vunpack.c.l.bf16 %v5029_v9  ;;  %v5031_v14 = vld [vmem:[%s5754_s10 + $0x28] sm:$0xff]   ;;  %v5032_v19 = vld [vmem:[%s5754_s10 + $0x30] sm:$0xff]   ;;  %v5033_v20 = vld [vmem:[%s5754_s10 + $0x38] sm:$0xff]   ;;  %s4446_s16 = scalar_lea.sflag [#allocation4], %s5748_s24  ;;  %s5487_s11 = scalar_lea.hbm %s8307_s8, 512 }
  0x5a   : > { %554 = vadd.xlane.f32.xlu1 %v5779_v3  ;;  %550 = vadd.xlane.f32.xlu0 %v5781_v4  ;;  %v5803_v13 = vunpack.c.l.bf16 %v5030_v10  ;;  %v5809_v15 = vunpack.c.h.bf16 %v5030_v10  ;;  %v5811_v16 = vunpack.c.l.bf16 %v5031_v14  ;;  %v5813_v17 = vunpack.c.h.bf16 %v5031_v14  ;;  %v1784_v39 = vld [vmem:[%s5762_s14 + $0x70] sm:$0xff]  ;;  %v1785_v40 = vld [vmem:[%s5762_s14 + $0x78] sm:$0xff]  ;;  %v5050_v42 = vld [vmem:[%s5754_s10 + $0xc0] sm:$0xff]  }
  0x5b   : > { %558 = vadd.xlane.f32.xlu2 %v5783_v5  ;;  %v678_v18 = vadd.f32 %v5790_v7, %v5781_v4  ;;  %v5822_v21 = vunpack.c.h.bf16 %v5032_v19  ;;  %v5824_v22 = vunpack.c.l.bf16 %v5032_v19  ;;  %v5827_v24 = vunpack.c.l.bf16 %v5033_v20  ;;  %v1782_v51 = vld [vmem:[%s5762_s14 + $0x60] sm:$0xff]  ;;  %v1783_v52 = vld [vmem:[%s5762_s14 + $0x68] sm:$0xff]  ;;  %v1780_v58 = vld [vmem:[%s5762_s14 + $0x50] sm:$0xff] }
  0x5c   : > { %v5833_v26 = vunpack.c.h.bf16 %v5033_v20  ;;  %v1848_v43 = vpack.c.bf16 %v1784_v39, %v1784_v39  ;;  %v1849_v44 = vpack.c.bf16 %v1785_v40, %v1785_v40  ;;  %v5851_v45 = vunpack.c.h.bf16 %v5050_v42  ;;  %v1781_v59 = vld [vmem:[%s5762_s14 + $0x58] sm:$0xff]  ;;  %v1778_v2 = vld [vmem:[%s5762_s14 + $0x40] sm:$0xff]  ;;  %v1779_v9 = vld [vmem:[%s5762_s14 + $0x48] sm:$0xff] }
  0x5d   : > { %v679_v23 = vadd.f32 %v5779_v3, %v678_v18  ;;  %v5853_v46 = vunpack.c.l.bf16 %v5050_v42  ;;  %v1846_v53 = vpack.c.bf16 %v1782_v51, %v1782_v51  ;;  %v1847_v54 = vpack.c.bf16 %v1783_v52, %v1783_v52 }
  0x5e   : > { %v1976_v47 = vunpack.c.l.b16 %v1848_v43  ;;  %v1977_v48 = vunpack.c.l.b16 %v1849_v44  ;;  %v1844_v61 = vpack.c.bf16 %v1780_v58, %v1780_v58  ;;  %v1845_v62 = vpack.c.bf16 %v1781_v59, %v1781_v59  ;;  %v1772_v44 = vld [vmem:[%s5762_s14 + $0x10] sm:$0xff] }
  0x5f   : > { %v680_v25 = vadd.f32 %v5788_v6, %v679_v23  ;;  %v1974_v56 = vunpack.c.l.b16 %v1846_v53  ;;  %v1975_v57 = vunpack.c.l.b16 %v1847_v54  ;;  %v1842_v14 = vpack.c.bf16 %v1778_v2, %v1778_v2  ;;  %v1770_v53 = vld [vmem:[%s5762_s14] sm:$0xff]  ;;  %v1771_v54 = vld [vmem:[%s5762_s14 + $0x8] sm:$0xff] }
  0x60   : > { %v1985_v50 = vpack.c.b16 %v1977_v48, %v1976_v47  ;;  %v1972_v0 = vunpack.c.l.b16 %v1844_v61  ;;  %v1973_v1 = vunpack.c.l.b16 %v1845_v62  ;;  %v1843_v18 = vpack.c.bf16 %v1779_v9, %v1779_v9  ;;  %v1773_v47 = vld [vmem:[%s5762_s14 + $0x18] sm:$0xff] }
  0x61   : > { %v681_v27 = vadd.f32 %v5783_v5, %v680_v25  ;;  %v1984_v60 = vpack.c.b16 %v1975_v57, %v1974_v56  ;;  %v1970_v20 = vunpack.c.l.b16 %v1842_v14  ;;  %v1776_v25 = vld [vmem:[%s5762_s14 + $0x30] sm:$0xff]  ;;  %v1835_v61 = vpack.c.bf16 %v1771_v54, %v1771_v54 }
  0x62   : > { %556 = vadd.xlane.f32.xlu1 %v5788_v6  ;;  %552 = vadd.xlane.f32.xlu0 %v5790_v7  ;;  %v1983_v10 = vpack.c.b16 %v1973_v1, %v1972_v0  ;;  %v1971_v23 = vunpack.c.l.b16 %v1843_v18 }
  0x63   : > { %560 = vadd.xlane.f32.xlu2 %v5792_v8  ;;  %v682_v28 = vadd.f32 %v5792_v8, %v681_v27  ;;  %1994 = vmatpush.bf16.msra.mxu0 %v1985_v50  ;;  %v1777_v27 = vld [vmem:[%s5762_s14 + $0x38] sm:$0xff]  ;;  %v1837_v50 = vpack.c.bf16 %v1773_v47, %v1773_v47  ;;  %v1963_v1 = vunpack.c.l.b16 %v1835_v61 }
  0x65   : > { %v683_v29 = vadd.f32 %v5801_v12, %v682_v28  ;;  %v1982_v28 = vpack.c.b16 %v1971_v23, %v1970_v20  ;;  %v1965_v52 = vunpack.c.l.b16 %v1837_v50 }
  0x67   : > { %v684_v30 = vadd.f32 %v5799_v11, %v683_v29  ;;  %1995 = vmatpush.bf16.msra.mxu0 %v1984_v60  ;;  %v5051_v29 = vld [vmem:[%s5754_s10 + $0xc8] sm:$0xff]   ;;  %v1834_v60 = vpack.c.bf16 %v1770_v53, %v1770_v53 }
  0x69   : > { %v685_v31 = vadd.f32 %v5803_v13, %v684_v30  ;;  %v1840_v30 = vpack.c.bf16 %v1776_v25, %v1776_v25  ;;  %v1962_v0 = vunpack.c.l.b16 %v1834_v60  ;;  %v5053_v25 = vld [vmem:[%s5754_s10 + $0xd8] sm:$0xff]  }
  0x6a   : > { %564 = vadd.xlane.f32.xlu1 %v5799_v11  ;;  %562 = vadd.xlane.f32.xlu0 %v5801_v12 }
  0x6b   : > { %566 = vadd.xlane.f32.xlu2 %v5803_v13  ;;  %v686_v32 = vadd.f32 %v5809_v15, %v685_v31  ;;  %1996 = vmatpush.bf16.msra.mxu0 %v1983_v10  ;;  %v1841_v31 = vpack.c.bf16 %v1777_v27, %v1777_v27  ;;  %v1978_v9 = vpack.c.b16 %v1963_v1, %v1962_v0 }
  0x6d   : > { %v687_v33 = vadd.f32 %v5811_v16, %v686_v32  ;;  %v5866_v32 = vunpack.c.h.bf16 %v5051_v29 }
  0x6f   : > { %v688_v34 = vadd.f32 %v5813_v17, %v687_v33  ;;  %v5868_v33 = vunpack.c.l.bf16 %v5051_v29  ;;  %1997 = vmatpush.bf16.msra.mxu0 %v1982_v28 }
  0x71   : > { %v689_v35 = vadd.f32 %v5824_v22, %v688_v34 }
  0x72   : > { %568 = vadd.xlane.f32.xlu0 %v5809_v15  ;;  %570 = vadd.xlane.f32.xlu1 %v5811_v16 }
  0x73   : > { %572 = vadd.xlane.f32.xlu2 %v5813_v17  ;;  %v690_v36 = vadd.f32 %v5822_v21, %v689_v35  ;;  %v1968_v35 = vunpack.c.l.b16 %v1840_v30 }
  0x75   : > { %v691_v37 = vadd.f32 %v5827_v24, %v690_v36  ;;  %v1969_v36 = vunpack.c.l.b16 %v1841_v31  ;;  %v5907_v31 = vunpack.c.h.bf16 %v5053_v25 }
  0x77   : > { %v692_v38 = vadd.f32 %v5833_v26, %v691_v37  ;;  %v1774_v37 = vld [vmem:[%s5762_s14 + $0x20] sm:$0xff]  ;;  %v1981_v39 = vpack.c.b16 %v1969_v36, %v1968_v35  ;;  %v5909_v35 = vunpack.c.l.bf16 %v5053_v25 }
  0x78   : > { %v1838_v40 = vpack.c.bf16 %v1774_v37, %v1774_v37 }
  0x79   : > { %v693_v41 = vrot.slane %v692_v38, 4  ;;  %1998 = vmatpush.bf16.msra.mxu0 %v1981_v39 }
  0x7a   : > { %576 = vadd.xlane.f32.xlu1 %v5822_v21  ;;  %574 = vadd.xlane.f32.xlu0 %v5824_v22  ;;  %v1966_v42 = vunpack.c.l.b16 %v1838_v40 }
  0x7b   : > { %578 = vadd.xlane.f32.xlu2 %v5827_v24  ;;  %v694_v49 = vadd.f32 %v693_v41, %v692_v38  ;;  %v1775_v38 = vld [vmem:[%s5762_s14 + $0x28] sm:$0xff] }
  0x7c   : > { %v1839_v41 = vpack.c.bf16 %v1775_v38, %v1775_v38 }
  0x7d   : > { %v695_v55 = vrot.slane %v694_v49, 2 }
  0x7e   : > { %v1967_v43 = vunpack.c.l.b16 %v1839_v41 }
  0x7f   : > { %v696_v63 = vadd.f32 %v695_v55, %v694_v49  ;;  %v1836_v49 = vpack.c.bf16 %v1772_v44, %v1772_v44  ;;  %v5052_v55 = vld [vmem:[%s5754_s10 + $0xd0] sm:$0xff]  }
  0x80   : > { %v1980_v48 = vpack.c.b16 %v1967_v43, %v1966_v42  ;;  %v5886_v62 = vunpack.c.l.bf16 %v5052_v55  ;;  %v5891_v2 = vunpack.c.h.bf16 %v5052_v55 }
  0x81   : > { %v697_v19 = vrot.slane %v696_v63, 1  ;;  %v1964_v51 = vunpack.c.l.b16 %v1836_v49 }
  0x82   : > { %580 = vadd.xlane.f32.xlu0 %v5833_v26  ;;  %646 = vadd.xlane.f32.xlu1 %v5853_v46 }
  0x83   : > { %648 = vadd.xlane.f32.xlu2 %v5851_v45  ;;  %v5870_v34 = vadd.f32 %v697_v19, %v696_v63  ;;  %1999 = vmatpush.bf16.msra.mxu0 %v1980_v48  ;;  %v1979_v59 = vpack.c.b16 %v1965_v52, %v1964_v51 }
  0x85   : > { %5180 = vrsqrt.f32 %v5870_v34  ;;  %vm1540_vm1 = vweird.f32 %v5870_v34  ;;  %vm1530_vm7 = vcmp.gt.f32.partialorder %v5870_v34, 0.0 }
  0x87   : > { %2000 = vmatpush.bf16.msra.mxu0 %v1979_v59 }
  0x8a   : > { %652 = vadd.xlane.f32.xlu1 %v5866_v32  ;;  %650 = vadd.xlane.f32.xlu0 %v5868_v33 }
  0x8b   : > { %v5882_v56 = vpop.eup %5180  ;;  %654 = vadd.xlane.f32.xlu2 %v5886_v62  ;;  %2001 = vmatpush.bf16.msra.mxu0 %v1978_v9 }
  0x8c   : > { %v1535_v63 = vmul.f32 %v5882_v56, %v5870_v34  ;;  %vm1541_vm2 = vweird.f32 %v5882_v56 }
  0x8d   : > { %vm5928_vm5 = vmor %vm1540_vm1, %vm1541_vm2 }
  0x8e   : > { %v1536_v10 = vmul.f32 %v5882_v56, %v1535_v63 }
  0x90   : > { %v1537_v27 = vmul.f32 0.5, %v1536_v10 }
  0x92   : > { %656 = vadd.xlane.f32.xlu0 %v5891_v2  ;;  %v1538_v37 = vsub.f32 1.5, %v1537_v27  ;;  %658 = vadd.xlane.f32.xlu1 %v5909_v35 }
  0x93   : > { %660 = vadd.xlane.f32.xlu2 %v5907_v31 }
  0x94   : > { %v1539_v48 = vmul.f32 %v5882_v56, %v1538_v37 }
  0x96   : > { %v1543_v55 = vsel %vm5928_vm5, %v5882_v56, %v1539_v48  ;;  %v741_v48 = vadd.f32 %v5851_v45, %v5853_v46 }
  0xcd   : > { %v5884_v57 = vpop.xlane.xlu1 %554  ;;  %v551_v58 = vpop.xlane.xlu0 %550 }
  0xce   : > { %5182 = vrsqrt.f32 %v551_v58  ;;  %v5896_v14 = vpop.xlane.xlu2 %558  ;;  %vm832_vm3 = vweird.f32 %v551_v58  ;;  %vm762_vm6 = vcmp.gt.f32.partialorder %v551_v58, 0.0  ;;  %vm852_vm12 = vweird.f32 %v5884_v57 }
  0xcf   : > { %5184 = vrsqrt.f32 %v5884_v57 }
  0xd4   : > { %v5183_v18 = vpop.eup %5182 }
  0xd5   : > { %v5898_v19 = vpop.xlane.xlu1 %556  ;;  %v5900_v20 = vpop.xlane.xlu0 %552  ;;  %v827_v23 = vmul.f32 %v5183_v18, %v551_v58  ;;  %vm833_vm0 = vweird.f32 %v5183_v18  ;;  %v5942_v58 = vsel %vm1530_vm7, %v1543_v55, 0.0 }
  0xd6   : > { %5186 = vrsqrt.f32 %v5898_v19  ;;  %v5905_v29 = vpop.eup %5184  ;;  %v5921_v43 = vpop.xlane.xlu2 %560  ;;  %vm834_vm4 = vmor %vm832_vm3, %vm833_vm0  ;;  %vm862_vm9 = vweird.f32 %v5898_v19  ;;  %vm842_vm11 = vweird.f32 %v5900_v20  ;;  %vm763_vm14 = vcmp.gt.f32.partialorder %v5900_v20, 0.0 }
  0xd7   : > { %v828_v28 = vmul.f32 %v5183_v18, %v827_v23  ;;  %5188 = vrsqrt.f32 %v5900_v20  ;;  %v847_v38 = vmul.f32 %v5905_v29, %v5884_v57  ;;  %vm853_vm13 = vweird.f32 %v5905_v29 }
  0xd8   : > { %5190 = vrsqrt.f32 %v5896_v14  ;;  %vm5963_vm1 = vmor %vm852_vm12, %vm853_vm13  ;;  %vm765_vm2 = vcmp.gt.f32.partialorder %v5898_v19, 0.0  ;;  %vm764_vm3 = vcmp.gt.f32.partialorder %v5884_v57, 0.0 }
  0xd9   : > { %v829_v30 = vmul.f32 0.5, %v828_v28  ;;  %v848_v49 = vmul.f32 %v5905_v29, %v847_v38  ;;  %5192 = vrsqrt.f32 %v5921_v43  ;;  %v5054_v38 = vld [vmem:[%s5754_s10 + $0xe0] sm:$0xff]  }
  0xdb   : > { %v830_v39 = vsub.f32 1.5, %v829_v30  ;;  %v849_v59 = vmul.f32 0.5, %v848_v49  ;;  %v5980_v49 = vunpack.c.h.bf16 %v5054_v38 }
  0xdc   : > { %v5911_v36 = vpop.eup %5186 }
  0xdd   : > { %v857_v40 = vmul.f32 %v5911_v36, %v5898_v19  ;;  %v5189_v41 = vpop.eup %5188  ;;  %v831_v42 = vmul.f32 %v5183_v18, %v830_v39  ;;  %v850_v34 = vsub.f32 1.5, %v849_v59  ;;  %vm863_vm10 = vweird.f32 %v5911_v36  ;;  %664 = vadd.xlane.f32.xlu1 %v5980_v49 }
  0xde   : > { %v837_v47 = vmul.f32 %v5189_v41, %v5900_v20  ;;  %v5937_v61 = vpop.eup %5190  ;;  %vm843_vm8 = vweird.f32 %v5189_v41  ;;  %vm5956_vm0 = vmor %vm862_vm9, %vm863_vm10  ;;  %v742_v59 = vadd.f32 %v5868_v33, %v741_v48  ;;  %v6027_v20 = vpop.xlane.xlu2 %566  ;;  %vm766_vm10 = vcmp.gt.f32.partialorder %v5896_v14, 0.0 }
  0xdf   : > { %v858_v44 = vmul.f32 %v5911_v36, %v857_v40  ;;  %v835_v50 = vsel %vm834_vm4, %v5183_v18, %v831_v42  ;;  %v5940_v9 = vpop.eup %5192  ;;  %vm844_vm15 = vmor %vm842_vm11, %vm843_vm8  ;;  %v851_v30 = vmul.f32 %v5905_v29, %v850_v34  ;;  %v5969_v40 = vpop.xlane.xlu1 %564  ;;  %vm872_vm4 = vweird.f32 %v5896_v14 }
  0xe0   : > { %v838_v53 = vmul.f32 %v5189_v41, %v837_v47  ;;  %v1466_v54 = vsel %vm762_vm6, %v835_v50, 0.0  ;;  %v877_v23 = vmul.f32 %v5940_v9, %v5921_v43  ;;  %v5976_v47 = vpop.xlane.xlu0 %562  ;;  %v5982_v50 = vunpack.c.l.bf16 %v5054_v38 }
  0xe1   : > { %v859_v52 = vmul.f32 0.5, %v858_v44  ;;  %v1578_v63 = vmul.f32 %v5781_v4, %v1466_v54  ;;  %v867_v4 = vmul.f32 %v5937_v61, %v5896_v14  ;;  %v855_v19 = vsel %vm5963_vm1, %v5905_v29, %v851_v30 }
  0xe2   : > { %v839_v60 = vmul.f32 0.5, %v838_v53  ;;  %v878_v42 = vmul.f32 %v5940_v9, %v877_v23  ;;  %5194 = vrsqrt.f32 %v5969_v40  ;;  %662 = vadd.xlane.f32.xlu0 %v5982_v50  ;;  %v1468_v57 = vsel %vm764_vm3, %v855_v19, 0.0 }
  0xe3   : > { %v860_v0 = vsub.f32 1.5, %v859_v52  ;;  %v1642_v25 = vmul.f32 %v1578_v63, %v5942_v58  ;;  %v868_v39 = vmul.f32 %v5937_v61, %v867_v4  ;;  %5196 = vrsqrt.f32 %v5976_v47 }
  0xe4   : > { %v840_v1 = vsub.f32 1.5, %v839_v60  ;;  %v879_v53 = vmul.f32 0.5, %v878_v42  ;;  %vm873_vm5 = vweird.f32 %v5937_v61  ;;  %v743_v4 = vadd.f32 %v5866_v32, %v742_v59 }
  0xe5   : > { %v861_v10 = vmul.f32 %v5911_v36, %v860_v0  ;;  %v869_v51 = vmul.f32 0.5, %v868_v39  ;;  %vm882_vm6 = vweird.f32 %v5921_v43  ;;  %vm883_vm7 = vweird.f32 %v5940_v9  ;;  %vm6012_vm8 = vmor %vm872_vm4, %vm873_vm5 }
  0xe6   : > { %v841_v56 = vmul.f32 %v5189_v41, %v840_v1  ;;  %v1580_v1 = vmul.f32 %v5779_v3, %v1468_v57  ;;  %v880_v34 = vsub.f32 1.5, %v879_v53  ;;  %vm6022_vm9 = vmor %vm882_vm6, %vm883_vm7  ;;  %v744_v38 = vadd.f32 %v5886_v62, %v743_v4  ;;  %v5056_v4 = vld [vmem:[%s5754_s10 + $0xf0] sm:$0xff]  }
  0xe7   : > { %v870_v63 = vsub.f32 1.5, %v869_v51  ;;  %vm767_vm11 = vcmp.gt.f32.partialorder %v5921_v43, 0.0  ;;  %5198 = vrsqrt.f32 %v6027_v20  ;;  %vm902_vm12 = vweird.f32 %v5969_v40 }
  0xe8   : > { %v845_v18 = vsel %vm844_vm15, %v5189_v41, %v841_v56  ;;  %v865_v41 = vsel %vm5956_vm0, %v5911_v36, %v861_v10  ;;  %v5996_v0 = vpop.eup %5194  ;;  %v5055_v10 = vld [vmem:[%s5754_s10 + $0xe8] sm:$0xff]   ;;  %v6031_v42 = vpop.xlane.xlu0 %568  ;;  %v745_v14 = vadd.f32 %v5891_v2, %v744_v38  ;;  %v6072_v23 = vunpack.c.l.bf16 %v5056_v4 }
  0xe9   : > { %v1467_v28 = vsel %vm763_vm14, %v845_v18, 0.0  ;;  %v1469_v52 = vsel %vm765_vm2, %v865_v41, 0.0  ;;  %v6000_v56 = vpop.eup %5196  ;;  %v871_v3 = vmul.f32 %v5937_v61, %v870_v63  ;;  %v897_v18 = vmul.f32 %v5996_v0, %v5969_v40 }
  0xea   : > { %v1579_v37 = vmul.f32 %v5790_v7, %v1467_v28  ;;  %v1706_v7 = vpack.c.bf16 %v1642_v25, %v1642_v25  ;;  %v1581_v29 = vmul.f32 %v5788_v6, %v1469_v52  ;;  %v881_v25 = vmul.f32 %v5940_v9, %v880_v34  ;;  %670 = vadd.xlane.f32.xlu1 %v6072_v23 }
  0xeb   : > { %v887_v27 = vmul.f32 %v6000_v56, %v5976_v47  ;;  %v1644_v28 = vmul.f32 %v1580_v1, %v5942_v58  ;;  %v6020_v30 = vunpack.c.l.bf16 %v5055_v10  ;;  %v6029_v39 = vunpack.c.h.bf16 %v5055_v10 }
  0xec   : > { %v1643_v44 = vmul.f32 %v1579_v37, %v5942_v58  ;;  %v1914_v54 = vunpack.c.l.b16 %v1706_v7  ;;  %v1645_v6 = vmul.f32 %v1581_v29, %v5942_v58  ;;  %v898_v7 = vmul.f32 %v5996_v0, %v897_v18 }
  0xed   : > { %666 = vadd.xlane.f32.xlu2 %v6020_v30  ;;  %668 = vadd.xlane.f32.xlu0 %v6029_v39  ;;  %v885_v48 = vsel %vm6022_vm9, %v5940_v9, %v881_v25  ;;  %v888_v19 = vmul.f32 %v6000_v56, %v887_v27  ;;  %5200 = vrsqrt.f32 %v6031_v42  ;;  %v6049_v57 = vpop.eup %5198  ;;  %vm903_vm13 = vweird.f32 %v5996_v0 }
  0xee   : > { %v1707_v36 = vpack.c.bf16 %v1643_v44, %v1643_v44  ;;  %v1709_v41 = vpack.c.bf16 %v1645_v6, %v1645_v6  ;;  %v875_v44 = vsel %vm6012_vm8, %v5937_v61, %v871_v3  ;;  %v1471_v51 = vsel %vm767_vm11, %v885_v48, 0.0  ;;  %vm6077_vm0 = vmor %vm902_vm12, %vm903_vm13 }
  0xef   : > { %v1470_v43 = vsel %vm766_vm10, %v875_v44, 0.0  ;;  %v899_v52 = vmul.f32 0.5, %v898_v7  ;;  %v889_v53 = vmul.f32 0.5, %v888_v19  ;;  %v1583_v59 = vmul.f32 %v5792_v8, %v1471_v51  ;;  %v6088_v44 = vpop.xlane.xlu1 %570 }
  0xf0   : > { %v1915_v55 = vunpack.c.l.b16 %v1707_v36  ;;  %v1708_v36 = vpack.c.bf16 %v1644_v28, %v1644_v28  ;;  %v1917_v61 = vunpack.c.l.b16 %v1709_v41  ;;  %v1582_v9 = vmul.f32 %v5783_v5, %v1470_v43 }
  0xf1   : > { %v900_v1 = vsub.f32 1.5, %v899_v52  ;;  %v890_v34 = vsub.f32 1.5, %v889_v53  ;;  %vm892_vm14 = vweird.f32 %v5976_v47  ;;  %v907_v5 = vmul.f32 %v6049_v57, %v6027_v20 }
  0xf2   : > { %v5994_v60 = vpack.c.b16 %v1915_v55, %v1914_v54  ;;  %v1916_v54 = vunpack.c.l.b16 %v1708_v36  ;;  %v746_v55 = vadd.f32 %v5909_v35, %v745_v14  ;;  %vm893_vm15 = vweird.f32 %v6000_v56  ;;  %v6093_v36 = vpop.xlane.xlu2 %572 }
  0xf3   : > { %v6055_v63 = vpop.eup %5200  ;;  %v1646_v6 = vmul.f32 %v1582_v9, %v5942_v58  ;;  %v1647_v3 = vmul.f32 %v1583_v59, %v5942_v58  ;;  %v6070_v18 = vunpack.c.h.bf16 %v5056_v4  ;;  %v901_v25 = vmul.f32 %v5996_v0, %v900_v1  ;;  %vm6082_vm1 = vmor %vm892_vm14, %vm893_vm15 }
  0xf4   : > { %8380 = vst [vmem:[#allocation21_spill] sm:$0xff] %v5994_v60  ;;  %2002 = vmatmul.bf16.vlgmr.msra.gmra.mxu0 %v5994_v60  ;;  %v6053_v29 = vpack.c.b16 %v1917_v61, %v1916_v54  ;;  %v747_v8 = vadd.f32 %v5907_v31, %v746_v55  ;;  %v917_v10 = vmul.f32 %v6055_v63, %v6031_v42  ;;  %vm769_vm2 = vcmp.gt.f32.partialorder %v5969_v40, 0.0 }
  0xf5   : > { %v891_v28 = vmul.f32 %v6000_v56, %v890_v34  ;;  %v908_v38 = vmul.f32 %v6049_v57, %v907_v5  ;;  %672 = vadd.xlane.f32.xlu2 %v6070_v18  ;;  %v1710_v48 = vpack.c.bf16 %v1646_v6, %v1646_v6  ;;  %v1711_v19 = vpack.c.bf16 %v1647_v3, %v1647_v3  ;;  %v5057_v5 = vld [vmem:[%s5754_s10 + $0xf8] sm:$0xff]   ;;  %v6126_v6 = vpop.xlane.xlu0 %574 }
  0xf6   : > { %8385 = vst [vmem:[#allocation22_spill] sm:$0xff] %v6053_v29  ;;  %v748_v41 = vadd.f32 %v5982_v50, %v747_v8  ;;  %v918_v7 = vmul.f32 %v6055_v63, %v917_v10  ;;  %v905_v14 = vsel %vm6077_vm0, %v5996_v0, %v901_v25  ;;  %vm768_vm3 = vcmp.gt.f32.partialorder %v5976_v47, 0.0  ;;  %v5034_v8 = vld [vmem:[%s5754_s10 + $0x40] sm:$0xff]  }
  0xf7   : > { %v895_v61 = vsel %vm6082_vm1, %v6000_v56, %v891_v28  ;;  %5202 = vrsqrt.f32 %v6088_v44  ;;  %v909_v43 = vmul.f32 0.5, %v908_v38  ;;  %v1918_v53 = vunpack.c.l.b16 %v1710_v48  ;;  %v6146_v48 = vpop.xlane.xlu1 %576  ;;  %v5035_v38 = vld [vmem:[%s5754_s10 + $0x48] sm:$0xff]  }
  0xf8   : > { %5204 = vrsqrt.f32 %v6093_v36  ;;  %v749_v51 = vadd.f32 %v5980_v49, %v748_v41  ;;  %v919_v52 = vmul.f32 0.5, %v918_v7  ;;  %v1919_v40 = vunpack.c.l.b16 %v1711_v19 }
  0xf9   : > { %v1473_v54 = vsel %vm769_vm2, %v905_v14, 0.0  ;;  %v1472_v0 = vsel %vm768_vm3, %v895_v61, 0.0  ;;  %v910_v55 = vsub.f32 1.5, %v909_v43  ;;  %vm912_vm4 = vweird.f32 %v6027_v20 }
  0xfa   : > { %v750_v47 = vadd.f32 %v6020_v30, %v749_v51  ;;  %v1585_v56 = vmul.f32 %v5799_v11, %v1473_v54  ;;  %v1584_v59 = vmul.f32 %v5801_v12, %v1472_v0  ;;  %v920_v1 = vsub.f32 1.5, %v919_v52 }
  0xfb   : > { %v6111_v34 = vpack.c.b16 %v1919_v40, %v1918_v53  ;;  %vm913_vm5 = vweird.f32 %v6049_v57  ;;  %vm922_vm6 = vweird.f32 %v6031_v42  ;;  %vm923_vm7 = vweird.f32 %v6055_v63 }
  0xfc   : > { %v911_v11 = vmul.f32 %v6049_v57, %v910_v55  ;;  %v751_v10 = vadd.f32 %v6029_v39, %v750_v47  ;;  %vm6128_vm8 = vmor %vm912_vm4, %vm913_vm5  ;;  %v921_v25 = vmul.f32 %v6055_v63, %v920_v1  ;;  %v1648_v28 = vmul.f32 %v1584_v59, %v5942_v58 }
  0xfd   : > { %v6107_v9 = vpop.eup %5202  ;;  %8390 = vst [vmem:[#allocation23_spill] sm:$0xff] %v6111_v34  ;;  %v1649_v37 = vmul.f32 %v1585_v56, %v5942_v58  ;;  %vm6137_vm9 = vmor %vm922_vm6, %vm923_vm7  ;;  %v6141_v41 = vunpack.c.l.bf16 %v5057_v5  ;;  %v6143_v7 = vunpack.c.l.bf16 %v5034_v8  ;;  %vm770_vm10 = vcmp.gt.f32.partialorder %v6027_v20, 0.0 }
  0xfe   : > { %v6113_v4 = vpop.eup %5204  ;;  %v927_v12 = vmul.f32 %v6107_v9, %v6088_v44  ;;  %5206 = vrsqrt.f32 %v6126_v6  ;;  %v6149_v19 = vunpack.c.h.bf16 %v5057_v5  ;;  %v915_v14 = vsel %vm6128_vm8, %v6049_v57, %v911_v11 }
  0xff   : > { %v937_v27 = vmul.f32 %v6113_v4, %v6093_v36  ;;  %vm771_vm11 = vcmp.gt.f32.partialorder %v6031_v42, 0.0  ;;  %v752_v43 = vadd.f32 %v6072_v23, %v751_v10  ;;  %674 = vadd.xlane.f32.xlu0 %v6141_v41  ;;  %582 = vadd.xlane.f32.xlu2 %v6143_v7  ;;  %v925_v51 = vsel %vm6137_vm9, %v6055_v63, %v921_v25 }
 0x100   : > { %v928_v61 = vmul.f32 %v6107_v9, %v927_v12  ;;  %v1712_v53 = vpack.c.bf16 %v1648_v28, %v1648_v28  ;;  %v1713_v40 = vpack.c.bf16 %v1649_v37, %v1649_v37  ;;  %676 = vadd.xlane.f32.xlu1 %v6149_v19  ;;  %5208 = vrsqrt.f32 %v6146_v48 }
 0x101   : > { %v938_v52 = vmul.f32 %v6113_v4, %v937_v27  ;;  %v1474_v42 = vsel %vm770_vm10, %v915_v14, 0.0  ;;  %v1475_v57 = vsel %vm771_vm11, %v925_v51, 0.0  ;;  %v753_v0 = vadd.f32 %v6070_v18, %v752_v43  ;;  %v6200_v43 = vpop.xlane.xlu2 %578 }
 0x102   : > { %v929_v54 = vmul.f32 0.5, %v928_v61  ;;  %v6168_v55 = vunpack.c.h.bf16 %v5034_v8  ;;  %v1920_v56 = vunpack.c.l.b16 %v1712_v53  ;;  %v1921_v59 = vunpack.c.l.b16 %v1713_v40 }
 0x103   : > { %v939_v63 = vmul.f32 0.5, %v938_v52  ;;  %v1586_v1 = vmul.f32 %v5803_v13, %v1474_v42  ;;  %v1587_v5 = vmul.f32 %v5809_v15, %v1475_v57  ;;  %v754_v10 = vadd.f32 %v6141_v41, %v753_v0 }
 0x104   : > { %2007 = vmatmul.bf16.gmra.mxu0 %v6053_v29  ;;  %v6170_v47 = vpop.eup %5206  ;;  %v930_v12 = vsub.f32 1.5, %v929_v54  ;;  %v6180_v3 = vpack.c.b16 %v1921_v59, %v1920_v56  ;;  %vm932_vm12 = vweird.f32 %v6088_v44  ;;  %vm933_vm13 = vweird.f32 %v6107_v9 }
 0x105   : > { %v947_v20 = vmul.f32 %v6170_v47, %v6126_v6  ;;  %v940_v8 = vsub.f32 1.5, %v939_v63  ;;  %v1650_v13 = vmul.f32 %v1586_v1, %v5942_v58  ;;  %vm942_vm14 = vweird.f32 %v6093_v36  ;;  %vm6196_vm0 = vmor %vm932_vm12, %vm933_vm13  ;;  %v6216_v63 = vpop.xlane.xlu0 %580 }
 0x106   : > { %v6174_v11 = vpop.eup %5208  ;;  %8395 = vst [vmem:[#allocation24_spill] sm:$0xff] %v6180_v3  ;;  %vm943_vm15 = vweird.f32 %v6113_v4  ;;  %v1651_v25 = vmul.f32 %v1587_v5, %v5942_v58  ;;  %v931_v27 = vmul.f32 %v6107_v9, %v930_v12  ;;  %v755_v37 = vadd.f32 %v6149_v19, %v754_v10 }
 0x107   : > { %584 = vadd.xlane.f32.xlu0 %v6168_v55  ;;  %v957_v15 = vmul.f32 %v6174_v11, %v6146_v48  ;;  %v948_v28 = vmul.f32 %v6170_v47, %v947_v20  ;;  %v941_v14 = vmul.f32 %v6113_v4, %v940_v8  ;;  %vm6202_vm1 = vmor %vm942_vm14, %vm943_vm15  ;;  %vm772_vm2 = vcmp.gt.f32.partialorder %v6088_v44, 0.0 }
 0x108   : > { %v1714_v52 = vpack.c.bf16 %v1650_v13, %v1650_v13  ;;  %v1715_v40 = vpack.c.bf16 %v1651_v25, %v1651_v25  ;;  %v6208_v42 = vunpack.c.h.bf16 %v5035_v38  ;;  %v6210_v57 = vunpack.c.l.bf16 %v5035_v38 }
 0x109   : > { %v958_v53 = vmul.f32 %v6174_v11, %v957_v15  ;;  %v935_v54 = vsel %vm6196_vm0, %v6107_v9, %v931_v27  ;;  %v949_v0 = vmul.f32 0.5, %v948_v28  ;;  %5210 = vrsqrt.f32 %v6200_v43  ;;  %v1832_v28 = vld [vmem:[%s5762_s14 + $0x1f0] sm:$0xff]  ;;  %v6273_v38 = vpop.xlane.xlu2 %648 }
 0x10a   : > { %v756_v56 = vrot.slane %v755_v37, 4  ;;  %vm773_vm3 = vcmp.gt.f32.partialorder %v6093_v36, 0.0  ;;  %v945_v44 = vsel %vm6202_vm1, %v6113_v4, %v941_v14  ;;  %588 = vadd.xlane.f32.xlu2 %v6208_v42  ;;  %586 = vadd.xlane.f32.xlu1 %v6210_v57  ;;  %v1476_v59 = vsel %vm772_vm2, %v935_v54, 0.0 }
 0x10b   : > { %v959_v1 = vmul.f32 0.5, %v958_v53  ;;  %v1922_v5 = vunpack.c.l.b16 %v1714_v52  ;;  %5212 = vrsqrt.f32 %v6216_v63  ;;  %v1477_v9 = vsel %vm773_vm3, %v945_v44, 0.0  ;;  %v1828_v44 = vld [vmem:[%s5762_s14 + $0x1d0] sm:$0xff] }
 0x10c   : > { %v950_v12 = vsub.f32 1.5, %v949_v0  ;;  %v1923_v20 = vunpack.c.l.b16 %v1715_v40  ;;  %v757_v10 = vadd.f32 %v756_v56, %v755_v37  ;;  %v1588_v8 = vmul.f32 %v5811_v16, %v1476_v59  ;;  %v1833_v37 = vld [vmem:[%s5762_s14 + $0x1f8] sm:$0xff]  ;;  %v1830_v0 = vld [vmem:[%s5762_s14 + $0x1e0] sm:$0xff]  ;;  %v1831_v56 = vld [vmem:[%s5762_s14 + $0x1e8] sm:$0xff] }
 0x10d   : > { %vm952_vm4 = vweird.f32 %v6126_v6  ;;  %vm953_vm5 = vweird.f32 %v6170_v47  ;;  %v1589_v4 = vmul.f32 %v5813_v17, %v1477_v9  ;;  %v960_v13 = vsub.f32 1.5, %v959_v1 }
 0x10e   : > { %vm962_vm6 = vweird.f32 %v6146_v48  ;;  %v951_v15 = vmul.f32 %v6170_v47, %v950_v12  ;;  %v6233_v25 = vpack.c.b16 %v1923_v20, %v1922_v5  ;;  %v758_v27 = vrot.slane %v757_v10, 2  ;;  %vm6240_vm8 = vmor %vm952_vm4, %vm953_vm5 }
 0x10f   : > { %v6225_v36 = vpop.eup %5210  ;;  %vm963_vm7 = vweird.f32 %v6174_v11  ;;  %v1896_v14 = vpack.c.bf16 %v1832_v28, %v1832_v28  ;;  %v1897_v61 = vpack.c.bf16 %v1833_v37, %v1833_v37  ;;  %vm774_vm9 = vcmp.gt.f32.partialorder %v6126_v6, 0.0  ;;  %v1829_v28 = vld [vmem:[%s5762_s14 + $0x1d8] sm:$0xff] }
 0x110   : > { %8400 = vst [vmem:[#allocation25_spill] sm:$0xff] %v6233_v25  ;;  %v967_v17 = vmul.f32 %v6225_v36, %v6200_v43  ;;  %v1652_v51 = vmul.f32 %v1588_v8, %v5942_v58  ;;  %v961_v52 = vmul.f32 %v6174_v11, %v960_v13  ;;  %v1653_v53 = vmul.f32 %v1589_v4, %v5942_v58  ;;  %vm6258_vm10 = vmor %vm962_vm6, %vm963_vm7 }
 0x111   : > { %v6237_v16 = vpop.eup %5212  ;;  %v2411_v40 = vunpack.c.l.b16 %v1896_v14  ;;  %v2412_v54 = vunpack.c.l.b16 %v1897_v61  ;;  %v955_v1 = vsel %vm6240_vm8, %v6170_v47, %v951_v15  ;;  %v759_v9 = vadd.f32 %v758_v27, %v757_v10  ;;  %v1826_v14 = vld [vmem:[%s5762_s14 + $0x1c0] sm:$0xff]  ;;  %v1827_v10 = vld [vmem:[%s5762_s14 + $0x1c8] sm:$0xff]  ;;  %v5036_v27 = vld [vmem:[%s5754_s10 + $0x50] sm:$0xff]  }
 0x112   : > { %v977_v5 = vmul.f32 %v6237_v16, %v6216_v63  ;;  %v1894_v12 = vpack.c.bf16 %v1830_v0, %v1830_v0  ;;  %v968_v20 = vmul.f32 %v6225_v36, %v967_v17  ;;  %v1895_v4 = vpack.c.bf16 %v1831_v56, %v1831_v56 }
 0x113   : > { %v2420_v8 = vpack.c.b16 %v2412_v54, %v2411_v40  ;;  %v1892_v13 = vpack.c.bf16 %v1828_v44, %v1828_v44  ;;  %vm775_vm11 = vcmp.gt.f32.partialorder %v6146_v48, 0.0  ;;  %v965_v37 = vsel %vm6258_vm10, %v6174_v11, %v961_v52  ;;  %v6281_v54 = vpop.xlane.xlu1 %646 }
 0x114   : > { %2012 = vmatmul.bf16.gmra.mxu0 %v6111_v34  ;;  %v1716_v47 = vpack.c.bf16 %v1652_v51, %v1652_v51  ;;  %v1717_v15 = vpack.c.bf16 %v1653_v53, %v1653_v53  ;;  %v1478_v17 = vsel %vm774_vm9, %v955_v1, 0.0  ;;  %v978_v61 = vmul.f32 %v6237_v16, %v977_v5 }
 0x115   : > { %2429 = vmatpush.bf16.msrb.mxu0 %v2420_v8  ;;  %v760_v40 = vrot.slane %v759_v9, 1  ;;  %v2409_v0 = vunpack.c.l.b16 %v1894_v12  ;;  %v969_v56 = vmul.f32 0.5, %v968_v20  ;;  %v2410_v44 = vunpack.c.l.b16 %v1895_v4 }
 0x116   : > { %v1893_v11 = vpack.c.bf16 %v1829_v28, %v1829_v28  ;;  %v2407_v51 = vunpack.c.l.b16 %v1892_v13  ;;  %5214 = vrsqrt.f32 %v6273_v38  ;;  %v1890_v52 = vpack.c.bf16 %v1826_v14, %v1826_v14 }
 0x117   : > { %v1891_v53 = vpack.c.bf16 %v1827_v10, %v1827_v10  ;;  %v6284_v59 = vunpack.c.h.bf16 %v5036_v27  ;;  %5216 = vrsqrt.f32 %v6281_v54  ;;  %v2419_v6 = vpack.c.b16 %v2410_v44, %v2409_v0 }
 0x118   : > { %v2408_v1 = vunpack.c.l.b16 %v1893_v11  ;;  %v6287_v8 = vunpack.c.l.bf16 %v5036_v27  ;;  %v1479_v5 = vsel %vm775_vm11, %v965_v37, 0.0  ;;  %v6291_v12 = vadd.f32 %v760_v40, %v759_v9 }
 0x119   : > { %v1924_v20 = vunpack.c.l.b16 %v1716_v47  ;;  %v1925_v4 = vunpack.c.l.b16 %v1717_v15  ;;  %592 = vadd.xlane.f32.xlu1 %v6284_v59  ;;  %v979_v13 = vmul.f32 0.5, %v978_v61  ;;  %2430 = vmatpush.bf16.msrb.mxu0 %v2419_v6  ;;  %v2405_v14 = vunpack.c.l.b16 %v1890_v52  ;;  %v1824_v15 = vld [vmem:[%s5762_s14 + $0x1b0] sm:$0xff]  ;;  %v1825_v61 = vld [vmem:[%s5762_s14 + $0x1b8] sm:$0xff]  ;;  %v1823_v6 = vld [vmem:[%s5762_s14 + $0x1a8] sm:$0xff] }
 0x11a   : > { %v2418_v28 = vpack.c.b16 %v2408_v1, %v2407_v51  ;;  %v2406_v10 = vunpack.c.l.b16 %v1891_v53  ;;  %590 = vadd.xlane.f32.xlu0 %v6287_v8  ;;  %v1590_v27 = vmul.f32 %v5824_v22, %v1478_v17  ;;  %v1591_v48 = vmul.f32 %v5822_v21, %v1479_v5  ;;  %v1822_v53 = vld [vmem:[%s5762_s14 + $0x1a0] sm:$0xff]  ;;  %v1820_v1 = vld [vmem:[%s5762_s14 + $0x190] sm:$0xff] }
 0x11b   : > { %v970_v37 = vsub.f32 1.5, %v969_v56  ;;  %vm972_vm12 = vweird.f32 %v6200_v43  ;;  %vm973_vm13 = vweird.f32 %v6225_v36  ;;  %5218 = vrsqrt.f32 %v6291_v12 }
 0x11c   : > { %v6297_v9 = vpop.eup %5214  ;;  %v6302_v47 = vpack.c.b16 %v1925_v4, %v1924_v20  ;;  %v980_v22 = vsub.f32 1.5, %v979_v13  ;;  %v2417_v21 = vpack.c.b16 %v2406_v10, %v2405_v14  ;;  %v1888_v17 = vpack.c.bf16 %v1824_v15, %v1824_v15  ;;  %vm6321_vm0 = vmor %vm972_vm12, %vm973_vm13  ;;  %v1821_v13 = vld [vmem:[%s5762_s14 + $0x198] sm:$0xff] }
 0x11d   : > { %v6306_v40 = vpop.eup %5216  ;;  %2431 = vmatpush.bf16.msrb.mxu0 %v2418_v28  ;;  %v1889_v0 = vpack.c.bf16 %v1825_v61, %v1825_v61  ;;  %vm982_vm14 = vweird.f32 %v6216_v63  ;;  %vm983_vm15 = vweird.f32 %v6237_v16  ;;  %v1654_v56 = vmul.f32 %v1590_v27, %v5942_v58 }
 0x11e   : > { %8405 = vst [vmem:[#allocation26_spill] sm:$0xff] %v6302_v47  ;;  %v971_v44 = vmul.f32 %v6225_v36, %v970_v37  ;;  %v1655_v11 = vmul.f32 %v1591_v48, %v5942_v58  ;;  %v2403_v51 = vunpack.c.l.b16 %v1888_v17  ;;  %v1317_v20 = vmul.f32 %v6297_v9, %v6273_v38  ;;  %vm6339_vm3 = vmor %vm982_vm14, %vm983_vm15  ;;  %v6346_v17 = vpop.xlane.xlu1 %652 }
 0x11f   : > { %v2404_v52 = vunpack.c.l.b16 %v1889_v0  ;;  %v1307_v4 = vmul.f32 %v6306_v40, %v6281_v54  ;;  %vm776_vm1 = vcmp.gt.f32.partialorder %v6200_v43, 0.0  ;;  %v981_v28 = vmul.f32 %v6237_v16, %v980_v22 }
 0x120   : > { %vm777_vm2 = vcmp.gt.f32.partialorder %v6216_v63, 0.0  ;;  %v1886_v48 = vpack.c.bf16 %v1822_v53, %v1822_v53  ;;  %v1887_v37 = vpack.c.bf16 %v1823_v6, %v1823_v6  ;;  %v1884_v15 = vpack.c.bf16 %v1820_v1, %v1820_v1 }
 0x121   : > { %2432 = vmatpush.bf16.msrb.mxu0 %v2417_v21  ;;  %v2416_v14 = vpack.c.b16 %v2404_v52, %v2403_v51  ;;  %v6332_v10 = vpop.eup %5218  ;;  %v975_v61 = vsel %vm6321_vm0, %v6225_v36, %v971_v44  ;;  %v1718_v22 = vpack.c.bf16 %v1654_v56, %v1654_v56  ;;  %v1719_v21 = vpack.c.bf16 %v1655_v11, %v1655_v11 }
 0x122   : > { %v1885_v0 = vpack.c.bf16 %v1821_v13, %v1821_v13  ;;  %v1318_v51 = vmul.f32 %v6297_v9, %v1317_v20  ;;  %v1308_v52 = vmul.f32 %v6306_v40, %v1307_v4  ;;  %v2402_v53 = vunpack.c.l.b16 %v1887_v37 }
 0x123   : > { %v985_v6 = vsel %vm6339_vm3, %v6237_v16, %v981_v28  ;;  %v1565_v36 = vmul.f32 %v6332_v10, %v6291_v12  ;;  %v2399_v56 = vunpack.c.l.b16 %v1884_v15  ;;  %5220 = vrsqrt.f32 %v6346_v17  ;;  %v1818_v28 = vld [vmem:[%s5762_s14 + $0x180] sm:$0xff] }
 0x124   : > { %2017 = vmatmul.bf16.gmra.mxu0 %v6180_v3  ;;  %v2400_v44 = vunpack.c.l.b16 %v1885_v0  ;;  %v1926_v1 = vunpack.c.l.b16 %v1718_v22  ;;  %v1927_v5 = vunpack.c.l.b16 %v1719_v21  ;;  %v1480_v20 = vsel %vm776_vm1, %v975_v61, 0.0 }
 0x125   : > { %2433 = vmatpush.bf16.msrb.mxu0 %v2416_v14  ;;  %v1481_v4 = vsel %vm777_vm2, %v985_v6, 0.0  ;;  %v1319_v16 = vmul.f32 0.5, %v1318_v51  ;;  %v1309_v13 = vmul.f32 0.5, %v1308_v52  ;;  %v1819_v14 = vld [vmem:[%s5762_s14 + $0x188] sm:$0xff]  ;;  %v1566_v27 = vmul.f32 %v6332_v10, %v1565_v36  ;;  %v5037_v52 = vld [vmem:[%s5754_s10 + $0x58] sm:$0xff]  }
 0x126   : > { %v1883_v37 = vpack.c.bf16 %v1819_v14, %v1819_v14  ;;  %v6366_v15 = vpack.c.b16 %v1927_v5, %v1926_v1  ;;  %v1592_v63 = vmul.f32 %v5827_v24, %v1480_v20  ;;  %v1593_v61 = vmul.f32 %v5833_v26, %v1481_v4  ;;  %v5038_v20 = vld [vmem:[%s5754_s10 + $0x60] sm:$0xff]  }
 0x127   : > { %v1320_v0 = vsub.f32 1.5, %v1319_v16  ;;  %v1310_v51 = vsub.f32 1.5, %v1309_v13  ;;  %v1567_v6 = vmul.f32 0.5, %v1566_v27  ;;  %vm1322_vm4 = vweird.f32 %v6273_v38 }
 0x128   : > { %8410 = vst [vmem:[#allocation27_spill] sm:$0xff] %v6366_v15  ;;  %v2398_v21 = vunpack.c.l.b16 %v1883_v37  ;;  %vm1323_vm5 = vweird.f32 %v6297_v9  ;;  %vm1312_vm6 = vweird.f32 %v6281_v54  ;;  %vm1313_vm7 = vweird.f32 %v6306_v40 }
 0x129   : > { %v6368_v43 = vpop.eup %5220  ;;  %v1568_v1 = vsub.f32 1.5, %v1567_v6  ;;  %v1321_v5 = vmul.f32 %v6297_v9, %v1320_v0  ;;  %vm6392_vm8 = vmor %vm1322_vm4, %vm1323_vm5  ;;  %v1311_v4 = vmul.f32 %v6306_v40, %v1310_v51  ;;  %v1657_v16 = vmul.f32 %v1593_v61, %v5942_v58 }
 0x12a   : > { %v1337_v24 = vmul.f32 %v6368_v43, %v6346_v17  ;;  %vm6398_vm9 = vmor %vm1312_vm6, %vm1313_vm7  ;;  %vm1570_vm10 = vweird.f32 %v6291_v12  ;;  %vm1571_vm11 = vweird.f32 %v6332_v10  ;;  %vm811_vm12 = vcmp.gt.f32.partialorder %v6273_v38, 0.0 }
 0x12b   : > { %vm810_vm13 = vcmp.gt.f32.partialorder %v6281_v54, 0.0  ;;  %v1325_v37 = vsel %vm6392_vm8, %v6297_v9, %v1321_v5  ;;  %vm6421_vm14 = vmor %vm1570_vm10, %vm1571_vm11  ;;  %vm1533_vm15 = vcmp.gt.f32.partialorder %v6291_v12, 0.0  ;;  %vm1342_vm0 = vweird.f32 %v6346_v17 }
 0x12c   : > { %v1338_v14 = vmul.f32 %v6368_v43, %v1337_v24  ;;  %v1515_v0 = vsel %vm811_vm12, %v1325_v37, 0.0  ;;  %vm1343_vm1 = vweird.f32 %v6368_v43  ;;  %vm813_vm6 = vcmp.gt.f32.partialorder %v6346_v17, 0.0 }
 0x12d   : > { %v1627_v24 = vmul.f32 %v5851_v45, %v1515_v0  ;;  %v6448_v45 = vunpack.c.l.bf16 %v5038_v20  ;;  %vm6461_vm4 = vmor %vm1342_vm0, %vm1343_vm1 }
 0x12e   : > { %v1339_v61 = vmul.f32 0.5, %v1338_v14 }
 0x12f   : > { %598 = vadd.xlane.f32.xlu1 %v6448_v45 }
 0x134   : > { %2022 = vmatmul.bf16.gmra.mxu0 %v6233_v25  ;;  %v2401_v25 = vunpack.c.l.b16 %v1886_v48  ;;  %v2414_v48 = vpack.c.b16 %v2400_v44, %v2399_v56  ;;  %v6375_v56 = vunpack.c.l.bf16 %v5037_v52  ;;  %v6377_v44 = vunpack.c.h.bf16 %v5037_v52 }
 0x136   : > { %v2415_v11 = vpack.c.b16 %v2402_v53, %v2401_v25  ;;  %v1882_v25 = vpack.c.bf16 %v1818_v28, %v1818_v28  ;;  %594 = vadd.xlane.f32.xlu2 %v6375_v56  ;;  %596 = vadd.xlane.f32.xlu0 %v6377_v44  ;;  %v699_v28 = vadd.f32 %v6168_v55, %v6143_v7 }
 0x138   : > { %2434 = vmatpush.bf16.msrb.mxu0 %v2415_v11  ;;  %v2397_v22 = vunpack.c.l.b16 %v1882_v25  ;;  %v1656_v11 = vmul.f32 %v1592_v63, %v5942_v58  ;;  %v1569_v25 = vmul.f32 %v6332_v10, %v1568_v1  ;;  %v700_v54 = vadd.f32 %v6210_v57, %v699_v28 }
 0x13a   : > { %v2413_v36 = vpack.c.b16 %v2398_v21, %v2397_v22  ;;  %v1720_v27 = vpack.c.bf16 %v1656_v11, %v1656_v11  ;;  %v1315_v22 = vsel %vm6398_vm9, %v6306_v40, %v1311_v4  ;;  %v1721_v21 = vpack.c.bf16 %v1657_v16, %v1657_v16 }
 0x13b   : > { %v1514_v51 = vsel %vm810_vm13, %v1315_v22, 0.0  ;;  %v1573_v40 = vsel %vm6421_vm14, %v6332_v10, %v1569_v25  ;;  %v1340_v11 = vsub.f32 1.5, %v1339_v61  ;;  %v701_v12 = vadd.f32 %v6208_v42, %v700_v54 }
 0x13c   : > { %2435 = vmatpush.bf16.msrb.mxu0 %v2414_v48  ;;  %v6410_v48 = vpop.xlane.xlu2 %654  ;;  %v1928_v52 = vunpack.c.l.b16 %v1720_v27  ;;  %v1929_v6 = vunpack.c.l.b16 %v1721_v21  ;;  %v6436_v1 = vsel %vm1533_vm15, %v1573_v40, 0.0  ;;  %v6446_v16 = vunpack.c.h.bf16 %v5038_v20 }
 0x13d   : > { %v1341_v13 = vmul.f32 %v6368_v43, %v1340_v11  ;;  %v1691_v14 = vmul.f32 %v1627_v24, %v6436_v1  ;;  %v702_v25 = vadd.f32 %v6287_v8, %v701_v12  ;;  %vm1352_vm8 = vweird.f32 %v6410_v48 }
 0x13e   : > { %v6444_v10 = vpack.c.b16 %v1929_v6, %v1928_v52  ;;  %600 = vadd.xlane.f32.xlu2 %v6446_v16  ;;  %vm814_vm14 = vcmp.gt.f32.partialorder %v6410_v48, 0.0 }
 0x13f   : > { %v1345_v0 = vsel %vm6461_vm4, %v6368_v43, %v1341_v13 }
 0x140   : > { %2436 = vmatpush.bf16.msrb.mxu0 %v2413_v36  ;;  %v6432_v36 = vpop.xlane.xlu1 %658  ;;  %8417 = vst [vmem:[#allocation28_spill] sm:$0xff] %v6444_v10  ;;  %v1517_v6 = vsel %vm813_vm6, %v1345_v0, 0.0 }
 0x141   : > { %vm1372_vm1 = vweird.f32 %v6432_v36 }
 0x144   : > { %2027 = vmatmul.bf16.gmra.mxu0 %v6302_v47  ;;  %v6350_v47 = vpop.xlane.xlu0 %650  ;;  %v6469_v22 = vpop.xlane.xlu2 %660 }
 0x145   : > { %5222 = vrsqrt.f32 %v6350_v47  ;;  %vm1332_vm2 = vweird.f32 %v6350_v47  ;;  %vm812_vm7 = vcmp.gt.f32.partialorder %v6350_v47, 0.0  ;;  %vm1382_vm0 = vweird.f32 %v6469_v22 }
 0x146   : > { %5224 = vrsqrt.f32 %v6410_v48 }
 0x14b   : > { %v6373_v53 = vpop.eup %5222 }
 0x14c   : > { %v1327_v26 = vmul.f32 %v6373_v53, %v6350_v47  ;;  %v6419_v63 = vpop.xlane.xlu0 %656  ;;  %v6441_v4 = vpop.eup %5224  ;;  %vm1333_vm3 = vweird.f32 %v6373_v53  ;;  %v703_v47 = vadd.f32 %v6284_v59, %v702_v25 }
 0x14d   : > { %5226 = vrsqrt.f32 %v6419_v63  ;;  %v1347_v37 = vmul.f32 %v6441_v4, %v6410_v48  ;;  %vm6472_vm5 = vmor %vm1332_vm2, %vm1333_vm3  ;;  %vm1353_vm9 = vweird.f32 %v6441_v4  ;;  %vm1362_vm10 = vweird.f32 %v6419_v63 }
 0x14e   : > { %v1328_v58 = vmul.f32 %v6373_v53, %v1327_v26  ;;  %v1626_v26 = vmul.f32 %v5853_v46, %v1514_v51  ;;  %5228 = vrsqrt.f32 %v6432_v36  ;;  %v704_v11 = vadd.f32 %v6375_v56, %v703_v47  ;;  %vm6541_vm12 = vmor %vm1352_vm8, %vm1353_vm9 }
 0x14f   : > { %5230 = vrsqrt.f32 %v6469_v22  ;;  %v1348_v17 = vmul.f32 %v6441_v4, %v1347_v37  ;;  %vm815_vm15 = vcmp.gt.f32.partialorder %v6419_v63, 0.0 }
 0x150   : > { %v1329_v9 = vmul.f32 0.5, %v1328_v58  ;;  %v1690_v28 = vmul.f32 %v1626_v26, %v6436_v1  ;;  %v6483_v61 = vpop.xlane.xlu1 %664  ;;  %v705_v21 = vadd.f32 %v6377_v44, %v704_v11 }
 0x151   : > { %v1349_v26 = vmul.f32 0.5, %v1348_v17 }
 0x152   : > { %v1330_v5 = vsub.f32 1.5, %v1329_v9  ;;  %v1754_v51 = vpack.c.bf16 %v1690_v28, %v1690_v28  ;;  %v1755_v9 = vpack.c.bf16 %v1691_v14, %v1691_v14  ;;  %v1629_v28 = vmul.f32 %v5866_v32, %v1517_v6  ;;  %v5039_v32 = vld [vmem:[%s5754_s10 + $0x68] sm:$0xff]  }
 0x153   : > { %v6450_v46 = vpop.eup %5226  ;;  %v1350_v25 = vsub.f32 1.5, %v1349_v26  ;;  %v706_v11 = vadd.f32 %v6448_v45, %v705_v21 }
 0x154   : > { %2032 = vmatmul.bf16.gmra.mxu0 %v6366_v15  ;;  %v1331_v27 = vmul.f32 %v6373_v53, %v1330_v5  ;;  %v1357_v38 = vmul.f32 %v6450_v46, %v6419_v63  ;;  %v6497_v24 = vpop.eup %5228  ;;  %v2349_v5 = vunpack.c.l.b16 %v1754_v51  ;;  %v1693_v47 = vmul.f32 %v1629_v28, %v6436_v1 }
 0x155   : > { %v6478_v54 = vpop.xlane.xlu0 %662  ;;  %v6500_v12 = vpop.eup %5230  ;;  %vm1363_vm11 = vweird.f32 %v6450_v46  ;;  %vm1373_vm2 = vweird.f32 %v6497_v24 }
 0x156   : > { %v1335_v40 = vsel %vm6472_vm5, %v6373_v53, %v1331_v27  ;;  %5232 = vrsqrt.f32 %v6478_v54  ;;  %v1358_v52 = vmul.f32 %v6450_v46, %v1357_v38  ;;  %v2350_v53 = vunpack.c.l.b16 %v1755_v9  ;;  %vm6549_vm13 = vmor %vm1362_vm10, %vm1363_vm11 }
 0x157   : > { %5234 = vrsqrt.f32 %v6483_v61  ;;  %v1516_v43 = vsel %vm812_vm7, %v1335_v40, 0.0  ;;  %v1367_v27 = vmul.f32 %v6497_v24, %v6432_v36  ;;  %v1377_v0 = vmul.f32 %v6500_v12, %v6469_v22  ;;  %vm6590_vm6 = vmor %vm1372_vm1, %vm1373_vm2 }
 0x158   : > { %v1359_v20 = vmul.f32 0.5, %v1358_v52  ;;  %v1628_v14 = vmul.f32 %v5868_v33, %v1516_v43  ;;  %v6514_v38 = vpack.c.b16 %v2350_v53, %v2349_v5  ;;  %v6521_v9 = vunpack.c.h.bf16 %v5039_v32 }
 0x159   : > { %v6523_v40 = vunpack.c.l.bf16 %v5039_v32  ;;  %v1368_v6 = vmul.f32 %v6497_v24, %v1367_v27  ;;  %v1351_v43 = vmul.f32 %v6441_v4, %v1350_v25  ;;  %v1378_v26 = vmul.f32 %v6500_v12, %v1377_v0 }
 0x15a   : > { %8422 = vst [vmem:[#allocation29_spill] sm:$0xff] %v6514_v38  ;;  %v1360_v51 = vsub.f32 1.5, %v1359_v20  ;;  %v1692_v17 = vmul.f32 %v1628_v14, %v6436_v1  ;;  %604 = vadd.xlane.f32.xlu1 %v6521_v9  ;;  %v1757_v25 = vpack.c.bf16 %v1693_v47, %v1693_v47  ;;  %vm1383_vm3 = vweird.f32 %v6500_v12 }
 0x15b   : > { %602 = vadd.xlane.f32.xlu0 %v6523_v40  ;;  %v1369_v32 = vmul.f32 0.5, %v1368_v6  ;;  %vm1392_vm4 = vweird.f32 %v6478_v54  ;;  %vm1402_vm7 = vweird.f32 %v6483_v61  ;;  %vm6604_vm9 = vmor %vm1382_vm0, %vm1383_vm3  ;;  %vm816_vm11 = vcmp.gt.f32.partialorder %v6432_v36, 0.0 }
 0x15c   : > { %v6502_v13 = vpop.eup %5232  ;;  %v1361_v53 = vmul.f32 %v6450_v46, %v1360_v51  ;;  %v1756_v27 = vpack.c.bf16 %v1692_v17, %v1692_v17  ;;  %v1355_v51 = vsel %vm6541_vm12, %v6441_v4, %v1351_v43  ;;  %v2352_v6 = vunpack.c.l.b16 %v1757_v25 }
 0x15d   : > { %v6506_v58 = vpop.eup %5234  ;;  %v1387_v33 = vmul.f32 %v6502_v13, %v6478_v54  ;;  %v1518_v43 = vsel %vm814_vm14, %v1355_v51, 0.0  ;;  %vm1393_vm5 = vweird.f32 %v6502_v13  ;;  %v5040_v51 = vld [vmem:[%s5754_s10 + $0x70] sm:$0xff]   ;;  %vm819_vm14 = vcmp.gt.f32.partialorder %v6483_v61, 0.0 }
 0x15e   : > { %v1397_v52 = vmul.f32 %v6506_v58, %v6483_v61  ;;  %v1365_v17 = vsel %vm6549_vm13, %v6450_v46, %v1361_v53  ;;  %vm1403_vm8 = vweird.f32 %v6506_v58  ;;  %vm6618_vm10 = vmor %vm1392_vm4, %vm1393_vm5  ;;  %vm817_vm13 = vcmp.gt.f32.partialorder %v6469_v22, 0.0 }
 0x15f   : > { %v1388_v20 = vmul.f32 %v6502_v13, %v1387_v33  ;;  %v1379_v33 = vmul.f32 0.5, %v1378_v26  ;;  %v1370_v26 = vsub.f32 1.5, %v1369_v32  ;;  %vm6631_vm12 = vmor %vm1402_vm7, %vm1403_vm8  ;;  %v5041_v32 = vld [vmem:[%s5754_s10 + $0x78] sm:$0xff]  }
 0x160   : > { %v6547_v28 = vpop.xlane.xlu2 %666  ;;  %v1398_v21 = vmul.f32 %v6506_v58, %v1397_v52  ;;  %v6554_v0 = vpop.xlane.xlu0 %668  ;;  %v2351_v52 = vunpack.c.l.b16 %v1756_v27 }
 0x161   : > { %5236 = vrsqrt.f32 %v6547_v28  ;;  %v1389_v47 = vmul.f32 0.5, %v1388_v20  ;;  %v1380_v5 = vsub.f32 1.5, %v1379_v33  ;;  %v1630_v20 = vmul.f32 %v5886_v62, %v1518_v43 }
 0x162   : > { %5238 = vrsqrt.f32 %v6554_v0  ;;  %v1399_v4 = vmul.f32 0.5, %v1398_v21  ;;  %v6581_v14 = vpack.c.b16 %v2352_v6, %v2351_v52  ;;  %v1371_v25 = vmul.f32 %v6497_v24, %v1370_v26 }
 0x163   : > { %v1390_v46 = vsub.f32 1.5, %v1389_v47  ;;  %v1381_v21 = vmul.f32 %v6500_v12, %v1380_v5  ;;  %v6611_v52 = vunpack.c.l.bf16 %v5040_v51  ;;  %v6613_v6 = vunpack.c.h.bf16 %v5040_v51 }
 0x164   : > { %2037 = vmatmul.bf16.gmra.mxu0 %v6444_v10  ;;  %v707_v10 = vadd.f32 %v6446_v16, %v706_v11  ;;  %v1519_v11 = vsel %vm815_vm15, %v1365_v17, 0.0  ;;  %8427 = vst [vmem:[#allocation30_spill] sm:$0xff] %v6581_v14  ;;  %v1400_v63 = vsub.f32 1.5, %v1399_v4  ;;  %v1375_v26 = vsel %vm6590_vm6, %v6497_v24, %v1371_v25 }
 0x165   : > { %v1391_v17 = vmul.f32 %v6502_v13, %v1390_v46  ;;  %606 = vadd.xlane.f32.xlu2 %v6611_v52  ;;  %v1385_v36 = vsel %vm6604_vm9, %v6500_v12, %v1381_v21  ;;  %v1694_v24 = vmul.f32 %v1630_v20, %v6436_v1  ;;  %608 = vadd.xlane.f32.xlu0 %v6613_v6  ;;  %vm818_vm15 = vcmp.gt.f32.partialorder %v6478_v54, 0.0 }
 0x166   : > { %v708_v15 = vadd.f32 %v6523_v40, %v707_v10  ;;  %v1631_v10 = vmul.f32 %v5891_v2, %v1519_v11  ;;  %v1401_v4 = vmul.f32 %v6506_v58, %v1400_v63  ;;  %v1520_v25 = vsel %vm816_vm11, %v1375_v26, 0.0 }
 0x167   : > { %v6577_v53 = vpop.eup %5236  ;;  %v1395_v63 = vsel %vm6618_vm10, %v6502_v13, %v1391_v17  ;;  %v1521_v21 = vsel %vm817_vm13, %v1385_v36, 0.0  ;;  %v1758_v54 = vpack.c.bf16 %v1694_v24, %v1694_v24  ;;  %v1632_v13 = vmul.f32 %v5909_v35, %v1520_v25 }
 0x168   : > { %v6583_v27 = vpop.eup %5238  ;;  %v709_v2 = vadd.f32 %v6521_v9, %v708_v15  ;;  %v1407_v47 = vmul.f32 %v6577_v53, %v6547_v28  ;;  %v1695_v46 = vmul.f32 %v1631_v10, %v6436_v1  ;;  %v1405_v12 = vsel %vm6631_vm12, %v6506_v58, %v1401_v4  ;;  %v6671_v36 = vpop.xlane.xlu2 %672  ;;  %v1796_v58 = vld [vmem:[%s5762_s14 + $0xd0] sm:$0xff] }
 0x169   : > { %v1417_v43 = vmul.f32 %v6583_v27, %v6554_v0  ;;  %v1522_v51 = vsel %vm818_vm15, %v1395_v63, 0.0  ;;  %v6658_v15 = vunpack.c.l.bf16 %v5041_v32  ;;  %v1523_v17 = vsel %vm819_vm14, %v1405_v12, 0.0  ;;  %v1800_v12 = vld [vmem:[%s5762_s14 + $0xf0] sm:$0xff] }
 0x16a   : > { %v710_v5 = vadd.f32 %v6611_v52, %v709_v2  ;;  %v1408_v22 = vmul.f32 %v6577_v53, %v1407_v47  ;;  %v1759_v33 = vpack.c.bf16 %v1695_v46, %v1695_v46  ;;  %v1633_v4 = vmul.f32 %v5907_v31, %v1521_v21 }
 0x16b   : > { %v1418_v20 = vmul.f32 %v6583_v27, %v1417_v43  ;;  %8436 = vst [vmem:[#allocation31_spill] sm:$0xff] %v6658_v15  ;;  %v6666_v26 = vunpack.c.h.bf16 %v5041_v32  ;;  %610 = vadd.xlane.f32.xlu1 %v6658_v15  ;;  %v1635_v61 = vmul.f32 %v5980_v49, %v1523_v17  ;;  %v2353_v24 = vunpack.c.l.b16 %v1758_v54  ;;  %v6690_v32 = vpop.xlane.xlu1 %670 }
 0x16c   : > { %v711_v10 = vadd.f32 %v6613_v6, %v710_v5  ;;  %v1409_v47 = vmul.f32 0.5, %v1408_v22  ;;  %v1634_v5 = vmul.f32 %v5982_v50, %v1522_v51  ;;  %v2354_v31 = vunpack.c.l.b16 %v1759_v33 }
 0x16d   : > { %v1419_v43 = vmul.f32 0.5, %v1418_v20  ;;  %8437 = vst [vmem:[#allocation32_spill] sm:$0xff] %v6666_v26  ;;  %612 = vadd.xlane.f32.xlu2 %v6666_v26  ;;  %v1696_v63 = vmul.f32 %v1632_v13, %v6436_v1  ;;  %vm1412_vm0 = vweird.f32 %v6547_v28  ;;  %vm1422_vm1 = vweird.f32 %v6554_v0  ;;  %v1801_v20 = vld [vmem:[%s5762_s14 + $0xf8] sm:$0xff] }
 0x16e   : > { %v712_v11 = vadd.f32 %v6658_v15, %v711_v10  ;;  %v1410_v46 = vsub.f32 1.5, %v1409_v47  ;;  %v1697_v25 = vmul.f32 %v1633_v4, %v6436_v1  ;;  %vm1413_vm2 = vweird.f32 %v6577_v53  ;;  %v1797_v4 = vld [vmem:[%s5762_s14 + $0xd8] sm:$0xff] }
 0x16f   : > { %v1420_v50 = vsub.f32 1.5, %v1419_v43  ;;  %vm1423_vm3 = vweird.f32 %v6583_v27  ;;  %v1698_v10 = vmul.f32 %v1634_v5, %v6436_v1  ;;  %5240 = vrsqrt.f32 %v6671_v36  ;;  %vm6700_vm4 = vmor %vm1412_vm0, %vm1413_vm2 }
 0x170   : > { %v713_v22 = vadd.f32 %v6666_v26, %v712_v11  ;;  %v1864_v51 = vpack.c.bf16 %v1800_v12, %v1800_v12  ;;  %v1865_v54 = vpack.c.bf16 %v1801_v20, %v1801_v20  ;;  %v1699_v33 = vmul.f32 %v1635_v61, %v6436_v1  ;;  %vm6710_vm5 = vmor %vm1422_vm1, %vm1423_vm3 }
 0x171   : > { %v6511_v37 = vpop.f32.mrf.mxu0  ;;  %v6693_v13 = vpack.c.b16 %v2354_v31, %v2353_v24  ;;  %v1411_v17 = vmul.f32 %v6577_v53, %v1410_v46  ;;  %v1421_v43 = vmul.f32 %v6583_v27, %v1420_v50  ;;  %v1760_v24 = vpack.c.bf16 %v1696_v63, %v1696_v63 }
 0x172   : > { %v6673_v35 = vpop.xlane.xlu0 %674  ;;  %v714_v49 = vrot.slane %v713_v22, 4  ;;  %v2121_v11 = vunpack.c.l.b16 %v1864_v51  ;;  %v2122_v5 = vunpack.c.l.b16 %v1865_v54  ;;  %v1761_v31 = vpack.c.bf16 %v1697_v25, %v1697_v25  ;;  %v1798_v54 = vld [vmem:[%s5762_s14 + $0xe0] sm:$0xff] }
 0x173   : > { %8438 = vst [vmem:[#allocation33_spill] sm:$0xff] %v6693_v13  ;;  %5242 = vrsqrt.f32 %v6690_v32  ;;  %v1763_v12 = vpack.c.bf16 %v1699_v33, %v1699_v33  ;;  %vm820_vm6 = vcmp.gt.f32.partialorder %v6547_v28, 0.0  ;;  %v1415_v63 = vsel %vm6700_vm4, %v6577_v53, %v1411_v17 }
 0x174   : > { %2437 = vmatmul.bf16.vlgmr.msrb.gmra.mxu0 %v6514_v38  ;;  %v715_v47 = vadd.f32 %v714_v49, %v713_v22  ;;  %v6715_v22 = vpop.xlane.xlu2 %582  ;;  %v2130_v50 = vpack.c.b16 %v2122_v5, %v2121_v11  ;;  %v1762_v49 = vpack.c.bf16 %v1698_v10, %v1698_v10  ;;  %vm821_vm7 = vcmp.gt.f32.partialorder %v6554_v0, 0.0  ;;  %v1799_v5 = vld [vmem:[%s5762_s14 + $0xe8] sm:$0xff] }
 0x175   : > { %5244 = vrsqrt.f32 %v6715_v22  ;;  %v6724_v51 = vpop.eup %5240  ;;  %v1425_v10 = vsel %vm6710_vm5, %v6583_v27, %v1421_v43  ;;  %v2355_v33 = vunpack.c.l.b16 %v1760_v24  ;;  %v2356_v11 = vunpack.c.l.b16 %v1761_v31 }
 0x176   : > { %v716_v46 = vrot.slane %v715_v47, 2  ;;  %2139 = vmatpush.bf16.msra.mxu1 %v2130_v50  ;;  %v1524_v53 = vsel %vm820_vm6, %v1415_v63, 0.0  ;;  %v1525_v27 = vsel %vm821_vm7, %v1425_v10, 0.0  ;;  %v1437_v61 = vmul.f32 %v6724_v51, %v6671_v36 }
 0x177   : > { %v1862_v50 = vpack.c.bf16 %v1798_v54, %v1798_v54  ;;  %v1861_v63 = vpack.c.bf16 %v1797_v4, %v1797_v4  ;;  %v6750_v0 = vpack.c.b16 %v2356_v11, %v2355_v33  ;;  %v1637_v54 = vmul.f32 %v6029_v39, %v1525_v27  ;;  %v1794_v33 = vld [vmem:[%s5762_s14 + $0xc0] sm:$0xff]  ;;  %v1795_v11 = vld [vmem:[%s5762_s14 + $0xc8] sm:$0xff]  ;;  %v1792_v27 = vld [vmem:[%s5762_s14 + $0xb0] sm:$0xff] }
 0x178   : > { %v717_v25 = vadd.f32 %v716_v46, %v715_v47  ;;  %v2357_v47 = vunpack.c.l.b16 %v1762_v49  ;;  %v2358_v46 = vunpack.c.l.b16 %v1763_v12  ;;  %v1863_v49 = vpack.c.bf16 %v1799_v5, %v1799_v5 }
 0x179   : > { %v6561_v38 = vpop.f32.mrf.mxu0  ;;  %v6737_v48 = vpop.eup %5242  ;;  %v1860_v12 = vpack.c.bf16 %v1796_v58, %v1796_v58  ;;  %8443 = vst [vmem:[#allocation34_spill] sm:$0xff] %v6750_v0  ;;  %v1438_v4 = vmul.f32 %v6724_v51, %v1437_v61  ;;  %vm992_vm8 = vweird.f32 %v6715_v22  ;;  %v1858_v3 = vpack.c.bf16 %v1794_v33, %v1794_v33 }
 0x17a   : > { %v6722_v20 = vpop.xlane.xlu0 %584  ;;  %v718_v28 = vrot.slane %v717_v25, 1  ;;  %v6753_v10 = vpack.c.b16 %v2358_v46, %v2357_v47  ;;  %v2120_v43 = vunpack.c.l.b16 %v1863_v49  ;;  %v1427_v58 = vmul.f32 %v6737_v48, %v6690_v32  ;;  %v6767_v47 = vpop.xlane.xlu1 %676  ;;  %v1793_v49 = vld [vmem:[%s5762_s14 + $0xb8] sm:$0xff] }
 0x17b   : > { %5246 = vrsqrt.f32 %v6722_v20  ;;  %v6747_v31 = vpop.eup %5244  ;;  %v1856_v29 = vpack.c.bf16 %v1792_v27, %v1792_v27  ;;  %v1857_v60 = vpack.c.bf16 %v1793_v49, %v1793_v49  ;;  %vm778_vm10 = vcmp.gt.f32.partialorder %v6715_v22, 0.0 }
 0x17c   : > { %v6745_v24 = vadd.f32 %v718_v28, %v717_v25  ;;  %8444 = vst [vmem:[#allocation35_spill] sm:$0xff] %v6753_v10  ;;  %v987_v25 = vmul.f32 %v6747_v31, %v6715_v22  ;;  %v2119_v28 = vunpack.c.l.b16 %v1862_v50  ;;  %v2118_v50 = vunpack.c.l.b16 %v1861_v63 }
 0x17d   : > { %vm993_vm9 = vweird.f32 %v6747_v31  ;;  %v2115_v26 = vunpack.c.l.b16 %v1858_v3  ;;  %vm1002_vm12 = vweird.f32 %v6722_v20  ;;  %vm779_vm1 = vcmp.gt.f32.partialorder %v6722_v20, 0.0 }
 0x17e   : > { %5248 = vrsqrt.f32 %v6745_v24  ;;  %v2129_v46 = vpack.c.b16 %v2120_v43, %v2119_v28  ;;  %v1859_v43 = vpack.c.bf16 %v1795_v11, %v1795_v11  ;;  %v1428_v28 = vmul.f32 %v6737_v48, %v1427_v58  ;;  %vm6794_vm11 = vmor %vm992_vm8, %vm993_vm9  ;;  %v6800_v11 = vpop.xlane.xlu2 %588 }
 0x17f   : > { %5250 = vrsqrt.f32 %v6673_v35  ;;  %vm1550_vm14 = vweird.f32 %v6745_v24  ;;  %vm1442_vm2 = vweird.f32 %v6671_v36  ;;  %vm1443_vm3 = vweird.f32 %v6724_v51 }
 0x180   : > { %2140 = vmatpush.bf16.msra.mxu1 %v2129_v46  ;;  %v2116_v33 = vunpack.c.l.b16 %v1859_v43  ;;  %5252 = vrsqrt.f32 %v6800_v11  ;;  %v1429_v43 = vmul.f32 0.5, %v1428_v28  ;;  %vm1531_vm4 = vcmp.gt.f32.partialorder %v6745_v24, 0.0 }
 0x181   : > { %v6594_v62 = vpop.f32.mrf.mxu0  ;;  %v6763_v5 = vpop.eup %5246  ;;  %5254 = vrsqrt.f32 %v6767_v47  ;;  %vm1432_vm6 = vweird.f32 %v6690_v32  ;;  %vm1433_vm7 = vweird.f32 %v6737_v48  ;;  %vm1022_vm8 = vweird.f32 %v6800_v11 }
 0x182   : > { %v997_v39 = vmul.f32 %v6763_v5, %v6722_v20  ;;  %vm1003_vm13 = vweird.f32 %v6763_v5  ;;  %v2127_v49 = vpack.c.b16 %v2116_v33, %v2115_v26  ;;  %v6823_v26 = vmul.f32 0.5, %v1438_v4  ;;  %v1791_v4 = vld [vmem:[%s5762_s14 + $0xa8] sm:$0xff]  ;;  %v1789_v33 = vld [vmem:[%s5762_s14 + $0x98] sm:$0xff] }
 0x183   : > { %vm6816_vm0 = vmor %vm1002_vm12, %vm1003_vm13 }
 0x184   : > { %2442 = vmatmul.bf16.gmra.mxu0 %v6581_v14  ;;  %v6780_v63 = vpop.eup %5248  ;;  %v998_v34 = vmul.f32 %v6763_v5, %v997_v39  ;;  %v2114_v39 = vunpack.c.l.b16 %v1857_v60  ;;  %v1855_v60 = vpack.c.bf16 %v1791_v4, %v1791_v4  ;;  %vm6898_vm12 = vmor %vm1442_vm2, %vm1443_vm3 }
 0x185   : > { %v1545_v15 = vmul.f32 %v6780_v63, %v6745_v24  ;;  %vm1551_vm15 = vweird.f32 %v6780_v63 }
 0x186   : > { %vm6845_vm5 = vmor %vm1550_vm14, %vm1551_vm15  ;;  %v2112_v4 = vunpack.c.l.b16 %v1855_v60 }
 0x187   : > { %v1546_v3 = vmul.f32 %v6780_v63, %v1545_v15 }
 0x189   : > { %v6656_v2 = vpop.f32.mrf.mxu0 }
 0x191   : > { %v6687_v21 = vpop.f32.mrf.mxu0 }
 0x194   : > { %2447 = vmatmul.bf16.gmra.mxu0 %v6693_v13  ;;  %v1636_v13 = vmul.f32 %v6020_v30, %v1524_v53  ;;  %v2117_v30 = vunpack.c.l.b16 %v1860_v12  ;;  %v988_v53 = vmul.f32 %v6747_v31, %v987_v25 }
 0x196   : > { %v6776_v12 = vmul.f32 %v1636_v13, %v6436_v1  ;;  %v989_v61 = vmul.f32 0.5, %v988_v53  ;;  %v2128_v25 = vpack.c.b16 %v2118_v50, %v2117_v30  ;;  %v6787_v53 = vpop.eup %5250  ;;  %v999_v30 = vmul.f32 0.5, %v998_v34 }
 0x197   : > { %v2113_v50 = vunpack.c.l.b16 %v1856_v29  ;;  %v6806_v34 = vmul.f32 %v1637_v54, %v6436_v1  ;;  %v6821_v29 = vpop.xlane.xlu1 %586 }
 0x198   : > { %v990_v13 = vsub.f32 1.5, %v989_v61  ;;  %2141 = vmatpush.bf16.msra.mxu1 %v2128_v25  ;;  %v1000_v27 = vsub.f32 1.5, %v999_v30  ;;  %v1547_v61 = vmul.f32 0.5, %v1546_v3  ;;  %v1790_v25 = vld [vmem:[%s5762_s14 + $0xa0] sm:$0xff]  ;;  %v1788_v30 = vld [vmem:[%s5762_s14 + $0x90] sm:$0xff]  ;;  %5256 = vrsqrt.f32 %v6821_v29 }
 0x199   : > { %v6734_v17 = vpop.f32.mrf.mxu0  ;;  %v2126_v22 = vpack.c.b16 %v2114_v39, %v2113_v50  ;;  %v1786_v50 = vld [vmem:[%s5762_s14 + $0x80] sm:$0xff]  ;;  %v1787_v39 = vld [vmem:[%s5762_s14 + $0x88] sm:$0xff]  ;;  %vm1012_vm13 = vweird.f32 %v6821_v29  ;;  %vm780_vm3 = vcmp.gt.f32.partialorder %v6821_v29, 0.0 }
 0x19a   : > { %v991_v46 = vmul.f32 %v6747_v31, %v990_v13  ;;  %v1001_v54 = vmul.f32 %v6763_v5, %v1000_v27  ;;  %v1548_v58 = vsub.f32 1.5, %v1547_v61  ;;  %v1850_v20 = vpack.c.bf16 %v1786_v50, %v1786_v50 }
 0x19c   : > { %v995_v15 = vsel %vm6794_vm11, %v6747_v31, %v991_v46  ;;  %2142 = vmatpush.bf16.msra.mxu1 %v2127_v49  ;;  %v1005_v46 = vsel %vm6816_vm0, %v6763_v5, %v1001_v54  ;;  %v1549_v27 = vmul.f32 %v6780_v63, %v1548_v58  ;;  %v1852_v5 = vpack.c.bf16 %v1788_v30, %v1788_v30 }
 0x19d   : > { %v1482_v31 = vsel %vm778_vm10, %v995_v15, 0.0  ;;  %v1483_v61 = vsel %vm779_vm1, %v1005_v46, 0.0  ;;  %v1854_v15 = vpack.c.bf16 %v1790_v25, %v1790_v25  ;;  %v1853_v54 = vpack.c.bf16 %v1789_v33, %v1789_v33  ;;  %vm6929_vm1 = vmor %vm1432_vm6, %vm1433_vm7 }
 0x19e   : > { %v1594_v49 = vmul.f32 %v6143_v7, %v1482_v31  ;;  %v1595_v3 = vmul.f32 %v6168_v55, %v1483_v61  ;;  %v1553_v58 = vsel %vm6845_vm5, %v6780_v63, %v1549_v27  ;;  %v1851_v31 = vpack.c.bf16 %v1787_v39, %v1787_v39 }
 0x19f   : > { %v2111_v7 = vunpack.c.l.b16 %v1854_v15  ;;  %v1440_v25 = vsub.f32 1.5, %v6823_v26  ;;  %v6870_v46 = vsel %vm1531_vm4, %v1553_v58, 0.0  ;;  %v1430_v33 = vsub.f32 1.5, %v1429_v43 }
 0x1a0   : > { %2143 = vmatpush.bf16.msra.mxu1 %v2126_v22  ;;  %v2109_v63 = vunpack.c.l.b16 %v1852_v5  ;;  %v2110_v22 = vunpack.c.l.b16 %v1853_v54  ;;  %v1658_v24 = vmul.f32 %v1594_v49, %v6870_v46  ;;  %v1659_v39 = vmul.f32 %v1595_v3, %v6870_v46 }
 0x1a1   : > { %v6778_v14 = vpop.f32.mrf.mxu0  ;;  %v2125_v26 = vpack.c.b16 %v2112_v4, %v2111_v7  ;;  %v2107_v61 = vunpack.c.l.b16 %v1850_v20  ;;  %v2108_v15 = vunpack.c.l.b16 %v1851_v31  ;;  %vm823_vm10 = vcmp.gt.f32.partialorder %v6671_v36, 0.0  ;;  %v5042_v4 = vld [vmem:[%s5754_s10 + $0x80] sm:$0xff]  }
 0x1a2   : > { %vm822_vm11 = vcmp.gt.f32.partialorder %v6690_v32, 0.0  ;;  %v2124_v5 = vpack.c.b16 %v2110_v22, %v2109_v63  ;;  %v1722_v49 = vpack.c.bf16 %v1658_v24, %v1658_v24  ;;  %v1723_v54 = vpack.c.bf16 %v1659_v39, %v1659_v39  ;;  %v4720_v63 = vld [vmem:[#allocation7 + $0x38] sm:$0xff]  ;;  %v4719_v22 = vld [vmem:[#allocation7 + $0x30] sm:$0xff] }
 0x1a3   : > { %v1441_v3 = vmul.f32 %v6724_v51, %v1440_v25  ;;  %v1431_v58 = vmul.f32 %v6737_v48, %v1430_v33  ;;  %v1447_v7 = vmul.f32 %v6787_v53, %v6673_v35  ;;  %v6908_v33 = vpop.xlane.xlu1 %592  ;;  %v6918_v39 = vunpack.c.h.bf16 %v5042_v4  ;;  %2578 = vmatpush.bf16.msra.mxu0 %v4720_v63 }
 0x1a4   : > { %2452 = vmatmul.bf16.gmra.mxu0 %v6750_v0  ;;  %v6862_v0 = vpop.eup %5252  ;;  %2144 = vmatpush.bf16.msra.mxu1 %v2125_v26  ;;  %v2059_v26 = vunpack.c.l.b16 %v1722_v49  ;;  %v2060_v24 = vunpack.c.l.b16 %v1723_v54  ;;  %vm781_vm0 = vcmp.gt.f32.partialorder %v6800_v11, 0.0  ;;  %5258 = vrsqrt.f32 %v6908_v33 }
 0x1a5   : > { %v1017_v55 = vmul.f32 %v6862_v0, %v6800_v11  ;;  %v6874_v30 = vpop.eup %5254  ;;  %vm1023_vm9 = vweird.f32 %v6862_v0  ;;  %v1764_v54 = vpack.c.bf16 %v6776_v12, %v6776_v12  ;;  %616 = vadd.xlane.f32.xlu1 %v6918_v39  ;;  %vm1452_vm4 = vweird.f32 %v6673_v35 }
 0x1a6   : > { %v6877_v28 = vpop.eup %5256  ;;  %v1457_v25 = vmul.f32 %v6874_v30, %v6767_v47  ;;  %vm6914_vm15 = vmor %vm1022_vm8, %vm1023_vm9  ;;  %vm1042_vm5 = vweird.f32 %v6908_v33  ;;  %vm1453_vm7 = vweird.f32 %v6787_v53 }
 0x1a7   : > { %v1018_v50 = vmul.f32 %v6862_v0, %v1017_v55  ;;  %v1007_v43 = vmul.f32 %v6877_v28, %v6821_v29  ;;  %vm1013_vm14 = vweird.f32 %v6877_v28  ;;  %2579 = vmatpush.bf16.msra.mxu0 %v4719_v22 }
 0x1a8   : > { %2145 = vmatpush.bf16.msra.mxu1 %v2124_v5  ;;  %v1448_v5 = vmul.f32 %v6787_v53, %v1447_v7  ;;  %vm6951_vm2 = vmor %vm1012_vm13, %vm1013_vm14  ;;  %v1435_v7 = vsel %vm6929_vm1, %v6737_v48, %v1431_v58  ;;  %v1458_v31 = vmul.f32 %v6874_v30, %v1457_v25  ;;  %vm1463_vm13 = vweird.f32 %v6874_v30 }
 0x1a9   : > { %v6832_v13 = vpop.f32.mrf.mxu0  ;;  %v1019_v60 = vmul.f32 0.5, %v1018_v50  ;;  %v1008_v20 = vmul.f32 %v6877_v28, %v1007_v43  ;;  %v6920_v43 = vpop.xlane.xlu0 %590  ;;  %v1526_v58 = vsel %vm822_vm11, %v1435_v7, 0.0 }
 0x1aa   : > { %5260 = vrsqrt.f32 %v6920_v43  ;;  %v1449_v25 = vmul.f32 0.5, %v1448_v5  ;;  %v1459_v49 = vmul.f32 0.5, %v1458_v31  ;;  %vm1032_vm8 = vweird.f32 %v6920_v43 }
 0x1ab   : > { %v1020_v55 = vsub.f32 1.5, %v1019_v60  ;;  %v1009_v50 = vmul.f32 0.5, %v1008_v20  ;;  %v1765_v20 = vpack.c.bf16 %v6806_v34, %v6806_v34 }
 0x1ac   : > { %v1450_v31 = vsub.f32 1.5, %v1449_v25 }
 0x1ad   : > { %v1021_v60 = vmul.f32 %v6862_v0, %v1020_v55  ;;  %v1010_v55 = vsub.f32 1.5, %v1009_v50  ;;  %v6975_v50 = vpop.eup %5258 }
 0x1ae   : > { %vm1043_vm6 = vweird.f32 %v6975_v50 }
 0x1af   : > { %v1025_v63 = vsel %vm6914_vm15, %v6862_v0, %v1021_v60  ;;  %v6962_v0 = vpack.c.b16 %v2060_v24, %v2059_v26  ;;  %v2359_v26 = vunpack.c.l.b16 %v1764_v54  ;;  %v4718_v60 = vld [vmem:[#allocation7 + $0x28] sm:$0xff]  ;;  %v2360_v54 = vunpack.c.l.b16 %v1765_v20  ;;  %vm7013_vm11 = vmor %vm1042_vm5, %vm1043_vm6 }
 0x1b0   : > { %2580 = vmatpush.bf16.msra.mxu0 %v4718_v60  ;;  %vm782_vm15 = vcmp.gt.f32.partialorder %v6920_v43, 0.0 }
 0x1b1   : > { %v6882_v27 = vpop.f32.mrf.mxu0 }
 0x1b4   : > { %2457 = vmatmul.bf16.gmra.mxu0 %v6753_v10  ;;  %v2123_v10 = vpack.c.b16 %v2108_v15, %v2107_v61  ;;  %v6938_v61 = vunpack.c.l.bf16 %v5042_v4  ;;  %v1445_v15 = vsel %vm6898_vm12, %v6724_v51, %v1441_v3  ;;  %v1485_v51 = vsel %vm781_vm0, %v1025_v63, 0.0  ;;  %vm7046_vm0 = vmor %vm1452_vm4, %vm1453_vm7 }
 0x1b5   : > { %v1011_v3 = vmul.f32 %v6877_v28, %v1010_v55  ;;  %v1597_v11 = vmul.f32 %v6208_v42, %v1485_v51  ;;  %v1527_v48 = vsel %vm823_vm10, %v1445_v15, 0.0  ;;  %v1638_v63 = vmul.f32 %v6072_v23, %v1526_v58 }
 0x1b6   : > { %614 = vadd.xlane.f32.xlu0 %v6938_v61  ;;  %2146 = vmatpush.bf16.msra.mxu1 %v2123_v10  ;;  %v1037_v10 = vmul.f32 %v6975_v50, %v6908_v33  ;;  %v1639_v15 = vmul.f32 %v6070_v18, %v1527_v48  ;;  %v1460_v18 = vsub.f32 1.5, %v1459_v49  ;;  %vm783_vm10 = vcmp.gt.f32.partialorder %v6908_v33, 0.0  ;;  %v5043_v48 = vld [vmem:[%s5754_s10 + $0x88] sm:$0xff]   ;;  %v4716_v49 = vld [vmem:[#allocation7 + $0x18] sm:$0xff] }
 0x1b7   : > { %v1015_v29 = vsel %vm6951_vm2, %v6877_v28, %v1011_v3  ;;  %v6985_v28 = vpop.eup %5260  ;;  %v1661_v55 = vmul.f32 %v1597_v11, %v6870_v46  ;;  %v4717_v3 = vld [vmem:[#allocation7 + $0x20] sm:$0xff]  ;;  %v7001_v11 = vpack.c.b16 %v2360_v54, %v2359_v26  ;;  %v7019_v25 = vunpack.c.l.bf16 %v5043_v48 }
 0x1b8   : > { %v1484_v24 = vsel %vm780_vm3, %v1015_v29, 0.0  ;;  %v1038_v36 = vmul.f32 %v6975_v50, %v1037_v10  ;;  %v1027_v32 = vmul.f32 %v6985_v28, %v6920_v43  ;;  %vm1033_vm9 = vweird.f32 %v6985_v28  ;;  %2581 = vmatpush.bf16.msra.mxu0 %v4717_v3  ;;  %v4714_v43 = vld [vmem:[#allocation7 + $0x8] sm:$0xff] }
 0x1b9   : > { %v6956_v34 = vpop.f32.mrf.mxu0  ;;  %v1596_v42 = vmul.f32 %v6210_v57, %v1484_v24  ;;  %2147 = vmatmul.bf16.vlgmr.msra.gmra.mxu1 %v6962_v0  ;;  %v1725_v5 = vpack.c.bf16 %v1661_v55, %v1661_v55  ;;  %8459 = vst [vmem:[#allocation36_spill] sm:$0xff] %v7001_v11  ;;  %v1702_v29 = vmul.f32 %v1638_v63, %v6436_v1  ;;  %vm1462_vm12 = vweird.f32 %v6767_v47  ;;  %vm7027_vm14 = vmor %vm1032_vm8, %vm1033_vm9 }
 0x1ba   : > { %v1039_v12 = vmul.f32 0.5, %v1038_v36  ;;  %v1028_v51 = vmul.f32 %v6985_v28, %v1027_v32  ;;  %v1703_v24 = vmul.f32 %v1639_v15, %v6436_v1  ;;  %v7031_v55 = vunpack.c.h.bf16 %v5043_v48  ;;  %618 = vadd.xlane.f32.xlu2 %v7019_v25  ;;  %vm7061_vm1 = vmor %vm1462_vm12, %vm1463_vm13  ;;  %v4715_v48 = vld [vmem:[#allocation7 + $0x10] sm:$0xff] }
 0x1bb   : > { %v1660_v57 = vmul.f32 %v1596_v42, %v6870_v46  ;;  %v2062_v60 = vunpack.c.l.b16 %v1725_v5  ;;  %v1451_v15 = vmul.f32 %v6787_v53, %v1450_v31  ;;  %vm824_vm2 = vcmp.gt.f32.partialorder %v6673_v35, 0.0 }
 0x1bc   : > { %v1040_v23 = vsub.f32 1.5, %v1039_v12  ;;  %v1029_v22 = vmul.f32 0.5, %v1028_v51  ;;  %v7055_v12 = vpop.xlane.xlu0 %596  ;;  %v1767_v31 = vpack.c.bf16 %v1703_v24, %v1703_v24  ;;  %2582 = vmatpush.bf16.msra.mxu0 %v4716_v49  ;;  %vm825_vm3 = vcmp.gt.f32.partialorder %v6767_v47, 0.0 }
 0x1bd   : > { %v1724_v7 = vpack.c.bf16 %v1660_v57, %v1660_v57  ;;  %v7039_v57 = vpop.xlane.xlu2 %594  ;;  %vm1062_vm6 = vweird.f32 %v7055_v12 }
 0x1be   : > { %v1041_v58 = vmul.f32 %v6975_v50, %v1040_v23  ;;  %v1030_v42 = vsub.f32 1.5, %v1029_v22  ;;  %5262 = vrsqrt.f32 %v7039_v57  ;;  %620 = vadd.xlane.f32.xlu0 %v7031_v55  ;;  %vm1052_vm4 = vweird.f32 %v7039_v57 }
 0x1bf   : > { %v2061_v10 = vunpack.c.l.b16 %v1724_v7  ;;  %v1766_v7 = vpack.c.bf16 %v1702_v29, %v1702_v29  ;;  %5264 = vrsqrt.f32 %v7055_v12  ;;  %vm784_vm9 = vcmp.gt.f32.partialorder %v7039_v57, 0.0 }
 0x1c0   : > { %v1045_v36 = vsel %vm7013_vm11, %v6975_v50, %v1041_v58  ;;  %v1031_v32 = vmul.f32 %v6985_v28, %v1030_v42  ;;  %v1461_v50 = vmul.f32 %v6874_v30, %v1460_v18  ;;  %2583 = vmatpush.bf16.msra.mxu0 %v4715_v48  ;;  %v2362_v58 = vunpack.c.l.b16 %v1767_v31 }
 0x1c1   : > { %v6996_v20 = vpop.f32.mrf.mxu0  ;;  %v1487_v5 = vsel %vm783_vm10, %v1045_v36, 0.0  ;;  %v7070_v18 = vpack.c.b16 %v2062_v60, %v2061_v10  ;;  %v2361_v60 = vunpack.c.l.b16 %v1766_v7  ;;  %vm785_vm10 = vcmp.gt.f32.partialorder %v7055_v12, 0.0 }
 0x1c2   : > { %v1035_v33 = vsel %vm7027_vm14, %v6985_v28, %v1031_v32  ;;  %v1599_v22 = vmul.f32 %v6284_v59, %v1487_v5  ;;  %v1455_v28 = vsel %vm7046_vm0, %v6787_v53, %v1451_v15  ;;  %v1465_v59 = vsel %vm7061_vm1, %v6874_v30, %v1461_v50  ;;  %v4713_v15 = vld [vmem:[#allocation7] sm:$0xff] }
 0x1c3   : > { %v1486_v26 = vsel %vm782_vm15, %v1035_v33, 0.0  ;;  %v1528_v42 = vsel %vm824_vm2, %v1455_v28, 0.0  ;;  %v1529_v10 = vsel %vm825_vm3, %v1465_v59, 0.0  ;;  %v7096_v5 = vpack.c.b16 %v2362_v58, %v2361_v60 }
 0x1c4   : > { %2462 = vmatmul.bf16.gmra.mxu0 %v7001_v11  ;;  %v1598_v29 = vmul.f32 %v6287_v8, %v1486_v26  ;;  %v5263_v24 = vpop.eup %5262  ;;  %v1663_v35 = vmul.f32 %v1599_v22, %v6870_v46  ;;  %v1640_v63 = vmul.f32 %v6141_v41, %v1528_v42  ;;  %v1641_v50 = vmul.f32 %v6149_v19, %v1529_v10  ;;  %v5044_v22 = vld [vmem:[%s5754_s10 + $0x90] sm:$0xff]  }
 0x1c5   : > { %v1047_v53 = vmul.f32 %v5263_v24, %v7039_v57  ;;  %v5265_v47 = vpop.eup %5264  ;;  %2584 = vmatpush.bf16.msra.mxu0 %v4714_v43  ;;  %8468 = vst [vmem:[#allocation37_spill] sm:$0xff] %v7096_v5  ;;  %vm1053_vm5 = vweird.f32 %v5263_v24  ;;  %v7102_v41 = vunpack.c.h.bf16 %v5044_v22  ;;  %v7104_v19 = vunpack.c.l.bf16 %v5044_v22  ;;  %v7117_v58 = vpop.xlane.xlu2 %600 }
 0x1c6   : > { %v1662_v8 = vmul.f32 %v1598_v29, %v6870_v46  ;;  %v1727_v54 = vpack.c.bf16 %v1663_v35, %v1663_v35  ;;  %v1057_v32 = vmul.f32 %v5265_v47, %v7055_v12  ;;  %vm1063_vm7 = vweird.f32 %v5265_v47  ;;  %vm7111_vm8 = vmor %vm1052_vm4, %vm1053_vm5 }
 0x1c7   : > { %v1048_v30 = vmul.f32 %v5263_v24, %v1047_v53  ;;  %v1704_v29 = vmul.f32 %v1640_v63, %v6436_v1  ;;  %v1705_v28 = vmul.f32 %v1641_v50, %v6436_v1  ;;  %624 = vadd.xlane.f32.xlu2 %v7102_v41  ;;  %622 = vadd.xlane.f32.xlu1 %v7104_v19  ;;  %vm1064_vm11 = vmor %vm1062_vm6, %vm1063_vm7  ;;  %5266 = vrsqrt.f32 %v7117_v58  ;;  %v7125_v1 = vpop.xlane.xlu1 %598 }
 0x1c8   : > { %v1726_v49 = vpack.c.bf16 %v1662_v8, %v1662_v8  ;;  %v1058_v7 = vmul.f32 %v5265_v47, %v1057_v32  ;;  %v2064_v33 = vunpack.c.l.b16 %v1727_v54  ;;  %5268 = vrsqrt.f32 %v7125_v1 }
 0x1c9   : > { %v7065_v3 = vpop.f32.mrf.mxu0  ;;  %2152 = vmatmul.bf16.gmra.mxu1 %v7070_v18  ;;  %v1049_v51 = vmul.f32 0.5, %v1048_v30  ;;  %2585 = vmatpush.bf16.msra.mxu0 %v4713_v15  ;;  %v1769_v12 = vpack.c.bf16 %v1705_v28, %v1705_v28  ;;  %vm1082_vm12 = vweird.f32 %v7117_v58  ;;  %vm1072_vm14 = vweird.f32 %v7125_v1 }
 0x1ca   : > { %v2063_v31 = vunpack.c.l.b16 %v1726_v49  ;;  %v1059_v48 = vmul.f32 0.5, %v1058_v7  ;;  %v1768_v49 = vpack.c.bf16 %v1704_v29, %v1704_v29  ;;  %vm787_vm1 = vcmp.gt.f32.partialorder %v7117_v58, 0.0 }
 0x1cb   : > { %v1050_v26 = vsub.f32 1.5, %v1049_v51  ;;  %v2364_v51 = vunpack.c.l.b16 %v1769_v12  ;;  %vm786_vm3 = vcmp.gt.f32.partialorder %v7125_v1, 0.0 }
 0x1cc   : > { %v1060_v60 = vsub.f32 1.5, %v1059_v48  ;;  %v7131_v10 = vpack.c.b16 %v2064_v33, %v2063_v31  ;;  %v2363_v50 = vunpack.c.l.b16 %v1768_v49 }
 0x1cd   : > { %v1051_v43 = vmul.f32 %v5263_v24, %v1050_v26 }
 0x1ce   : > { %v1061_v42 = vmul.f32 %v5265_v47, %v1060_v60  ;;  %v7147_v48 = vpack.c.b16 %v2364_v51, %v2363_v50  ;;  %v5045_v60 = vld [vmem:[%s5754_s10 + $0x98] sm:$0xff]   ;;  %v603_v51 = vpop.xlane.xlu0 %602 }
 0x1cf   : > { %v1055_v35 = vsel %vm7111_vm8, %v5263_v24, %v1051_v43  ;;  %v5267_v24 = vpop.eup %5266  ;;  %v7153_v49 = vunpack.c.h.bf16 %v5045_v60  ;;  %v7155_v12 = vunpack.c.l.bf16 %v5045_v60  ;;  %vm1092_vm6 = vweird.f32 %v603_v51 }
 0x1d0   : > { %v1488_v54 = vsel %vm784_vm9, %v1055_v35, 0.0  ;;  %v1065_v32 = vsel %vm1064_vm11, %v5265_v47, %v1061_v42  ;;  %v5269_v31 = vpop.eup %5268  ;;  %v1077_v33 = vmul.f32 %v5267_v24, %v7117_v58  ;;  %8471 = vst [vmem:[#allocation38_spill] sm:$0xff] %v7147_v48  ;;  %vm1083_vm13 = vweird.f32 %v5267_v24 }
 0x1d1   : > { %v7091_v36 = vpop.f32.mrf.mxu0  ;;  %v1600_v30 = vmul.f32 %v6375_v56, %v1488_v54  ;;  %v1489_v15 = vsel %vm785_vm10, %v1065_v32, 0.0  ;;  %v1067_v57 = vmul.f32 %v5269_v31, %v7125_v1  ;;  %vm1073_vm15 = vweird.f32 %v5269_v31  ;;  %vm7157_vm0 = vmor %vm1082_vm12, %vm1083_vm13  ;;  %628 = vadd.xlane.f32.xlu1 %v7153_v49  ;;  %626 = vadd.xlane.f32.xlu0 %v7155_v12 }
 0x1d2   : > { %v1601_v63 = vmul.f32 %v6377_v44, %v1489_v15  ;;  %v1078_v26 = vmul.f32 %v5267_v24, %v1077_v33  ;;  %vm7162_vm2 = vmor %vm1072_vm14, %vm1073_vm15  ;;  %v720_v1 = vadd.f32 %v6918_v39, %v6938_v61  ;;  %vm788_vm11 = vcmp.gt.f32.partialorder %v603_v51, 0.0 }
 0x1d3   : > { %v1664_v7 = vmul.f32 %v1600_v30, %v6870_v46  ;;  %v1068_v29 = vmul.f32 %v5269_v31, %v1067_v57 }
 0x1d4   : > { %2467 = vmatmul.bf16.gmra.mxu0 %v7096_v5  ;;  %v1665_v22 = vmul.f32 %v1601_v63, %v6870_v46  ;;  %v1079_v28 = vmul.f32 0.5, %v1078_v26  ;;  %v7167_v63 = vpop.xlane.xlu1 %604  ;;  %v721_v60 = vadd.f32 %v7019_v25, %v720_v1 }
 0x1d5   : > { %v1728_v56 = vpack.c.bf16 %v1664_v7, %v1664_v7  ;;  %v1069_v59 = vmul.f32 0.5, %v1068_v29  ;;  %5270 = vrsqrt.f32 %v7167_v63  ;;  %vm1102_vm4 = vweird.f32 %v7167_v63 }
 0x1d6   : > { %v1729_v44 = vpack.c.bf16 %v1665_v22, %v1665_v22  ;;  %v1080_v35 = vsub.f32 1.5, %v1079_v28  ;;  %5272 = vrsqrt.f32 %v603_v51  ;;  %vm789_vm9 = vcmp.gt.f32.partialorder %v7167_v63, 0.0  ;;  %v1814_v22 = vld [vmem:[%s5762_s14 + $0x160] sm:$0xff] }
 0x1d7   : > { %v2065_v43 = vunpack.c.l.b16 %v1728_v56  ;;  %v1070_v30 = vsub.f32 1.5, %v1069_v59  ;;  %v1878_v23 = vpack.c.bf16 %v1814_v22, %v1814_v22 }
 0x1d8   : > { %v2066_v42 = vunpack.c.l.b16 %v1729_v44  ;;  %v1081_v32 = vmul.f32 %v5267_v24, %v1080_v35 }
 0x1d9   : > { %v7127_v8 = vpop.f32.mrf.mxu0  ;;  %2157 = vmatmul.bf16.gmra.mxu1 %v7131_v10  ;;  %v1071_v50 = vmul.f32 %v5269_v31, %v1070_v30 }
 0x1da   : > { %v1085_v58 = vsel %vm7157_vm0, %v5267_v24, %v1081_v32  ;;  %v7176_v33 = vpack.c.b16 %v2066_v42, %v2065_v43  ;;  %v722_v32 = vadd.f32 %v7031_v55, %v721_v60 }
 0x1db   : > { %v1491_v57 = vsel %vm787_vm1, %v1085_v58, 0.0  ;;  %v1075_v56 = vsel %vm7162_vm2, %v5269_v31, %v1071_v50  ;;  %v5271_v24 = vpop.eup %5270  ;;  %v8476_v50 = vpack.c.bf16 %v6561_v38, %v6511_v37 }
 0x1dc   : > { %v1603_v26 = vmul.f32 %v6446_v16, %v1491_v57  ;;  %v1490_v44 = vsel %vm786_vm3, %v1075_v56, 0.0  ;;  %v5273_v43 = vpop.eup %5272  ;;  %v1097_v31 = vmul.f32 %v5271_v24, %v7167_v63  ;;  %vm1103_vm5 = vweird.f32 %v5271_v24  ;;  %v5046_v56 = vld [vmem:[%s5754_s10 + $0xa0] sm:$0xff]  }
 0x1dd   : > { %v1602_v29 = vmul.f32 %v6448_v45, %v1490_v44  ;;  %v1087_v35 = vmul.f32 %v5273_v43, %v603_v51  ;;  %vm1093_vm7 = vweird.f32 %v5273_v43  ;;  %v7199_v44 = vunpack.c.l.bf16 %v5046_v56  ;;  %vm7203_vm8 = vmor %vm1102_vm4, %vm1103_vm5 }
 0x1de   : > { %v1667_v59 = vmul.f32 %v1603_v26, %v6870_v46  ;;  %v1098_v16 = vmul.f32 %v5271_v24, %v1097_v31  ;;  %v723_v60 = vadd.f32 %v7104_v19, %v722_v32  ;;  %vm7209_vm10 = vmor %vm1092_vm6, %vm1093_vm7  ;;  %v7214_v31 = vpop.xlane.xlu2 %606 }
 0x1df   : > { %v1666_v28 = vmul.f32 %v1602_v29, %v6870_v46  ;;  %v1088_v45 = vmul.f32 %v5273_v43, %v1087_v35  ;;  %v7201_v29 = vunpack.c.h.bf16 %v5046_v56  ;;  %630 = vadd.xlane.f32.xlu2 %v7199_v44  ;;  %5274 = vrsqrt.f32 %v7214_v31 }
 0x1e0   : > { %v1731_v30 = vpack.c.bf16 %v1667_v59, %v1667_v59  ;;  %v1099_v15 = vmul.f32 0.5, %v1098_v16  ;;  %vm1112_vm12 = vweird.f32 %v7214_v31  ;;  %vm790_vm1 = vcmp.gt.f32.partialorder %v7214_v31, 0.0 }
 0x1e1   : > { %v7145_v47 = vpop.f32.mrf.mxu0  ;;  %v1730_v42 = vpack.c.bf16 %v1666_v28, %v1666_v28  ;;  %v1089_v58 = vmul.f32 0.5, %v1088_v45  ;;  %632 = vadd.xlane.f32.xlu0 %v7201_v29 }
 0x1e2   : > { %v1100_v1 = vsub.f32 1.5, %v1099_v15  ;;  %v2068_v26 = vunpack.c.l.b16 %v1731_v30 }
 0x1e3   : > { %v2067_v57 = vunpack.c.l.b16 %v1730_v42  ;;  %v1090_v59 = vsub.f32 1.5, %v1089_v58  ;;  %v609_v42 = vpop.xlane.xlu0 %608 }
 0x1e4   : > { %2472 = vmatmul.bf16.gmra.mxu0 %v7147_v48  ;;  %v1101_v37 = vmul.f32 %v5271_v24, %v1100_v1  ;;  %5276 = vrsqrt.f32 %v609_v42  ;;  %vm1122_vm14 = vweird.f32 %v609_v42  ;;  %vm791_vm3 = vcmp.gt.f32.partialorder %v609_v42, 0.0 }
 0x1e5   : > { %v1091_v35 = vmul.f32 %v5273_v43, %v1090_v59  ;;  %v7222_v30 = vpack.c.b16 %v2068_v26, %v2067_v57 }
 0x1e6   : > { %v1105_v63 = vsel %vm7203_vm8, %v5271_v24, %v1101_v37  ;;  %v5275_v24 = vpop.eup %5274 }
 0x1e7   : > { %v1493_v32 = vsel %vm789_vm9, %v1105_v63, 0.0  ;;  %v1095_v15 = vsel %vm7209_vm10, %v5273_v43, %v1091_v35  ;;  %v1107_v59 = vmul.f32 %v5275_v24, %v7214_v31  ;;  %vm1113_vm13 = vweird.f32 %v5275_v24 }
 0x1e8   : > { %v1605_v51 = vmul.f32 %v6521_v9, %v1493_v32  ;;  %v1492_v58 = vsel %vm788_vm11, %v1095_v15, 0.0  ;;  %v8481_v32 = vpack.c.bf16 %v6656_v2, %v6594_v62  ;;  %vm7251_vm0 = vmor %vm1112_vm12, %vm1113_vm13 }
 0x1e9   : > { %v7172_v7 = vpop.f32.mrf.mxu0  ;;  %2162 = vmatmul.bf16.gmra.mxu1 %v7176_v33  ;;  %v1604_v56 = vmul.f32 %v6523_v40, %v1492_v58  ;;  %v7244_v58 = vpop.xlane.xlu2 %612 }
 0x1ea   : > { %v1669_v1 = vmul.f32 %v1605_v51, %v6870_v46  ;;  %v5277_v26 = vpop.eup %5276  ;;  %5278 = vrsqrt.f32 %v7244_v58  ;;  %vm1142_vm4 = vweird.f32 %v7244_v58  ;;  %vm793_vm9 = vcmp.gt.f32.partialorder %v7244_v58, 0.0 }
 0x1eb   : > { %v1668_v57 = vmul.f32 %v1604_v56, %v6870_v46  ;;  %v1117_v43 = vmul.f32 %v5277_v26, %v609_v42  ;;  %vm1123_vm15 = vweird.f32 %v5277_v26  ;;  %v7246_v56 = vpop.xlane.xlu1 %610 }
 0x1ec   : > { %v1733_v38 = vpack.c.bf16 %v1669_v1, %v1669_v1  ;;  %vm7259_vm2 = vmor %vm1122_vm14, %vm1123_vm15  ;;  %5280 = vrsqrt.f32 %v7246_v56  ;;  %vm1132_vm6 = vweird.f32 %v7246_v56  ;;  %vm792_vm11 = vcmp.gt.f32.partialorder %v7246_v56, 0.0 }
 0x1ed   : > { %v1732_v9 = vpack.c.bf16 %v1668_v57, %v1668_v57  ;;  %v1118_v40 = vmul.f32 %v5277_v26, %v1117_v43 }
 0x1ee   : > { %v2070_v1 = vunpack.c.l.b16 %v1733_v38 }
 0x1ef   : > { %v1119_v15 = vmul.f32 0.5, %v1118_v40  ;;  %v2069_v51 = vunpack.c.l.b16 %v1732_v9 }
 0x1f1   : > { %v7191_v54 = vpop.f32.mrf.mxu0  ;;  %v1120_v62 = vsub.f32 1.5, %v1119_v15 }
 0x1f3   : > { %v1121_v38 = vmul.f32 %v5277_v26, %v1120_v62 }
 0x1f4   : > { %2586 = vmatmul.bf16.vlgmr.msra.gmra.mxu0 %v8476_v50  ;;  %v724_v50 = vadd.f32 %v7102_v41, %v723_v60  ;;  %v1108_v60 = vmul.f32 %v5275_v24, %v1107_v59 }
 0x1f6   : > { %v725_v28 = vadd.f32 %v7155_v12, %v724_v50  ;;  %v1109_v63 = vmul.f32 0.5, %v1108_v60  ;;  %v5047_v50 = vld [vmem:[%s5754_s10 + $0xa8] sm:$0xff]  }
 0x1f7   : > { %v7255_v2 = vunpack.c.l.bf16 %v5047_v50 }
 0x1f8   : > { %v726_v35 = vadd.f32 %v7153_v49, %v725_v28  ;;  %v1110_v57 = vsub.f32 1.5, %v1109_v63  ;;  %v7248_v28 = vunpack.c.h.bf16 %v5047_v50  ;;  %v7271_v63 = vpack.c.b16 %v2070_v1, %v2069_v51 }
 0x1f9   : > { %v7218_v16 = vpop.f32.mrf.mxu0  ;;  %2167 = vmatmul.bf16.gmra.mxu1 %v7222_v30  ;;  %634 = vadd.xlane.f32.xlu1 %v7255_v2  ;;  %v1125_v50 = vsel %vm7259_vm2, %v5277_v26, %v1121_v38 }
 0x1fa   : > { %v1111_v43 = vmul.f32 %v5275_v24, %v1110_v57  ;;  %636 = vadd.xlane.f32.xlu2 %v7248_v28  ;;  %v727_v60 = vadd.f32 %v7199_v44, %v726_v35  ;;  %8486 = vst [vmem:[#allocation39_spill] sm:$0xff] %v7271_v63  ;;  %v5279_v57 = vpop.eup %5278  ;;  %v1495_v35 = vsel %vm791_vm3, %v1125_v50, 0.0 }
 0x1fb   : > { %v1607_v45 = vmul.f32 %v6613_v6, %v1495_v35  ;;  %v1137_v59 = vmul.f32 %v5279_v57, %v7244_v58  ;;  %vm1143_vm5 = vweird.f32 %v5279_v57 }
 0x1fc   : > { %v1115_v31 = vsel %vm7251_vm0, %v5275_v24, %v1111_v43  ;;  %v728_v62 = vadd.f32 %v7201_v29, %v727_v60  ;;  %v5281_v24 = vpop.eup %5280  ;;  %vm7290_vm8 = vmor %vm1142_vm4, %vm1143_vm5 }
 0x1fd   : > { %v1494_v15 = vsel %vm790_vm1, %v1115_v31, 0.0  ;;  %v1138_v51 = vmul.f32 %v5279_v57, %v1137_v59  ;;  %v1127_v1 = vmul.f32 %v5281_v24, %v7246_v56  ;;  %v1671_v26 = vmul.f32 %v1607_v45, %v6870_v46  ;;  %v5048_v59 = vld [vmem:[%s5754_s10 + $0xb0] sm:$0xff]  }
 0x1fe   : > { %v1606_v42 = vmul.f32 %v6611_v52, %v1494_v15  ;;  %v729_v9 = vadd.f32 %v7255_v2, %v728_v62  ;;  %vm1133_vm7 = vweird.f32 %v5281_v24  ;;  %v8489_v45 = vpack.c.bf16 %v6734_v17, %v6687_v21  ;;  %v8492_v56 = vld [vmem:[#allocation31_spill] sm:$0xff] }
 0x1ff   : > { %v1139_v52 = vmul.f32 0.5, %v1138_v51  ;;  %v1128_v6 = vmul.f32 %v5281_v24, %v1127_v1  ;;  %v1735_v31 = vpack.c.bf16 %v1671_v26, %v1671_v26  ;;  %vm1134_vm10 = vmor %vm1132_vm6, %vm1133_vm7  ;;  %v7300_v26 = vunpack.c.h.bf16 %v5048_v59 }
 0x200   : > { %v1670_v43 = vmul.f32 %v1606_v42, %v6870_v46  ;;  %v730_v51 = vadd.f32 %v7248_v28, %v729_v9 }
 0x201   : > { %v7236_v37 = vpop.f32.mrf.mxu0  ;;  %v1140_v15 = vsub.f32 1.5, %v1139_v52  ;;  %v1129_v50 = vmul.f32 0.5, %v1128_v6  ;;  %v7302_v52 = vunpack.c.l.bf16 %v5048_v59  ;;  %640 = vadd.xlane.f32.xlu1 %v7300_v26 }
 0x202   : > { %v1734_v38 = vpack.c.bf16 %v1670_v43, %v1670_v43  ;;  %v2072_v43 = vunpack.c.l.b16 %v1735_v31 }
 0x203   : > { %v1141_v35 = vmul.f32 %v5279_v57, %v1140_v15  ;;  %v1130_v62 = vsub.f32 1.5, %v1129_v50  ;;  %638 = vadd.xlane.f32.xlu0 %v7302_v52  ;;  %v731_v9 = vadd.f32 %v7302_v52, %v730_v51 }
 0x204   : > { %2591 = vmatmul.bf16.gmra.mxu0 %v8481_v32  ;;  %v2071_v1 = vunpack.c.l.b16 %v1734_v38 }
 0x205   : > { %v1145_v6 = vsel %vm7290_vm8, %v5279_v57, %v1141_v35  ;;  %v1131_v21 = vmul.f32 %v5281_v24, %v1130_v62  ;;  %v8491_v57 = vld [vmem:[#allocation32_spill] sm:$0xff] }
 0x206   : > { %v1497_v17 = vsel %vm793_vm9, %v1145_v6, 0.0  ;;  %v7312_v15 = vpack.c.b16 %v2072_v43, %v2071_v1  ;;  %v5049_v35 = vld [vmem:[%s5754_s10 + $0xb8] sm:$0xff]   ;;  %s4461_s10 = sshll.u32 %s4458_s19, 4  ;;  %s4462_s10 = int_to_ptr.hbm [resolvable:$true] %s4461_s10 }
 0x207   : > { %v1135_v58 = vsel %vm1134_vm10, %v5281_v24, %v1131_v21  ;;  %v1609_v42 = vmul.f32 %v8491_v57, %v1497_v17  ;;  %v7319_v62 = vunpack.c.l.bf16 %v5049_v35  ;;  %v732_v24 = vadd.f32 %v7300_v26, %v731_v9  ;;  %v1817_v57 = vld [vmem:[%s5762_s14 + $0x178] sm:$0xff]  ;;  %s5481_s23 = sshra.s32 %s4462_s10, 4  ;;  %s5482_s23 = int_to_ptr.hbm [resolvable:$true] %s5481_s23 }
 0x208   : > { %v1496_v31 = vsel %vm792_vm11, %v1135_v58, 0.0  ;;  %8490 = vst [vmem:[#allocation40_spill] sm:$0xff] %v7312_v15  ;;  %v7327_v43 = vunpack.c.h.bf16 %v5049_v35  ;;  %s5483_s9 = scalar_lea.hbm %s5482_s23, 256  ;;  %p5488_p2 = scmp.lt.s32.totalorder %s5482_s23, %s8307_s8 }
 0x209   : > { %v7267_v40 = vpop.f32.mrf.mxu0  ;;  %2172 = vmatmul.bf16.gmra.mxu1 %v7271_v63  ;;  %v1673_v51 = vmul.f32 %v1609_v42, %v6870_v46  ;;  %v733_v1 = vadd.f32 %v7319_v62, %v732_v24  ;;  %642 = vadd.xlane.f32.xlu2 %v7319_v62  ;;  %v1803_v63 = vld [vmem:[%s5762_s14 + $0x108] sm:$0xff]  ;;  %p5484_p1 = scmp.ne.s32.totalorder %s5482_s23, %s5483_s9  ;;  %p5489_p10 = scmp.lt.s32.totalorder %s5487_s11, %s5483_s9 }
 0x20b   : > { %v734_v6 = vadd.f32 %v7327_v43, %v733_v1  ;;  %644 = vadd.xlane.f32.xlu0 %v7327_v43  ;;  %v1737_v58 = vpack.c.bf16 %v1673_v51, %v1673_v51  ;;  %p5485_p4 = pnand %p5484_p1, %p5693_p7  ;;  %p5490_p11 = por %p5489_p10, %p5488_p2 }
 0x20d   : > { %v735_v9 = vrot.slane %v734_v6, 4  ;;  %v2074_v24 = vunpack.c.l.b16 %v1737_v58  ;;  %v2264_v58 = vunpack.c.l.b16 %v1878_v23  ;;  %v1810_v23 = vld [vmem:[%s5762_s14 + $0x140] sm:$0xff]  ;;  %p5486_p8 = pneg %p5485_p4 }
 0x20f   : > { %v736_v42 = vadd.f32 %v735_v9, %v734_v6  ;;  %p5491_p9 = pnand %p5490_p11, %p5486_p8 }
 0x211   : > { %v7287_v60 = vpop.f32.mrf.mxu0  ;;  %v737_v1 = vrot.slane %v736_v42, 2 }
 0x213   : > { %v738_v51 = vadd.f32 %v737_v1, %v736_v42 }
 0x214   : > { %2596 = vmatmul.bf16.gmra.mxu0 %v8489_v45  ;;  %v1608_v45 = vmul.f32 %v8492_v56, %v1496_v31  ;;  %v1816_v31 = vld [vmem:[%s5762_s14 + $0x170] sm:$0xff] }
 0x215   : > { %v1880_v56 = vpack.c.bf16 %v1816_v31, %v1816_v31  ;;  %v739_v6 = vrot.slane %v738_v51, 1  ;;  %v1812_v31 = vld [vmem:[%s5762_s14 + $0x150] sm:$0xff] }
 0x216   : > { %v1672_v59 = vmul.f32 %v1608_v45, %v6870_v46  ;;  %v8493_v46 = vpack.c.bf16 %v6832_v13, %v6778_v14  ;;  %v1881_v45 = vpack.c.bf16 %v1817_v57, %v1817_v57  ;;  %v1813_v57 = vld [vmem:[%s5762_s14 + $0x158] sm:$0xff]  ;;  %v1876_v22 = vpack.c.bf16 %v1812_v31, %v1812_v31  ;;  %v1808_v31 = vld [vmem:[%s5762_s14 + $0x130] sm:$0xff]  ;;  %v1807_v13 = vld [vmem:[%s5762_s14 + $0x128] sm:$0xff] }
 0x217   : > { %v2266_v50 = vunpack.c.l.b16 %v1880_v56  ;;  %v1877_v42 = vpack.c.bf16 %v1813_v57, %v1813_v57  ;;  %v1811_v56 = vld [vmem:[%s5762_s14 + $0x148] sm:$0xff]  ;;  %v1809_v57 = vld [vmem:[%s5762_s14 + $0x138] sm:$0xff] }
 0x218   : > { %v1736_v17 = vpack.c.bf16 %v1672_v59, %v1672_v59  ;;  %v2267_v32 = vunpack.c.l.b16 %v1881_v45  ;;  %v1815_v59 = vld [vmem:[%s5762_s14 + $0x168] sm:$0xff] }
 0x219   : > { %v7310_v38 = vpop.f32.mrf.mxu0  ;;  %2177 = vmatmul.bf16.gmra.mxu1 %v7312_v15  ;;  %v1879_v4 = vpack.c.bf16 %v1815_v59, %v1815_v59  ;;  %v1802_v15 = vld [vmem:[%s5762_s14 + $0x100] sm:$0xff] }
 0x21a   : > { %v2073_v35 = vunpack.c.l.b16 %v1736_v17  ;;  %v2275_v53 = vpack.c.b16 %v2267_v32, %v2266_v50  ;;  %v7346_v17 = vpop.xlane.xlu1 %616  ;;  %v7351_v32 = vadd.f32 %v739_v6, %v738_v51 }
 0x21b   : > { %v2265_v9 = vunpack.c.l.b16 %v1879_v4  ;;  %5282 = vrsqrt.f32 %v7346_v17  ;;  %v2263_v4 = vunpack.c.l.b16 %v1877_v42  ;;  %vm1162_vm12 = vweird.f32 %v7346_v17 }
 0x21c   : > { %v7342_v14 = vpack.c.b16 %v2074_v24, %v2073_v35  ;;  %2284 = vmatpush.bf16.msra.mxu2 %v2275_v53  ;;  %v2262_v53 = vunpack.c.l.b16 %v1876_v22  ;;  %v1874_v35 = vpack.c.bf16 %v1810_v23, %v1810_v23  ;;  %v1875_v24 = vpack.c.bf16 %v1811_v56, %v1811_v56 }
 0x21d   : > { %v1872_v56 = vpack.c.bf16 %v1808_v31, %v1808_v31  ;;  %vm1560_vm15 = vweird.f32 %v7351_v32  ;;  %vm795_vm3 = vcmp.gt.f32.partialorder %v7346_v17, 0.0  ;;  %vm1532_vm7 = vcmp.gt.f32.partialorder %v7351_v32, 0.0 }
 0x21e   : > { %8494 = vst [vmem:[#allocation32_spill] sm:$0xff] %v7342_v14  ;;  %v2273_v45 = vpack.c.b16 %v2263_v4, %v2262_v53  ;;  %v2260_v6 = vunpack.c.l.b16 %v1874_v35 }
 0x221   : > { %v7331_v21 = vpop.f32.mrf.mxu0  ;;  %v5283_v1 = vpop.eup %5282 }
 0x222   : > { %v1157_v51 = vmul.f32 %v5283_v1, %v7346_v17  ;;  %vm1163_vm13 = vweird.f32 %v5283_v1 }
 0x223   : > { %vm7380_vm2 = vmor %vm1162_vm12, %vm1163_vm13 }
 0x224   : > { %2601 = vmatmul.bf16.gmra.mxu0 %v8493_v46  ;;  %v2274_v46 = vpack.c.b16 %v2265_v9, %v2264_v58  ;;  %v2261_v58 = vunpack.c.l.b16 %v1875_v24  ;;  %v1158_v42 = vmul.f32 %v5283_v1, %v1157_v51 }
 0x226   : > { %2285 = vmatpush.bf16.msra.mxu2 %v2274_v46  ;;  %v8495_v46 = vpack.c.bf16 %v6956_v34, %v6882_v27  ;;  %v2272_v4 = vpack.c.b16 %v2261_v58, %v2260_v6  ;;  %v1159_v35 = vmul.f32 0.5, %v1158_v42  ;;  %v2258_v34 = vunpack.c.l.b16 %v1872_v56 }
 0x228   : > { %v1160_v6 = vsub.f32 1.5, %v1159_v35 }
 0x229   : > { %v7340_v48 = vpop.f32.mrf.mxu0  ;;  %v7353_v50 = vpop.xlane.xlu0 %614  ;;  %2182 = vmatmul.bf16.gmra.mxu1 %v7342_v14 }
 0x22a   : > { %5284 = vrsqrt.f32 %v7353_v50  ;;  %2286 = vmatpush.bf16.msra.mxu2 %v2273_v45  ;;  %v1873_v45 = vpack.c.bf16 %v1809_v57, %v1809_v57  ;;  %vm1152_vm14 = vweird.f32 %v7353_v50  ;;  %vm794_vm6 = vcmp.gt.f32.partialorder %v7353_v50, 0.0 }
 0x22b   : > { %5286 = vrsqrt.f32 %v7351_v32 }
 0x22c   : > { %v2259_v51 = vunpack.c.l.b16 %v1873_v45 }
 0x22d   : > { %v7387_v45 = vpop.xlane.xlu2 %618 }
 0x22e   : > { %2287 = vmatpush.bf16.msra.mxu2 %v2272_v4  ;;  %v2271_v42 = vpack.c.b16 %v2259_v51, %v2258_v34  ;;  %5288 = vrsqrt.f32 %v7387_v45  ;;  %v1804_v34 = vld [vmem:[%s5762_s14 + $0x110] sm:$0xff]  ;;  %v1805_v51 = vld [vmem:[%s5762_s14 + $0x118] sm:$0xff]  ;;  %vm1172_vm8 = vweird.f32 %v7387_v45  ;;  %vm796_vm13 = vcmp.gt.f32.partialorder %v7387_v45, 0.0 }
 0x22f   : > { %v1868_v14 = vpack.c.bf16 %v1804_v34, %v1804_v34 }
 0x230   : > { %v5285_v9 = vpop.eup %5284 }
 0x231   : > { %v7360_v59 = vpop.f32.mrf.mxu0  ;;  %v5287_v22 = vpop.eup %5286  ;;  %v1147_v53 = vmul.f32 %v5285_v9, %v7353_v50  ;;  %vm1153_vm0 = vweird.f32 %v5285_v9 }
 0x232   : > { %v1555_v23 = vmul.f32 %v5287_v22, %v7351_v32  ;;  %vm1561_vm1 = vweird.f32 %v5287_v22  ;;  %vm7391_vm4 = vmor %vm1152_vm14, %vm1153_vm0  ;;  %2288 = vmatpush.bf16.msra.mxu2 %v2271_v42 }
 0x233   : > { %v1148_v24 = vmul.f32 %v5285_v9, %v1147_v53  ;;  %v1871_v53 = vpack.c.bf16 %v1807_v13, %v1807_v13  ;;  %v7396_v13 = vpop.xlane.xlu0 %620  ;;  %vm7403_vm5 = vmor %vm1560_vm15, %vm1561_vm1 }
 0x234   : > { %2606 = vmatmul.bf16.gmra.mxu0 %v8495_v46  ;;  %v1556_v27 = vmul.f32 %v5287_v22, %v1555_v23  ;;  %v1806_v46 = vld [vmem:[%s5762_s14 + $0x120] sm:$0xff]  ;;  %v1161_v23 = vmul.f32 %v5283_v1, %v1160_v6  ;;  %5290 = vrsqrt.f32 %v7396_v13  ;;  %vm1182_vm10 = vweird.f32 %v7396_v13 }
 0x235   : > { %v1149_v58 = vmul.f32 0.5, %v1148_v24  ;;  %v1870_v5 = vpack.c.bf16 %v1806_v46, %v1806_v46  ;;  %v2257_v42 = vunpack.c.l.b16 %v1871_v53  ;;  %v1867_v24 = vpack.c.bf16 %v1803_v63, %v1803_v63 }
 0x236   : > { %v1557_v31 = vmul.f32 0.5, %v1556_v27  ;;  %v1165_v6 = vsel %vm7380_vm2, %v5283_v1, %v1161_v23  ;;  %v1869_v1 = vpack.c.bf16 %v1805_v51, %v1805_v51  ;;  %vm797_vm15 = vcmp.gt.f32.partialorder %v7396_v13, 0.0 }
 0x237   : > { %v1150_v56 = vsub.f32 1.5, %v1149_v58  ;;  %v2256_v27 = vunpack.c.l.b16 %v1870_v5 }
 0x238   : > { %v1558_v35 = vsub.f32 1.5, %v1557_v31  ;;  %v1499_v31 = vsel %vm795_vm3, %v1165_v6, 0.0  ;;  %v2255_v53 = vunpack.c.l.b16 %v1869_v1  ;;  %v5289_v6 = vpop.eup %5288 }
 0x239   : > { %v7375_v11 = vpop.f32.mrf.mxu0  ;;  %v1151_v58 = vmul.f32 %v5285_v9, %v1150_v56  ;;  %v1611_v4 = vmul.f32 %v6918_v39, %v1499_v31  ;;  %v2270_v56 = vpack.c.b16 %v2257_v42, %v2256_v27  ;;  %v2253_v31 = vunpack.c.l.b16 %v1867_v24 }
 0x23a   : > { %v1559_v5 = vmul.f32 %v5287_v22, %v1558_v35  ;;  %v2254_v35 = vunpack.c.l.b16 %v1868_v14  ;;  %v5291_v51 = vpop.eup %5290  ;;  %vm1173_vm9 = vweird.f32 %v5289_v6 }
 0x23b   : > { %v1155_v57 = vsel %vm7391_vm4, %v5285_v9, %v1151_v58  ;;  %2289 = vmatpush.bf16.msra.mxu2 %v2270_v56  ;;  %v1866_v9 = vpack.c.bf16 %v1802_v15, %v1802_v15  ;;  %v1177_v58 = vmul.f32 %v5291_v51, %v7396_v13  ;;  %vm1183_vm11 = vweird.f32 %v5291_v51  ;;  %vm7443_vm12 = vmor %vm1172_vm8, %vm1173_vm9 }
 0x23c   : > { %v1563_v50 = vsel %vm7403_vm5, %v5287_v22, %v1559_v5  ;;  %v1498_v23 = vsel %vm794_vm6, %v1155_v57, 0.0  ;;  %v1167_v22 = vmul.f32 %v5289_v6, %v7387_v45  ;;  %v2269_v27 = vpack.c.b16 %v2255_v53, %v2254_v35  ;;  %vm1184_vm14 = vmor %vm1182_vm10, %vm1183_vm11 }
 0x23d   : > { %v7421_v32 = vsel %vm1532_vm7, %v1563_v50, 0.0  ;;  %v1610_v17 = vmul.f32 %v6938_v61, %v1498_v23  ;;  %v2252_v5 = vunpack.c.l.b16 %v1866_v9  ;;  %v8502_v61 = vpack.c.bf16 %v7065_v3, %v6996_v20 }
 0x23e   : > { %v1675_v34 = vmul.f32 %v1611_v4, %v7421_v32  ;;  %v1168_v14 = vmul.f32 %v5289_v6, %v1167_v22  ;;  %v1178_v63 = vmul.f32 %v5291_v51, %v1177_v58 }
 0x23f   : > { %v1674_v46 = vmul.f32 %v1610_v17, %v7421_v32  ;;  %2290 = vmatpush.bf16.msra.mxu2 %v2269_v27  ;;  %v2268_v57 = vpack.c.b16 %v2253_v31, %v2252_v5  ;;  %v7439_v17 = vpop.f32.mrf.mxu1  ;;  %v623_v27 = vpop.xlane.xlu1 %622 }
 0x240   : > { %v1739_v15 = vpack.c.bf16 %v1675_v34, %v1675_v34  ;;  %v1169_v4 = vmul.f32 0.5, %v1168_v14  ;;  %v1179_v23 = vmul.f32 0.5, %v1178_v63  ;;  %v625_v34 = vpop.xlane.xlu2 %624  ;;  %vm1192_vm2 = vweird.f32 %v623_v27 }
 0x241   : > { %v7424_v39 = vpop.f32.mrf.mxu0  ;;  %v1738_v42 = vpack.c.bf16 %v1674_v46, %v1674_v46  ;;  %5292 = vrsqrt.f32 %v625_v34  ;;  %vm1202_vm0 = vweird.f32 %v625_v34  ;;  %vm799_vm5 = vcmp.gt.f32.partialorder %v625_v34, 0.0 }
 0x242   : > { %v2205_v50 = vunpack.c.l.b16 %v1739_v15  ;;  %v1170_v56 = vsub.f32 1.5, %v1169_v4  ;;  %v1180_v53 = vsub.f32 1.5, %v1179_v23  ;;  %5294 = vrsqrt.f32 %v623_v27 }
 0x243   : > { %v2204_v1 = vunpack.c.l.b16 %v1738_v42  ;;  %2291 = vmatpush.bf16.msra.mxu2 %v2268_v57  ;;  %vm798_vm7 = vcmp.gt.f32.partialorder %v623_v27, 0.0 }
 0x244   : > { %2611 = vmatmul.bf16.gmra.mxu0 %v8502_v61  ;;  %v1171_v24 = vmul.f32 %v5289_v6, %v1170_v56  ;;  %v1181_v22 = vmul.f32 %v5291_v51, %v1180_v53 }
 0x245   : > { %v7435_v20 = vpack.c.b16 %v2205_v50, %v2204_v1 }
 0x246   : > { %v1175_v46 = vsel %vm7443_vm12, %v5289_v6, %v1171_v24  ;;  %v1185_v5 = vsel %vm1184_vm14, %v5291_v51, %v1181_v22  ;;  %v8505_v51 = vpack.c.bf16 %v7127_v8, %v7091_v36 }
 0x247   : > { %2292 = vmatmul.bf16.vlgmr.msra.gmra.mxu2 %v7435_v20  ;;  %v1500_v58 = vsel %vm796_vm13, %v1175_v46, 0.0  ;;  %v1501_v14 = vsel %vm797_vm15, %v1185_v5, 0.0  ;;  %v5293_v31 = vpop.eup %5292  ;;  %v7460_v6 = vpop.f32.mrf.mxu1 }
 0x248   : > { %v1612_v61 = vmul.f32 %v7019_v25, %v1500_v58  ;;  %v1613_v45 = vmul.f32 %v7031_v55, %v1501_v14  ;;  %v5295_v63 = vpop.eup %5294  ;;  %v1197_v4 = vmul.f32 %v5293_v31, %v625_v34  ;;  %vm1203_vm1 = vweird.f32 %v5293_v31 }
 0x249   : > { %v7437_v3 = vpop.f32.mrf.mxu0  ;;  %v1187_v57 = vmul.f32 %v5295_v63, %v623_v27  ;;  %vm1193_vm3 = vweird.f32 %v5295_v63  ;;  %vm7469_vm4 = vmor %vm1202_vm0, %vm1203_vm1 }
 0x24a   : > { %v1676_v13 = vmul.f32 %v1612_v61, %v7421_v32  ;;  %v1677_v15 = vmul.f32 %v1613_v45, %v7421_v32  ;;  %v1198_v25 = vmul.f32 %v5293_v31, %v1197_v4  ;;  %vm1194_vm6 = vmor %vm1192_vm2, %vm1193_vm3  ;;  %v629_v61 = vpop.xlane.xlu1 %628  ;;  %v627_v45 = vpop.xlane.xlu0 %626 }
 0x24b   : > { %v1188_v55 = vmul.f32 %v5295_v63, %v1187_v57  ;;  %5296 = vrsqrt.f32 %v629_v61  ;;  %vm1222_vm8 = vweird.f32 %v629_v61  ;;  %vm1212_vm10 = vweird.f32 %v627_v45 }
 0x24c   : > { %v1740_v1 = vpack.c.bf16 %v1676_v13, %v1676_v13  ;;  %v1741_v50 = vpack.c.bf16 %v1677_v15, %v1677_v15  ;;  %v1199_v56 = vmul.f32 0.5, %v1198_v25  ;;  %5298 = vrsqrt.f32 %v627_v45 }
 0x24d   : > { %v1189_v53 = vmul.f32 0.5, %v1188_v55  ;;  %vm801_vm13 = vcmp.gt.f32.partialorder %v629_v61, 0.0  ;;  %vm800_vm15 = vcmp.gt.f32.partialorder %v627_v45, 0.0 }
 0x24e   : > { %v2206_v23 = vunpack.c.l.b16 %v1740_v1  ;;  %v2207_v35 = vunpack.c.l.b16 %v1741_v50  ;;  %v1200_v24 = vsub.f32 1.5, %v1199_v56 }
 0x24f   : > { %v1190_v36 = vsub.f32 1.5, %v1189_v53  ;;  %v7478_v15 = vpop.f32.mrf.mxu1  ;;  %v8508_v53 = vpack.c.bf16 %v7172_v7, %v7145_v47 }
 0x250   : > { %v7465_v22 = vpack.c.b16 %v2207_v35, %v2206_v23  ;;  %v1201_v5 = vmul.f32 %v5293_v31, %v1200_v24 }
 0x251   : > { %v7456_v42 = vpop.f32.mrf.mxu0  ;;  %v1191_v14 = vmul.f32 %v5295_v63, %v1190_v36  ;;  %v5297_v25 = vpop.eup %5296 }
 0x252   : > { %v1205_v13 = vsel %vm7469_vm4, %v5293_v31, %v1201_v5  ;;  %v5299_v31 = vpop.eup %5298  ;;  %v1217_v23 = vmul.f32 %v5297_v25, %v629_v61  ;;  %vm1223_vm9 = vweird.f32 %v5297_v25  ;;  %v7503_v61 = vld [vmem:[%s8302_s3] ss:$0 sm:$0xff] }
 0x253   : > { %v1503_v4 = vsel %vm799_vm5, %v1205_v13, 0.0  ;;  %v1195_v57 = vsel %vm1194_vm6, %v5295_v63, %v1191_v14  ;;  %v1207_v56 = vmul.f32 %v5299_v31, %v627_v45  ;;  %vm1213_vm11 = vweird.f32 %v5299_v31  ;;  %vm1224_vm12 = vmor %vm1222_vm8, %vm1223_vm9 }
 0x254   : > { %2616 = vmatmul.bf16.gmra.mxu0 %v8505_v51  ;;  %v1615_v1 = vmul.f32 %v7102_v41, %v1503_v4  ;;  %v1502_v34 = vsel %vm798_vm7, %v1195_v57, 0.0  ;;  %v1218_v63 = vmul.f32 %v5297_v25, %v1217_v23  ;;  %vm1214_vm14 = vmor %vm1212_vm10, %vm1213_vm11 }
 0x255   : > { %v1614_v51 = vmul.f32 %v7104_v19, %v1502_v34  ;;  %v1208_v24 = vmul.f32 %v5299_v31, %v1207_v56  ;;  %v631_v34 = vpop.xlane.xlu2 %630 }
 0x256   : > { %v1679_v55 = vmul.f32 %v1615_v1, %v7421_v32  ;;  %v1219_v19 = vmul.f32 0.5, %v1218_v63  ;;  %5300 = vrsqrt.f32 %v631_v34  ;;  %vm1232_vm0 = vweird.f32 %v631_v34 }
 0x257   : > { %2297 = vmatmul.bf16.gmra.mxu2 %v7465_v22  ;;  %v1678_v50 = vmul.f32 %v1614_v51, %v7421_v32  ;;  %v7489_v5 = vpop.f32.mrf.mxu1  ;;  %v1209_v14 = vmul.f32 0.5, %v1208_v24  ;;  %vm802_vm5 = vcmp.gt.f32.partialorder %v631_v34, 0.0 }
 0x258   : > { %v1743_v41 = vpack.c.bf16 %v1679_v55, %v1679_v55  ;;  %v1220_v13 = vsub.f32 1.5, %v1219_v19 }
 0x259   : > { %v7467_v46 = vpop.f32.mrf.mxu0  ;;  %v1742_v35 = vpack.c.bf16 %v1678_v50, %v1678_v50  ;;  %v1210_v47 = vsub.f32 1.5, %v1209_v14  ;;  %v633_v50 = vpop.xlane.xlu0 %632 }
 0x25a   : > { %v2209_v36 = vunpack.c.l.b16 %v1743_v41  ;;  %v1221_v1 = vmul.f32 %v5297_v25, %v1220_v13  ;;  %5302 = vrsqrt.f32 %v633_v50  ;;  %vm1242_vm2 = vweird.f32 %v633_v50 }
 0x25b   : > { %v2208_v58 = vunpack.c.l.b16 %v1742_v35  ;;  %v1211_v51 = vmul.f32 %v5299_v31, %v1210_v47  ;;  %vm803_vm7 = vcmp.gt.f32.partialorder %v633_v50, 0.0 }
 0x25c   : > { %v1225_v55 = vsel %vm1224_vm12, %v5297_v25, %v1221_v1  ;;  %v5301_v45 = vpop.eup %5300 }
 0x25d   : > { %v7491_v4 = vpack.c.b16 %v2209_v36, %v2208_v58  ;;  %v1505_v23 = vsel %vm801_vm13, %v1225_v55, 0.0  ;;  %v1215_v56 = vsel %vm1214_vm14, %v5299_v31, %v1211_v51  ;;  %v1227_v31 = vmul.f32 %v5301_v45, %v631_v34 }
 0x25e   : > { %v1617_v35 = vmul.f32 %v7153_v49, %v1505_v23  ;;  %v2486_v49 = vpack.c.bf16 %v7460_v6, %v7439_v17  ;;  %vm1233_vm1 = vweird.f32 %v5301_v45 }
 0x25f   : > { %v7505_v41 = vpop.f32.mrf.mxu1  ;;  %v1228_v13 = vmul.f32 %v5301_v45, %v1227_v31  ;;  %vm7514_vm4 = vmor %vm1232_vm0, %vm1233_vm1 }
 0x260   : > { %v1681_v58 = vmul.f32 %v1617_v35, %v7421_v32  ;;  %v5303_v19 = vpop.eup %5302 }
 0x261   : > { %v7482_v27 = vpop.f32.mrf.mxu0  ;;  %v1237_v36 = vmul.f32 %v5303_v19, %v633_v50  ;;  %v1229_v55 = vmul.f32 0.5, %v1228_v13  ;;  %vm1243_vm3 = vweird.f32 %v5303_v19 }
 0x262   : > { %v1745_v47 = vpack.c.bf16 %v1681_v58, %v1681_v58  ;;  %vm7519_vm6 = vmor %vm1242_vm2, %vm1243_vm3 }
 0x263   : > { %v1238_v1 = vmul.f32 %v5303_v19, %v1237_v36 }
 0x264   : > { %2621 = vmatmul.bf16.gmra.mxu0 %v8508_v53  ;;  %v1504_v53 = vsel %vm800_vm15, %v1215_v56, 0.0  ;;  %v2211_v23 = vunpack.c.l.b16 %v1745_v47 }
 0x265   : > { %v1616_v63 = vmul.f32 %v7155_v12, %v1504_v53  ;;  %v1239_v56 = vmul.f32 0.5, %v1238_v1  ;;  %v1230_v53 = vsub.f32 1.5, %v1229_v55 }
 0x267   : > { %2302 = vmatmul.bf16.gmra.mxu2 %v7491_v4  ;;  %v1680_v25 = vmul.f32 %v1616_v63, %v7421_v32  ;;  %v1231_v58 = vmul.f32 %v5301_v45, %v1230_v53  ;;  %v7525_v36 = vpop.f32.mrf.mxu1 }
 0x269   : > { %v7493_v57 = vpop.f32.mrf.mxu0  ;;  %v1744_v12 = vpack.c.bf16 %v1680_v25, %v1680_v25  ;;  %v1235_v34 = vsel %vm7514_vm4, %v5301_v45, %v1231_v58  ;;  %v2487_v58 = vpack.c.bf16 %v7489_v5, %v7478_v15 }
 0x26a   : > { %v1506_v1 = vsel %vm802_vm5, %v1235_v34, 0.0 }
 0x26b   : > { %v2210_v51 = vunpack.c.l.b16 %v1744_v12  ;;  %v1618_v50 = vmul.f32 %v7199_v44, %v1506_v1 }
 0x26d   : > { %v7512_v17 = vpack.c.b16 %v2211_v23, %v2210_v51  ;;  %v7523_v31 = vpop.xlane.xlu2 %636  ;;  %v1682_v45 = vmul.f32 %v1618_v50, %v7421_v32 }
 0x26e   : > { %5304 = vrsqrt.f32 %v7523_v31  ;;  %vm1262_vm8 = vweird.f32 %v7523_v31  ;;  %vm805_vm13 = vcmp.gt.f32.partialorder %v7523_v31, 0.0 }
 0x26f   : > { %v7547_v34 = vpop.f32.mrf.mxu1 }
 0x271   : > { %v2587_v24 = vpop.f32.mrf.mxu0 }
 0x272   : > { %v2588_v14 = vadd.f32 %v7503_v61, %v2587_v24  ;;  %v1240_v24 = vsub.f32 1.5, %v1239_v56 }
 0x274   : > { %2626 = vmatmul.bf16.gmra.mxu0 %v2486_v49  ;;  %v2747_v35 = vmax.f32 %v2588_v14, 0.0  ;;  %v1241_v12 = vmul.f32 %v5303_v19, %v1240_v24  ;;  %v7528_v14 = vpop.xlane.xlu1 %634 }
 0x275   : > { %5306 = vrsqrt.f32 %v7528_v14  ;;  %vm1252_vm10 = vweird.f32 %v7528_v14  ;;  %vm804_vm15 = vcmp.gt.f32.partialorder %v7528_v14, 0.0 }
 0x276   : > { %v2811_v13 = vpack.c.bf16 %v2747_v35, %v2747_v35  ;;  %v1245_v51 = vsel %vm7519_vm6, %v5303_v19, %v1241_v12  ;;  %v1746_v12 = vpack.c.bf16 %v1682_v45, %v1682_v45 }
 0x277   : > { %2307 = vmatmul.bf16.gmra.mxu2 %v7512_v17  ;;  %v1507_v23 = vsel %vm803_vm7, %v1245_v51, 0.0 }
 0x278   : > { %v1619_v56 = vmul.f32 %v7201_v29, %v1507_v23  ;;  %v2891_v53 = vunpack.c.l.b16 %v2811_v13  ;;  %v2212_v51 = vunpack.c.l.b16 %v1746_v12  ;;  %v7567_v12 = vpop.xlane.xlu0 %638 }
 0x279   : > { %v2589_v6 = vpop.f32.mrf.mxu0  ;;  %vm1272_vm2 = vweird.f32 %v7567_v12  ;;  %vm806_vm7 = vcmp.gt.f32.partialorder %v7567_v12, 0.0 }
 0x27a   : > { %v2590_v25 = vadd.f32 %v7503_v61, %v2589_v6  ;;  %v5305_v6 = vpop.eup %5304  ;;  %v1683_v63 = vmul.f32 %v1619_v56, %v7421_v32 }
 0x27b   : > { %v1257_v19 = vmul.f32 %v5305_v6, %v7523_v31  ;;  %vm1263_vm9 = vweird.f32 %v5305_v6 }
 0x27c   : > { %v2748_v47 = vmax.f32 %v2590_v25, 0.0  ;;  %v5307_v25 = vpop.eup %5306  ;;  %vm7553_vm12 = vmor %vm1262_vm8, %vm1263_vm9 }
 0x27d   : > { %v1247_v44 = vmul.f32 %v5307_v25, %v7528_v14  ;;  %v1258_v13 = vmul.f32 %v5305_v6, %v1257_v19  ;;  %vm1253_vm11 = vweird.f32 %v5307_v25  ;;  %v7563_v19 = vpop.xlane.xlu1 %640 }
 0x27e   : > { %v2812_v55 = vpack.c.bf16 %v2748_v47, %v2748_v47  ;;  %v1747_v47 = vpack.c.bf16 %v1683_v63, %v1683_v63  ;;  %vm7559_vm14 = vmor %vm1252_vm10, %vm1253_vm11  ;;  %5308 = vrsqrt.f32 %v7563_v19  ;;  %vm1282_vm0 = vweird.f32 %v7563_v19 }
 0x27f   : > { %v1248_v1 = vmul.f32 %v5307_v25, %v1247_v44  ;;  %5310 = vrsqrt.f32 %v7567_v12  ;;  %vm807_vm5 = vcmp.gt.f32.partialorder %v7563_v19, 0.0 }
 0x280   : > { %v2892_v35 = vunpack.c.l.b16 %v2812_v55  ;;  %v1259_v55 = vmul.f32 0.5, %v1258_v13  ;;  %v2213_v15 = vunpack.c.l.b16 %v1747_v47 }
 0x281   : > { %v2592_v24 = vpop.f32.mrf.mxu0  ;;  %v1249_v5 = vmul.f32 0.5, %v1248_v1 }
 0x282   : > { %v7543_v49 = vpack.c.b16 %v2892_v35, %v2891_v53  ;;  %v2593_v29 = vadd.f32 %v7503_v61, %v2592_v24  ;;  %v1260_v23 = vsub.f32 1.5, %v1259_v55  ;;  %v7551_v56 = vpack.c.b16 %v2213_v15, %v2212_v51  ;;  %v7576_v15 = vpop.f32.mrf.mxu1 }
 0x283   : > { %v1250_v24 = vsub.f32 1.5, %v1249_v5 }
 0x284   : > { %2631 = vmatmul.bf16.gmra.mxu0 %v2487_v58  ;;  %v2749_v50 = vmax.f32 %v2593_v29, 0.0  ;;  %v1261_v63 = vmul.f32 %v5305_v6, %v1260_v23 }
 0x285   : > { %v1251_v44 = vmul.f32 %v5307_v25, %v1250_v24 }
 0x286   : > { %v2813_v29 = vpack.c.bf16 %v2749_v50, %v2749_v50  ;;  %v1265_v47 = vsel %vm7553_vm12, %v5305_v6, %v1261_v63 }
 0x287   : > { %2312 = vmatmul.bf16.gmra.mxu2 %v7551_v56  ;;  %v1509_v31 = vsel %vm805_vm13, %v1265_v47, 0.0  ;;  %v1255_v1 = vsel %vm7559_vm14, %v5307_v25, %v1251_v44  ;;  %v2488_v25 = vpack.c.bf16 %v7525_v36, %v7505_v41 }
 0x288   : > { %v1621_v14 = vmul.f32 %v7248_v28, %v1509_v31  ;;  %v1508_v55 = vsel %vm804_vm15, %v1255_v1, 0.0  ;;  %v2893_v50 = vunpack.c.l.b16 %v2813_v29 }
 0x289   : > { %v2594_v53 = vpop.f32.mrf.mxu0  ;;  %v1620_v5 = vmul.f32 %v7255_v2, %v1508_v55 }
 0x28a   : > { %v2595_v45 = vadd.f32 %v7503_v61, %v2594_v53  ;;  %v5309_v53 = vpop.eup %5308  ;;  %v1685_v24 = vmul.f32 %v1621_v14, %v7421_v32 }
 0x28b   : > { %v1684_v35 = vmul.f32 %v1620_v5, %v7421_v32  ;;  %v1277_v63 = vmul.f32 %v5309_v53, %v7563_v19  ;;  %vm1283_vm1 = vweird.f32 %v5309_v53  ;;  %v7592_v5 = vpop.xlane.xlu2 %642 }
 0x28c   : > { %v2750_v13 = vmax.f32 %v2595_v45, 0.0  ;;  %v5311_v45 = vpop.eup %5310  ;;  %vm1284_vm4 = vmor %vm1282_vm0, %vm1283_vm1  ;;  %5312 = vrsqrt.f32 %v7592_v5  ;;  %vm1292_vm8 = vweird.f32 %v7592_v5  ;;  %vm808_vm13 = vcmp.gt.f32.partialorder %v7592_v5, 0.0 }
 0x28d   : > { %v1267_v58 = vmul.f32 %v5311_v45, %v7567_v12  ;;  %v1748_v44 = vpack.c.bf16 %v1684_v35, %v1684_v35  ;;  %v1278_v29 = vmul.f32 %v5309_v53, %v1277_v63  ;;  %vm1273_vm3 = vweird.f32 %v5311_v45 }
 0x28e   : > { %v2814_v51 = vpack.c.bf16 %v2750_v13, %v2750_v13  ;;  %v1749_v13 = vpack.c.bf16 %v1685_v24, %v1685_v24  ;;  %vm1274_vm6 = vmor %vm1272_vm2, %vm1273_vm3 }
 0x28f   : > { %v1268_v47 = vmul.f32 %v5311_v45, %v1267_v58  ;;  %v2214_v31 = vunpack.c.l.b16 %v1748_v44  ;;  %v1279_v1 = vmul.f32 0.5, %v1278_v29 }
 0x290   : > { %v2894_v23 = vunpack.c.l.b16 %v2814_v51  ;;  %v2215_v51 = vunpack.c.l.b16 %v1749_v13 }
 0x291   : > { %v2597_v6 = vpop.f32.mrf.mxu0  ;;  %v1269_v41 = vmul.f32 0.5, %v1268_v47  ;;  %v1280_v14 = vsub.f32 1.5, %v1279_v1 }
 0x292   : > { %v7584_v28 = vpack.c.b16 %v2894_v23, %v2893_v50  ;;  %v2598_v2 = vadd.f32 %v7503_v61, %v2597_v6  ;;  %v7590_v55 = vpack.c.b16 %v2215_v51, %v2214_v31  ;;  %v7594_v50 = vpop.xlane.xlu0 %644  ;;  %v7596_v23 = vpop.f32.mrf.mxu1 }
 0x293   : > { %v1270_v35 = vsub.f32 1.5, %v1269_v41  ;;  %5314 = vrsqrt.f32 %v7594_v50  ;;  %v5313_v1 = vpop.eup %5312  ;;  %vm1302_vm10 = vweird.f32 %v7594_v50  ;;  %vm809_vm15 = vcmp.gt.f32.partialorder %v7594_v50, 0.0 }
 0x294   : > { %2636 = vmatmul.bf16.gmra.mxu0 %v2488_v25  ;;  %v2751_v36 = vmax.f32 %v2598_v2, 0.0  ;;  %v1281_v25 = vmul.f32 %v5309_v53, %v1280_v14  ;;  %v1287_v12 = vmul.f32 %v5313_v1, %v7592_v5  ;;  %vm1293_vm9 = vweird.f32 %v5313_v1 }
 0x295   : > { %v1271_v63 = vmul.f32 %v5311_v45, %v1270_v35  ;;  %vm1294_vm12 = vmor %vm1292_vm8, %vm1293_vm9 }
 0x296   : > { %v2815_v58 = vpack.c.bf16 %v2751_v36, %v2751_v36  ;;  %v1285_v2 = vsel %vm1284_vm4, %v5309_v53, %v1281_v25 }
 0x297   : > { %2317 = vmatmul.bf16.gmra.mxu2 %v7590_v55  ;;  %v1511_v29 = vsel %vm807_vm5, %v1285_v2, 0.0  ;;  %v1275_v13 = vsel %vm1274_vm6, %v5311_v45, %v1271_v63  ;;  %v2489_v45 = vpack.c.bf16 %v7576_v15, %v7547_v34 }
 0x298   : > { %v1623_v31 = vmul.f32 %v7300_v26, %v1511_v29  ;;  %v1510_v19 = vsel %vm806_vm7, %v1275_v13, 0.0  ;;  %v2895_v14 = vunpack.c.l.b16 %v2815_v58  ;;  %v1288_v26 = vmul.f32 %v5313_v1, %v1287_v12 }
 0x299   : > { %v2599_v6 = vpop.f32.mrf.mxu0  ;;  %v1622_v51 = vmul.f32 %v7302_v52, %v1510_v19  ;;  %v5315_v41 = vpop.eup %5314 }
 0x29a   : > { %v2600_v24 = vadd.f32 %v7503_v61, %v2599_v6  ;;  %v1297_v36 = vmul.f32 %v5315_v41, %v7594_v50  ;;  %v2170_v63 = vpop.f32.mrf.mxu1  ;;  %v1289_v29 = vmul.f32 0.5, %v1288_v26  ;;  %vm1303_vm11 = vweird.f32 %v5315_v41 }
 0x29b   : > { %v1686_v53 = vmul.f32 %v1622_v51, %v7421_v32  ;;  %vm1304_vm14 = vmor %vm1302_vm10, %vm1303_vm11 }
 0x29c   : > { %v2752_v44 = vmax.f32 %v2600_v24, 0.0  ;;  %v1687_v24 = vmul.f32 %v1623_v31, %v7421_v32  ;;  %v1298_v52 = vmul.f32 %v5315_v41, %v1297_v36  ;;  %v1290_v15 = vsub.f32 1.5, %v1289_v29 }
 0x29d   : > { %v1750_v58 = vpack.c.bf16 %v1686_v53, %v1686_v53 }
 0x29e   : > { %v2816_v47 = vpack.c.bf16 %v2752_v44, %v2752_v44  ;;  %v1751_v44 = vpack.c.bf16 %v1687_v24, %v1687_v24  ;;  %v1299_v13 = vmul.f32 0.5, %v1298_v52  ;;  %v1291_v51 = vmul.f32 %v5313_v1, %v1290_v15 }
 0x2a0   : > { %v2896_v6 = vunpack.c.l.b16 %v2816_v47  ;;  %v2216_v47 = vunpack.c.l.b16 %v1750_v58  ;;  %v2217_v34 = vunpack.c.l.b16 %v1751_v44  ;;  %v1300_v31 = vsub.f32 1.5, %v1299_v13 }
 0x2a1   : > { %v2602_v35 = vpop.f32.mrf.mxu0  ;;  %v1295_v36 = vsel %vm1294_vm12, %v5313_v1, %v1291_v51 }
 0x2a2   : > { %v7614_v25 = vpack.c.b16 %v2896_v6, %v2895_v14  ;;  %v2603_v2 = vadd.f32 %v7503_v61, %v2602_v35  ;;  %v7620_v14 = vpack.c.b16 %v2217_v34, %v2216_v47  ;;  %v1301_v12 = vmul.f32 %v5315_v41, %v1300_v31  ;;  %v2173_v58 = vpop.f32.mrf.mxu1 }
 0x2a3   : > { %v1512_v53 = vsel %vm808_vm13, %v1295_v36, 0.0 }
 0x2a4   : > { %2641 = vmatmul.bf16.gmra.mxu0 %v2489_v45  ;;  %v2753_v19 = vmax.f32 %v2603_v2, 0.0  ;;  %v1305_v24 = vsel %vm1304_vm14, %v5315_v41, %v1301_v12  ;;  %v1624_v5 = vmul.f32 %v7319_v62, %v1512_v53  ;;  %v2490_v41 = vpack.c.bf16 %v2170_v63, %v7596_v23 }
 0x2a5   : > { %v1513_v52 = vsel %vm809_vm15, %v1305_v24, 0.0 }
 0x2a6   : > { %v2817_v45 = vpack.c.bf16 %v2753_v19, %v2753_v19  ;;  %v1625_v44 = vmul.f32 %v7327_v43, %v1513_v52  ;;  %v1688_v47 = vmul.f32 %v1624_v5, %v7421_v32 }
 0x2a7   : > { %2322 = vmatmul.bf16.gmra.mxu2 %v7620_v14 }
 0x2a8   : > { %v2897_v29 = vunpack.c.l.b16 %v2817_v45  ;;  %v1689_v1 = vmul.f32 %v1625_v44, %v7421_v32  ;;  %v1752_v15 = vpack.c.bf16 %v1688_v47, %v1688_v47 }
 0x2a9   : > { %v2604_v6 = vpop.f32.mrf.mxu0 }
 0x2aa   : > { %v2605_v35 = vadd.f32 %v7503_v61, %v2604_v6  ;;  %v1753_v31 = vpack.c.bf16 %v1689_v1, %v1689_v1  ;;  %v2218_v19 = vunpack.c.l.b16 %v1752_v15  ;;  %v2175_v62 = vpop.f32.mrf.mxu1 }
 0x2ab   : > { %v2491_v36 = vpack.c.bf16 %v2175_v62, %v2173_v58 }
 0x2ac   : > { %v2754_v26 = vmax.f32 %v2605_v35, 0.0  ;;  %v2219_v51 = vunpack.c.l.b16 %v1753_v31 }
 0x2ae   : > { %v2818_v2 = vpack.c.bf16 %v2754_v26, %v2754_v26  ;;  %v7632_v6 = vpack.c.b16 %v2219_v51, %v2218_v19 }
 0x2b0   : > { %v2898_v13 = vunpack.c.l.b16 %v2818_v2  ;;  %8517 = vst [vmem:[#allocation31_spill] sm:$0xff] %v7632_v6 }
 0x2b1   : > { %v2607_v50 = vpop.f32.mrf.mxu0 }
 0x2b2   : > { %v7630_v34 = vpack.c.b16 %v2898_v13, %v2897_v29  ;;  %v2178_v12 = vpop.f32.mrf.mxu1 }
 0x2b4   : > { %2646 = vmatmul.bf16.gmra.mxu0 %v2490_v41 }
 0x2b7   : > { %2327 = vmatmul.bf16.gmra.mxu2 %v7632_v6 }
 0x2b9   : > { %v2609_v43 = vpop.f32.mrf.mxu0 }
 0x2ba   : > { %v2180_v53 = vpop.f32.mrf.mxu1 }
 0x2bb   : > { %v2492_v24 = vpack.c.bf16 %v2180_v53, %v2178_v12 }
 0x2c1   : > { %v2612_v35 = vpop.f32.mrf.mxu0 }
 0x2c2   : > { %v2183_v45 = vpop.f32.mrf.mxu1  ;;  %v2613_v62 = vadd.f32 %v7503_v61, %v2612_v35 }
 0x2c4   : > { %2651 = vmatmul.bf16.gmra.mxu0 %v2491_v36 }
 0x2c9   : > { %v2614_v32 = vpop.f32.mrf.mxu0 }
 0x2ca   : > { %v2293_v23 = vpop.f32.mrf.mxu2  ;;  %v2185_v5 = vpop.f32.mrf.mxu1  ;;  %v2615_v31 = vadd.f32 %v7503_v61, %v2614_v32 }
 0x2cb   : > { %v2493_v29 = vpack.c.bf16 %v2185_v5, %v2183_v45 }
 0x2cc   : > { %v2758_v45 = vmax.f32 %v2615_v31, 0.0 }
 0x2ce   : > { %v2822_v9 = vpack.c.bf16 %v2758_v45, %v2758_v45 }
 0x2d1   : > { %v2617_v63 = vpop.f32.mrf.mxu0 }
 0x2d2   : > { %v2295_v26 = vpop.f32.mrf.mxu2  ;;  %v2618_v1 = vadd.f32 %v7503_v61, %v2617_v63  ;;  %v2757_v63 = vmax.f32 %v2613_v62, 0.0 }
 0x2d4   : > { %2656 = vmatmul.bf16.gmra.mxu0 %v2492_v24  ;;  %v2759_v12 = vmax.f32 %v2618_v1, 0.0  ;;  %v2610_v24 = vadd.f32 %v7503_v61, %v2609_v43 }
 0x2d9   : > { %v2619_v52 = vpop.f32.mrf.mxu0 }
 0x2da   : > { %v7635_v44 = vpop.f32.mrf.mxu2  ;;  %v2620_v58 = vadd.f32 %v7503_v61, %v2619_v52 }
 0x2dc   : > { %v2760_v19 = vmax.f32 %v2620_v58, 0.0  ;;  %v2494_v58 = vpack.c.bf16 %v2295_v26, %v2293_v23 }
 0x2de   : > { %v2824_v5 = vpack.c.bf16 %v2760_v19, %v2760_v19 }
 0x2e0   : > { %v2904_v35 = vunpack.c.l.b16 %v2824_v5 }
 0x2e1   : > { %v2622_v2 = vpop.f32.mrf.mxu0 }
 0x2e2   : > { %v2623_v13 = vadd.f32 %v7503_v61, %v2622_v2  ;;  %v2300_v47 = vpop.f32.mrf.mxu2  ;;  %v2608_v2 = vadd.f32 %v7503_v61, %v2607_v50  ;;  %v2902_v50 = vunpack.c.l.b16 %v2822_v9 }
 0x2e3   : > { %v2495_v9 = vpack.c.bf16 %v2300_v47, %v7635_v44 }
 0x2e4   : > { %2661 = vmatmul.bf16.gmra.mxu0 %v2493_v29  ;;  %v2761_v41 = vmax.f32 %v2623_v13, 0.0  ;;  %v2823_v13 = vpack.c.bf16 %v2759_v12, %v2759_v12 }
 0x2e6   : > { %v2825_v36 = vpack.c.bf16 %v2761_v41, %v2761_v41  ;;  %v2755_v41 = vmax.f32 %v2608_v2, 0.0  ;;  %v2903_v6 = vunpack.c.l.b16 %v2823_v13 }
 0x2e8   : > { %v2905_v7 = vunpack.c.l.b16 %v2825_v36  ;;  %v2913_v19 = vpack.c.b16 %v2904_v35, %v2903_v6  ;;  %v2819_v62 = vpack.c.bf16 %v2755_v41, %v2755_v41 }
 0x2e9   : > { %v2624_v15 = vpop.f32.mrf.mxu0 }
 0x2ea   : > { %v2625_v51 = vadd.f32 %v7503_v61, %v2624_v15  ;;  %v2303_v29 = vpop.f32.mrf.mxu2  ;;  %v2756_v15 = vmax.f32 %v2610_v24, 0.0  ;;  %v2899_v45 = vunpack.c.l.b16 %v2819_v62 }
 0x2ec   : > { %v2762_v53 = vmax.f32 %v2625_v51, 0.0  ;;  %v2821_v51 = vpack.c.bf16 %v2757_v63, %v2757_v63  ;;  %v2820_v31 = vpack.c.bf16 %v2756_v15, %v2756_v15 }
 0x2ee   : > { %v2826_v52 = vpack.c.bf16 %v2762_v53, %v2762_v53  ;;  %v2901_v12 = vunpack.c.l.b16 %v2821_v51  ;;  %v2900_v53 = vunpack.c.l.b16 %v2820_v31 }
 0x2f0   : > { %v2906_v32 = vunpack.c.l.b16 %v2826_v52  ;;  %v2911_v2 = vpack.c.b16 %v2900_v53, %v2899_v45 }
 0x2f1   : > { %v2627_v8 = vpop.f32.mrf.mxu0 }
 0x2f2   : > { %v2914_v1 = vpack.c.b16 %v2906_v32, %v2905_v7  ;;  %v2628_v43 = vadd.f32 %v7503_v61, %v2627_v8  ;;  %v2305_v26 = vpop.f32.mrf.mxu2  ;;  %v2912_v7 = vpack.c.b16 %v2902_v50, %v2901_v12 }
 0x2f4   : > { %2666 = vmatmul.bf16.gmra.mxu0 %v2494_v58  ;;  %2923 = vmatpush.bf16.msrb.mxu1 %v2914_v1  ;;  %v2763_v36 = vmax.f32 %v2628_v43, 0.0 }
 0x2f6   : > { %v2827_v5 = vpack.c.bf16 %v2763_v36, %v2763_v36 }
 0x2f8   : > { %2924 = vmatpush.bf16.msrb.mxu1 %v2913_v19  ;;  %v2988_v63 = vunpack.c.l.b16 %v2827_v5  ;;  %v2496_v19 = vpack.c.bf16 %v2305_v26, %v2303_v29 }
 0x2f9   : > { %v2629_v23 = vpop.f32.mrf.mxu0 }
 0x2fa   : > { %v2630_v24 = vadd.f32 %v7503_v61, %v2629_v23  ;;  %v2308_v58 = vpop.f32.mrf.mxu2 }
 0x2fc   : > { %v2764_v52 = vmax.f32 %v2630_v24, 0.0  ;;  %2925 = vmatpush.bf16.msrb.mxu1 %v2912_v7 }
 0x2fe   : > { %v2828_v8 = vpack.c.bf16 %v2764_v52, %v2764_v52 }
 0x300   : > { %v2989_v13 = vunpack.c.l.b16 %v2828_v8  ;;  %2926 = vmatpush.bf16.msrb.mxu1 %v2911_v2  ;;  %v8519_v2 = vld [vmem:[#allocation22_spill] sm:$0xff] }
 0x301   : > { %v2632_v6 = vpop.f32.mrf.mxu0 }
 0x302   : > { %v7648_v32 = vpack.c.b16 %v2989_v13, %v2988_v63  ;;  %v2633_v15 = vadd.f32 %v7503_v61, %v2632_v6  ;;  %v2310_v44 = vpop.f32.mrf.mxu2 }
 0x304   : > { %2671 = vmatmul.bf16.gmra.mxu0 %v2495_v9  ;;  %2927 = vmatpush.bf16.msrb.mxu1 %v7630_v34  ;;  %v2765_v35 = vmax.f32 %v2633_v15, 0.0  ;;  %v8518_v34 = vld [vmem:[#allocation21_spill] sm:$0xff] }
 0x306   : > { %v2829_v51 = vpack.c.bf16 %v2765_v35, %v2765_v35 }
 0x308   : > { %2928 = vmatpush.bf16.msrb.mxu1 %v7614_v25  ;;  %v2990_v31 = vunpack.c.l.b16 %v2829_v51 }
 0x309   : > { %v2634_v1 = vpop.f32.mrf.mxu0 }
 0x30a   : > { %v2635_v41 = vadd.f32 %v7503_v61, %v2634_v1  ;;  %v2313_v36 = vpop.f32.mrf.mxu2 }
 0x30c   : > { %v2766_v43 = vmax.f32 %v2635_v41, 0.0  ;;  %2929 = vmatpush.bf16.msrb.mxu1 %v7584_v28 }
 0x30e   : > { %v2830_v47 = vpack.c.bf16 %v2766_v43, %v2766_v43 }
 0x310   : > { %v2991_v50 = vunpack.c.l.b16 %v2830_v47  ;;  %2930 = vmatpush.bf16.msrb.mxu1 %v7543_v49  ;;  %v2497_v49 = vpack.c.bf16 %v2310_v44, %v2308_v58 }
 0x311   : > { %v2637_v62 = vpop.f32.mrf.mxu0 }
 0x312   : > { %v7656_v12 = vpack.c.b16 %v2991_v50, %v2990_v31  ;;  %v2638_v25 = vadd.f32 %v7503_v61, %v2637_v62  ;;  %v2315_v26 = vpop.f32.mrf.mxu2  ;;  %v8520_v31 = vld [vmem:[#allocation23_spill] sm:$0xff] }
 0x313   : > { %2931 = vmatmul.bf16.vlgmr.msrb.gmra.mxu1 %v8518_v34  ;;  %v2498_v58 = vpack.c.bf16 %v2315_v26, %v2313_v36 }
 0x314   : > { %2676 = vmatmul.bf16.gmra.mxu0 %v2496_v19  ;;  %v2767_v23 = vmax.f32 %v2638_v25, 0.0 }
 0x316   : > { %v2831_v24 = vpack.c.bf16 %v2767_v23, %v2767_v23 }
 0x318   : > { %v2992_v5 = vunpack.c.l.b16 %v2831_v24 }
 0x319   : > { %v2639_v53 = vpop.f32.mrf.mxu0 }
 0x31a   : > { %v2640_v28 = vadd.f32 %v7503_v61, %v2639_v53  ;;  %v2318_v15 = vpop.f32.mrf.mxu2  ;;  %v8521_v53 = vld [vmem:[#allocation24_spill] sm:$0xff] }
 0x31c   : > { %v2768_v7 = vmax.f32 %v2640_v28, 0.0 }
 0x31e   : > { %v2832_v45 = vpack.c.bf16 %v2768_v7, %v2768_v7 }
 0x320   : > { %v2993_v52 = vunpack.c.l.b16 %v2832_v45 }
 0x321   : > { %v2642_v29 = vpop.f32.mrf.mxu0 }
 0x322   : > { %v7661_v8 = vpack.c.b16 %v2993_v52, %v2992_v5  ;;  %v2643_v63 = vadd.f32 %v7503_v61, %v2642_v29  ;;  %v2320_v50 = vpop.f32.mrf.mxu2  ;;  %v8522_v5 = vld [vmem:[#allocation25_spill] sm:$0xff] }
 0x323   : > { %2936 = vmatmul.bf16.gmra.mxu1 %v8519_v2  ;;  %v2499_v25 = vpack.c.bf16 %v2320_v50, %v2318_v15 }
 0x324   : > { %2681 = vmatmul.bf16.gmra.mxu0 %v2497_v49  ;;  %v2769_v13 = vmax.f32 %v2643_v63, 0.0  ;;  %v8523_v63 = vld [vmem:[#allocation26_spill] sm:$0xff] }
 0x326   : > { %v2833_v35 = vpack.c.bf16 %v2769_v13, %v2769_v13 }
 0x328   : > { %v2994_v51 = vunpack.c.l.b16 %v2833_v35 }
 0x329   : > { %v2644_v9 = vpop.f32.mrf.mxu0 }
 0x32a   : > { %v2645_v6 = vadd.f32 %v7503_v61, %v2644_v9  ;;  %v2323_v62 = vpop.f32.mrf.mxu2 }
 0x32c   : > { %v2770_v1 = vmax.f32 %v2645_v6, 0.0 }
 0x32e   : > { %v2834_v41 = vpack.c.bf16 %v2770_v1, %v2770_v1 }
 0x330   : > { %v2995_v43 = vunpack.c.l.b16 %v2834_v41 }
 0x331   : > { %v2647_v44 = vpop.f32.mrf.mxu0 }
 0x332   : > { %v7666_v47 = vpack.c.b16 %v2995_v43, %v2994_v51  ;;  %v2325_v24 = vpop.f32.mrf.mxu2 }
 0x333   : > { %2941 = vmatmul.bf16.gmra.mxu1 %v8520_v31  ;;  %v2500_v7 = vpack.c.bf16 %v2325_v24, %v2323_v62 }
 0x334   : > { %2686 = vmatmul.bf16.gmra.mxu0 %v2498_v58 }
 0x339   : > { %v2649_v19 = vpop.f32.mrf.mxu0 }
 0x33a   : > { %v2328_v36 = vpop.f32.mrf.mxu2 }
 0x341   : > { %v2652_v23 = vpop.f32.mrf.mxu0 }
 0x342   : > { %v2330_v49 = vpop.f32.mrf.mxu2  ;;  %v2653_v43 = vadd.f32 %v7503_v61, %v2652_v23  ;;  %v8524_v23 = vld [vmem:[#allocation27_spill] sm:$0xff] }
 0x343   : > { %2946 = vmatmul.bf16.gmra.mxu1 %v8521_v53  ;;  %v2501_v29 = vpack.c.bf16 %v2330_v49, %v2328_v36 }
 0x344   : > { %2691 = vmatmul.bf16.gmra.mxu0 %v2499_v25  ;;  %v2650_v25 = vadd.f32 %v7503_v61, %v2649_v19  ;;  %v8525_v19 = vpack.c.bf16 %v7218_v16, %v7191_v54  ;;  %v8527_v54 = vpack.c.bf16 %v7267_v40, %v7236_v37  ;;  %v8529_v37 = vpack.c.bf16 %v7340_v48, %v7331_v21 }
 0x349   : > { %v2654_v28 = vpop.f32.mrf.mxu0 }
 0x34a   : > { %v2655_v1 = vadd.f32 %v7503_v61, %v2654_v28 }
 0x34c   : > { %v2774_v24 = vmax.f32 %v2655_v1, 0.0 }
 0x351   : > { %v2657_v45 = vpop.f32.mrf.mxu0 }
 0x352   : > { %v2658_v6 = vadd.f32 %v7503_v61, %v2657_v45  ;;  %v2773_v45 = vmax.f32 %v2653_v43, 0.0 }
 0x353   : > { %2951 = vmatmul.bf16.gmra.mxu1 %v8522_v5 }
 0x354   : > { %2696 = vmatmul.bf16.gmra.mxu0 %v2500_v7  ;;  %v2775_v58 = vmax.f32 %v2658_v6, 0.0 }
 0x356   : > { %v2839_v49 = vpack.c.bf16 %v2775_v58, %v2775_v58 }
 0x359   : > { %v2659_v52 = vpop.f32.mrf.mxu0 }
 0x35a   : > { %v2660_v9 = vadd.f32 %v7503_v61, %v2659_v52  ;;  %v2648_v52 = vadd.f32 %v7503_v61, %v2647_v44 }
 0x35c   : > { %v2776_v41 = vmax.f32 %v2660_v9, 0.0  ;;  %v2838_v9 = vpack.c.bf16 %v2774_v24, %v2774_v24  ;;  %v2771_v6 = vmax.f32 %v2648_v52, 0.0  ;;  %v8526_v52 = vld [vmem:[#allocation28_spill] sm:$0xff] }
 0x35e   : > { %v2840_v7 = vpack.c.bf16 %v2776_v41, %v2776_v41  ;;  %v2999_v1 = vunpack.c.l.b16 %v2838_v9  ;;  %v2835_v43 = vpack.c.bf16 %v2771_v6, %v2771_v6 }
 0x360   : > { %v2996_v24 = vunpack.c.l.b16 %v2835_v43 }
 0x361   : > { %v2662_v26 = vpop.f32.mrf.mxu0 }
 0x362   : > { %v2663_v13 = vadd.f32 %v7503_v61, %v2662_v26 }
 0x363   : > { %2956 = vmatmul.bf16.gmra.mxu1 %v8523_v63 }
 0x364   : > { %2701 = vmatmul.bf16.gmra.mxu0 %v2501_v29  ;;  %v2777_v15 = vmax.f32 %v2663_v13, 0.0  ;;  %v2772_v13 = vmax.f32 %v2650_v25, 0.0 }
 0x366   : > { %v2841_v50 = vpack.c.bf16 %v2777_v15, %v2777_v15  ;;  %v2837_v15 = vpack.c.bf16 %v2773_v45, %v2773_v45  ;;  %v2836_v44 = vpack.c.bf16 %v2772_v13, %v2772_v13  ;;  %v8528_v45 = vpack.c.bf16 %v7310_v38, %v7287_v60 }
 0x367   : > { %v8530_v13 = vpack.c.bf16 %v7375_v11, %v7360_v59  ;;  %v8531_v11 = vpack.c.bf16 %v7437_v3, %v7424_v39  ;;  %v8532_v39 = vpack.c.bf16 %v7467_v46, %v7456_v42  ;;  %v4725_v42 = vld [vmem:[#allocation8 + $0x20] sm:$0xff] }
 0x368   : > { %v3002_v29 = vunpack.c.l.b16 %v2841_v50  ;;  %v2998_v58 = vunpack.c.l.b16 %v2837_v15 }
 0x369   : > { %v2664_v35 = vpop.f32.mrf.mxu0 }
 0x36a   : > { %v2665_v51 = vadd.f32 %v7503_v61, %v2664_v35  ;;  %v3001_v35 = vunpack.c.l.b16 %v2840_v7  ;;  %v3009_v25 = vpack.c.b16 %v2999_v1, %v2998_v58 }
 0x36c   : > { %v2778_v62 = vmax.f32 %v2665_v51, 0.0  ;;  %v3000_v51 = vunpack.c.l.b16 %v2839_v49 }
 0x36e   : > { %v2842_v36 = vpack.c.bf16 %v2778_v62, %v2778_v62  ;;  %v3010_v41 = vpack.c.b16 %v3001_v35, %v3000_v51  ;;  %v2997_v62 = vunpack.c.l.b16 %v2836_v44 }
 0x370   : > { %v3003_v26 = vunpack.c.l.b16 %v2842_v36  ;;  %v3008_v7 = vpack.c.b16 %v2997_v62, %v2996_v24 }
 0x371   : > { %v2667_v28 = vpop.f32.mrf.mxu0 }
 0x372   : > { %v3011_v63 = vpack.c.b16 %v3003_v26, %v3002_v29 }
 0x373   : > { %2961 = vmatmul.bf16.gmra.mxu1 %v8524_v23 }
 0x374   : > { %2706 = vmatmul.bf16.gmra.mxu0 %v8525_v19  ;;  %3020 = vmatpush.bf16.msrb.mxu2 %v3011_v63 }
 0x378   : > { %3021 = vmatpush.bf16.msrb.mxu2 %v3010_v41 }
 0x379   : > { %v2669_v50 = vpop.f32.mrf.mxu0 }
 0x37c   : > { %3022 = vmatpush.bf16.msrb.mxu2 %v3009_v25 }
 0x380   : > { %3023 = vmatpush.bf16.msrb.mxu2 %v3008_v7 }
 0x381   : > { %v2672_v36 = vpop.f32.mrf.mxu0 }
 0x383   : > { %2966 = vmatmul.bf16.gmra.mxu1 %v8526_v52 }
 0x384   : > { %2711 = vmatmul.bf16.gmra.mxu0 %v8527_v54  ;;  %3024 = vmatpush.bf16.msrb.mxu2 %v7666_v47 }
 0x388   : > { %3025 = vmatpush.bf16.msrb.mxu2 %v7661_v8 }
 0x389   : > { %v2674_v16 = vpop.f32.mrf.mxu0 }
 0x38a   : > { %v2675_v35 = vadd.f32 %v7503_v61, %v2674_v16 }
 0x38c   : > { %3026 = vmatpush.bf16.msrb.mxu2 %v7656_v12  ;;  %v2668_v12 = vadd.f32 %v7503_v61, %v2667_v28  ;;  %v2673_v28 = vadd.f32 %v7503_v61, %v2672_v36  ;;  %v2782_v51 = vmax.f32 %v2675_v35, 0.0 }
 0x38e   : > { %v2779_v8 = vmax.f32 %v2668_v12, 0.0  ;;  %v2781_v15 = vmax.f32 %v2673_v28, 0.0  ;;  %v2846_v1 = vpack.c.bf16 %v2782_v51, %v2782_v51 }
 0x390   : > { %3027 = vmatpush.bf16.msrb.mxu2 %v7648_v32  ;;  %v2670_v32 = vadd.f32 %v7503_v61, %v2669_v50  ;;  %v2843_v60 = vpack.c.bf16 %v2779_v8, %v2779_v8  ;;  %v2845_v44 = vpack.c.bf16 %v2781_v15, %v2781_v15  ;;  %v3088_v41 = vunpack.c.l.b16 %v2846_v1  ;;  %v4727_v8 = vld [vmem:[#allocation8 + $0x30] sm:$0xff] }
 0x391   : > { %v2677_v63 = vpop.f32.mrf.mxu0  ;;  %v8534_v15 = vpack.c.bf16 %v7493_v57, %v7482_v27 }
 0x392   : > { %v2780_v47 = vmax.f32 %v2670_v32, 0.0  ;;  %v3085_v9 = vunpack.c.l.b16 %v2843_v60  ;;  %v3087_v59 = vunpack.c.l.b16 %v2845_v44  ;;  %v2678_v58 = vadd.f32 %v7503_v61, %v2677_v63  ;;  %v4728_v63 = vld [vmem:[#allocation8 + $0x38] sm:$0xff] }
 0x393   : > { %3028 = vmatmul.bf16.vlgmr.msrb.gmra.mxu2 %v6962_v0  ;;  %v4724_v44 = vld [vmem:[#allocation8 + $0x18] sm:$0xff] }
 0x394   : > { %2716 = vmatmul.bf16.gmra.mxu0 %v8528_v45  ;;  %v2844_v38 = vpack.c.bf16 %v2780_v47, %v2780_v47  ;;  %v7720_v62 = vpack.c.b16 %v3088_v41, %v3087_v59  ;;  %v2783_v25 = vmax.f32 %v2678_v58, 0.0  ;;  %3363 = vmatpush.bf16.msra.mxu2 %v4728_v63  ;;  %v7740_v59 = vpop.f32.mrf.mxu1 }
 0x396   : > { %v3086_v48 = vunpack.c.l.b16 %v2844_v38  ;;  %v2847_v36 = vpack.c.bf16 %v2783_v25, %v2783_v25 }
 0x398   : > { %v7712_v6 = vpack.c.b16 %v3086_v48, %v3085_v9  ;;  %v3089_v45 = vunpack.c.l.b16 %v2847_v36  ;;  %3364 = vmatpush.bf16.msra.mxu2 %v4727_v8  ;;  %v8533_v48 = vld [vmem:[#allocation39_spill] sm:$0xff] }
 0x399   : > { %v2679_v49 = vpop.f32.mrf.mxu0 }
 0x39a   : > { %v2680_v50 = vadd.f32 %v7503_v61, %v2679_v49 }
 0x39c   : > { %v2784_v24 = vmax.f32 %v2680_v50, 0.0 }
 0x39e   : > { %v2848_v54 = vpack.c.bf16 %v2784_v24, %v2784_v24  ;;  %v4723_v24 = vld [vmem:[#allocation8 + $0x10] sm:$0xff] }
 0x3a0   : > { %v3090_v49 = vunpack.c.l.b16 %v2848_v54 }
 0x3a1   : > { %v2682_v29 = vpop.f32.mrf.mxu0 }
 0x3a2   : > { %v2683_v3 = vadd.f32 %v7503_v61, %v2682_v29  ;;  %v7728_v47 = vpack.c.b16 %v3090_v49, %v3089_v45 }
 0x3a3   : > { %3033 = vmatmul.bf16.gmra.mxu2 %v7070_v18 }
 0x3a4   : > { %2721 = vmatmul.bf16.gmra.mxu0 %v8529_v37  ;;  %v2785_v37 = vmax.f32 %v2683_v3, 0.0 }
 0x3a6   : > { %v2849_v60 = vpack.c.bf16 %v2785_v37, %v2785_v37 }
 0x3a8   : > { %v3091_v46 = vunpack.c.l.b16 %v2849_v60 }
 0x3a9   : > { %v2684_v40 = vpop.f32.mrf.mxu0 }
 0x3aa   : > { %v2685_v16 = vadd.f32 %v7503_v61, %v2684_v40 }
 0x3ac   : > { %v2786_v12 = vmax.f32 %v2685_v16, 0.0 }
 0x3ae   : > { %v2850_v38 = vpack.c.bf16 %v2786_v12, %v2786_v12 }
 0x3b0   : > { %v3092_v29 = vunpack.c.l.b16 %v2850_v38 }
 0x3b1   : > { %v7702_v26 = vpop.f32.mrf.mxu0 }
 0x3b2   : > { %v7737_v51 = vpack.c.b16 %v3092_v29, %v3091_v46  ;;  %v2688_v57 = vadd.f32 %v7503_v61, %v7702_v26  ;;  %v4721_v26 = vld [vmem:[#allocation8] sm:$0xff]  ;;  %v8535_v29 = vld [vmem:[#allocation40_spill] sm:$0xff] }
 0x3b3   : > { %3038 = vmatmul.bf16.gmra.mxu2 %v7131_v10 }
 0x3b4   : > { %2726 = vmatmul.bf16.gmra.mxu0 %v8530_v13  ;;  %v4726_v13 = vld [vmem:[#allocation8 + $0x28] sm:$0xff]  ;;  %v2787_v49 = vmax.f32 %v2688_v57, 0.0 }
 0x3b5   : > { %3365 = vmatpush.bf16.msra.mxu2 %v4726_v13 }
 0x3b9   : > { %v7708_v21 = vpop.f32.mrf.mxu0  ;;  %3366 = vmatpush.bf16.msra.mxu2 %v4725_v42  ;;  %v2851_v42 = vpack.c.bf16 %v2787_v49, %v2787_v49 }
 0x3ba   : > { %v2690_v36 = vadd.f32 %v7503_v61, %v7708_v21 }
 0x3bc   : > { %v2788_v37 = vmax.f32 %v2690_v36, 0.0 }
 0x3bd   : > { %3367 = vmatpush.bf16.msra.mxu2 %v4724_v44  ;;  %v3093_v44 = vunpack.c.l.b16 %v2851_v42 }
 0x3be   : > { %v2852_v46 = vpack.c.bf16 %v2788_v37, %v2788_v37 }
 0x3c1   : > { %v2692_v19 = vpop.f32.mrf.mxu0  ;;  %3368 = vmatpush.bf16.msra.mxu2 %v4723_v24 }
 0x3c3   : > { %3043 = vmatmul.bf16.gmra.mxu2 %v7176_v33 }
 0x3c4   : > { %2731 = vmatmul.bf16.gmra.mxu0 %v8531_v11  ;;  %v2693_v11 = vadd.f32 %v7503_v61, %v2692_v19 }
 0x3c6   : > { %v2789_v54 = vmax.f32 %v2693_v11, 0.0 }
 0x3c8   : > { %v2853_v12 = vpack.c.bf16 %v2789_v54, %v2789_v54 }
 0x3c9   : > { %v2694_v43 = vpop.f32.mrf.mxu0 }
 0x3ca   : > { %v2695_v41 = vadd.f32 %v7503_v61, %v2694_v43  ;;  %v4722_v43 = vld [vmem:[#allocation8 + $0x8] sm:$0xff] }
 0x3cb   : > { %3369 = vmatpush.bf16.msra.mxu2 %v4722_v43 }
 0x3cc   : > { %v2790_v19 = vmax.f32 %v2695_v41, 0.0 }
 0x3cf   : > { %3370 = vmatpush.bf16.msra.mxu2 %v4721_v26 }
 0x3d1   : > { %v2697_v7 = vpop.f32.mrf.mxu0 }
 0x3d2   : > { %v2698_v28 = vadd.f32 %v7503_v61, %v2697_v7 }
 0x3d3   : > { %3048 = vmatmul.bf16.gmra.mxu2 %v7222_v30 }
 0x3d4   : > { %2736 = vmatmul.bf16.gmra.mxu0 %v8532_v39  ;;  %v2791_v58 = vmax.f32 %v2698_v28, 0.0  ;;  %v7752_v28 = vld [vmem:[%s8302_s3] ss:$0 sm:$0xff] }
 0x3d6   : > { %v2855_v39 = vpack.c.bf16 %v2791_v58, %v2791_v58 }
 0x3d8   : > { %v3097_v8 = vunpack.c.l.b16 %v2855_v39 }
 0x3d9   : > { %v2699_v32 = vpop.f32.mrf.mxu0 }
 0x3da   : > { %v2700_v35 = vadd.f32 %v7503_v61, %v2699_v32  ;;  %v2854_v32 = vpack.c.bf16 %v2790_v19, %v2790_v19 }
 0x3dc   : > { %v2792_v50 = vmax.f32 %v2700_v35, 0.0 }
 0x3de   : > { %v2856_v3 = vpack.c.bf16 %v2792_v50, %v2792_v50 }
 0x3e0   : > { %v3098_v60 = vunpack.c.l.b16 %v2856_v3  ;;  %v8536_v3 = vld [vmem:[#allocation32_spill] sm:$0xff] }
 0x3e1   : > { %v2702_v9 = vpop.f32.mrf.mxu0 }
 0x3e2   : > { %v2703_v40 = vadd.f32 %v7503_v61, %v2702_v9  ;;  %v3095_v9 = vunpack.c.l.b16 %v2853_v12 }
 0x3e3   : > { %3053 = vmatmul.bf16.gmra.mxu2 %v8533_v48 }
 0x3e4   : > { %2741 = vmatmul.bf16.gmra.mxu0 %v8534_v15  ;;  %v2793_v1 = vmax.f32 %v2703_v40, 0.0  ;;  %v3096_v40 = vunpack.c.l.b16 %v2854_v32  ;;  %v3107_v15 = vpack.c.b16 %v3098_v60, %v3097_v8 }
 0x3e6   : > { %v2857_v7 = vpack.c.bf16 %v2793_v1, %v2793_v1  ;;  %v3094_v1 = vunpack.c.l.b16 %v2852_v46  ;;  %v3106_v41 = vpack.c.b16 %v3096_v40, %v3095_v9 }
 0x3e8   : > { %v3099_v63 = vunpack.c.l.b16 %v2857_v7 }
 0x3e9   : > { %v2704_v25 = vpop.f32.mrf.mxu0 }
 0x3ea   : > { %v2705_v27 = vadd.f32 %v7503_v61, %v2704_v25  ;;  %v2934_v61 = vpop.f32.mrf.mxu1 }
 0x3eb   : > { %v3263_v26 = vpack.c.bf16 %v2934_v61, %v7740_v59 }
 0x3ec   : > { %v2794_v16 = vmax.f32 %v2705_v27, 0.0  ;;  %v3105_v27 = vpack.c.b16 %v3094_v1, %v3093_v44 }
 0x3ee   : > { %v2858_v45 = vpack.c.bf16 %v2794_v16, %v2794_v16 }
 0x3f0   : > { %v3100_v38 = vunpack.c.l.b16 %v2858_v45 }
 0x3f1   : > { %v2707_v13 = vpop.f32.mrf.mxu0 }
 0x3f2   : > { %v3108_v21 = vpack.c.b16 %v3100_v38, %v3099_v63  ;;  %v2708_v35 = vadd.f32 %v7752_v28, %v2707_v13  ;;  %v2937_v25 = vpop.f32.mrf.mxu1 }
 0x3f3   : > { %3058 = vmatmul.bf16.gmra.mxu2 %v8535_v29 }
 0x3f4   : > { %3117 = vmatpush.bf16.msra.mxu1 %v3108_v21  ;;  %v2795_v11 = vmax.f32 %v2708_v35, 0.0 }
 0x3f6   : > { %v2859_v24 = vpack.c.bf16 %v2795_v11, %v2795_v11 }
 0x3f8   : > { %3118 = vmatpush.bf16.msra.mxu1 %v3107_v15  ;;  %v3182_v36 = vunpack.c.l.b16 %v2859_v24 }
 0x3f9   : > { %v2709_v58 = vpop.f32.mrf.mxu0 }
 0x3fa   : > { %v2710_v50 = vadd.f32 %v7752_v28, %v2709_v58  ;;  %v2939_v43 = vpop.f32.mrf.mxu1 }
 0x3fb   : > { %v3264_v1 = vpack.c.bf16 %v2939_v43, %v2937_v25 }
 0x3fc   : > { %v2796_v7 = vmax.f32 %v2710_v50, 0.0  ;;  %3119 = vmatpush.bf16.msra.mxu1 %v3106_v41 }
 0x3fe   : > { %v2860_v57 = vpack.c.bf16 %v2796_v7, %v2796_v7 }
 0x400   : > { %v3183_v54 = vunpack.c.l.b16 %v2860_v57  ;;  %3120 = vmatpush.bf16.msra.mxu1 %v3105_v27 }
 0x401   : > { %v2712_v19 = vpop.f32.mrf.mxu0 }
 0x402   : > { %v7756_v39 = vpack.c.b16 %v3183_v54, %v3182_v36  ;;  %v2713_v16 = vadd.f32 %v7752_v28, %v2712_v19  ;;  %v2942_v8 = vpop.f32.mrf.mxu1 }
 0x403   : > { %3063 = vmatmul.bf16.gmra.mxu2 %v8536_v3 }
 0x404   : > { %3121 = vmatpush.bf16.msra.mxu1 %v7737_v51  ;;  %v2797_v63 = vmax.f32 %v2713_v16, 0.0 }
 0x406   : > { %v2861_v37 = vpack.c.bf16 %v2797_v63, %v2797_v63 }
 0x408   : > { %3122 = vmatpush.bf16.msra.mxu1 %v7728_v47  ;;  %v3184_v60 = vunpack.c.l.b16 %v2861_v37 }
 0x409   : > { %v2714_v45 = vpop.f32.mrf.mxu0 }
 0x40a   : > { %v2715_v49 = vadd.f32 %v7752_v28, %v2714_v45  ;;  %v2944_v46 = vpop.f32.mrf.mxu1 }
 0x40c   : > { %v2798_v12 = vmax.f32 %v2715_v49, 0.0  ;;  %3123 = vmatpush.bf16.msra.mxu1 %v7720_v62  ;;  %v3265_v49 = vpack.c.bf16 %v2944_v46, %v2942_v8 }
 0x40e   : > { %v2862_v32 = vpack.c.bf16 %v2798_v12, %v2798_v12 }
 0x410   : > { %v3185_v38 = vunpack.c.l.b16 %v2862_v32  ;;  %3124 = vmatpush.bf16.msra.mxu1 %v7712_v6 }
 0x411   : > { %v2717_v51 = vpop.f32.mrf.mxu0 }
 0x412   : > { %v7766_v13 = vpack.c.b16 %v3185_v38, %v3184_v60  ;;  %v2718_v47 = vadd.f32 %v7752_v28, %v2717_v51  ;;  %v2947_v58 = vpop.f32.mrf.mxu1 }
 0x413   : > { %3125 = vmatmul.bf16.vlgmr.msra.gmra.mxu1 %v7435_v20  ;;  %3371 = vmatmul.bf16.vlgmr.msra.gmra.mxu2 %v3263_v26 }
 0x414   : > { %v2799_v42 = vmax.f32 %v2718_v47, 0.0 }
 0x416   : > { %v7770_v21 = vpop.f32.mrf.mxu2  ;;  %v2863_v40 = vpack.c.bf16 %v2799_v42, %v2799_v42 }
 0x418   : > { %v3186_v61 = vunpack.c.l.b16 %v2863_v40 }
 0x419   : > { %v2719_v62 = vpop.f32.mrf.mxu0 }
 0x41a   : > { %v2720_v9 = vadd.f32 %v7752_v28, %v2719_v62  ;;  %v2949_v19 = vpop.f32.mrf.mxu1 }
 0x41b   : > { %v3266_v47 = vpack.c.bf16 %v2949_v19, %v2947_v58 }
 0x41c   : > { %v2800_v35 = vmax.f32 %v2720_v9, 0.0 }
 0x41e   : > { %v2864_v6 = vpack.c.bf16 %v2800_v35, %v2800_v35  ;;  %v7773_v15 = vpop.f32.mrf.mxu2 }
 0x420   : > { %v3187_v44 = vunpack.c.l.b16 %v2864_v6 }
 0x421   : > { %v2722_v11 = vpop.f32.mrf.mxu0 }
 0x422   : > { %v7777_v41 = vpack.c.b16 %v3187_v44, %v3186_v61  ;;  %v2723_v50 = vadd.f32 %v7752_v28, %v2722_v11  ;;  %v2952_v60 = vpop.f32.mrf.mxu1 }
 0x423   : > { %3130 = vmatmul.bf16.gmra.mxu1 %v7465_v22  ;;  %3376 = vmatmul.bf16.gmra.mxu2 %v3264_v1 }
 0x424   : > { %v2801_v7 = vmax.f32 %v2723_v50, 0.0 }
 0x426   : > { %v7781_v24 = vpop.f32.mrf.mxu2  ;;  %v2865_v36 = vpack.c.bf16 %v2801_v7, %v2801_v7 }
 0x428   : > { %v3188_v63 = vunpack.c.l.b16 %v2865_v36 }
 0x429   : > { %v2724_v27 = vpop.f32.mrf.mxu0 }
 0x42a   : > { %v2725_v57 = vadd.f32 %v7752_v28, %v2724_v27  ;;  %v2954_v62 = vpop.f32.mrf.mxu1 }
 0x42b   : > { %v3267_v6 = vpack.c.bf16 %v2954_v62, %v2952_v60 }
 0x42c   : > { %v2802_v54 = vmax.f32 %v2725_v57, 0.0 }
 0x42e   : > { %v2866_v16 = vpack.c.bf16 %v2802_v54, %v2802_v54  ;;  %v7784_v25 = vpop.f32.mrf.mxu2 }
 0x430   : > { %v3189_v45 = vunpack.c.l.b16 %v2866_v16 }
 0x431   : > { %v2727_v37 = vpop.f32.mrf.mxu0 }
 0x432   : > { %v7788_v12 = vpack.c.b16 %v3189_v45, %v3188_v63  ;;  %v2957_v9 = vpop.f32.mrf.mxu1 }
 0x433   : > { %3135 = vmatmul.bf16.gmra.mxu1 %v7491_v4  ;;  %3381 = vmatmul.bf16.gmra.mxu2 %v3265_v49 }
 0x436   : > { %v7791_v32 = vpop.f32.mrf.mxu2 }
 0x439   : > { %v2729_v38 = vpop.f32.mrf.mxu0 }
 0x43a   : > { %v2959_v44 = vpop.f32.mrf.mxu1 }
 0x43b   : > { %v3268_v27 = vpack.c.bf16 %v2959_v44, %v2957_v9 }
 0x43e   : > { %v7793_v26 = vpop.f32.mrf.mxu2 }
 0x441   : > { %v2732_v42 = vpop.f32.mrf.mxu0 }
 0x442   : > { %v2962_v7 = vpop.f32.mrf.mxu1  ;;  %v2733_v9 = vadd.f32 %v7752_v28, %v2732_v42 }
 0x443   : > { %3140 = vmatmul.bf16.gmra.mxu1 %v7512_v17  ;;  %3386 = vmatmul.bf16.gmra.mxu2 %v3266_v47 }
 0x446   : > { %v7798_v8 = vpop.f32.mrf.mxu2 }
 0x449   : > { %v2734_v46 = vpop.f32.mrf.mxu0 }
 0x44a   : > { %v2964_v49 = vpop.f32.mrf.mxu1  ;;  %v2735_v60 = vadd.f32 %v7752_v28, %v2734_v46 }
 0x44b   : > { %v3269_v42 = vpack.c.bf16 %v2964_v49, %v2962_v7 }
 0x44e   : > { %v7800_v40 = vpop.f32.mrf.mxu2 }
 0x451   : > { %v2737_v61 = vpop.f32.mrf.mxu0 }
 0x452   : > { %v2738_v16 = vadd.f32 %v7752_v28, %v2737_v61  ;;  %v2728_v61 = vadd.f32 %v7752_v28, %v2727_v37 }
 0x453   : > { %3145 = vmatmul.bf16.gmra.mxu1 %v7551_v56  ;;  %3391 = vmatmul.bf16.gmra.mxu2 %v3267_v6 }
 0x454   : > { %v2807_v6 = vmax.f32 %v2738_v16, 0.0 }
 0x456   : > { %v7805_v1 = vpop.f32.mrf.mxu2 }
 0x459   : > { %v2739_v11 = vpop.f32.mrf.mxu0 }
 0x45a   : > { %v2740_v54 = vadd.f32 %v7752_v28, %v2739_v11  ;;  %v2806_v11 = vmax.f32 %v2735_v60, 0.0  ;;  %v2803_v60 = vmax.f32 %v2728_v61, 0.0  ;;  %v8537_v61 = vld [vmem:[#allocation31_spill] sm:$0xff] }
 0x45c   : > { %v2808_v47 = vmax.f32 %v2740_v54, 0.0  ;;  %v2871_v54 = vpack.c.bf16 %v2807_v6, %v2807_v6  ;;  %v2867_v6 = vpack.c.bf16 %v2803_v60, %v2803_v60 }
 0x45e   : > { %v7807_v58 = vpop.f32.mrf.mxu2  ;;  %v2872_v50 = vpack.c.bf16 %v2808_v47, %v2808_v47 }
 0x461   : > { %v2742_v57 = vpop.f32.mrf.mxu0 }
 0x462   : > { %v2743_v36 = vadd.f32 %v7752_v28, %v2742_v57  ;;  %v2730_v57 = vadd.f32 %v7752_v28, %v2729_v38  ;;  %v2967_v38 = vpop.f32.mrf.mxu1 }
 0x463   : > { %3150 = vmatmul.bf16.gmra.mxu1 %v7590_v55  ;;  %3396 = vmatmul.bf16.gmra.mxu2 %v3268_v27 }
 0x464   : > { %v2809_v63 = vmax.f32 %v2743_v36, 0.0  ;;  %v2805_v36 = vmax.f32 %v2733_v9, 0.0  ;;  %v2804_v16 = vmax.f32 %v2730_v57, 0.0 }
 0x466   : > { %v7814_v19 = vpop.f32.mrf.mxu2  ;;  %v2873_v44 = vpack.c.bf16 %v2809_v63, %v2809_v63  ;;  %v2870_v63 = vpack.c.bf16 %v2806_v11, %v2806_v11  ;;  %v2869_v47 = vpack.c.bf16 %v2805_v36, %v2805_v36 }
 0x468   : > { %v3193_v37 = vunpack.c.l.b16 %v2870_v63 }
 0x469   : > { %v2744_v45 = vpop.f32.mrf.mxu0 }
 0x46a   : > { %v2745_v62 = vadd.f32 %v7752_v28, %v2744_v45  ;;  %v3196_v45 = vunpack.c.l.b16 %v2873_v44  ;;  %v2868_v28 = vpack.c.bf16 %v2804_v16, %v2804_v16  ;;  %v8539_v16 = vpack.c.bf16 %v7773_v15, %v7770_v21 }
 0x46b   : > { %v8541_v21 = vpack.c.bf16 %v7784_v25, %v7781_v24  ;;  %v8543_v24 = vpack.c.bf16 %v7793_v26, %v7791_v32  ;;  %v8545_v32 = vpack.c.bf16 %v7800_v40, %v7798_v8  ;;  %v8547_v8 = vpack.c.bf16 %v7807_v58, %v7805_v1  ;;  %v8550_v58 = vld [vmem:[#allocation37_spill] sm:$0xff] }
 0x46c   : > { %v2810_v27 = vmax.f32 %v2745_v62, 0.0  ;;  %v3195_v62 = vunpack.c.l.b16 %v2872_v50  ;;  %v3191_v7 = vunpack.c.l.b16 %v2868_v28  ;;  %v3190_v50 = vunpack.c.l.b16 %v2867_v6 }
 0x46e   : > { %v2874_v35 = vpack.c.bf16 %v2810_v27, %v2810_v27  ;;  %v7821_v51 = vpop.f32.mrf.mxu2  ;;  %v3194_v27 = vunpack.c.l.b16 %v2871_v54  ;;  %v3202_v57 = vpack.c.b16 %v3191_v7, %v3190_v50 }
 0x470   : > { %v3197_v43 = vunpack.c.l.b16 %v2874_v35  ;;  %v3204_v9 = vpack.c.b16 %v3195_v62, %v3194_v27  ;;  %v3192_v35 = vunpack.c.l.b16 %v2869_v47  ;;  %v8540_v27 = vld [vmem:[#allocation30_spill] sm:$0xff] }
 0x472   : > { %v3205_v59 = vpack.c.b16 %v3197_v43, %v3196_v45  ;;  %v3203_v49 = vpack.c.b16 %v3193_v37, %v3192_v35  ;;  %v2969_v43 = vpop.f32.mrf.mxu1 }
 0x473   : > { %3155 = vmatmul.bf16.gmra.mxu1 %v7620_v14  ;;  %3401 = vmatmul.bf16.gmra.mxu2 %v3269_v42  ;;  %v8538_v42 = vld [vmem:[#allocation29_spill] sm:$0xff] }
 0x474   : > { %3214 = vmatpush.bf16.msrb.mxu1 %v3205_v59  ;;  %v3270_v59 = vpack.c.bf16 %v2969_v43, %v2967_v38 }
 0x476   : > { %v7827_v46 = vpop.f32.mrf.mxu2 }
 0x478   : > { %3215 = vmatpush.bf16.msrb.mxu1 %v3204_v9 }
 0x47c   : > { %3216 = vmatpush.bf16.msrb.mxu1 %v3203_v49 }
 0x47e   : > { %v7829_v44 = vpop.f32.mrf.mxu2 }
 0x47f   : > { %v3277_v11 = vpack.c.bf16 %v7829_v44, %v7827_v46 }
 0x480   : > { %3217 = vmatpush.bf16.msrb.mxu1 %v3202_v57 }
 0x483   : > { %3160 = vmatmul.bf16.gmra.mxu1 %v8537_v61  ;;  %3406 = vmatmul.bf16.gmra.mxu2 %v3270_v59  ;;  %v8542_v59 = vld [vmem:[#allocation33_spill] sm:$0xff] }
 0x484   : > { %3218 = vmatpush.bf16.msrb.mxu1 %v7788_v12  ;;  %v7851_v12 = vld [vmem:[%s8304_s5] ss:$0 sm:$0xff] }
 0x486   : > { %v7835_v36 = vpop.f32.mrf.mxu2 }
 0x488   : > { %3219 = vmatpush.bf16.msrb.mxu1 %v7777_v41 }
 0x48c   : > { %3220 = vmatpush.bf16.msrb.mxu1 %v7766_v13 }
 0x48e   : > { %v7839_v54 = vpop.f32.mrf.mxu2 }
 0x48f   : > { %v3278_v45 = vpack.c.bf16 %v7839_v54, %v7835_v36 }
 0x490   : > { %3221 = vmatpush.bf16.msrb.mxu1 %v7756_v39 }
 0x493   : > { %3222 = vmatmul.bf16.vlgmr.msrb.gmra.mxu1 %v8538_v42  ;;  %3411 = vmatmul.bf16.gmra.mxu2 %v8539_v16 }
 0x496   : > { %v3372_v41 = vpop.f32.mrf.mxu2 }
 0x497   : > { %v3373_v13 = vadd.f32 %v7851_v12, %v3372_v41 }
 0x499   : > { %v3532_v63 = vmax.f32 %v3373_v13, 0.0 }
 0x49b   : > { %v3596_v60 = vpack.c.bf16 %v3532_v63, %v3532_v63 }
 0x49d   : > { %v3676_v15 = vunpack.c.l.b16 %v3596_v60 }
 0x49e   : > { %v3374_v62 = vpop.f32.mrf.mxu2 }
 0x49f   : > { %v3375_v38 = vadd.f32 %v7851_v12, %v3374_v62  ;;  %v3126_v62 = vpop.f32.mrf.mxu1 }
 0x4a1   : > { %v3533_v39 = vmax.f32 %v3375_v38, 0.0 }
 0x4a3   : > { %v3597_v47 = vpack.c.bf16 %v3533_v39, %v3533_v39  ;;  %3227 = vmatmul.bf16.gmra.mxu1 %v8540_v27  ;;  %3416 = vmatmul.bf16.gmra.mxu2 %v8541_v21 }
 0x4a5   : > { %v3677_v28 = vunpack.c.l.b16 %v3597_v47 }
 0x4a6   : > { %v3377_v37 = vpop.f32.mrf.mxu2 }
 0x4a7   : > { %v7859_v9 = vpack.c.b16 %v3677_v28, %v3676_v15  ;;  %v3378_v6 = vadd.f32 %v7851_v12, %v3377_v37  ;;  %v8544_v28 = vld [vmem:[#allocation34_spill] sm:$0xff] }
 0x4a9   : > { %v3534_v35 = vmax.f32 %v3378_v6, 0.0 }
 0x4ab   : > { %v3598_v50 = vpack.c.bf16 %v3534_v35, %v3534_v35  ;;  %v3128_v35 = vpop.f32.mrf.mxu1 }
 0x4ad   : > { %v3678_v25 = vunpack.c.l.b16 %v3598_v50 }
 0x4ae   : > { %v3379_v7 = vpop.f32.mrf.mxu2 }
 0x4af   : > { %v3380_v49 = vadd.f32 %v7851_v12, %v3379_v7 }
 0x4b1   : > { %v3535_v43 = vmax.f32 %v3380_v49, 0.0 }
 0x4b3   : > { %v3599_v57 = vpack.c.bf16 %v3535_v43, %v3535_v43  ;;  %3232 = vmatmul.bf16.gmra.mxu1 %v8542_v59  ;;  %3421 = vmatmul.bf16.gmra.mxu2 %v8543_v24  ;;  %v7879_v24 = vpop.f32.mrf.mxu1 }
 0x4b5   : > { %v3679_v16 = vunpack.c.l.b16 %v3599_v57 }
 0x4b6   : > { %v3382_v41 = vpop.f32.mrf.mxu2 }
 0x4b7   : > { %v7867_v13 = vpack.c.b16 %v3679_v16, %v3678_v25  ;;  %v3383_v63 = vadd.f32 %v7851_v12, %v3382_v41 }
 0x4b9   : > { %v3536_v38 = vmax.f32 %v3383_v63, 0.0  ;;  %v8546_v63 = vld [vmem:[#allocation35_spill] sm:$0xff] }
 0x4bb   : > { %v3600_v47 = vpack.c.bf16 %v3536_v38, %v3536_v38 }
 0x4bd   : > { %v3680_v26 = vunpack.c.l.b16 %v3600_v47  ;;  %v7887_v47 = vpop.f32.mrf.mxu1 }
 0x4be   : > { %v3384_v60 = vpop.f32.mrf.mxu2 }
 0x4bf   : > { %v3385_v39 = vadd.f32 %v7851_v12, %v3384_v60 }
 0x4c1   : > { %v3537_v21 = vmax.f32 %v3385_v39, 0.0 }
 0x4c3   : > { %v3601_v15 = vpack.c.bf16 %v3537_v21, %v3537_v21  ;;  %3237 = vmatmul.bf16.gmra.mxu1 %v8544_v28  ;;  %3426 = vmatmul.bf16.gmra.mxu2 %v8545_v32  ;;  %v8549_v32 = vpack.c.bf16 %v7821_v51, %v7814_v19  ;;  %v8551_v51 = vld [vmem:[#allocation38_spill] sm:$0xff] }
 0x4c5   : > { %v3681_v37 = vunpack.c.l.b16 %v3601_v15  ;;  %v8548_v15 = vld [vmem:[#allocation36_spill] sm:$0xff] }
 0x4c6   : > { %v3387_v6 = vpop.f32.mrf.mxu2 }
 0x4c7   : > { %v7875_v7 = vpack.c.b16 %v3681_v37, %v3680_v26  ;;  %v3388_v49 = vadd.f32 %v7851_v12, %v3387_v6  ;;  %v7893_v26 = vpop.f32.mrf.mxu1 }
 0x4c9   : > { %v3538_v50 = vmax.f32 %v3388_v49, 0.0 }
 0x4cb   : > { %v3602_v25 = vpack.c.bf16 %v3538_v50, %v3538_v50 }
 0x4cd   : > { %v3682_v40 = vunpack.c.l.b16 %v3602_v25 }
 0x4ce   : > { %v3389_v43 = vpop.f32.mrf.mxu2 }
 0x4cf   : > { %v3390_v57 = vadd.f32 %v7851_v12, %v3389_v43  ;;  %v7895_v1 = vpop.f32.mrf.mxu1 }
 0x4d1   : > { %v3539_v16 = vmax.f32 %v3390_v57, 0.0 }
 0x4d3   : > { %v3603_v41 = vpack.c.bf16 %v3539_v16, %v3539_v16  ;;  %3242 = vmatmul.bf16.gmra.mxu1 %v8546_v63  ;;  %3431 = vmatmul.bf16.gmra.mxu2 %v8547_v8 }
 0x4d5   : > { %v3683_v38 = vunpack.c.l.b16 %v3603_v41 }
 0x4d6   : > { %v3392_v60 = vpop.f32.mrf.mxu2 }
 0x4d7   : > { %v7885_v39 = vpack.c.b16 %v3683_v38, %v3682_v40  ;;  %v7901_v50 = vpop.f32.mrf.mxu1  ;;  %v3279_v38 = vpack.c.bf16 %v3128_v35, %v3126_v62 }
 0x4de   : > { %v3394_v21 = vpop.f32.mrf.mxu2 }
 0x4df   : > { %v7903_v57 = vpop.f32.mrf.mxu1 }
 0x4e3   : > { %3247 = vmatmul.bf16.gmra.mxu1 %v8548_v15  ;;  %3436 = vmatmul.bf16.gmra.mxu2 %v8549_v32 }
 0x4e6   : > { %v3397_v37 = vpop.f32.mrf.mxu2 }
 0x4e7   : > { %v3398_v32 = vadd.f32 %v7851_v12, %v3397_v37 }
 0x4ee   : > { %v3399_v6 = vpop.f32.mrf.mxu2 }
 0x4ef   : > { %v3400_v41 = vadd.f32 %v7851_v12, %v3399_v6 }
 0x4f3   : > { %3252 = vmatmul.bf16.gmra.mxu1 %v8550_v58  ;;  %3441 = vmatmul.bf16.gmra.mxu2 %v3277_v11 }
 0x4f6   : > { %v3402_v49 = vpop.f32.mrf.mxu2 }
 0x4f7   : > { %v3403_v46 = vadd.f32 %v7851_v12, %v3402_v49  ;;  %v3393_v49 = vadd.f32 %v7851_v12, %v3392_v60 }
 0x4fe   : > { %v3404_v43 = vpop.f32.mrf.mxu2 }
 0x4ff   : > { %v3405_v16 = vadd.f32 %v7851_v12, %v3404_v43 }
 0x501   : > { %v3545_v8 = vmax.f32 %v3405_v16, 0.0 }
 0x503   : > { %3257 = vmatmul.bf16.gmra.mxu1 %v8551_v51  ;;  %3446 = vmatmul.bf16.gmra.mxu2 %v3278_v45  ;;  %v3544_v51 = vmax.f32 %v3403_v46, 0.0  ;;  %v3395_v45 = vadd.f32 %v7851_v12, %v3394_v21  ;;  %v3609_v58 = vpack.c.bf16 %v3545_v8, %v3545_v8  ;;  %v7917_v46 = vpop.f32.mrf.mxu1 }
 0x505   : > { %v3608_v15 = vpack.c.bf16 %v3544_v51, %v3544_v51  ;;  %v3689_v35 = vunpack.c.l.b16 %v3609_v58 }
 0x506   : > { %v3407_v19 = vpop.f32.mrf.mxu2 }
 0x507   : > { %v3408_v25 = vadd.f32 %v7851_v12, %v3407_v19  ;;  %v3543_v19 = vmax.f32 %v3400_v41, 0.0  ;;  %v3688_v21 = vunpack.c.l.b16 %v3608_v15 }
 0x509   : > { %v3546_v44 = vmax.f32 %v3408_v25, 0.0  ;;  %v3542_v25 = vmax.f32 %v3398_v32, 0.0  ;;  %v3607_v62 = vpack.c.bf16 %v3543_v19, %v3543_v19  ;;  %v3698_v60 = vpack.c.b16 %v3689_v35, %v3688_v21 }
 0x50b   : > { %v3610_v36 = vpack.c.bf16 %v3546_v44, %v3546_v44  ;;  %v3540_v44 = vmax.f32 %v3393_v49, 0.0 }
 0x50d   : > { %v3690_v6 = vunpack.c.l.b16 %v3610_v36  ;;  %v3604_v32 = vpack.c.bf16 %v3540_v44, %v3540_v44 }
 0x50e   : > { %v3409_v11 = vpop.f32.mrf.mxu2 }
 0x50f   : > { %v3410_v40 = vadd.f32 %v7851_v12, %v3409_v11  ;;  %v3541_v11 = vmax.f32 %v3395_v45, 0.0  ;;  %v3684_v49 = vunpack.c.l.b16 %v3604_v32 }
 0x511   : > { %v3547_v54 = vmax.f32 %v3410_v40, 0.0  ;;  %v3606_v40 = vpack.c.bf16 %v3542_v25, %v3542_v25  ;;  %v3605_v8 = vpack.c.bf16 %v3541_v11, %v3541_v11 }
 0x513   : > { %3451 = vmatmul.bf16.gmra.mxu2 %v3279_v38  ;;  %v3611_v43 = vpack.c.bf16 %v3547_v54, %v3547_v54  ;;  %v3687_v38 = vunpack.c.l.b16 %v3607_v62  ;;  %v3686_v51 = vunpack.c.l.b16 %v3606_v40  ;;  %v3685_v45 = vunpack.c.l.b16 %v3605_v8 }
 0x515   : > { %v3691_v16 = vunpack.c.l.b16 %v3611_v43  ;;  %v3697_v19 = vpack.c.b16 %v3687_v38, %v3686_v51  ;;  %v3280_v43 = vpack.c.bf16 %v7887_v47, %v7879_v24 }
 0x516   : > { %v3412_v63 = vpop.f32.mrf.mxu2 }
 0x517   : > { %v3699_v37 = vpack.c.b16 %v3691_v16, %v3690_v6  ;;  %v3413_v41 = vadd.f32 %v7851_v12, %v3412_v63  ;;  %v3148_v63 = vpop.f32.mrf.mxu1  ;;  %v3696_v16 = vpack.c.b16 %v3685_v45, %v3684_v49 }
 0x519   : > { %3708 = vmatpush.bf16.msra.mxu3 %v3699_v37  ;;  %v3548_v36 = vmax.f32 %v3413_v41, 0.0  ;;  %v3281_v41 = vpack.c.bf16 %v7895_v1, %v7893_v26 }
 0x51b   : > { %v3612_v15 = vpack.c.bf16 %v3548_v36, %v3548_v36 }
 0x51d   : > { %3709 = vmatpush.bf16.msra.mxu3 %v3698_v60  ;;  %v3773_v11 = vunpack.c.l.b16 %v3612_v15 }
 0x51e   : > { %v3414_v54 = vpop.f32.mrf.mxu2 }
 0x51f   : > { %v3415_v58 = vadd.f32 %v7851_v12, %v3414_v54  ;;  %v3151_v40 = vpop.f32.mrf.mxu1 }
 0x521   : > { %v3549_v25 = vmax.f32 %v3415_v58, 0.0  ;;  %3710 = vmatpush.bf16.msra.mxu3 %v3697_v19 }
 0x523   : > { %v3613_v6 = vpack.c.bf16 %v3549_v25, %v3549_v25  ;;  %3456 = vmatmul.bf16.gmra.mxu2 %v3280_v43 }
 0x525   : > { %v3774_v62 = vunpack.c.l.b16 %v3613_v6  ;;  %3711 = vmatpush.bf16.msra.mxu3 %v3696_v16 }
 0x526   : > { %v3417_v35 = vpop.f32.mrf.mxu2 }
 0x527   : > { %v7923_v37 = vpack.c.b16 %v3774_v62, %v3773_v11  ;;  %v3418_v44 = vadd.f32 %v7851_v12, %v3417_v35 }
 0x529   : > { %3712 = vmatpush.bf16.msra.mxu3 %v7885_v39  ;;  %v3550_v24 = vmax.f32 %v3418_v44, 0.0  ;;  %v3153_v39 = vpop.f32.mrf.mxu1 }
 0x52b   : > { %v3614_v8 = vpack.c.bf16 %v3550_v24, %v3550_v24 }
 0x52d   : > { %3713 = vmatpush.bf16.msra.mxu3 %v7875_v7  ;;  %v3775_v32 = vunpack.c.l.b16 %v3614_v8 }
 0x52e   : > { %v3419_v47 = vpop.f32.mrf.mxu2 }
 0x52f   : > { %v3420_v21 = vadd.f32 %v7851_v12, %v3419_v47 }
 0x531   : > { %v3551_v38 = vmax.f32 %v3420_v21, 0.0  ;;  %3714 = vmatpush.bf16.msra.mxu3 %v7867_v13  ;;  %v3156_v58 = vpop.f32.mrf.mxu1  ;;  %v3282_v13 = vpack.c.bf16 %v7903_v57, %v7901_v50  ;;  %v3283_v50 = vpack.c.bf16 %v3148_v63, %v7917_v46 }
 0x533   : > { %v3615_v60 = vpack.c.bf16 %v3551_v38, %v3551_v38  ;;  %3461 = vmatmul.bf16.gmra.mxu2 %v3281_v41 }
 0x535   : > { %v3776_v51 = vunpack.c.l.b16 %v3615_v60  ;;  %3715 = vmatpush.bf16.msra.mxu3 %v7859_v9 }
 0x536   : > { %v3422_v36 = vpop.f32.mrf.mxu2 }
 0x537   : > { %v7933_v54 = vpack.c.b16 %v3776_v51, %v3775_v32  ;;  %v3423_v7 = vadd.f32 %v7851_v12, %v3422_v36  ;;  %v3284_v32 = vpack.c.bf16 %v3153_v39, %v3151_v40 }
 0x538   : > { %3716 = vmatmul.bf16.vlgmr.msra.gmra.mxu3 %v8518_v34 }
 0x539   : > { %v3552_v45 = vmax.f32 %v3423_v7, 0.0  ;;  %v3158_v16 = vpop.f32.mrf.mxu1 }
 0x53a   : > { %v3285_v63 = vpack.c.bf16 %v3158_v16, %v3156_v58 }
 0x53b   : > { %v3616_v19 = vpack.c.bf16 %v3552_v45, %v3552_v45 }
 0x53d   : > { %v3777_v9 = vunpack.c.l.b16 %v3616_v19 }
 0x53e   : > { %v3424_v26 = vpop.f32.mrf.mxu2 }
 0x53f   : > { %v3425_v1 = vadd.f32 %v7851_v12, %v3424_v26 }
 0x541   : > { %v3553_v43 = vmax.f32 %v3425_v1, 0.0  ;;  %v3161_v47 = vpop.f32.mrf.mxu1 }
 0x543   : > { %v3617_v49 = vpack.c.bf16 %v3553_v43, %v3553_v43  ;;  %3466 = vmatmul.bf16.gmra.mxu2 %v3282_v13  ;;  %v8552_v43 = vld [vmem:[#allocation26_spill] sm:$0xff] }
 0x545   : > { %v3778_v15 = vunpack.c.l.b16 %v3617_v49 }
 0x546   : > { %v3427_v25 = vpop.f32.mrf.mxu2 }
 0x547   : > { %v7940_v6 = vpack.c.b16 %v3778_v15, %v3777_v9  ;;  %v3428_v34 = vadd.f32 %v7851_v12, %v3427_v25 }
 0x548   : > { %3721 = vmatmul.bf16.gmra.mxu3 %v8519_v2 }
 0x549   : > { %v3554_v11 = vmax.f32 %v3428_v34, 0.0  ;;  %v3163_v2 = vpop.f32.mrf.mxu1 }
 0x54a   : > { %v3286_v13 = vpack.c.bf16 %v3163_v2, %v3161_v47 }
 0x54b   : > { %v3618_v57 = vpack.c.bf16 %v3554_v11, %v3554_v11 }
 0x54d   : > { %v3779_v21 = vunpack.c.l.b16 %v3618_v57 }
 0x54e   : > { %v3429_v62 = vpop.f32.mrf.mxu2 }
 0x54f   : > { %v3430_v35 = vadd.f32 %v7851_v12, %v3429_v62 }
 0x551   : > { %v3555_v44 = vmax.f32 %v3430_v35, 0.0  ;;  %v3223_v36 = vpop.f32.mrf.mxu1 }
 0x553   : > { %v3619_v24 = vpack.c.bf16 %v3555_v44, %v3555_v44  ;;  %3471 = vmatmul.bf16.gmra.mxu2 %v3283_v50 }
 0x555   : > { %v3780_v41 = vunpack.c.l.b16 %v3619_v24 }
 0x556   : > { %v3432_v8 = vpop.f32.mrf.mxu2 }
 0x557   : > { %v7946_v38 = vpack.c.b16 %v3780_v41, %v3779_v21  ;;  %v3433_v47 = vadd.f32 %v7851_v12, %v3432_v8 }
 0x558   : > { %3726 = vmatmul.bf16.gmra.mxu3 %v8520_v31 }
 0x559   : > { %v3225_v7 = vpop.f32.mrf.mxu1 }
 0x55a   : > { %v3287_v25 = vpack.c.bf16 %v3225_v7, %v3223_v36 }
 0x55e   : > { %v3434_v60 = vpop.f32.mrf.mxu2 }
 0x55f   : > { %v3435_v50 = vadd.f32 %v7851_v12, %v3434_v60 }
 0x561   : > { %v3228_v26 = vpop.f32.mrf.mxu1 }
 0x563   : > { %3476 = vmatmul.bf16.gmra.mxu2 %v3284_v32 }
 0x566   : > { %v3437_v51 = vpop.f32.mrf.mxu2 }
 0x567   : > { %v3438_v16 = vadd.f32 %v7851_v12, %v3437_v51 }
 0x568   : > { %3731 = vmatmul.bf16.gmra.mxu3 %v8521_v53 }
 0x569   : > { %v3230_v31 = vpop.f32.mrf.mxu1  ;;  %v3558_v21 = vmax.f32 %v3438_v16, 0.0 }
 0x56e   : > { %v3439_v46 = vpop.f32.mrf.mxu2 }
 0x56f   : > { %v3440_v9 = vadd.f32 %v7851_v12, %v3439_v46  ;;  %v3557_v46 = vmax.f32 %v3435_v50, 0.0 }
 0x571   : > { %v7957_v34 = vpop.f32.mrf.mxu1  ;;  %v3559_v57 = vmax.f32 %v3440_v9, 0.0 }
 0x573   : > { %3481 = vmatmul.bf16.gmra.mxu2 %v3285_v63  ;;  %v3623_v63 = vpack.c.bf16 %v3559_v57, %v3559_v57 }
 0x575   : > { %v3784_v8 = vunpack.c.l.b16 %v3623_v63 }
 0x576   : > { %v3442_v45 = vpop.f32.mrf.mxu2 }
 0x577   : > { %v3443_v53 = vadd.f32 %v7851_v12, %v3442_v45  ;;  %v3556_v45 = vmax.f32 %v3433_v47, 0.0 }
 0x578   : > { %3736 = vmatmul.bf16.gmra.mxu3 %v8522_v5 }
 0x579   : > { %v3560_v11 = vmax.f32 %v3443_v53, 0.0 }
 0x57b   : > { %v3624_v41 = vpack.c.bf16 %v3560_v11, %v3560_v11 }
 0x57d   : > { %v3785_v60 = vunpack.c.l.b16 %v3624_v41 }
 0x57e   : > { %v3444_v1 = vpop.f32.mrf.mxu2 }
 0x57f   : > { %v3445_v39 = vadd.f32 %v7851_v12, %v3444_v1  ;;  %v3622_v1 = vpack.c.bf16 %v3558_v21, %v3558_v21 }
 0x581   : > { %v3561_v15 = vmax.f32 %v3445_v39, 0.0  ;;  %v3620_v39 = vpack.c.bf16 %v3556_v45, %v3556_v45  ;;  %v3783_v53 = vunpack.c.l.b16 %v3622_v1 }
 0x583   : > { %3486 = vmatmul.bf16.gmra.mxu2 %v3286_v13  ;;  %v3625_v44 = vpack.c.bf16 %v3561_v15, %v3561_v15 }
 0x585   : > { %v3786_v7 = vunpack.c.l.b16 %v3625_v44 }
 0x586   : > { %v3447_v19 = vpop.f32.mrf.mxu2 }
 0x587   : > { %v3448_v40 = vadd.f32 %v7851_v12, %v3447_v19  ;;  %v3235_v19 = vpop.f32.mrf.mxu1 }
 0x588   : > { %3741 = vmatmul.bf16.gmra.mxu3 %v8552_v43  ;;  %v3621_v43 = vpack.c.bf16 %v3557_v46, %v3557_v46 }
 0x589   : > { %v3562_v58 = vmax.f32 %v3448_v40, 0.0  ;;  %v3795_v40 = vpack.c.b16 %v3786_v7, %v3785_v60 }
 0x58a   : > { %v3782_v9 = vunpack.c.l.b16 %v3621_v43 }
 0x58b   : > { %v3626_v62 = vpack.c.bf16 %v3562_v58, %v3562_v58 }
 0x58d   : > { %v3787_v2 = vunpack.c.l.b16 %v3626_v62 }
 0x58e   : > { %v3449_v49 = vpop.f32.mrf.mxu2 }
 0x58f   : > { %v3450_v5 = vadd.f32 %v7851_v12, %v3449_v49  ;;  %v3238_v50 = vpop.f32.mrf.mxu1 }
 0x591   : > { %v3563_v35 = vmax.f32 %v3450_v5, 0.0  ;;  %v3794_v5 = vpack.c.b16 %v3784_v8, %v3783_v53 }
 0x593   : > { %v3627_v24 = vpack.c.bf16 %v3563_v35, %v3563_v35  ;;  %3491 = vmatmul.bf16.gmra.mxu2 %v3287_v25  ;;  %v3781_v25 = vunpack.c.l.b16 %v3620_v39 }
 0x595   : > { %v3788_v32 = vunpack.c.l.b16 %v3627_v24  ;;  %v3793_v35 = vpack.c.b16 %v3782_v9, %v3781_v25 }
 0x596   : > { %v3452_v36 = vpop.f32.mrf.mxu2 }
 0x597   : > { %v3796_v51 = vpack.c.b16 %v3788_v32, %v3787_v2  ;;  %v3453_v13 = vadd.f32 %v7851_v12, %v3452_v36  ;;  %v3289_v32 = vpack.c.bf16 %v3235_v19, %v7957_v34 }
 0x598   : > { %3746 = vmatmul.bf16.gmra.mxu3 %v8524_v23  ;;  %v3288_v23 = vpack.c.bf16 %v3230_v31, %v3228_v26  ;;  %v3240_v31 = vpop.f32.mrf.mxu1 }
 0x599   : > { %3805 = vmatpush.bf16.msra.mxu1 %v3796_v51  ;;  %v3564_v58 = vmax.f32 %v3453_v13, 0.0  ;;  %v3290_v13 = vpack.c.bf16 %v3240_v31, %v3238_v50 }
 0x59b   : > { %v3628_v16 = vpack.c.bf16 %v3564_v58, %v3564_v58 }
 0x59d   : > { %3806 = vmatpush.bf16.msra.mxu1 %v3795_v40  ;;  %v3870_v57 = vunpack.c.l.b16 %v3628_v16 }
 0x59e   : > { %v3454_v49 = vpop.f32.mrf.mxu2 }
 0x59f   : > { %v3455_v15 = vadd.f32 %v7851_v12, %v3454_v49 }
 0x5a1   : > { %v3565_v11 = vmax.f32 %v3455_v15, 0.0  ;;  %3807 = vmatpush.bf16.msra.mxu1 %v3794_v5 }
 0x5a3   : > { %v3629_v62 = vpack.c.bf16 %v3565_v11, %v3565_v11  ;;  %3496 = vmatmul.bf16.gmra.mxu2 %v3288_v23 }
 0x5a5   : > { %v3871_v44 = vunpack.c.l.b16 %v3629_v62  ;;  %3808 = vmatpush.bf16.msra.mxu1 %v3793_v35 }
 0x5a6   : > { %v3457_v24 = vpop.f32.mrf.mxu2 }
 0x5a7   : > { %v7965_v47 = vpack.c.b16 %v3871_v44, %v3870_v57  ;;  %v3458_v21 = vadd.f32 %v7851_v12, %v3457_v24 }
 0x5a8   : > { %3751 = vmatmul.bf16.gmra.mxu3 %v8526_v52 }
 0x5a9   : > { %3809 = vmatpush.bf16.msra.mxu1 %v7946_v38  ;;  %v3566_v26 = vmax.f32 %v3458_v21, 0.0 }
 0x5ab   : > { %v3630_v36 = vpack.c.bf16 %v3566_v26, %v3566_v26 }
 0x5ad   : > { %3810 = vmatpush.bf16.msra.mxu1 %v7940_v6  ;;  %v3872_v52 = vunpack.c.l.b16 %v3630_v36  ;;  %v3243_v6 = vpop.f32.mrf.mxu1 }
 0x5ae   : > { %v3459_v41 = vpop.f32.mrf.mxu2 }
 0x5af   : > { %v3460_v2 = vadd.f32 %v7851_v12, %v3459_v41 }
 0x5b1   : > { %v3567_v46 = vmax.f32 %v3460_v2, 0.0  ;;  %3811 = vmatpush.bf16.msra.mxu1 %v7933_v54 }
 0x5b3   : > { %v3631_v63 = vpack.c.bf16 %v3567_v46, %v3567_v46  ;;  %3501 = vmatmul.bf16.gmra.mxu2 %v3289_v32 }
 0x5b5   : > { %v3873_v7 = vunpack.c.l.b16 %v3631_v63  ;;  %3812 = vmatpush.bf16.msra.mxu1 %v7923_v37  ;;  %v3245_v43 = vpop.f32.mrf.mxu1 }
 0x5b6   : > { %v3462_v38 = vpop.f32.mrf.mxu2  ;;  %v3291_v5 = vpack.c.bf16 %v3245_v43, %v3243_v6 }
 0x5b7   : > { %v7975_v51 = vpack.c.b16 %v3873_v7, %v3872_v52  ;;  %v3463_v45 = vadd.f32 %v7851_v12, %v3462_v38 }
 0x5b8   : > { %3813 = vmatmul.bf16.vlgmr.msra.gmra.mxu1 %v6962_v0 }
 0x5b9   : > { %v3568_v1 = vmax.f32 %v3463_v45, 0.0 }
 0x5bb   : > { %v3632_v54 = vpack.c.bf16 %v3568_v1, %v3568_v1 }
 0x5bd   : > { %v3874_v40 = vunpack.c.l.b16 %v3632_v54  ;;  %v3248_v58 = vpop.f32.mrf.mxu1 }
 0x5be   : > { %v3464_v34 = vpop.f32.mrf.mxu2 }
 0x5bf   : > { %v3465_v60 = vadd.f32 %v7851_v12, %v3464_v34 }
 0x5c1   : > { %v3569_v19 = vmax.f32 %v3465_v60, 0.0 }
 0x5c3   : > { %v3633_v8 = vpack.c.bf16 %v3569_v19, %v3569_v19  ;;  %3506 = vmatmul.bf16.gmra.mxu2 %v3290_v13 }
 0x5c5   : > { %v3875_v37 = vunpack.c.l.b16 %v3633_v8  ;;  %v3250_v35 = vpop.f32.mrf.mxu1 }
 0x5c6   : > { %v3467_v39 = vpop.f32.mrf.mxu2  ;;  %v3292_v24 = vpack.c.bf16 %v3250_v35, %v3248_v58 }
 0x5c7   : > { %v7980_v53 = vpack.c.b16 %v3875_v37, %v3874_v40  ;;  %v3468_v0 = vadd.f32 %v7851_v12, %v3467_v39 }
 0x5c8   : > { %3818 = vmatmul.bf16.gmra.mxu1 %v7070_v18 }
 0x5c9   : > { %v3570_v49 = vmax.f32 %v3468_v0, 0.0 }
 0x5cb   : > { %v3634_v23 = vpack.c.bf16 %v3570_v49, %v3570_v49 }
 0x5cd   : > { %v3876_v11 = vunpack.c.l.b16 %v3634_v23  ;;  %v3253_v44 = vpop.f32.mrf.mxu1 }
 0x5ce   : > { %v3469_v9 = vpop.f32.mrf.mxu2 }
 0x5cf   : > { %v3470_v15 = vadd.f32 %v7851_v12, %v3469_v9 }
 0x5d1   : > { %v3571_v25 = vmax.f32 %v3470_v15, 0.0 }
 0x5d3   : > { %v3635_v16 = vpack.c.bf16 %v3571_v25, %v3571_v25  ;;  %3511 = vmatmul.bf16.gmra.mxu2 %v3291_v5 }
 0x5d5   : > { %v3877_v62 = vunpack.c.l.b16 %v3635_v16  ;;  %v3255_v26 = vpop.f32.mrf.mxu1 }
 0x5d6   : > { %v3472_v50 = vpop.f32.mrf.mxu2  ;;  %v3293_v41 = vpack.c.bf16 %v3255_v26, %v3253_v44  ;;  %v8001_v44 = vpop.f32.mrf.mxu3 }
 0x5d7   : > { %v7985_v57 = vpack.c.b16 %v3877_v62, %v3876_v11  ;;  %v3473_v40 = vadd.f32 %v7851_v12, %v3472_v50 }
 0x5d8   : > { %3823 = vmatmul.bf16.gmra.mxu1 %v7131_v10 }
 0x5d9   : > { %v3572_v25 = vmax.f32 %v3473_v40, 0.0 }
 0x5dd   : > { %v3258_v2 = vpop.f32.mrf.mxu1 }
 0x5de   : > { %v3474_v18 = vpop.f32.mrf.mxu2 }
 0x5e3   : > { %3516 = vmatmul.bf16.gmra.mxu2 %v3292_v24  ;;  %v3636_v24 = vpack.c.bf16 %v3572_v25, %v3572_v25 }
 0x5e5   : > { %v3260_v36 = vpop.f32.mrf.mxu1 }
 0x5e6   : > { %v3477_v21 = vpop.f32.mrf.mxu2  ;;  %v3294_v63 = vpack.c.bf16 %v3260_v36, %v3258_v2 }
 0x5e7   : > { %v3478_v34 = vadd.f32 %v7851_v12, %v3477_v21 }
 0x5e8   : > { %3828 = vmatmul.bf16.gmra.mxu1 %v7176_v33 }
 0x5e9   : > { %v3574_v37 = vmax.f32 %v3478_v34, 0.0 }
 0x5eb   : > { %v3638_v16 = vpack.c.bf16 %v3574_v37, %v3574_v37 }
 0x5ed   : > { %v3880_v21 = vunpack.c.l.b16 %v3638_v16 }
 0x5ee   : > { %v3479_v31 = vpop.f32.mrf.mxu2 }
 0x5ef   : > { %v3480_v45 = vadd.f32 %v7851_v12, %v3479_v31 }
 0x5f1   : > { %v3575_v19 = vmax.f32 %v3480_v45, 0.0 }
 0x5f3   : > { %3521 = vmatmul.bf16.gmra.mxu2 %v3293_v41  ;;  %v3639_v15 = vpack.c.bf16 %v3575_v19, %v3575_v19 }
 0x5f6   : > { %v3482_v32 = vpop.f32.mrf.mxu2 }
 0x5f7   : > { %v3483_v33 = vadd.f32 %v7851_v12, %v3482_v32  ;;  %v3878_v32 = vunpack.c.l.b16 %v3636_v24 }
 0x5f8   : > { %3833 = vmatmul.bf16.gmra.mxu1 %v7222_v30 }
 0x5f9   : > { %v3576_v60 = vmax.f32 %v3483_v33, 0.0 }
 0x5fb   : > { %v3640_v39 = vpack.c.bf16 %v3576_v60, %v3576_v60 }
 0x5fd   : > { %v3882_v11 = vunpack.c.l.b16 %v3640_v39 }
 0x5fe   : > { %v3484_v46 = vpop.f32.mrf.mxu2 }
 0x5ff   : > { %v3485_v7 = vadd.f32 %v7851_v12, %v3484_v46 }
 0x601   : > { %v3577_v1 = vmax.f32 %v3485_v7, 0.0 }
 0x603   : > { %3526 = vmatmul.bf16.gmra.mxu2 %v3294_v63  ;;  %v3641_v43 = vpack.c.bf16 %v3577_v1, %v3577_v1 }
 0x605   : > { %v3883_v5 = vunpack.c.l.b16 %v3641_v43 }
 0x606   : > { %v3487_v10 = vpop.f32.mrf.mxu2 }
 0x607   : > { %v3488_v52 = vadd.f32 %v7851_v12, %v3487_v10  ;;  %v3892_v50 = vpack.c.b16 %v3883_v5, %v3882_v11 }
 0x608   : > { %3838 = vmatmul.bf16.gmra.mxu1 %v8533_v48  ;;  %v3475_v48 = vadd.f32 %v7851_v12, %v3474_v18  ;;  %v3881_v18 = vunpack.c.l.b16 %v3639_v15 }
 0x609   : > { %v3578_v38 = vmax.f32 %v3488_v52, 0.0 }
 0x60a   : > { %v3573_v9 = vmax.f32 %v3475_v48, 0.0 }
 0x60b   : > { %v3642_v13 = vpack.c.bf16 %v3578_v38, %v3578_v38  ;;  %v8004_v38 = vpop.f32.mrf.mxu3 }
 0x60c   : > { %v3637_v35 = vpack.c.bf16 %v3573_v9, %v3573_v9 }
 0x60d   : > { %v3884_v0 = vunpack.c.l.b16 %v3642_v13 }
 0x60e   : > { %v3489_v6 = vpop.f32.mrf.mxu2  ;;  %v3879_v41 = vunpack.c.l.b16 %v3637_v35 }
 0x60f   : > { %v3490_v30 = vadd.f32 %v7851_v12, %v3489_v6 }
 0x610   : > { %v3890_v10 = vpack.c.b16 %v3879_v41, %v3878_v32 }
 0x611   : > { %v3579_v54 = vmax.f32 %v3490_v30, 0.0 }
 0x613   : > { %v3643_v8 = vpack.c.bf16 %v3579_v54, %v3579_v54  ;;  %v8013_v60 = vpop.f32.mrf.mxu3 }
 0x615   : > { %v3885_v58 = vunpack.c.l.b16 %v3643_v8 }
 0x616   : > { %v3492_v49 = vpop.f32.mrf.mxu2 }
 0x617   : > { %v3893_v23 = vpack.c.b16 %v3885_v58, %v3884_v0  ;;  %v3493_v62 = vadd.f32 %v7851_v12, %v3492_v49 }
 0x618   : > { %3843 = vmatmul.bf16.gmra.mxu1 %v8535_v29  ;;  %v3891_v29 = vpack.c.b16 %v3881_v18, %v3880_v21 }
 0x619   : > { %3902 = vmatpush.bf16.msrb.mxu3 %v3893_v23  ;;  %v3580_v26 = vmax.f32 %v3493_v62, 0.0 }
 0x61b   : > { %v3644_v36 = vpack.c.bf16 %v3580_v26, %v3580_v26 }
 0x61d   : > { %3903 = vmatpush.bf16.msrb.mxu3 %v3892_v50  ;;  %v3967_v52 = vunpack.c.l.b16 %v3644_v36 }
 0x61e   : > { %v3494_v31 = vpop.f32.mrf.mxu2 }
 0x61f   : > { %v3495_v2 = vadd.f32 %v7851_v12, %v3494_v31 }
 0x621   : > { %v3581_v46 = vmax.f32 %v3495_v2, 0.0  ;;  %3904 = vmatpush.bf16.msrb.mxu3 %v3891_v29 }
 0x623   : > { %v3645_v63 = vpack.c.bf16 %v3581_v46, %v3581_v46 }
 0x625   : > { %v3968_v7 = vunpack.c.l.b16 %v3645_v63  ;;  %3905 = vmatpush.bf16.msrb.mxu3 %v3890_v10  ;;  %v4736_v63 = vld [vmem:[#allocation10 + $0x38] sm:$0xff] }
 0x626   : > { %v3497_v33 = vpop.f32.mrf.mxu2 }
 0x627   : > { %v8006_v6 = vpack.c.b16 %v3968_v7, %v3967_v52  ;;  %v3498_v45 = vadd.f32 %v7851_v12, %v3497_v33  ;;  %v4734_v7 = vld [vmem:[#allocation10 + $0x28] sm:$0xff]  ;;  %v4733_v33 = vld [vmem:[#allocation10 + $0x20] sm:$0xff] }
 0x628   : > { %3848 = vmatmul.bf16.gmra.mxu1 %v8536_v3 }
 0x629   : > { %3906 = vmatpush.bf16.msrb.mxu3 %v7985_v57  ;;  %v3582_v1 = vmax.f32 %v3498_v45, 0.0  ;;  %v8021_v57 = vpop.f32.mrf.mxu3 }
 0x62b   : > { %v3646_v13 = vpack.c.bf16 %v3582_v1, %v3582_v1  ;;  %v4732_v1 = vld [vmem:[#allocation10 + $0x18] sm:$0xff] }
 0x62d   : > { %3907 = vmatpush.bf16.msrb.mxu3 %v7980_v53  ;;  %v3969_v19 = vunpack.c.l.b16 %v3646_v13 }
 0x62e   : > { %v3499_v30 = vpop.f32.mrf.mxu2 }
 0x62f   : > { %v3500_v34 = vadd.f32 %v7851_v12, %v3499_v30 }
 0x631   : > { %v3583_v54 = vmax.f32 %v3500_v34, 0.0  ;;  %3908 = vmatpush.bf16.msrb.mxu3 %v7975_v51  ;;  %v8024_v49 = vpop.f32.mrf.mxu3 }
 0x633   : > { %v3647_v48 = vpack.c.bf16 %v3583_v54, %v3583_v54 }
 0x635   : > { %v3970_v43 = vunpack.c.l.b16 %v3647_v48  ;;  %3909 = vmatpush.bf16.msrb.mxu3 %v7965_v47  ;;  %v4731_v48 = vld [vmem:[#allocation10 + $0x10] sm:$0xff] }
 0x636   : > { %v3502_v3 = vpop.f32.mrf.mxu2 }
 0x637   : > { %v8017_v8 = vpack.c.b16 %v3970_v43, %v3969_v19  ;;  %v3503_v53 = vadd.f32 %v7851_v12, %v3502_v3 }
 0x638   : > { %3910 = vmatmul.bf16.vlgmr.msrb.gmra.mxu3 %v7435_v20 }
 0x639   : > { %v3584_v40 = vmax.f32 %v3503_v53, 0.0  ;;  %v8030_v16 = vpop.f32.mrf.mxu3  ;;  %4148 = vmatpush.bf16.msra.mxu3 %v4736_v63 }
 0x63b   : > { %v3648_v0 = vpack.c.bf16 %v3584_v40, %v3584_v40 }
 0x63d   : > { %v3971_v9 = vunpack.c.l.b16 %v3648_v0 }
 0x63e   : > { %v3504_v37 = vpop.f32.mrf.mxu2 }
 0x63f   : > { %v3505_v39 = vadd.f32 %v7851_v12, %v3504_v37 }
 0x641   : > { %v3585_v51 = vmax.f32 %v3505_v39, 0.0  ;;  %v8036_v31 = vpop.f32.mrf.mxu3  ;;  %v4730_v39 = vld [vmem:[#allocation10 + $0x8] sm:$0xff] }
 0x643   : > { %v3649_v58 = vpack.c.bf16 %v3585_v51, %v3585_v51 }
 0x645   : > { %v3972_v47 = vunpack.c.l.b16 %v3649_v58 }
 0x646   : > { %v3507_v15 = vpop.f32.mrf.mxu2 }
 0x647   : > { %v8026_v5 = vpack.c.b16 %v3972_v47, %v3971_v9  ;;  %v3508_v20 = vadd.f32 %v7851_v12, %v3507_v15 }
 0x648   : > { %3915 = vmatmul.bf16.gmra.mxu3 %v7465_v22 }
 0x649   : > { %v3586_v23 = vmax.f32 %v3508_v20, 0.0  ;;  %v8038_v41 = vpop.f32.mrf.mxu3 }
 0x64b   : > { %v3650_v62 = vpack.c.bf16 %v3586_v23, %v3586_v23 }
 0x64d   : > { %v3973_v50 = vunpack.c.l.b16 %v3650_v62  ;;  %v4729_v62 = vld [vmem:[#allocation10] sm:$0xff] }
 0x64e   : > { %v3509_v25 = vpop.f32.mrf.mxu2 }
 0x64f   : > { %v3510_v11 = vadd.f32 %v7851_v12, %v3509_v25 }
 0x651   : > { %v3587_v35 = vmax.f32 %v3510_v11, 0.0  ;;  %v8041_v29 = vpop.f32.mrf.mxu3 }
 0x653   : > { %v3651_v18 = vpack.c.bf16 %v3587_v35, %v3587_v35 }
 0x655   : > { %v3974_v24 = vunpack.c.l.b16 %v3651_v18 }
 0x656   : > { %v3512_v21 = vpop.f32.mrf.mxu2 }
 0x657   : > { %v8033_v26 = vpack.c.b16 %v3974_v24, %v3973_v50  ;;  %v3513_v47 = vadd.f32 %v7851_v12, %v3512_v21 }
 0x658   : > { %3920 = vmatmul.bf16.gmra.mxu3 %v7491_v4  ;;  %v4735_v4 = vld [vmem:[#allocation10 + $0x30] sm:$0xff] }
 0x659   : > { %v8043_v46 = vpop.f32.mrf.mxu3  ;;  %4149 = vmatpush.bf16.msra.mxu3 %v4735_v4 }
 0x65d   : > { %4150 = vmatpush.bf16.msra.mxu3 %v4734_v7 }
 0x65e   : > { %v3514_v22 = vpop.f32.mrf.mxu2 }
 0x65f   : > { %v3515_v0 = vadd.f32 %v7851_v12, %v3514_v22  ;;  %v3588_v22 = vmax.f32 %v3513_v47, 0.0 }
 0x661   : > { %v8046_v52 = vpop.f32.mrf.mxu3  ;;  %4151 = vmatpush.bf16.msra.mxu3 %v4733_v33  ;;  %v3589_v35 = vmax.f32 %v3515_v0, 0.0  ;;  %v3652_v63 = vpack.c.bf16 %v3588_v22, %v3588_v22 }
 0x665   : > { %4152 = vmatpush.bf16.msra.mxu3 %v4732_v1 }
 0x666   : > { %v3517_v2 = vpop.f32.mrf.mxu2 }
 0x668   : > { %3925 = vmatmul.bf16.gmra.mxu3 %v7512_v17 }
 0x669   : > { %v8050_v30 = vpop.f32.mrf.mxu3  ;;  %4153 = vmatpush.bf16.msra.mxu3 %v4731_v48  ;;  %v4052_v48 = vpack.c.bf16 %v8043_v46, %v8041_v29 }
 0x66d   : > { %4154 = vmatpush.bf16.msra.mxu3 %v4730_v39 }
 0x66e   : > { %v3519_v32 = vpop.f32.mrf.mxu2 }
 0x66f   : > { %v3520_v19 = vadd.f32 %v7851_v12, %v3519_v32 }
 0x671   : > { %v3591_v51 = vmax.f32 %v3520_v19, 0.0  ;;  %v8059_v15 = vpop.f32.mrf.mxu3  ;;  %4155 = vmatpush.bf16.msra.mxu3 %v4729_v62 }
 0x673   : > { %v3655_v18 = vpack.c.bf16 %v3591_v51, %v3591_v51  ;;  %v8555_v51 = vld [vmem:[#allocation37_spill] sm:$0xff] }
 0x675   : > { %v3978_v21 = vunpack.c.l.b16 %v3655_v18  ;;  %v8139_v18 = vld [vmem:[%s8306_s7] ss:$0 sm:$0xff] }
 0x676   : > { %v3522_v36 = vpop.f32.mrf.mxu2 }
 0x677   : > { %v3523_v34 = vadd.f32 %v7851_v12, %v3522_v36 }
 0x678   : > { %3930 = vmatmul.bf16.gmra.mxu3 %v7551_v56 }
 0x679   : > { %v3592_v53 = vmax.f32 %v3523_v34, 0.0  ;;  %v3749_v4 = vpop.f32.mrf.mxu3 }
 0x67a   : > { %v4054_v0 = vpack.c.bf16 %v3749_v4, %v8059_v15 }
 0x67b   : > { %v3656_v23 = vpack.c.bf16 %v3592_v53, %v3592_v53  ;;  %v8554_v53 = vld [vmem:[#allocation36_spill] sm:$0xff] }
 0x67d   : > { %v3979_v32 = vunpack.c.l.b16 %v3656_v23  ;;  %v8556_v23 = vld [vmem:[#allocation38_spill] sm:$0xff] }
 0x67e   : > { %v3524_v10 = vpop.f32.mrf.mxu2 }
 0x67f   : > { %v3525_v56 = vadd.f32 %v7851_v12, %v3524_v10 }
 0x681   : > { %v3593_v43 = vmax.f32 %v3525_v56, 0.0  ;;  %v4048_v56 = vpack.c.bf16 %v8004_v38, %v8001_v44  ;;  %v4050_v44 = vpack.c.bf16 %v8030_v16, %v8024_v49 }
 0x683   : > { %v3657_v58 = vpack.c.bf16 %v3593_v43, %v3593_v43  ;;  %v8553_v43 = vld [vmem:[#allocation35_spill] sm:$0xff] }
 0x685   : > { %v3980_v50 = vunpack.c.l.b16 %v3657_v58 }
 0x686   : > { %v3527_v45 = vpop.f32.mrf.mxu2 }
 0x687   : > { %v3528_v17 = vadd.f32 %v7851_v12, %v3527_v45  ;;  %v3989_v36 = vpack.c.b16 %v3980_v50, %v3979_v32  ;;  %v3975_v45 = vunpack.c.l.b16 %v3652_v63 }
 0x688   : > { %3935 = vmatmul.bf16.gmra.mxu3 %v7590_v55  ;;  %v3518_v55 = vadd.f32 %v7851_v12, %v3517_v2 }
 0x689   : > { %v3594_v13 = vmax.f32 %v3528_v17, 0.0 }
 0x68a   : > { %v3590_v20 = vmax.f32 %v3518_v55, 0.0  ;;  %v4053_v55 = vpack.c.bf16 %v8050_v30, %v8046_v52 }
 0x68b   : > { %v3658_v40 = vpack.c.bf16 %v3594_v13, %v3594_v13 }
 0x68c   : > { %v3654_v2 = vpack.c.bf16 %v3590_v20, %v3590_v20 }
 0x68d   : > { %v3981_v25 = vunpack.c.l.b16 %v3658_v40 }
 0x68e   : > { %v3529_v54 = vpop.f32.mrf.mxu2  ;;  %v3977_v10 = vunpack.c.l.b16 %v3654_v2 }
 0x68f   : > { %v3530_v3 = vadd.f32 %v7851_v12, %v3529_v54  ;;  %v3653_v12 = vpack.c.bf16 %v3589_v35, %v3589_v35 }
 0x690   : > { %v3988_v33 = vpack.c.b16 %v3978_v21, %v3977_v10 }
 0x691   : > { %v3595_v37 = vmax.f32 %v3530_v3, 0.0  ;;  %v3976_v7 = vunpack.c.l.b16 %v3653_v12 }
 0x693   : > { %v3659_v9 = vpack.c.bf16 %v3595_v37, %v3595_v37  ;;  %v3987_v17 = vpack.c.b16 %v3976_v7, %v3975_v45 }
 0x695   : > { %v3982_v11 = vunpack.c.l.b16 %v3659_v9 }
 0x697   : > { %v3990_v24 = vpack.c.b16 %v3982_v11, %v3981_v25 }
 0x698   : > { %3940 = vmatmul.bf16.gmra.mxu3 %v7620_v14  ;;  %v3752_v14 = vpop.f32.mrf.mxu3 }
 0x699   : > { %3999 = vmatpush.bf16.msrb.mxu1 %v3990_v24 }
 0x69d   : > { %4000 = vmatpush.bf16.msrb.mxu1 %v3989_v36 }
 0x6a0   : > { %v3754_v1 = vpop.f32.mrf.mxu3 }
 0x6a1   : > { %4001 = vmatpush.bf16.msrb.mxu1 %v3988_v33  ;;  %v4055_v47 = vpack.c.bf16 %v3754_v1, %v3752_v14 }
 0x6a5   : > { %4002 = vmatpush.bf16.msrb.mxu1 %v3987_v17 }
 0x6a8   : > { %3945 = vmatmul.bf16.gmra.mxu3 %v8537_v61 }
 0x6a9   : > { %4003 = vmatpush.bf16.msrb.mxu1 %v8033_v26  ;;  %v3814_v26 = vpop.f32.mrf.mxu1 }
 0x6ad   : > { %4004 = vmatpush.bf16.msrb.mxu1 %v8026_v5  ;;  %v4049_v5 = vpack.c.bf16 %v8021_v57, %v8013_v60  ;;  %v4051_v57 = vpack.c.bf16 %v8038_v41, %v8036_v31 }
 0x6b1   : > { %4005 = vmatpush.bf16.msrb.mxu1 %v8017_v8  ;;  %v3816_v49 = vpop.f32.mrf.mxu1 }
 0x6b2   : > { %v4056_v62 = vpack.c.bf16 %v3816_v49, %v3814_v26 }
 0x6b5   : > { %4006 = vmatpush.bf16.msrb.mxu1 %v8006_v6 }
 0x6b8   : > { %4007 = vmatmul.bf16.vlgmr.msrb.gmra.mxu1 %v8538_v42  ;;  %4156 = vmatmul.bf16.vlgmr.msra.gmra.mxu3 %v4048_v56 }
 0x6b9   : > { %v3819_v19 = vpop.f32.mrf.mxu1 }
 0x6bb   : > { %v8070_v34 = vpop.f32.mrf.mxu3 }
 0x6c1   : > { %v3821_v31 = vpop.f32.mrf.mxu1 }
 0x6c2   : > { %v4057_v2 = vpack.c.bf16 %v3821_v31, %v3819_v19 }
 0x6c3   : > { %v8072_v13 = vpop.f32.mrf.mxu3 }
 0x6c4   : > { %v4064_v61 = vpack.c.bf16 %v8072_v13, %v8070_v34 }
 0x6c8   : > { %4012 = vmatmul.bf16.gmra.mxu1 %v8540_v27  ;;  %4161 = vmatmul.bf16.gmra.mxu3 %v4049_v5 }
 0x6c9   : > { %v3824_v40 = vpop.f32.mrf.mxu1 }
 0x6cb   : > { %v8079_v6 = vpop.f32.mrf.mxu3 }
 0x6d1   : > { %v3826_v37 = vpop.f32.mrf.mxu1 }
 0x6d2   : > { %v4058_v10 = vpack.c.bf16 %v3826_v37, %v3824_v40 }
 0x6d3   : > { %v8081_v8 = vpop.f32.mrf.mxu3 }
 0x6d4   : > { %v4065_v42 = vpack.c.bf16 %v8081_v8, %v8079_v6 }
 0x6d8   : > { %4017 = vmatmul.bf16.gmra.mxu1 %v8542_v59  ;;  %4166 = vmatmul.bf16.gmra.mxu3 %v4050_v44 }
 0x6d9   : > { %v3829_v52 = vpop.f32.mrf.mxu1 }
 0x6db   : > { %v8088_v38 = vpop.f32.mrf.mxu3 }
 0x6e1   : > { %v3831_v20 = vpop.f32.mrf.mxu1 }
 0x6e2   : > { %v4059_v1 = vpack.c.bf16 %v3831_v20, %v3829_v52 }
 0x6e3   : > { %v8090_v60 = vpop.f32.mrf.mxu3 }
 0x6e4   : > { %v4066_v27 = vpack.c.bf16 %v8090_v60, %v8088_v38 }
 0x6e8   : > { %4022 = vmatmul.bf16.gmra.mxu1 %v8544_v28  ;;  %4171 = vmatmul.bf16.gmra.mxu3 %v4051_v57 }
 0x6e9   : > { %v3834_v33 = vpop.f32.mrf.mxu1 }
 0x6eb   : > { %v8097_v54 = vpop.f32.mrf.mxu3 }
 0x6f1   : > { %v3836_v5 = vpop.f32.mrf.mxu1 }
 0x6f2   : > { %v4060_v19 = vpack.c.bf16 %v3836_v5, %v3834_v33 }
 0x6f3   : > { %v8099_v16 = vpop.f32.mrf.mxu3 }
 0x6f4   : > { %v4067_v59 = vpack.c.bf16 %v8099_v16, %v8097_v54 }
 0x6f8   : > { %4027 = vmatmul.bf16.gmra.mxu1 %v8553_v43  ;;  %4176 = vmatmul.bf16.gmra.mxu3 %v4052_v48 }
 0x6f9   : > { %v3839_v26 = vpop.f32.mrf.mxu1 }
 0x6fb   : > { %v8106_v3 = vpop.f32.mrf.mxu3 }
 0x701   : > { %v3841_v31 = vpop.f32.mrf.mxu1 }
 0x703   : > { %v8108_v28 = vpop.f32.mrf.mxu3 }
 0x704   : > { %v4068_v41 = vpack.c.bf16 %v8108_v28, %v8106_v3 }
 0x708   : > { %4032 = vmatmul.bf16.gmra.mxu1 %v8554_v53  ;;  %4181 = vmatmul.bf16.gmra.mxu3 %v4053_v55 }
 0x70b   : > { %v8115_v29 = vpop.f32.mrf.mxu3 }
 0x713   : > { %v8117_v46 = vpop.f32.mrf.mxu3 }
 0x714   : > { %v4069_v39 = vpack.c.bf16 %v8117_v46, %v8115_v29 }
 0x718   : > { %4037 = vmatmul.bf16.gmra.mxu1 %v8555_v51  ;;  %4186 = vmatmul.bf16.gmra.mxu3 %v4054_v0  ;;  %v3844_v0 = vpop.f32.mrf.mxu1  ;;  %v4061_v51 = vpack.c.bf16 %v3841_v31, %v3839_v26 }
 0x71b   : > { %v8123_v58 = vpop.f32.mrf.mxu3 }
 0x720   : > { %v3846_v20 = vpop.f32.mrf.mxu1 }
 0x723   : > { %v8125_v30 = vpop.f32.mrf.mxu3 }
 0x724   : > { %v4070_v9 = vpack.c.bf16 %v8125_v30, %v8123_v58 }
 0x728   : > { %4042 = vmatmul.bf16.gmra.mxu1 %v8556_v23  ;;  %4191 = vmatmul.bf16.gmra.mxu3 %v4055_v47 }
 0x72b   : > { %v8130_v25 = vpop.f32.mrf.mxu3 }
 0x733   : > { %v8132_v15 = vpop.f32.mrf.mxu3 }
 0x734   : > { %v4071_v11 = vpack.c.bf16 %v8132_v15, %v8130_v25 }
 0x738   : > { %4196 = vmatmul.bf16.gmra.mxu3 %v4056_v62 }
 0x73b   : > { %v4157_v35 = vpop.f32.mrf.mxu3 }
 0x73c   : > { %v4158_v24 = vadd.f32 %v8139_v18, %v4157_v35 }
 0x743   : > { %v4159_v50 = vpop.f32.mrf.mxu3 }
 0x744   : > { %v4160_v22 = vadd.f32 %v8139_v18, %v4159_v50  ;;  %v4062_v50 = vpack.c.bf16 %v3846_v20, %v3844_v0 }
 0x746   : > { %v4870_v32 = vpack.c.bf16 %v4160_v22, %v4158_v24  ;;  %v3849_v22 = vpop.f32.mrf.mxu1 }
 0x748   : > { %4871 = vst [vmem:[%s8145_s18] sm:$0xff] %v4870_v32   ;;  %4201 = vmatmul.bf16.gmra.mxu3 %v4057_v2 }
 0x74b   : > { %v4162_v12 = vpop.f32.mrf.mxu3 }
 0x74c   : > { %v4163_v36 = vadd.f32 %v8139_v18, %v4162_v12 }
 0x74e   : > { %v3851_v32 = vpop.f32.mrf.mxu1 }
 0x753   : > { %v4164_v21 = vpop.f32.mrf.mxu3 }
 0x754   : > { %v4165_v63 = vadd.f32 %v8139_v18, %v4164_v21 }
 0x756   : > { %v4875_v4 = vpack.c.bf16 %v4165_v63, %v4163_v36  ;;  %v4063_v63 = vpack.c.bf16 %v3851_v32, %v3849_v22 }
 0x758   : > { %5058 = vst [vmem:[%s8145_s18 + $0x8] sm:$0xff] %v4875_v4   ;;  %4206 = vmatmul.bf16.gmra.mxu3 %v4058_v10 }
 0x75b   : > { %v4167_v7 = vpop.f32.mrf.mxu3 }
 0x75c   : > { %v4168_v17 = vadd.f32 %v8139_v18, %v4167_v7 }
 0x763   : > { %v4169_v45 = vpop.f32.mrf.mxu3 }
 0x764   : > { %v4170_v14 = vadd.f32 %v8139_v18, %v4169_v45 }
 0x766   : > { %v4880_v56 = vpack.c.bf16 %v4170_v14, %v4168_v17 }
 0x768   : > { %5059 = vst [vmem:[%s8145_s18 + $0x10] sm:$0xff] %v4880_v56   ;;  %4211 = vmatmul.bf16.gmra.mxu3 %v4059_v1 }
 0x76b   : > { %v4172_v44 = vpop.f32.mrf.mxu3 }
 0x76c   : > { %v4173_v49 = vadd.f32 %v8139_v18, %v4172_v44 }
 0x773   : > { %v4174_v57 = vpop.f32.mrf.mxu3 }
 0x774   : > { %v4175_v48 = vadd.f32 %v8139_v18, %v4174_v57 }
 0x776   : > { %v4885_v43 = vpack.c.bf16 %v4175_v48, %v4173_v49 }
 0x778   : > { %5060 = vst [vmem:[%s8145_s18 + $0x18] sm:$0xff] %v4885_v43   ;;  %4216 = vmatmul.bf16.gmra.mxu3 %v4060_v19 }
 0x77b   : > { %v4177_v55 = vpop.f32.mrf.mxu3 }
 0x77c   : > { %v4178_v40 = vadd.f32 %v8139_v18, %v4177_v55 }
 0x783   : > { %v4179_v53 = vpop.f32.mrf.mxu3 }
 0x784   : > { %v4180_v37 = vadd.f32 %v8139_v18, %v4179_v53 }
 0x786   : > { %v4890_v52 = vpack.c.bf16 %v4180_v37, %v4178_v40  ;;  %v4008_v40 = vpop.f32.mrf.mxu1 }
 0x788   : > { %5061 = vst [vmem:[%s8145_s18 + $0x20] sm:$0xff] %v4890_v52   ;;  %4221 = vmatmul.bf16.gmra.mxu3 %v4061_v51 }
 0x78b   : > { %v4182_v47 = vpop.f32.mrf.mxu3 }
 0x78c   : > { %v4183_v62 = vadd.f32 %v8139_v18, %v4182_v47 }
 0x78e   : > { %v4010_v0 = vpop.f32.mrf.mxu1 }
 0x793   : > { %v4184_v23 = vpop.f32.mrf.mxu3 }
 0x794   : > { %v4185_v35 = vadd.f32 %v8139_v18, %v4184_v23 }
 0x796   : > { %v4895_v24 = vpack.c.bf16 %v4185_v35, %v4183_v62  ;;  %v4013_v52 = vpop.f32.mrf.mxu1  ;;  %v4072_v35 = vpack.c.bf16 %v4010_v0, %v4008_v40 }
 0x798   : > { %5062 = vst [vmem:[%s8145_s18 + $0x28] sm:$0xff] %v4895_v24   ;;  %4226 = vmatmul.bf16.gmra.mxu3 %v4062_v50 }
 0x79b   : > { %v4187_v2 = vpop.f32.mrf.mxu3 }
 0x79c   : > { %v4188_v21 = vadd.f32 %v8139_v18, %v4187_v2 }
 0x79e   : > { %v4015_v20 = vpop.f32.mrf.mxu1 }
 0x7a3   : > { %v4189_v12 = vpop.f32.mrf.mxu3 }
 0x7a4   : > { %v4190_v36 = vadd.f32 %v8139_v18, %v4189_v12 }
 0x7a6   : > { %v4900_v10 = vpack.c.bf16 %v4190_v36, %v4188_v21 }
 0x7a8   : > { %5063 = vst [vmem:[%s8145_s18 + $0x30] sm:$0xff] %v4900_v10   ;;  %4231 = vmatmul.bf16.gmra.mxu3 %v4063_v63 }
 0x7ab   : > { %v4192_v4 = vpop.f32.mrf.mxu3 }
 0x7ac   : > { %v4193_v33 = vadd.f32 %v8139_v18, %v4192_v4 }
 0x7b3   : > { %v4194_v7 = vpop.f32.mrf.mxu3 }
 0x7b4   : > { %v4195_v45 = vadd.f32 %v8139_v18, %v4194_v7 }
 0x7b6   : > { %v4905_v17 = vpack.c.bf16 %v4195_v45, %v4193_v33 }
 0x7b8   : > { %5064 = vst [vmem:[%s8145_s18 + $0x38] sm:$0xff] %v4905_v17   ;;  %4236 = vmatmul.bf16.gmra.mxu3 %v4064_v61 }
 0x7bb   : > { %v4197_v14 = vpop.f32.mrf.mxu3 }
 0x7bc   : > { %v4198_v56 = vadd.f32 %v8139_v18, %v4197_v14 }
 0x7c3   : > { %v4199_v1 = vpop.f32.mrf.mxu3 }
 0x7c4   : > { %v4200_v5 = vadd.f32 %v8139_v18, %v4199_v1 }
 0x7c6   : > { %v4910_v44 = vpack.c.bf16 %v4200_v5, %v4198_v56 }
 0x7c8   : > { %5065 = vst [vmem:[%s8145_s18 + $0x40] sm:$0xff] %v4910_v44   ;;  %4241 = vmatmul.bf16.gmra.mxu3 %v4065_v42 }
 0x7cb   : > { %v4202_v26 = vpop.f32.mrf.mxu3 }
 0x7cc   : > { %v4203_v49 = vadd.f32 %v8139_v18, %v4202_v26 }
 0x7d3   : > { %v4204_v57 = vpop.f32.mrf.mxu3 }
 0x7d4   : > { %v4205_v34 = vadd.f32 %v8139_v18, %v4204_v57 }
 0x7d6   : > { %v4915_v13 = vpack.c.bf16 %v4205_v34, %v4203_v49 }
 0x7d8   : > { %5066 = vst [vmem:[%s8145_s18 + $0x48] sm:$0xff] %v4915_v13   ;;  %4246 = vmatmul.bf16.gmra.mxu3 %v4066_v27 }
 0x7db   : > { %v4207_v61 = vpop.f32.mrf.mxu3 }
 0x7dc   : > { %v4208_v19 = vadd.f32 %v8139_v18, %v4207_v61 }
 0x7e3   : > { %v4209_v48 = vpop.f32.mrf.mxu3 }
 0x7e4   : > { %v4210_v6 = vadd.f32 %v8139_v18, %v4209_v48 }
 0x7e6   : > { %v4920_v8 = vpack.c.bf16 %v4210_v6, %v4208_v19 }
 0x7e8   : > { %5067 = vst [vmem:[%s8145_s18 + $0x50] sm:$0xff] %v4920_v8   ;;  %4251 = vmatmul.bf16.gmra.mxu3 %v4067_v59 }
 0x7eb   : > { %v4212_v42 = vpop.f32.mrf.mxu3 }
 0x7ec   : > { %v4213_v31 = vadd.f32 %v8139_v18, %v4212_v42 }
 0x7f3   : > { %v4214_v43 = vpop.f32.mrf.mxu3 }
 0x7f4   : > { %v4215_v38 = vadd.f32 %v8139_v18, %v4214_v43 }
 0x7f6   : > { %v4925_v60 = vpack.c.bf16 %v4215_v38, %v4213_v31 }
 0x7f8   : > { %5068 = vst [vmem:[%s8145_s18 + $0x58] sm:$0xff] %v4925_v60   ;;  %4256 = vmatmul.bf16.gmra.mxu3 %v4068_v41 }
 0x7fb   : > { %v4217_v27 = vpop.f32.mrf.mxu3 }
 0x7fc   : > { %v4218_v53 = vadd.f32 %v8139_v18, %v4217_v27 }
 0x803   : > { %v4219_v55 = vpop.f32.mrf.mxu3 }
 0x804   : > { %v4220_v54 = vadd.f32 %v8139_v18, %v4219_v55 }
 0x806   : > { %v4930_v16 = vpack.c.bf16 %v4220_v54, %v4218_v53 }
 0x808   : > { %5069 = vst [vmem:[%s8145_s18 + $0x60] sm:$0xff] %v4930_v16   ;;  %4261 = vmatmul.bf16.gmra.mxu3 %v4069_v39 }
 0x80b   : > { %v4222_v59 = vpop.f32.mrf.mxu3 }
 0x80c   : > { %v4223_v3 = vadd.f32 %v8139_v18, %v4222_v59 }
 0x813   : > { %v4224_v37 = vpop.f32.mrf.mxu3 }
 0x814   : > { %v4225_v28 = vadd.f32 %v8139_v18, %v4224_v37 }
 0x816   : > { %v4935_v41 = vpack.c.bf16 %v4225_v28, %v4223_v3 }
 0x818   : > { %5070 = vst [vmem:[%s8145_s18 + $0x68] sm:$0xff] %v4935_v41   ;;  %4266 = vmatmul.bf16.gmra.mxu3 %v4070_v9  ;;  %v4018_v9 = vpop.f32.mrf.mxu1 }
 0x81b   : > { %v4227_v51 = vpop.f32.mrf.mxu3 }
 0x81c   : > { %v4228_v46 = vadd.f32 %v8139_v18, %v4227_v51 }
 0x820   : > { %v4020_v22 = vpop.f32.mrf.mxu1 }
 0x821   : > { %v4074_v7 = vpack.c.bf16 %v4020_v22, %v4018_v9 }
 0x823   : > { %v4229_v29 = vpop.f32.mrf.mxu3 }
 0x824   : > { %v4230_v39 = vadd.f32 %v8139_v18, %v4229_v29 }
 0x826   : > { %v4940_v47 = vpack.c.bf16 %v4230_v39, %v4228_v46 }
 0x828   : > { %5071 = vst [vmem:[%s8145_s18 + $0x70] sm:$0xff] %v4940_v47   ;;  %4271 = vmatmul.bf16.gmra.mxu3 %v4071_v11  ;;  %v4073_v11 = vpack.c.bf16 %v4015_v20, %v4013_v52  ;;  %v4023_v12 = vpop.f32.mrf.mxu1 }
 0x82b   : > { %v4232_v23 = vpop.f32.mrf.mxu3 }
 0x82c   : > { %v4233_v58 = vadd.f32 %v8139_v18, %v4232_v23 }
 0x830   : > { %v4025_v36 = vpop.f32.mrf.mxu1 }
 0x831   : > { %v4075_v5 = vpack.c.bf16 %v4025_v36, %v4023_v12 }
 0x833   : > { %v4234_v62 = vpop.f32.mrf.mxu3 }
 0x834   : > { %v4235_v30 = vadd.f32 %v8139_v18, %v4234_v62 }
 0x836   : > { %v4945_v50 = vpack.c.bf16 %v4235_v30, %v4233_v58 }
 0x838   : > { %5072 = vst [vmem:[%s8145_s18 + $0x78] sm:$0xff] %v4945_v50   ;;  %4276 = vmatmul.bf16.gmra.mxu3 %v4072_v35  ;;  %v4028_v17 = vpop.f32.mrf.mxu1 }
 0x83b   : > { %v4237_v24 = vpop.f32.mrf.mxu3 }
 0x83c   : > { %v4238_v25 = vadd.f32 %v8139_v18, %v4237_v24 }
 0x840   : > { %v4030_v26 = vpop.f32.mrf.mxu1 }
 0x841   : > { %v4076_v48 = vpack.c.bf16 %v4030_v26, %v4028_v17 }
 0x843   : > { %v4239_v2 = vpop.f32.mrf.mxu3 }
 0x844   : > { %v4240_v15 = vadd.f32 %v8139_v18, %v4239_v2 }
 0x846   : > { %v4950_v32 = vpack.c.bf16 %v4240_v15, %v4238_v25 }
 0x848   : > { %5073 = vst [vmem:[%s8145_s18 + $0x80] sm:$0xff] %v4950_v32   ;;  %4281 = vmatmul.bf16.gmra.mxu3 %v4073_v11  ;;  %v4033_v49 = vpop.f32.mrf.mxu1 }
 0x84b   : > { %v4242_v21 = vpop.f32.mrf.mxu3 }
 0x84c   : > { %v4243_v10 = vadd.f32 %v8139_v18, %v4242_v21 }
 0x850   : > { %v4035_v6 = vpop.f32.mrf.mxu1 }
 0x851   : > { %v4077_v60 = vpack.c.bf16 %v4035_v6, %v4033_v49 }
 0x853   : > { %v4244_v63 = vpop.f32.mrf.mxu3 }
 0x854   : > { %v4245_v4 = vadd.f32 %v8139_v18, %v4244_v63 }
 0x856   : > { %v4955_v33 = vpack.c.bf16 %v4245_v4, %v4243_v10 }
 0x858   : > { %5074 = vst [vmem:[%s8145_s18 + $0x88] sm:$0xff] %v4955_v33   ;;  %4286 = vmatmul.bf16.gmra.mxu3 %v4074_v7  ;;  %v4038_v38 = vpop.f32.mrf.mxu1 }
 0x85b   : > { %v4247_v45 = vpop.f32.mrf.mxu3 }
 0x85c   : > { %v4248_v1 = vadd.f32 %v8139_v18, %v4247_v45 }
 0x860   : > { %v4040_v53 = vpop.f32.mrf.mxu1 }
 0x861   : > { %v4078_v40 = vpack.c.bf16 %v4040_v53, %v4038_v38 }
 0x863   : > { %v4249_v14 = vpop.f32.mrf.mxu3 }
 0x864   : > { %v4250_v56 = vadd.f32 %v8139_v18, %v4249_v14 }
 0x866   : > { %v4960_v44 = vpack.c.bf16 %v4250_v56, %v4248_v1 }
 0x868   : > { %5075 = vst [vmem:[%s8145_s18 + $0x90] sm:$0xff] %v4960_v44   ;;  %4291 = vmatmul.bf16.gmra.mxu3 %v4075_v5  ;;  %v4043_v3 = vpop.f32.mrf.mxu1 }
 0x86b   : > { %v4252_v57 = vpop.f32.mrf.mxu3 }
 0x86c   : > { %v4253_v13 = vadd.f32 %v8139_v18, %v4252_v57 }
 0x870   : > { %v4045_v41 = vpop.f32.mrf.mxu1 }
 0x871   : > { %v4079_v29 = vpack.c.bf16 %v4045_v41, %v4043_v3 }
 0x873   : > { %v4254_v34 = vpop.f32.mrf.mxu3 }
 0x874   : > { %v4255_v61 = vadd.f32 %v8139_v18, %v4254_v34 }
 0x876   : > { %v4965_v19 = vpack.c.bf16 %v4255_v61, %v4253_v13 }
 0x878   : > { %5076 = vst [vmem:[%s8145_s18 + $0x98] sm:$0xff] %v4965_v19   ;;  %4296 = vmatmul.bf16.gmra.mxu3 %v4076_v48 }
 0x87b   : > { %v4257_v8 = vpop.f32.mrf.mxu3 }
 0x87c   : > { %v4258_v43 = vadd.f32 %v8139_v18, %v4257_v8 }
 0x883   : > { %v4259_v42 = vpop.f32.mrf.mxu3 }
 0x884   : > { %v4260_v31 = vadd.f32 %v8139_v18, %v4259_v42 }
 0x886   : > { %v4970_v27 = vpack.c.bf16 %v4260_v31, %v4258_v43 }
 0x888   : > { %5077 = vst [vmem:[%s8145_s18 + $0xa0] sm:$0xff] %v4970_v27   ;;  %4301 = vmatmul.bf16.gmra.mxu3 %v4077_v60 }
 0x88b   : > { %v4262_v55 = vpop.f32.mrf.mxu3 }
 0x88c   : > { %v4263_v16 = vadd.f32 %v8139_v18, %v4262_v55 }
 0x893   : > { %v4264_v54 = vpop.f32.mrf.mxu3 }
 0x894   : > { %v4265_v59 = vadd.f32 %v8139_v18, %v4264_v54 }
 0x896   : > { %v4975_v37 = vpack.c.bf16 %v4265_v59, %v4263_v16 }
 0x898   : > { %5078 = vst [vmem:[%s8145_s18 + $0xa8] sm:$0xff] %v4975_v37   ;;  %4306 = vmatmul.bf16.gmra.mxu3 %v4078_v40 }
 0x89b   : > { %v4267_v28 = vpop.f32.mrf.mxu3 }
 0x89c   : > { %v4268_v51 = vadd.f32 %v8139_v18, %v4267_v28 }
 0x8a3   : > { %v4269_v0 = vpop.f32.mrf.mxu3 }
 0x8a4   : > { %v4270_v52 = vadd.f32 %v8139_v18, %v4269_v0 }
 0x8a6   : > { %v4980_v46 = vpack.c.bf16 %v4270_v52, %v4268_v51 }
 0x8a8   : > { %5079 = vst [vmem:[%s8145_s18 + $0xb0] sm:$0xff] %v4980_v46   ;;  %4311 = vmatmul.bf16.gmra.mxu3 %v4079_v29 }
 0x8ab   : > { %v4272_v39 = vpop.f32.mrf.mxu3 }
 0x8ac   : > { %v4273_v20 = vadd.f32 %v8139_v18, %v4272_v39 }
 0x8b3   : > { %v4274_v47 = vpop.f32.mrf.mxu3 }
 0x8b4   : > { %v4275_v23 = vadd.f32 %v8139_v18, %v4274_v47 }
 0x8b6   : > { %v4985_v62 = vpack.c.bf16 %v4275_v23, %v4273_v20 }
 0x8b8   : > { %5080 = vst [vmem:[%s8145_s18 + $0xb8] sm:$0xff] %v4985_v62  }
 0x8bb   : > { %v4277_v58 = vpop.f32.mrf.mxu3 }
 0x8bc   : > { %v4278_v9 = vadd.f32 %v8139_v18, %v4277_v58 }
 0x8c3   : > { %v4279_v30 = vpop.f32.mrf.mxu3 }
 0x8c4   : > { %v4280_v35 = vadd.f32 %v8139_v18, %v4279_v30 }
 0x8c6   : > { %v4990_v50 = vpack.c.bf16 %v4280_v35, %v4278_v9 }
 0x8c8   : > { %5081 = vst [vmem:[%s8145_s18 + $0xc0] sm:$0xff] %v4990_v50  }
 0x8cb   : > { %v4282_v24 = vpop.f32.mrf.mxu3 }
 0x8cc   : > { %v4283_v2 = vadd.f32 %v8139_v18, %v4282_v24 }
 0x8d3   : > { %v4284_v22 = vpop.f32.mrf.mxu3 }
 0x8d4   : > { %v4285_v25 = vadd.f32 %v8139_v18, %v4284_v22 }
 0x8d6   : > { %v4995_v15 = vpack.c.bf16 %v4285_v25, %v4283_v2 }
 0x8d8   : > { %5082 = vst [vmem:[%s8145_s18 + $0xc8] sm:$0xff] %v4995_v15  }
 0x8db   : > { %v4287_v11 = vpop.f32.mrf.mxu3 }
 0x8dc   : > { %v4288_v12 = vadd.f32 %v8139_v18, %v4287_v11 }
 0x8e3   : > { %v4289_v32 = vpop.f32.mrf.mxu3 }
 0x8e4   : > { %v4290_v21 = vadd.f32 %v8139_v18, %v4289_v32 }
 0x8e6   : > { %v5000_v36 = vpack.c.bf16 %v4290_v21, %v4288_v12 }
 0x8e8   : > { %5083 = vst [vmem:[%s8145_s18 + $0xd0] sm:$0xff] %v5000_v36  }
 0x8eb   : > { %v4292_v63 = vpop.f32.mrf.mxu3 }
 0x8ec   : > { %v4293_v4 = vadd.f32 %v8139_v18, %v4292_v63 }
 0x8f3   : > { %v4294_v10 = vpop.f32.mrf.mxu3 }
 0x8f4   : > { %v4295_v7 = vadd.f32 %v8139_v18, %v4294_v10 }
 0x8f6   : > { %v5005_v33 = vpack.c.bf16 %v4295_v7, %v4293_v4 }
 0x8f8   : > { %5084 = vst [vmem:[%s8145_s18 + $0xd8] sm:$0xff] %v5005_v33  }
 0x8fb   : > { %v4297_v45 = vpop.f32.mrf.mxu3 }
 0x8fc   : > { %v4298_v14 = vadd.f32 %v8139_v18, %v4297_v45 }
 0x903   : > { %v4299_v17 = vpop.f32.mrf.mxu3 }
 0x904   : > { %v4300_v1 = vadd.f32 %v8139_v18, %v4299_v17 }
 0x906   : > { %v5010_v56 = vpack.c.bf16 %v4300_v1, %v4298_v14 }
 0x908   : > { %5085 = vst [vmem:[%s8145_s18 + $0xe0] sm:$0xff] %v5010_v56  }
 0x90b   : > { %v4302_v5 = vpop.f32.mrf.mxu3 }
 0x90c   : > { %v4303_v26 = vadd.f32 %v8139_v18, %v4302_v5 }
 0x913   : > { %v4304_v44 = vpop.f32.mrf.mxu3 }
 0x914   : > { %v4305_v57 = vadd.f32 %v8139_v18, %v4304_v44 }
 0x916   : > { %v5015_v49 = vpack.c.bf16 %v4305_v57, %v4303_v26 }
 0x918   : > { %5086 = vst [vmem:[%s8145_s18 + $0xe8] sm:$0xff] %v5015_v49  }
 0x91b   : > { %v4307_v34 = vpop.f32.mrf.mxu3 }
 0x91c   : > { %v4308_v61 = vadd.f32 %v8139_v18, %v4307_v34 }
 0x923   : > { %v4309_v13 = vpop.f32.mrf.mxu3 }
 0x924   : > { %v4310_v48 = vadd.f32 %v8139_v18, %v4309_v13 }
 0x926   : > { %v5020_v19 = vpack.c.bf16 %v4310_v48, %v4308_v61 }
 0x928   : > { %5087 = vst [vmem:[%s8145_s18 + $0xf0] sm:$0xff] %v5020_v19  }
 0x92b   : > { %v4312_v6 = vpop.f32.mrf.mxu3 }
 0x92c   : > { %v4313_v42 = vadd.f32 %v8139_v18, %v4312_v6 }
 0x933   : > { %v4314_v8 = vpop.f32.mrf.mxu3 }
 0x934   : > { %v4315_v43 = vadd.f32 %v8139_v18, %v4314_v8 }
 0x936   : > { %v5025_v31 = vpack.c.bf16 %v4315_v43, %v4313_v42 }
 0x938   : > { %5088 = vst [vmem:[%s8145_s18 + $0xf8] sm:$0xff] %v5025_v31  }
 0x939   : > { %5494 = shalt.err (!%p5491_p9)
}
 0x93a   : > { %s5554_s24 = smov 64   ;;  %s5555_s13 = smov 4  }
 0x93b   : > { %5105 = dma.vmem_to_hbm [thread:$0]  (%p5693_p7), %s4460_s20, 4096, %s4462_s10, %s4446_s16, %s5554_s24, %s5554_s24, %s5555_s13  }
 0x93c PF: > { %s4476_s4 = sand.u32 1, %s5533_s27   ;;  %p8558_p12 = scmp.ge.s32.totalorder %s5545_s30, 2 }
 0x93d   : > { %s4477_s17 = scalar_lea.sflag [#allocation4], %s4476_s4 }
 0x93e   : > { %p5125_p13 = pnand %p8558_p12, %p5636_p6 }
 0x940   : > { %p5126_p0 = pneg %p5125_p13 }
 0x942   : > { %5528 = dma.done.wait (%p5126_p0), %s4477_s17, 4096  }
 0x943   : > { %5530 = vsyncadd (%p5126_p0), %s4477_s17, 4294963200  ;;  %s8559_s30 = sld [smem:[#allocation19_spill]]  ;;  %s8562_s27 = smov %s5537_s28 }
 0x944   : > { %s8560_s2 = sld [smem:[#allocation17_spill]] }
 0x945   : > { %s8561_s29 = sld [smem:[#allocation20_spill]] }
 0x949   : > { %p25_p3 = scmp.ge.s32.totalorder %s8559_s30, 4  }
 0x94a   : > { %s8563_s28 = smov %s8560_s2 }
 0x94b   :  { %27 = sbr.rel (!%p25_p3) target bundleno = 12 (0xc), region = 122 }
 0x950   :  { %4483 = vsyncpa [#allocation3], 1 }
 0x951   :  { %4485 = vsyncpa [#allocation3 + $0x1], 1 }
 0x952   :  { %4486 = vsyncpa [#allocation6], 1 }
 0x953   :  { %4488 = vsyncpa [#allocation6 + $0x1], 1 }
 0x954   :  { %4489 = vsyncpa [#allocation9], 1 }
 0x955   :  { %4490 = vsyncpa [#allocation4], 1 }
 0x956   :  { %4492 = vsyncpa [#allocation4 + $0x1], 1 }

</bundles_post_ra>
